<compile_context>
chip_gen: v6e
topology: v6e:2x2x1
jax: 0.10.0
libtpu: 0.0.40
codegen_flags: <defaults>
</compile_context>

<pallas_src>
import numpy as np
import jax
import jax.numpy as jnp
from jax.experimental import pallas as pl
from jax.experimental.pallas import tpu as pltpu

BN_EPS = 1e-5
NB = 8           # batch elements processed per grid step
POOL = 4         # adaptive pool output is 4x4
NPOOL = POOL * POOL  # 16


# ----------------------------------------------------------------------------
# Fused kernel: pool -> conv(+BN folded) -> flatten -> fc1 -> ReLU -> fc2
# ----------------------------------------------------------------------------
def inception_aux_kernel(ppm_ref, x_ref, wc_ref, bc_ref, w1_ref, b1_ref,
                         w2_ref, b2_ref, o_ref):
    # ppm_ref: (16*NB, NB*HW)  block-"diagonal", p-major pooling matrix
    # x_ref  : (NB*HW, C)      NB batch elements, spatial-major rows, C last
    # wc_ref : (C, 128)        1x1 conv weight with BN scale folded in
    # bc_ref : (1, 128)        conv bias + BN shift folded
    # w1_ref : (16, 128, 1024) fc1 weight, bf16, reordered p-major
    # b1_ref : (1, 1024)
    # w2_ref : (1024, 128)     fc2 weight padded to 128 output lanes
    # b2_ref : (1, 128)
    # o_ref  : (NB, 128)
    nb = o_ref.shape[0]

    # Adaptive avg-pool for all NB elements at once: rows are p*nb + b.
    pooled = jnp.dot(ppm_ref[...], x_ref[...],
                     preferred_element_type=jnp.float32)          # (16*nb, C)
    # 1x1 conv with BatchNorm folded in.
    conv = jnp.dot(pooled, wc_ref[...],
                   preferred_element_type=jnp.float32) + bc_ref[...]  # (16*nb, 128)

    # fc1 over the channel-major-flattened (128*16) features, decomposed over
    # the 16 pool positions; each slice [p*nb:(p+1)*nb] is a static,
    # sublane-aligned (nb, 128) f32 tile, cast to bf16 for the MXU.
    acc = None
    for p in range(NPOOL):
        blk = conv[p * nb:(p + 1) * nb, :].astype(jnp.bfloat16)   # (nb, 128)
        term = jnp.dot(blk, w1_ref[p],
                       preferred_element_type=jnp.float32)        # (nb, 1024)
        acc = term if acc is None else acc + term

    h = jnp.maximum(acc + b1_ref[...], 0.0)   # ReLU; dropout = identity (eval)

    # fc2 — full 128-lane (unmasked) store; wrapper slices to the 10 classes.
    o_ref[...] = jnp.dot(h, w2_ref[...],
                         preferred_element_type=jnp.float32) + b2_ref[...]


# ----------------------------------------------------------------------------
# Host-side helpers
# ----------------------------------------------------------------------------
def make_pool_matrix(H, W, PH=POOL, PW=POOL):
    """(16, H*W) averaging matrix for AdaptiveAvgPool2d((4,4)), divisible case."""
    assert H % PH == 0 and W % PW == 0, "adaptive pool supported for divisible sizes"
    kh, kw = H // PH, W // PW
    P = np.zeros((PH * PW, H * W), dtype=np.float32)
    inv = 1.0 / (kh * kw)
    for ho in range(PH):
        for wo in range(PW):
            for dh in range(kh):
                for dw in range(kw):
                    P[ho * PW + wo, (ho * kh + dh) * W + (wo * kw + dw)] = inv
    return P


def make_pmajor_pool_matrix(H, W, nb):
    """Block-'diagonal', p-major pooling matrix of shape (16*nb, nb*H*W).

    Row p*nb + b pools spatial window p of batch element b."""
    P = make_pool_matrix(H, W)
    HW = H * W
    Ppm = np.zeros((NPOOL * nb, nb * HW), dtype=np.float32)
    for p in range(NPOOL):
        for b in range(nb):
            Ppm[p * nb + b, b * HW:(b + 1) * HW] = P[p]
    return jnp.asarray(Ppm)


def inception_aux_forward(x, params):
    """x: (N, C, H, W) float32, NCHW like PyTorch."""
    N, C, H, W = x.shape
    HW = H * W
    NP = ((N + NB - 1) // NB) * NB           # batch padded to multiple of NB
    n_tiles = NP // NB

    # NCHW -> (N, HW, C), pad batch, flatten to a 2-D (NP*HW, C) slab.
    x_nhwc = jnp.transpose(x, (0, 2, 3, 1)).reshape(N, HW, C)
    x_nhwc = jnp.pad(x_nhwc, ((0, NP - N), (0, 0), (0, 0)))
    x2 = x_nhwc.reshape(NP * HW, C)

    Ppm = make_pmajor_pool_matrix(H, W, NB)                      # (16*NB, NB*HW)

    # Fold BatchNorm (eval mode) into the 1x1 conv weight / bias.
    scale = params["bn_gamma"] * jax.lax.rsqrt(params["bn_var"] + BN_EPS)
    w_conv = params["w_conv"] * scale[None, :]                   # (C, 128)
    b_conv = (params["bn_beta"]
              + (params["b_conv"] - params["bn_mean"]) * scale).reshape(1, 128)

    # fc1 weight: rows reordered from k*16+p (torch.flatten order on NCHW) to
    # the kernel's p-major decomposition, cast to bf16 (f32 accumulation).
    w1 = params["w_fc1"].reshape(128, NPOOL, 1024).transpose(1, 0, 2)
    w1 = w1.astype(jnp.bfloat16)                                 # (16, 128, 1024)
    b1 = params["b_fc1"].reshape(1, 1024)

    # fc2 padded to a full 128-lane output.
    n_cls = params["w_fc2"].shape[1]
    w2 = jnp.pad(params["w_fc2"], ((0, 0), (0, 128 - n_cls)))    # (1024, 128)
    b2 = jnp.pad(params["b_fc2"], (0, 128 - n_cls)).reshape(1, 128)

    out = pl.pallas_call(
        inception_aux_kernel,
        out_shape=jax.ShapeDtypeStruct((NP, 128), jnp.float32),
        grid=(n_tiles,),
        in_specs=[
            pl.BlockSpec((NPOOL * NB, NB * HW), lambda i: (0, 0)),   # pool matrix
            pl.BlockSpec((NB * HW, C), lambda i: (i, 0)),            # input tile
            pl.BlockSpec((C, 128), lambda i: (0, 0)),                # folded conv w
            pl.BlockSpec((1, 128), lambda i: (0, 0)),                # folded conv b
            pl.BlockSpec((NPOOL, 128, 1024), lambda i: (0, 0, 0)),   # fc1 w (bf16)
            pl.BlockSpec((1, 1024), lambda i: (0, 0)),               # fc1 b
            pl.BlockSpec((1024, 128), lambda i: (0, 0)),             # fc2 w (padded)
            pl.BlockSpec((1, 128), lambda i: (0, 0)),                # fc2 b (padded)
        ],
        out_specs=pl.BlockSpec((NB, 128), lambda i: (i, 0)),
        compiler_params=pltpu.CompilerParams(
            dimension_semantics=("parallel",),
            vmem_limit_bytes=48 * 1024 * 1024),
    )(Ppm, x2, w_conv, b_conv, w1, b1, w2, b2)

    return out[:N, :n_cls]


# ----------------------------------------------------------------------------
# Plain-JAX reference (PyTorch eval-mode semantics, f32 throughout)
# ----------------------------------------------------------------------------
def reference_forward(x, params):
    N, C, H, W = x.shape
    kh, kw = H // 4, W // 4
    pooled = x.reshape(N, C, 4, kh, 4, kw).mean(axis=(3, 5))        # (N, C, 4, 4)
    conv = (jnp.einsum("nchw,ck->nkhw", pooled, params["w_conv"])
            + params["b_conv"][None, :, None, None])
    scale = params["bn_gamma"] / jnp.sqrt(params["bn_var"] + BN_EPS)
    bn = ((conv - params["bn_mean"][None, :, None, None])
          * scale[None, :, None, None]
          + params["bn_beta"][None, :, None, None])
    flat = bn.reshape(N, -1)                                        # (N, 2048)
    h = jnp.maximum(flat @ params["w_fc1"] + params["b_fc1"], 0.0)
    return h @ params["w_fc2"] + params["b_fc2"]


def init_params(key, in_channels):
    ks = jax.random.split(key, 11)
    p = {
        "w_conv": 0.1 * jax.random.normal(ks[0], (in_channels, 128), jnp.float32),
        "b_conv": 0.1 * jax.random.normal(ks[1], (128,), jnp.float32),
        "bn_gamma": 1.0 + 0.1 * jax.random.normal(ks[2], (128,), jnp.float32),
        "bn_beta": 0.1 * jax.random.normal(ks[3], (128,), jnp.float32),
        "bn_mean": 0.1 * jax.random.normal(ks[4], (128,), jnp.float32),
        "bn_var": jnp.abs(jax.random.normal(ks[5], (128,), jnp.float32)) + 0.5,
        "w_fc1": 0.02 * jax.random.normal(ks[6], (128 * 16, 1024), jnp.float32),
        "b_fc1": 0.02 * jax.random.normal(ks[7], (1024,), jnp.float32),
        "w_fc2": 0.05 * jax.random.normal(ks[8], (1024, 10), jnp.float32),
        "b_fc2": 0.05 * jax.random.normal(ks[9], (10,), jnp.float32),
    }
    return p, ks[10]


if __name__ == "__main__":
    key = jax.random.PRNGKey(0)
    in_channels = 4
    params, xkey = init_params(key, in_channels)
    x = jax.random.normal(xkey, (2, in_channels, 16, 16), jnp.float32)

    fwd = jax.jit(inception_aux_forward)
    out = jax.block_until_ready(fwd(x, params))
    ref = jax.block_until_ready(reference_forward(x, params))

    assert out.shape == (2, 10), out.shape
    # Tolerance accounts for bf16 fc1 weights/activations (f32 accumulation).
    np.testing.assert_allclose(np.asarray(out), np.asarray(ref),
                               rtol=2e-2, atol=5e-3)
    print("KERNEL_OK")
</pallas_src>

<mosaic_0001>
module attributes {stable_mosaic.version = 11 : i64} {
  func.func @inception_aux_kernel(%arg0: i32, %arg1: memref<128x2048xf32, #tpu.memory_space<vmem>>, %arg2: memref<2048x4xf32, #tpu.memory_space<vmem>>, %arg3: memref<4x128xf32, #tpu.memory_space<vmem>>, %arg4: memref<1x128xf32, #tpu.memory_space<vmem>>, %arg5: memref<16x128x1024xbf16, #tpu.memory_space<vmem>>, %arg6: memref<1x1024xf32, #tpu.memory_space<vmem>>, %arg7: memref<1024x128xf32, #tpu.memory_space<vmem>>, %arg8: memref<1x128xf32, #tpu.memory_space<vmem>>, %arg9: memref<8x128xf32, #tpu.memory_space<vmem>>) attributes {dimension_semantics = [#tpu.dimension_semantics<parallel>], iteration_bounds = array<i64: 1>, scalar_prefetch = 0 : i64, scratch_operands = 0 : i64, tpu.core_type = #tpu.core_type<tc>, window_params = [{pipeline_mode = #tpu.pipeline_mode<synchronous>, transform_indices = @transform_0, window_bounds = array<i64: 128, 2048>}, {transform_indices = @transform_1, window_bounds = array<i64: 2048, 4>}, {pipeline_mode = #tpu.pipeline_mode<synchronous>, transform_indices = @transform_2, window_bounds = array<i64: 4, 128>}, {pipeline_mode = #tpu.pipeline_mode<synchronous>, transform_indices = @transform_3, window_bounds = array<i64: 1, 128>}, {pipeline_mode = #tpu.pipeline_mode<synchronous>, transform_indices = @transform_4, window_bounds = array<i64: 16, 128, 1024>}, {pipeline_mode = #tpu.pipeline_mode<synchronous>, transform_indices = @transform_5, window_bounds = array<i64: 1, 1024>}, {pipeline_mode = #tpu.pipeline_mode<synchronous>, transform_indices = @transform_6, window_bounds = array<i64: 1024, 128>}, {pipeline_mode = #tpu.pipeline_mode<synchronous>, transform_indices = @transform_7, window_bounds = array<i64: 1, 128>}, {transform_indices = @transform_8, window_bounds = array<i64: 8, 128>}]} {
    %c0 = arith.constant 0 : index
    %c0_0 = arith.constant 0 : index
    %0 = vector.load %arg1[%c0, %c0_0] : memref<128x2048xf32, #tpu.memory_space<vmem>>, vector<128x2048xf32>
    %c0_1 = arith.constant 0 : index
    %c0_2 = arith.constant 0 : index
    %1 = vector.load %arg2[%c0_1, %c0_2] : memref<2048x4xf32, #tpu.memory_space<vmem>>, vector<2048x4xf32>
    %cst = arith.constant dense<0.000000e+00> : vector<128x4xf32>
    %2 = tpu.matmul %0, %1, %cst {dimension_numbers = #tpu.dot_dimension_numbers<[1], [0], [0], [1], [0, 0, 1, 1], [], []>} : vector<128x2048xf32>, vector<2048x4xf32>, vector<128x4xf32> -> vector<128x4xf32>
    %c0_3 = arith.constant 0 : index
    %c0_4 = arith.constant 0 : index
    %3 = vector.load %arg3[%c0_3, %c0_4] : memref<4x128xf32, #tpu.memory_space<vmem>>, vector<4x128xf32>
    %cst_5 = arith.constant dense<0.000000e+00> : vector<128x128xf32>
    %4 = tpu.matmul %2, %3, %cst_5 {dimension_numbers = #tpu.dot_dimension_numbers<[1], [0], [0], [1], [0, 0, 1, 1], [], []>} : vector<128x4xf32>, vector<4x128xf32>, vector<128x128xf32> -> vector<128x128xf32>
    %c0_6 = arith.constant 0 : index
    %c0_7 = arith.constant 0 : index
    %5 = vector.load %arg4[%c0_6, %c0_7] : memref<1x128xf32, #tpu.memory_space<vmem>>, vector<1x128xf32>
    %6 = vector.broadcast %5 : vector<1x128xf32> to vector<128x128xf32>
    %7 = arith.addf %4, %6 : vector<128x128xf32>
    %8 = vector.extract_strided_slice %7 {offsets = [0, 0], sizes = [8, 128], strides = [1, 1]} : vector<128x128xf32> to vector<8x128xf32>
    %9 = arith.truncf %8 : vector<8x128xf32> to vector<8x128xbf16>
    %c0_8 = arith.constant 0 : index
    %c0_9 = arith.constant 0 : index
    %c0_10 = arith.constant 0 : index
    %10 = vector.load %arg5[%c0_8, %c0_9, %c0_10] : memref<16x128x1024xbf16, #tpu.memory_space<vmem>>, vector<1x128x1024xbf16>
    %11 = vector.shape_cast %10 : vector<1x128x1024xbf16> to vector<128x1024xbf16>
    %cst_11 = arith.constant dense<0.000000e+00> : vector<8x1024xf32>
    %12 = tpu.matmul %9, %11, %cst_11 {dimension_numbers = #tpu.dot_dimension_numbers<[1], [0], [0], [1], [0, 0, 1, 1], [], []>} : vector<8x128xbf16>, vector<128x1024xbf16>, vector<8x1024xf32> -> vector<8x1024xf32>
    %13 = vector.extract_strided_slice %7 {offsets = [8, 0], sizes = [8, 128], strides = [1, 1]} : vector<128x128xf32> to vector<8x128xf32>
    %14 = arith.truncf %13 : vector<8x128xf32> to vector<8x128xbf16>
    %c1 = arith.constant 1 : index
    %c0_12 = arith.constant 0 : index
    %c0_13 = arith.constant 0 : index
    %15 = vector.load %arg5[%c1, %c0_12, %c0_13] : memref<16x128x1024xbf16, #tpu.memory_space<vmem>>, vector<1x128x1024xbf16>
    %16 = vector.shape_cast %15 : vector<1x128x1024xbf16> to vector<128x1024xbf16>
    %cst_14 = arith.constant dense<0.000000e+00> : vector<8x1024xf32>
    %17 = tpu.matmul %14, %16, %cst_14 {dimension_numbers = #tpu.dot_dimension_numbers<[1], [0], [0], [1], [0, 0, 1, 1], [], []>} : vector<8x128xbf16>, vector<128x1024xbf16>, vector<8x1024xf32> -> vector<8x1024xf32>
    %18 = arith.addf %12, %17 : vector<8x1024xf32>
    %19 = vector.extract_strided_slice %7 {offsets = [16, 0], sizes = [8, 128], strides = [1, 1]} : vector<128x128xf32> to vector<8x128xf32>
    %20 = arith.truncf %19 : vector<8x128xf32> to vector<8x128xbf16>
    %c2 = arith.constant 2 : index
    %c0_15 = arith.constant 0 : index
    %c0_16 = arith.constant 0 : index
    %21 = vector.load %arg5[%c2, %c0_15, %c0_16] : memref<16x128x1024xbf16, #tpu.memory_space<vmem>>, vector<1x128x1024xbf16>
    %22 = vector.shape_cast %21 : vector<1x128x1024xbf16> to vector<128x1024xbf16>
    %cst_17 = arith.constant dense<0.000000e+00> : vector<8x1024xf32>
    %23 = tpu.matmul %20, %22, %cst_17 {dimension_numbers = #tpu.dot_dimension_numbers<[1], [0], [0], [1], [0, 0, 1, 1], [], []>} : vector<8x128xbf16>, vector<128x1024xbf16>, vector<8x1024xf32> -> vector<8x1024xf32>
    %24 = arith.addf %18, %23 : vector<8x1024xf32>
    %25 = vector.extract_strided_slice %7 {offsets = [24, 0], sizes = [8, 128], strides = [1, 1]} : vector<128x128xf32> to vector<8x128xf32>
    %26 = arith.truncf %25 : vector<8x128xf32> to vector<8x128xbf16>
    %c3 = arith.constant 3 : index
    %c0_18 = arith.constant 0 : index
    %c0_19 = arith.constant 0 : index
    %27 = vector.load %arg5[%c3, %c0_18, %c0_19] : memref<16x128x1024xbf16, #tpu.memory_space<vmem>>, vector<1x128x1024xbf16>
    %28 = vector.shape_cast %27 : vector<1x128x1024xbf16> to vector<128x1024xbf16>
    %cst_20 = arith.constant dense<0.000000e+00> : vector<8x1024xf32>
    %29 = tpu.matmul %26, %28, %cst_20 {dimension_numbers = #tpu.dot_dimension_numbers<[1], [0], [0], [1], [0, 0, 1, 1], [], []>} : vector<8x128xbf16>, vector<128x1024xbf16>, vector<8x1024xf32> -> vector<8x1024xf32>
    %30 = arith.addf %24, %29 : vector<8x1024xf32>
    %31 = vector.extract_strided_slice %7 {offsets = [32, 0], sizes = [8, 128], strides = [1, 1]} : vector<128x128xf32> to vector<8x128xf32>
    %32 = arith.truncf %31 : vector<8x128xf32> to vector<8x128xbf16>
    %c4 = arith.constant 4 : index
    %c0_21 = arith.constant 0 : index
    %c0_22 = arith.constant 0 : index
    %33 = vector.load %arg5[%c4, %c0_21, %c0_22] : memref<16x128x1024xbf16, #tpu.memory_space<vmem>>, vector<1x128x1024xbf16>
    %34 = vector.shape_cast %33 : vector<1x128x1024xbf16> to vector<128x1024xbf16>
    %cst_23 = arith.constant dense<0.000000e+00> : vector<8x1024xf32>
    %35 = tpu.matmul %32, %34, %cst_23 {dimension_numbers = #tpu.dot_dimension_numbers<[1], [0], [0], [1], [0, 0, 1, 1], [], []>} : vector<8x128xbf16>, vector<128x1024xbf16>, vector<8x1024xf32> -> vector<8x1024xf32>
    %36 = arith.addf %30, %35 : vector<8x1024xf32>
    %37 = vector.extract_strided_slice %7 {offsets = [40, 0], sizes = [8, 128], strides = [1, 1]} : vector<128x128xf32> to vector<8x128xf32>
    %38 = arith.truncf %37 : vector<8x128xf32> to vector<8x128xbf16>
    %c5 = arith.constant 5 : index
    %c0_24 = arith.constant 0 : index
    %c0_25 = arith.constant 0 : index
    %39 = vector.load %arg5[%c5, %c0_24, %c0_25] : memref<16x128x1024xbf16, #tpu.memory_space<vmem>>, vector<1x128x1024xbf16>
    %40 = vector.shape_cast %39 : vector<1x128x1024xbf16> to vector<128x1024xbf16>
    %cst_26 = arith.constant dense<0.000000e+00> : vector<8x1024xf32>
    %41 = tpu.matmul %38, %40, %cst_26 {dimension_numbers = #tpu.dot_dimension_numbers<[1], [0], [0], [1], [0, 0, 1, 1], [], []>} : vector<8x128xbf16>, vector<128x1024xbf16>, vector<8x1024xf32> -> vector<8x1024xf32>
    %42 = arith.addf %36, %41 : vector<8x1024xf32>
    %43 = vector.extract_strided_slice %7 {offsets = [48, 0], sizes = [8, 128], strides = [1, 1]} : vector<128x128xf32> to vector<8x128xf32>
    %44 = arith.truncf %43 : vector<8x128xf32> to vector<8x128xbf16>
    %c6 = arith.constant 6 : index
    %c0_27 = arith.constant 0 : index
    %c0_28 = arith.constant 0 : index
    %45 = vector.load %arg5[%c6, %c0_27, %c0_28] : memref<16x128x1024xbf16, #tpu.memory_space<vmem>>, vector<1x128x1024xbf16>
    %46 = vector.shape_cast %45 : vector<1x128x1024xbf16> to vector<128x1024xbf16>
    %cst_29 = arith.constant dense<0.000000e+00> : vector<8x1024xf32>
    %47 = tpu.matmul %44, %46, %cst_29 {dimension_numbers = #tpu.dot_dimension_numbers<[1], [0], [0], [1], [0, 0, 1, 1], [], []>} : vector<8x128xbf16>, vector<128x1024xbf16>, vector<8x1024xf32> -> vector<8x1024xf32>
    %48 = arith.addf %42, %47 : vector<8x1024xf32>
    %49 = vector.extract_strided_slice %7 {offsets = [56, 0], sizes = [8, 128], strides = [1, 1]} : vector<128x128xf32> to vector<8x128xf32>
    %50 = arith.truncf %49 : vector<8x128xf32> to vector<8x128xbf16>
    %c7 = arith.constant 7 : index
    %c0_30 = arith.constant 0 : index
    %c0_31 = arith.constant 0 : index
    %51 = vector.load %arg5[%c7, %c0_30, %c0_31] : memref<16x128x1024xbf16, #tpu.memory_space<vmem>>, vector<1x128x1024xbf16>
    %52 = vector.shape_cast %51 : vector<1x128x1024xbf16> to vector<128x1024xbf16>
    %cst_32 = arith.constant dense<0.000000e+00> : vector<8x1024xf32>
    %53 = tpu.matmul %50, %52, %cst_32 {dimension_numbers = #tpu.dot_dimension_numbers<[1], [0], [0], [1], [0, 0, 1, 1], [], []>} : vector<8x128xbf16>, vector<128x1024xbf16>, vector<8x1024xf32> -> vector<8x1024xf32>
    %54 = arith.addf %48, %53 : vector<8x1024xf32>
    %55 = vector.extract_strided_slice %7 {offsets = [64, 0], sizes = [8, 128], strides = [1, 1]} : vector<128x128xf32> to vector<8x128xf32>
    %56 = arith.truncf %55 : vector<8x128xf32> to vector<8x128xbf16>
    %c8 = arith.constant 8 : index
    %c0_33 = arith.constant 0 : index
    %c0_34 = arith.constant 0 : index
    %57 = vector.load %arg5[%c8, %c0_33, %c0_34] : memref<16x128x1024xbf16, #tpu.memory_space<vmem>>, vector<1x128x1024xbf16>
    %58 = vector.shape_cast %57 : vector<1x128x1024xbf16> to vector<128x1024xbf16>
    %cst_35 = arith.constant dense<0.000000e+00> : vector<8x1024xf32>
    %59 = tpu.matmul %56, %58, %cst_35 {dimension_numbers = #tpu.dot_dimension_numbers<[1], [0], [0], [1], [0, 0, 1, 1], [], []>} : vector<8x128xbf16>, vector<128x1024xbf16>, vector<8x1024xf32> -> vector<8x1024xf32>
    %60 = arith.addf %54, %59 : vector<8x1024xf32>
    %61 = vector.extract_strided_slice %7 {offsets = [72, 0], sizes = [8, 128], strides = [1, 1]} : vector<128x128xf32> to vector<8x128xf32>
    %62 = arith.truncf %61 : vector<8x128xf32> to vector<8x128xbf16>
    %c9 = arith.constant 9 : index
    %c0_36 = arith.constant 0 : index
    %c0_37 = arith.constant 0 : index
    %63 = vector.load %arg5[%c9, %c0_36, %c0_37] : memref<16x128x1024xbf16, #tpu.memory_space<vmem>>, vector<1x128x1024xbf16>
    %64 = vector.shape_cast %63 : vector<1x128x1024xbf16> to vector<128x1024xbf16>
    %cst_38 = arith.constant dense<0.000000e+00> : vector<8x1024xf32>
    %65 = tpu.matmul %62, %64, %cst_38 {dimension_numbers = #tpu.dot_dimension_numbers<[1], [0], [0], [1], [0, 0, 1, 1], [], []>} : vector<8x128xbf16>, vector<128x1024xbf16>, vector<8x1024xf32> -> vector<8x1024xf32>
    %66 = arith.addf %60, %65 : vector<8x1024xf32>
    %67 = vector.extract_strided_slice %7 {offsets = [80, 0], sizes = [8, 128], strides = [1, 1]} : vector<128x128xf32> to vector<8x128xf32>
    %68 = arith.truncf %67 : vector<8x128xf32> to vector<8x128xbf16>
    %c10 = arith.constant 10 : index
    %c0_39 = arith.constant 0 : index
    %c0_40 = arith.constant 0 : index
    %69 = vector.load %arg5[%c10, %c0_39, %c0_40] : memref<16x128x1024xbf16, #tpu.memory_space<vmem>>, vector<1x128x1024xbf16>
    %70 = vector.shape_cast %69 : vector<1x128x1024xbf16> to vector<128x1024xbf16>
    %cst_41 = arith.constant dense<0.000000e+00> : vector<8x1024xf32>
    %71 = tpu.matmul %68, %70, %cst_41 {dimension_numbers = #tpu.dot_dimension_numbers<[1], [0], [0], [1], [0, 0, 1, 1], [], []>} : vector<8x128xbf16>, vector<128x1024xbf16>, vector<8x1024xf32> -> vector<8x1024xf32>
    %72 = arith.addf %66, %71 : vector<8x1024xf32>
    %73 = vector.extract_strided_slice %7 {offsets = [88, 0], sizes = [8, 128], strides = [1, 1]} : vector<128x128xf32> to vector<8x128xf32>
    %74 = arith.truncf %73 : vector<8x128xf32> to vector<8x128xbf16>
    %c11 = arith.constant 11 : index
    %c0_42 = arith.constant 0 : index
    %c0_43 = arith.constant 0 : index
    %75 = vector.load %arg5[%c11, %c0_42, %c0_43] : memref<16x128x1024xbf16, #tpu.memory_space<vmem>>, vector<1x128x1024xbf16>
    %76 = vector.shape_cast %75 : vector<1x128x1024xbf16> to vector<128x1024xbf16>
    %cst_44 = arith.constant dense<0.000000e+00> : vector<8x1024xf32>
    %77 = tpu.matmul %74, %76, %cst_44 {dimension_numbers = #tpu.dot_dimension_numbers<[1], [0], [0], [1], [0, 0, 1, 1], [], []>} : vector<8x128xbf16>, vector<128x1024xbf16>, vector<8x1024xf32> -> vector<8x1024xf32>
    %78 = arith.addf %72, %77 : vector<8x1024xf32>
    %79 = vector.extract_strided_slice %7 {offsets = [96, 0], sizes = [8, 128], strides = [1, 1]} : vector<128x128xf32> to vector<8x128xf32>
    %80 = arith.truncf %79 : vector<8x128xf32> to vector<8x128xbf16>
    %c12 = arith.constant 12 : index
    %c0_45 = arith.constant 0 : index
    %c0_46 = arith.constant 0 : index
    %81 = vector.load %arg5[%c12, %c0_45, %c0_46] : memref<16x128x1024xbf16, #tpu.memory_space<vmem>>, vector<1x128x1024xbf16>
    %82 = vector.shape_cast %81 : vector<1x128x1024xbf16> to vector<128x1024xbf16>
    %cst_47 = arith.constant dense<0.000000e+00> : vector<8x1024xf32>
    %83 = tpu.matmul %80, %82, %cst_47 {dimension_numbers = #tpu.dot_dimension_numbers<[1], [0], [0], [1], [0, 0, 1, 1], [], []>} : vector<8x128xbf16>, vector<128x1024xbf16>, vector<8x1024xf32> -> vector<8x1024xf32>
    %84 = arith.addf %78, %83 : vector<8x1024xf32>
    %85 = vector.extract_strided_slice %7 {offsets = [104, 0], sizes = [8, 128], strides = [1, 1]} : vector<128x128xf32> to vector<8x128xf32>
    %86 = arith.truncf %85 : vector<8x128xf32> to vector<8x128xbf16>
    %c13 = arith.constant 13 : index
    %c0_48 = arith.constant 0 : index
    %c0_49 = arith.constant 0 : index
    %87 = vector.load %arg5[%c13, %c0_48, %c0_49] : memref<16x128x1024xbf16, #tpu.memory_space<vmem>>, vector<1x128x1024xbf16>
    %88 = vector.shape_cast %87 : vector<1x128x1024xbf16> to vector<128x1024xbf16>
    %cst_50 = arith.constant dense<0.000000e+00> : vector<8x1024xf32>
    %89 = tpu.matmul %86, %88, %cst_50 {dimension_numbers = #tpu.dot_dimension_numbers<[1], [0], [0], [1], [0, 0, 1, 1], [], []>} : vector<8x128xbf16>, vector<128x1024xbf16>, vector<8x1024xf32> -> vector<8x1024xf32>
    %90 = arith.addf %84, %89 : vector<8x1024xf32>
    %91 = vector.extract_strided_slice %7 {offsets = [112, 0], sizes = [8, 128], strides = [1, 1]} : vector<128x128xf32> to vector<8x128xf32>
    %92 = arith.truncf %91 : vector<8x128xf32> to vector<8x128xbf16>
    %c14 = arith.constant 14 : index
    %c0_51 = arith.constant 0 : index
    %c0_52 = arith.constant 0 : index
    %93 = vector.load %arg5[%c14, %c0_51, %c0_52] : memref<16x128x1024xbf16, #tpu.memory_space<vmem>>, vector<1x128x1024xbf16>
    %94 = vector.shape_cast %93 : vector<1x128x1024xbf16> to vector<128x1024xbf16>
    %cst_53 = arith.constant dense<0.000000e+00> : vector<8x1024xf32>
    %95 = tpu.matmul %92, %94, %cst_53 {dimension_numbers = #tpu.dot_dimension_numbers<[1], [0], [0], [1], [0, 0, 1, 1], [], []>} : vector<8x128xbf16>, vector<128x1024xbf16>, vector<8x1024xf32> -> vector<8x1024xf32>
    %96 = arith.addf %90, %95 : vector<8x1024xf32>
    %97 = vector.extract_strided_slice %7 {offsets = [120, 0], sizes = [8, 128], strides = [1, 1]} : vector<128x128xf32> to vector<8x128xf32>
    %98 = arith.truncf %97 : vector<8x128xf32> to vector<8x128xbf16>
    %c15 = arith.constant 15 : index
    %c0_54 = arith.constant 0 : index
    %c0_55 = arith.constant 0 : index
    %99 = vector.load %arg5[%c15, %c0_54, %c0_55] : memref<16x128x1024xbf16, #tpu.memory_space<vmem>>, vector<1x128x1024xbf16>
    %100 = vector.shape_cast %99 : vector<1x128x1024xbf16> to vector<128x1024xbf16>
    %cst_56 = arith.constant dense<0.000000e+00> : vector<8x1024xf32>
    %101 = tpu.matmul %98, %100, %cst_56 {dimension_numbers = #tpu.dot_dimension_numbers<[1], [0], [0], [1], [0, 0, 1, 1], [], []>} : vector<8x128xbf16>, vector<128x1024xbf16>, vector<8x1024xf32> -> vector<8x1024xf32>
    %102 = arith.addf %96, %101 : vector<8x1024xf32>
    %c0_57 = arith.constant 0 : index
    %c0_58 = arith.constant 0 : index
    %103 = vector.load %arg6[%c0_57, %c0_58] : memref<1x1024xf32, #tpu.memory_space<vmem>>, vector<1x1024xf32>
    %104 = vector.broadcast %103 : vector<1x1024xf32> to vector<8x1024xf32>
    %105 = arith.addf %102, %104 : vector<8x1024xf32>
    %cst_59 = arith.constant 0.000000e+00 : f32
    %106 = vector.broadcast %cst_59 : f32 to vector<8x1024xf32>
    %107 = arith.maximumf %105, %106 : vector<8x1024xf32>
    %c0_60 = arith.constant 0 : index
    %c0_61 = arith.constant 0 : index
    %108 = vector.load %arg7[%c0_60, %c0_61] : memref<1024x128xf32, #tpu.memory_space<vmem>>, vector<1024x128xf32>
    %cst_62 = arith.constant dense<0.000000e+00> : vector<8x128xf32>
    %109 = tpu.matmul %107, %108, %cst_62 {dimension_numbers = #tpu.dot_dimension_numbers<[1], [0], [0], [1], [0, 0, 1, 1], [], []>} : vector<8x1024xf32>, vector<1024x128xf32>, vector<8x128xf32> -> vector<8x128xf32>
    %c0_63 = arith.constant 0 : index
    %c0_64 = arith.constant 0 : index
    %110 = vector.load %arg8[%c0_63, %c0_64] : memref<1x128xf32, #tpu.memory_space<vmem>>, vector<1x128xf32>
    %111 = vector.broadcast %110 : vector<1x128xf32> to vector<8x128xf32>
    %112 = arith.addf %109, %111 : vector<8x128xf32>
    %c0_65 = arith.constant 0 : index
    %c0_66 = arith.constant 0 : index
    %113 = vector.load %arg9[%c0_65, %c0_66] : memref<8x128xf32, #tpu.memory_space<vmem>>, vector<8x128xf32>
    tpu.vector_store %arg9[%c0_65, %c0_66], %112 {strides = array<i32>} : memref<8x128xf32, #tpu.memory_space<vmem>>, vector<8x128xf32>,
    return
  }
  func.func @transform_0(%arg0: i32) -> (i32, i32) {
    %c0_i32 = arith.constant 0 : i32
    %c0_i32_0 = arith.constant 0 : i32
    %c0_i32_1 = arith.constant 0 : i32
    return %c0_i32, %c0_i32_0 : i32, i32
  }
  func.func @transform_1(%arg0: i32) -> (i32, i32) {
    %c0_i32 = arith.constant 0 : i32
    %c0_i32_0 = arith.constant 0 : i32
    return %arg0, %c0_i32 : i32, i32
  }
  func.func @transform_2(%arg0: i32) -> (i32, i32) {
    %c0_i32 = arith.constant 0 : i32
    %c0_i32_0 = arith.constant 0 : i32
    %c0_i32_1 = arith.constant 0 : i32
    return %c0_i32, %c0_i32_0 : i32, i32
  }
  func.func @transform_3(%arg0: i32) -> (i32, i32) {
    %c0_i32 = arith.constant 0 : i32
    %c0_i32_0 = arith.constant 0 : i32
    %c0_i32_1 = arith.constant 0 : i32
    return %c0_i32, %c0_i32_0 : i32, i32
  }
  func.func @transform_4(%arg0: i32) -> (i32, i32, i32) {
    %c0_i32 = arith.constant 0 : i32
    %c0_i32_0 = arith.constant 0 : i32
    %c0_i32_1 = arith.constant 0 : i32
    %c0_i32_2 = arith.constant 0 : i32
    return %c0_i32, %c0_i32_0, %c0_i32_1 : i32, i32, i32
  }
  func.func @transform_5(%arg0: i32) -> (i32, i32) {
    %c0_i32 = arith.constant 0 : i32
    %c0_i32_0 = arith.constant 0 : i32
    %c0_i32_1 = arith.constant 0 : i32
    return %c0_i32, %c0_i32_0 : i32, i32
  }
  func.func @transform_6(%arg0: i32) -> (i32, i32) {
    %c0_i32 = arith.constant 0 : i32
    %c0_i32_0 = arith.constant 0 : i32
    %c0_i32_1 = arith.constant 0 : i32
    return %c0_i32, %c0_i32_0 : i32, i32
  }
  func.func @transform_7(%arg0: i32) -> (i32, i32) {
    %c0_i32 = arith.constant 0 : i32
    %c0_i32_0 = arith.constant 0 : i32
    %c0_i32_1 = arith.constant 0 : i32
    return %c0_i32, %c0_i32_0 : i32, i32
  }
  func.func @transform_8(%arg0: i32) -> (i32, i32) {
    %c0_i32 = arith.constant 0 : i32
    %c0_i32_0 = arith.constant 0 : i32
    return %arg0, %c0_i32 : i32, i32
  }
}

</mosaic_0001>

<bundles_post_ra>
// kernel: inception_aux_forward.1
= control target key start
LH: loop header
LB: loop body
LE: loop exit
PB: predicated region body
PF: predicated region fallthrough
CT: control target
= control target key end

     0   :  { %vm1759_vm0 = vcmask 1043456   ;;  %vm1710_vm1 = vcmask 31744   ;;  %s20089_s1 = inlined_call_operand.vmem [shape: f32[2048,4], index: 1, kind: input, shape index: {}]   ;;  %s20090_s0 = inlined_call_operand.vmem [shape: f32[128,2048], index: 0, kind: input, shape index: {}]   ;;  %s20091_s2 = inlined_call_operand.vmem [shape: f32[4,128], index: 2, kind: input, shape index: {}]   ;;  %s20092_s4 = inlined_call_operand.vmem [shape: bf16[16,128,1024], index: 4, kind: input, shape index: {}]   ;;  %s20093_s3 = inlined_call_operand.vmem [shape: f32[1,128], index: 3, kind: input, shape index: {}]   ;;  %s20094_s6 = inlined_call_operand.vmem [shape: f32[1024,128], index: 6, kind: input, shape index: {}]   ;;  %s20095_s5 = inlined_call_operand.vmem [shape: f32[1,1024], index: 5, kind: input, shape index: {}]   ;;  %s20096_s7 = inlined_call_operand.vmem [shape: f32[1,128], index: 7, kind: input, shape index: {}]   ;;  %s20097_s8 = inlined_call_operand.vmem [shape: f32[8,128], index: 8, kind: output, shape index: {}]  }
   0x1   :  { %v317_v0 = vld [vmem:[%s20089_s1 + $0xf8] sm:$0xff]  ;;  %v316_v4 = vld [vmem:[%s20089_s1 + $0xf0] sm:$0xff]  ;;  %v315_v8 = vld [vmem:[%s20089_s1 + $0xe8] sm:$0xff] }
   0x2   :  { %v349_v1 = vld [vmem:[%s20089_s1 + $0x1f8] sm:$0xff]  ;;  %13300 = vmatprep.subr.mxu0 %v317_v0  ;;  %v348_v5 = vld [vmem:[%s20089_s1 + $0x1f0] sm:$0xff]  ;;  %v347_v9 = vld [vmem:[%s20089_s1 + $0x1e8] sm:$0xff] }
   0x3   :  { %v301_v2 = vld [vmem:[%s20089_s1 + $0x78] sm:$0xff]  ;;  %13380 = vmatprep.subr.mxu1 %v349_v1  ;;  %v300_v6 = vld [vmem:[%s20089_s1 + $0x70] sm:$0xff]  ;;  %v299_v10 = vld [vmem:[%s20089_s1 + $0x68] sm:$0xff] }
   0x4   :  { %v333_v3 = vld [vmem:[%s20089_s1 + $0x178] sm:$0xff]  ;;  %13301 = vmatpush3.msra.mxu0 %v301_v2  ;;  %v332_v7 = vld [vmem:[%s20089_s1 + $0x170] sm:$0xff]  ;;  %v331_v11 = vld [vmem:[%s20089_s1 + $0x168] sm:$0xff] }
   0x5   :  { %13381 = vmatpush3.msra.mxu1 %v333_v3  ;;  %13302 = vmatprep.subr.mxu0 %v316_v4  ;;  %v314_v12 = vld [vmem:[%s20089_s1 + $0xe0] sm:$0xff]  ;;  %v313_v16 = vld [vmem:[%s20089_s1 + $0xd8] sm:$0xff]  ;;  %v312_v20 = vld [vmem:[%s20089_s1 + $0xd0] sm:$0xff] }
   0x6   :  { %13382 = vmatprep.subr.mxu1 %v348_v5  ;;  %13303 = vmatpush3.msra.mxu0 %v300_v6  ;;  %v346_v13 = vld [vmem:[%s20089_s1 + $0x1e0] sm:$0xff]  ;;  %v345_v17 = vld [vmem:[%s20089_s1 + $0x1d8] sm:$0xff]  ;;  %v344_v21 = vld [vmem:[%s20089_s1 + $0x1d0] sm:$0xff] }
   0x7   :  { %13383 = vmatpush3.msra.mxu1 %v332_v7  ;;  %13304 = vmatprep.subr.mxu0 %v315_v8  ;;  %v298_v14 = vld [vmem:[%s20089_s1 + $0x60] sm:$0xff]  ;;  %v297_v18 = vld [vmem:[%s20089_s1 + $0x58] sm:$0xff]  ;;  %v296_v22 = vld [vmem:[%s20089_s1 + $0x50] sm:$0xff] }
   0x8   :  { %13384 = vmatprep.subr.mxu1 %v347_v9  ;;  %v330_v15 = vld [vmem:[%s20089_s1 + $0x160] sm:$0xff]  ;;  %13305 = vmatpush3.msra.mxu0 %v299_v10  ;;  %v329_v19 = vld [vmem:[%s20089_s1 + $0x158] sm:$0xff]  ;;  %v328_v23 = vld [vmem:[%s20089_s1 + $0x150] sm:$0xff] }
   0x9   :  { %13385 = vmatpush3.msra.mxu1 %v331_v11  ;;  %13306 = vmatprep.subr.mxu0 %v314_v12  ;;  %v311_v24 = vld [vmem:[%s20089_s1 + $0xc8] sm:$0xff]  ;;  %v310_v28 = vld [vmem:[%s20089_s1 + $0xc0] sm:$0xff]  ;;  %v309_v32 = vld [vmem:[%s20089_s1 + $0xb8] sm:$0xff] }
   0xa   :  { %13386 = vmatprep.subr.mxu1 %v346_v13  ;;  %13307 = vmatpush3.msra.mxu0 %v298_v14  ;;  %v343_v25 = vld [vmem:[%s20089_s1 + $0x1c8] sm:$0xff]  ;;  %v342_v29 = vld [vmem:[%s20089_s1 + $0x1c0] sm:$0xff]  ;;  %v341_v33 = vld [vmem:[%s20089_s1 + $0x1b8] sm:$0xff] }
   0xb   :  { %13387 = vmatpush3.msra.mxu1 %v330_v15  ;;  %13308 = vmatprep.subr.mxu0 %v313_v16  ;;  %v295_v26 = vld [vmem:[%s20089_s1 + $0x48] sm:$0xff]  ;;  %v294_v30 = vld [vmem:[%s20089_s1 + $0x40] sm:$0xff]  ;;  %v293_v34 = vld [vmem:[%s20089_s1 + $0x38] sm:$0xff] }
   0xc   :  { %13388 = vmatprep.subr.mxu1 %v345_v17  ;;  %13309 = vmatpush3.msra.mxu0 %v297_v18  ;;  %v327_v27 = vld [vmem:[%s20089_s1 + $0x148] sm:$0xff]  ;;  %v326_v31 = vld [vmem:[%s20089_s1 + $0x140] sm:$0xff]  ;;  %v325_v35 = vld [vmem:[%s20089_s1 + $0x138] sm:$0xff] }
   0xd   :  { %13389 = vmatpush3.msra.mxu1 %v329_v19  ;;  %13310 = vmatprep.subr.mxu0 %v312_v20  ;;  %v308_v36 = vld [vmem:[%s20089_s1 + $0xb0] sm:$0xff]  ;;  %v307_v40 = vld [vmem:[%s20089_s1 + $0xa8] sm:$0xff]  ;;  %v306_v44 = vld [vmem:[%s20089_s1 + $0xa0] sm:$0xff] }
   0xe   :  { %13390 = vmatprep.subr.mxu1 %v344_v21  ;;  %13311 = vmatpush3.msra.mxu0 %v296_v22  ;;  %v340_v37 = vld [vmem:[%s20089_s1 + $0x1b0] sm:$0xff]  ;;  %v339_v41 = vld [vmem:[%s20089_s1 + $0x1a8] sm:$0xff]  ;;  %v338_v45 = vld [vmem:[%s20089_s1 + $0x1a0] sm:$0xff] }
   0xf   :  { %13391 = vmatpush3.msra.mxu1 %v328_v23  ;;  %13312 = vmatprep.subr.mxu0 %v311_v24  ;;  %v292_v38 = vld [vmem:[%s20089_s1 + $0x30] sm:$0xff]  ;;  %v291_v42 = vld [vmem:[%s20089_s1 + $0x28] sm:$0xff]  ;;  %v290_v46 = vld [vmem:[%s20089_s1 + $0x20] sm:$0xff] }
  0x10   :  { %13392 = vmatprep.subr.mxu1 %v343_v25  ;;  %13313 = vmatpush3.msra.mxu0 %v295_v26  ;;  %v324_v39 = vld [vmem:[%s20089_s1 + $0x130] sm:$0xff]  ;;  %v323_v43 = vld [vmem:[%s20089_s1 + $0x128] sm:$0xff]  ;;  %v322_v47 = vld [vmem:[%s20089_s1 + $0x120] sm:$0xff] }
  0x11   :  { %13393 = vmatpush3.msra.mxu1 %v327_v27  ;;  %13314 = vmatprep.subr.mxu0 %v310_v28  ;;  %v305_v48 = vld [vmem:[%s20089_s1 + $0x98] sm:$0xff]  ;;  %v304_v52 = vld [vmem:[%s20089_s1 + $0x90] sm:$0xff]  ;;  %v303_v56 = vld [vmem:[%s20089_s1 + $0x88] sm:$0xff] }
  0x12   :  { %13394 = vmatprep.subr.mxu1 %v342_v29  ;;  %13315 = vmatpush3.msra.mxu0 %v294_v30  ;;  %v337_v49 = vld [vmem:[%s20089_s1 + $0x198] sm:$0xff]  ;;  %v336_v53 = vld [vmem:[%s20089_s1 + $0x190] sm:$0xff]  ;;  %v335_v57 = vld [vmem:[%s20089_s1 + $0x188] sm:$0xff] }
  0x13   :  { %13395 = vmatpush3.msra.mxu1 %v326_v31  ;;  %13316 = vmatprep.subr.mxu0 %v309_v32  ;;  %v289_v50 = vld [vmem:[%s20089_s1 + $0x18] sm:$0xff]  ;;  %v288_v54 = vld [vmem:[%s20089_s1 + $0x10] sm:$0xff]  ;;  %v287_v58 = vld [vmem:[%s20089_s1 + $0x8] sm:$0xff] }
  0x14   :  { %13396 = vmatprep.subr.mxu1 %v341_v33  ;;  %13317 = vmatpush3.msra.mxu0 %v293_v34  ;;  %v321_v51 = vld [vmem:[%s20089_s1 + $0x118] sm:$0xff]  ;;  %v320_v55 = vld [vmem:[%s20089_s1 + $0x110] sm:$0xff]  ;;  %v319_v59 = vld [vmem:[%s20089_s1 + $0x108] sm:$0xff] }
  0x15   :  { %13397 = vmatpush3.msra.mxu1 %v325_v35  ;;  %13318 = vmatprep.subr.mxu0 %v308_v36  ;;  %v302_v60 = vld [vmem:[%s20089_s1 + $0x80] sm:$0xff]  ;;  %v31_v63 = vld [vmem:[%s20090_s0 + $0x8] sm:$0xff]  ;;  %v33_v1 = vld [vmem:[%s20090_s0 + $0x18] sm:$0xff] }
  0x16   :  { %13398 = vmatprep.subr.mxu1 %v340_v37  ;;  %13319 = vmatpush3.msra.mxu0 %v292_v38  ;;  %v334_v61 = vld [vmem:[%s20089_s1 + $0x180] sm:$0xff]  ;;  %v32_v3 = vld [vmem:[%s20090_s0 + $0x10] sm:$0xff]  ;;  %v381_v4 = vld [vmem:[%s20089_s1 + $0x2f8] sm:$0xff] }
  0x17   :  { %13399 = vmatpush3.msra.mxu1 %v324_v39  ;;  %13320 = vmatprep.subr.mxu0 %v307_v40  ;;  %v286_v62 = vld [vmem:[%s20089_s1] sm:$0xff]  ;;  %v413_v5 = vld [vmem:[%s20089_s1 + $0x3f8] sm:$0xff]  ;;  %v47_v7 = vld [vmem:[%s20090_s0 + $0x88] sm:$0xff] }
  0x18   :  { %13400 = vmatprep.subr.mxu1 %v339_v41  ;;  %13321 = vmatpush3.msra.mxu0 %v291_v42  ;;  %v318_v0 = vld [vmem:[%s20089_s1 + $0x100] sm:$0xff]  ;;  %v365_v6 = vld [vmem:[%s20089_s1 + $0x278] sm:$0xff]  ;;  %v48_v11 = vld [vmem:[%s20090_s0 + $0x90] sm:$0xff] }
  0x19   :  { %13401 = vmatpush3.msra.mxu1 %v323_v43  ;;  %13322 = vmatprep.subr.mxu0 %v306_v44  ;;  %v30_v2 = vld [vmem:[%s20090_s0] sm:$0xff]  ;;  %v49_v8 = vld [vmem:[%s20090_s0 + $0x98] sm:$0xff]  ;;  %v380_v12 = vld [vmem:[%s20089_s1 + $0x2f0] sm:$0xff] }
  0x1a   :  { %13402 = vmatprep.subr.mxu1 %v338_v45  ;;  %13323 = vmatpush3.msra.mxu0 %v290_v46  ;;  %v397_v9 = vld [vmem:[%s20089_s1 + $0x378] sm:$0xff]  ;;  %v46_v10 = vld [vmem:[%s20090_s0 + $0x80] sm:$0xff]  ;;  %v412_v13 = vld [vmem:[%s20089_s1 + $0x3f0] sm:$0xff] }
  0x1b   :  { %13403 = vmatpush3.msra.mxu1 %v322_v47  ;;  %13324 = vmatprep.subr.mxu0 %v305_v48  ;;  %v364_v14 = vld [vmem:[%s20089_s1 + $0x270] sm:$0xff]  ;;  %v63_v15 = vld [vmem:[%s20090_s0 + $0x108] sm:$0xff]  ;;  %v65_v16 = vld [vmem:[%s20090_s0 + $0x118] sm:$0xff] }
  0x1c   :  { %13404 = vmatprep.subr.mxu1 %v337_v49  ;;  %13325 = vmatpush3.msra.mxu0 %v289_v50  ;;  %v396_v17 = vld [vmem:[%s20089_s1 + $0x370] sm:$0xff]  ;;  %v62_v18 = vld [vmem:[%s20090_s0 + $0x100] sm:$0xff]  ;;  %v379_v20 = vld [vmem:[%s20089_s1 + $0x2e8] sm:$0xff] }
  0x1d   :  { %13405 = vmatpush3.msra.mxu1 %v321_v51  ;;  %13326 = vmatprep.subr.mxu0 %v304_v52  ;;  %v64_v19 = vld [vmem:[%s20090_s0 + $0x110] sm:$0xff]  ;;  %v411_v21 = vld [vmem:[%s20089_s1 + $0x3e8] sm:$0xff]  ;;  %v81_v24 = vld [vmem:[%s20090_s0 + $0x198] sm:$0xff] }
  0x1e   :  { %13406 = vmatprep.subr.mxu1 %v336_v53  ;;  %13327 = vmatpush3.msra.mxu0 %v288_v54  ;;  %v363_v22 = vld [vmem:[%s20089_s1 + $0x268] sm:$0xff]  ;;  %v78_v26 = vld [vmem:[%s20090_s0 + $0x180] sm:$0xff]  ;;  %v80_v27 = vld [vmem:[%s20090_s0 + $0x190] sm:$0xff] }
  0x1f   :  { %13407 = vmatpush3.msra.mxu1 %v320_v55  ;;  %13328 = vmatprep.subr.mxu0 %v303_v56  ;;  %v79_v23 = vld [vmem:[%s20090_s0 + $0x188] sm:$0xff]  ;;  %v378_v28 = vld [vmem:[%s20089_s1 + $0x2e0] sm:$0xff]  ;;  %v97_v32 = vld [vmem:[%s20090_s0 + $0x218] sm:$0xff] }
  0x20   :  { %13408 = vmatprep.subr.mxu1 %v335_v57  ;;  %13329 = vmatpush3.msra.mxu0 %v287_v58  ;;  %v395_v25 = vld [vmem:[%s20089_s1 + $0x368] sm:$0xff]  ;;  %v410_v29 = vld [vmem:[%s20089_s1 + $0x3e0] sm:$0xff]  ;;  %v96_v35 = vld [vmem:[%s20090_s0 + $0x210] sm:$0xff] }
  0x21   :  { %13409 = vmatpush3.msra.mxu1 %v319_v59  ;;  %13330 = vmatprep.subr.mxu0 %v302_v60  ;;  %v362_v30 = vld [vmem:[%s20089_s1 + $0x260] sm:$0xff]  ;;  %v95_v31 = vld [vmem:[%s20090_s0 + $0x208] sm:$0xff]  ;;  %v377_v36 = vld [vmem:[%s20089_s1 + $0x2d8] sm:$0xff] }
  0x22   :  { %13410 = vmatprep.subr.mxu1 %v334_v61  ;;  %13331 = vmatpush3.msra.mxu0 %v286_v62  ;;  %v394_v33 = vld [vmem:[%s20089_s1 + $0x360] sm:$0xff]  ;;  %v409_v37 = vld [vmem:[%s20089_s1 + $0x3d8] sm:$0xff]  ;;  %v111_v39 = vld [vmem:[%s20090_s0 + $0x288] sm:$0xff] }
  0x23   :  { %606 = vmatprep.mubr.f32.mxu0 %v31_v63  ;;  %13411 = vmatpush3.msra.mxu1 %v318_v0  ;;  %v94_v34 = vld [vmem:[%s20090_s0 + $0x200] sm:$0xff]  ;;  %v361_v38 = vld [vmem:[%s20089_s1 + $0x258] sm:$0xff]  ;;  %v112_v43 = vld [vmem:[%s20090_s0 + $0x290] sm:$0xff] }
  0x24   :  { %751 = vmatprep.mubr.f32.mxu1 %v33_v1  ;;  %607 = vmatmul.mubr.f32.vlgmr.msra.gmra.mxu0 %v30_v2  ;;  %v113_v40 = vld [vmem:[%s20090_s0 + $0x298] sm:$0xff]  ;;  %v110_v42 = vld [vmem:[%s20090_s0 + $0x280] sm:$0xff]  ;;  %v376_v44 = vld [vmem:[%s20089_s1 + $0x2d0] sm:$0xff] }
  0x25   :  { %752 = vmatmul.mubr.f32.vlgmr.msra.gmra.mxu1 %v32_v3  ;;  %13460 = vmatprep.subr.mxu0 %v381_v4  ;;  %v393_v41 = vld [vmem:[%s20089_s1 + $0x358] sm:$0xff]  ;;  %v408_v45 = vld [vmem:[%s20089_s1 + $0x3d0] sm:$0xff]  ;;  %v127_v47 = vld [vmem:[%s20090_s0 + $0x308] sm:$0xff] }
  0x26   :  { %13540 = vmatprep.subr.mxu1 %v413_v5  ;;  %13461 = vmatpush3.msra.mxu0 %v365_v6  ;;  %v360_v46 = vld [vmem:[%s20089_s1 + $0x250] sm:$0xff]  ;;  %v129_v48 = vld [vmem:[%s20090_s0 + $0x318] sm:$0xff]  ;;  %v126_v50 = vld [vmem:[%s20090_s0 + $0x300] sm:$0xff] }
  0x27   :  { %611 = vmatprep.mubr.f32.mxu0 %v47_v7  ;;  %756 = vmatprep.mubr.f32.mxu1 %v49_v8  ;;  %v392_v49 = vld [vmem:[%s20089_s1 + $0x350] sm:$0xff]  ;;  %v375_v52 = vld [vmem:[%s20089_s1 + $0x2c8] sm:$0xff]  ;;  %v145_v56 = vld [vmem:[%s20090_s0 + $0x398] sm:$0xff] }
  0x28   :  { %13541 = vmatpush3.msra.mxu1 %v397_v9  ;;  %612 = vmatmul.mubr.f32.gmra.mxu0 %v46_v10  ;;  %v128_v51 = vld [vmem:[%s20090_s0 + $0x310] sm:$0xff]  ;;  %v407_v53 = vld [vmem:[%s20089_s1 + $0x3c8] sm:$0xff]  ;;  %v142_v58 = vld [vmem:[%s20090_s0 + $0x380] sm:$0xff] }
  0x29   :  { %757 = vmatmul.mubr.f32.gmra.mxu1 %v48_v11  ;;  %13462 = vmatprep.subr.mxu0 %v380_v12  ;;  %v359_v54 = vld [vmem:[%s20089_s1 + $0x248] sm:$0xff]  ;;  %v144_v59 = vld [vmem:[%s20090_s0 + $0x390] sm:$0xff]  ;;  %v374_v60 = vld [vmem:[%s20089_s1 + $0x2c0] sm:$0xff] }
  0x2a   :  { %13542 = vmatprep.subr.mxu1 %v412_v13  ;;  %13463 = vmatpush3.msra.mxu0 %v364_v14  ;;  %v143_v55 = vld [vmem:[%s20090_s0 + $0x388] sm:$0xff]  ;;  %v406_v61 = vld [vmem:[%s20089_s1 + $0x3c0] sm:$0xff]  ;;  %v161_v0 = vld [vmem:[%s20090_s0 + $0x418] sm:$0xff] }
  0x2b   :  { %616 = vmatprep.mubr.f32.mxu0 %v63_v15  ;;  %761 = vmatprep.mubr.f32.mxu1 %v65_v16  ;;  %v391_v57 = vld [vmem:[%s20089_s1 + $0x348] sm:$0xff]  ;;  %v358_v62 = vld [vmem:[%s20089_s1 + $0x240] sm:$0xff]  ;;  %v160_v3 = vld [vmem:[%s20090_s0 + $0x410] sm:$0xff] }
  0x2c   :  { %13543 = vmatpush3.msra.mxu1 %v396_v17  ;;  %617 = vmatmul.mubr.f32.gmra.mxu0 %v62_v18  ;;  %v159_v63 = vld [vmem:[%s20090_s0 + $0x408] sm:$0xff]  ;;  %v390_v1 = vld [vmem:[%s20089_s1 + $0x340] sm:$0xff]  ;;  %v373_v4 = vld [vmem:[%s20089_s1 + $0x2b8] sm:$0xff] }
  0x2d   :  { %762 = vmatmul.mubr.f32.gmra.mxu1 %v64_v19  ;;  %13464 = vmatprep.subr.mxu0 %v379_v20  ;;  %v158_v2 = vld [vmem:[%s20090_s0 + $0x400] sm:$0xff]  ;;  %v405_v5 = vld [vmem:[%s20089_s1 + $0x3b8] sm:$0xff]  ;;  %v175_v7 = vld [vmem:[%s20090_s0 + $0x488] sm:$0xff] }
  0x2e   :  { %13544 = vmatprep.subr.mxu1 %v411_v21  ;;  %13465 = vmatpush3.msra.mxu0 %v363_v22  ;;  %v357_v6 = vld [vmem:[%s20089_s1 + $0x238] sm:$0xff]  ;;  %v174_v10 = vld [vmem:[%s20090_s0 + $0x480] sm:$0xff]  ;;  %v176_v11 = vld [vmem:[%s20090_s0 + $0x490] sm:$0xff] }
  0x2f   :  { %621 = vmatprep.mubr.f32.mxu0 %v79_v23  ;;  %766 = vmatprep.mubr.f32.mxu1 %v81_v24  ;;  %v177_v8 = vld [vmem:[%s20090_s0 + $0x498] sm:$0xff]  ;;  %v372_v12 = vld [vmem:[%s20089_s1 + $0x2b0] sm:$0xff]  ;;  %v191_v15 = vld [vmem:[%s20090_s0 + $0x508] sm:$0xff] }
  0x30   :  { %13545 = vmatpush3.msra.mxu1 %v395_v25  ;;  %622 = vmatmul.mubr.f32.gmra.mxu0 %v78_v26  ;;  %v389_v9 = vld [vmem:[%s20089_s1 + $0x338] sm:$0xff]  ;;  %v404_v13 = vld [vmem:[%s20089_s1 + $0x3b0] sm:$0xff]  ;;  %v190_v18 = vld [vmem:[%s20090_s0 + $0x500] sm:$0xff] }
  0x31   :  { %767 = vmatmul.mubr.f32.gmra.mxu1 %v80_v27  ;;  %13466 = vmatprep.subr.mxu0 %v378_v28  ;;  %v356_v14 = vld [vmem:[%s20089_s1 + $0x230] sm:$0xff]  ;;  %v193_v16 = vld [vmem:[%s20090_s0 + $0x518] sm:$0xff]  ;;  %v371_v20 = vld [vmem:[%s20089_s1 + $0x2a8] sm:$0xff] }
  0x32   :  { %13546 = vmatprep.subr.mxu1 %v410_v29  ;;  %13467 = vmatpush3.msra.mxu0 %v362_v30  ;;  %v388_v17 = vld [vmem:[%s20089_s1 + $0x330] sm:$0xff]  ;;  %v403_v21 = vld [vmem:[%s20089_s1 + $0x3a8] sm:$0xff]  ;;  %v209_v24 = vld [vmem:[%s20090_s0 + $0x598] sm:$0xff] }
  0x33   :  { %626 = vmatprep.mubr.f32.mxu0 %v95_v31  ;;  %771 = vmatprep.mubr.f32.mxu1 %v97_v32  ;;  %v192_v19 = vld [vmem:[%s20090_s0 + $0x510] sm:$0xff]  ;;  %v355_v22 = vld [vmem:[%s20089_s1 + $0x228] sm:$0xff]  ;;  %v206_v26 = vld [vmem:[%s20090_s0 + $0x580] sm:$0xff] }
  0x34   :  { %13547 = vmatpush3.msra.mxu1 %v394_v33  ;;  %627 = vmatmul.mubr.f32.gmra.mxu0 %v94_v34  ;;  %v207_v23 = vld [vmem:[%s20090_s0 + $0x588] sm:$0xff]  ;;  %v208_v27 = vld [vmem:[%s20090_s0 + $0x590] sm:$0xff]  ;;  %v370_v28 = vld [vmem:[%s20089_s1 + $0x2a0] sm:$0xff] }
  0x35   :  { %772 = vmatmul.mubr.f32.gmra.mxu1 %v96_v35  ;;  %13468 = vmatprep.subr.mxu0 %v377_v36  ;;  %v387_v25 = vld [vmem:[%s20089_s1 + $0x328] sm:$0xff]  ;;  %v402_v29 = vld [vmem:[%s20089_s1 + $0x3a0] sm:$0xff]  ;;  %v225_v32 = vld [vmem:[%s20090_s0 + $0x618] sm:$0xff] }
  0x36   :  { %13548 = vmatprep.subr.mxu1 %v409_v37  ;;  %13469 = vmatpush3.msra.mxu0 %v361_v38  ;;  %v354_v30 = vld [vmem:[%s20089_s1 + $0x220] sm:$0xff]  ;;  %v223_v31 = vld [vmem:[%s20090_s0 + $0x608] sm:$0xff]  ;;  %v224_v35 = vld [vmem:[%s20090_s0 + $0x610] sm:$0xff] }
  0x37   :  { %631 = vmatprep.mubr.f32.mxu0 %v111_v39  ;;  %776 = vmatprep.mubr.f32.mxu1 %v113_v40  ;;  %v386_v33 = vld [vmem:[%s20089_s1 + $0x320] sm:$0xff]  ;;  %v369_v36 = vld [vmem:[%s20089_s1 + $0x298] sm:$0xff]  ;;  %v239_v39 = vld [vmem:[%s20090_s0 + $0x688] sm:$0xff] }
  0x38   :  { %13549 = vmatpush3.msra.mxu1 %v393_v41  ;;  %632 = vmatmul.mubr.f32.gmra.mxu0 %v110_v42  ;;  %v222_v34 = vld [vmem:[%s20090_s0 + $0x600] sm:$0xff]  ;;  %v401_v37 = vld [vmem:[%s20089_s1 + $0x398] sm:$0xff] }
  0x39   :  { %777 = vmatmul.mubr.f32.gmra.mxu1 %v112_v43  ;;  %13470 = vmatprep.subr.mxu0 %v376_v44  ;;  %v353_v38 = vld [vmem:[%s20089_s1 + $0x218] sm:$0xff]  ;;  %v238_v42 = vld [vmem:[%s20090_s0 + $0x680] sm:$0xff]  ;;  %v240_v43 = vld [vmem:[%s20090_s0 + $0x690] sm:$0xff] }
  0x3a   :  { %13550 = vmatprep.subr.mxu1 %v408_v45  ;;  %13471 = vmatpush3.msra.mxu0 %v360_v46  ;;  %v241_v40 = vld [vmem:[%s20090_s0 + $0x698] sm:$0xff]  ;;  %v368_v44 = vld [vmem:[%s20089_s1 + $0x290] sm:$0xff] }
  0x3b   :  { %636 = vmatprep.mubr.f32.mxu0 %v127_v47  ;;  %781 = vmatprep.mubr.f32.mxu1 %v129_v48  ;;  %v385_v41 = vld [vmem:[%s20089_s1 + $0x318] sm:$0xff]  ;;  %v400_v45 = vld [vmem:[%s20089_s1 + $0x390] sm:$0xff]  ;;  %v255_v47 = vld [vmem:[%s20090_s0 + $0x708] sm:$0xff] }
  0x3c   :  { %13551 = vmatpush3.msra.mxu1 %v392_v49  ;;  %637 = vmatmul.mubr.f32.gmra.mxu0 %v126_v50  ;;  %v352_v46 = vld [vmem:[%s20089_s1 + $0x210] sm:$0xff]  ;;  %v257_v48 = vld [vmem:[%s20090_s0 + $0x718] sm:$0xff]  ;;  %v254_v50 = vld [vmem:[%s20090_s0 + $0x700] sm:$0xff] }
  0x3d   :  { %782 = vmatmul.mubr.f32.gmra.mxu1 %v128_v51  ;;  %13472 = vmatprep.subr.mxu0 %v375_v52  ;;  %v384_v49 = vld [vmem:[%s20089_s1 + $0x310] sm:$0xff]  ;;  %v367_v52 = vld [vmem:[%s20089_s1 + $0x288] sm:$0xff] }
  0x3e   :  { %13552 = vmatprep.subr.mxu1 %v407_v53  ;;  %13473 = vmatpush3.msra.mxu0 %v359_v54  ;;  %v256_v51 = vld [vmem:[%s20090_s0 + $0x710] sm:$0xff]  ;;  %v399_v53 = vld [vmem:[%s20089_s1 + $0x388] sm:$0xff] }
  0x3f   :  { %641 = vmatprep.mubr.f32.mxu0 %v143_v55  ;;  %786 = vmatprep.mubr.f32.mxu1 %v145_v56  ;;  %v351_v54 = vld [vmem:[%s20089_s1 + $0x208] sm:$0xff]  ;;  %v273_v56 = vld [vmem:[%s20090_s0 + $0x798] sm:$0xff] }
  0x40   :  { %13553 = vmatpush3.msra.mxu1 %v391_v57  ;;  %642 = vmatmul.mubr.f32.gmra.mxu0 %v142_v58  ;;  %v271_v55 = vld [vmem:[%s20090_s0 + $0x788] sm:$0xff]  ;;  %v270_v58 = vld [vmem:[%s20090_s0 + $0x780] sm:$0xff] }
  0x41   :  { %787 = vmatmul.mubr.f32.gmra.mxu1 %v144_v59  ;;  %13474 = vmatprep.subr.mxu0 %v374_v60  ;;  %v383_v57 = vld [vmem:[%s20089_s1 + $0x308] sm:$0xff]  ;;  %v272_v59 = vld [vmem:[%s20090_s0 + $0x790] sm:$0xff]  ;;  %v366_v60 = vld [vmem:[%s20089_s1 + $0x280] sm:$0xff] }
  0x42   :  { %13554 = vmatprep.subr.mxu1 %v406_v61  ;;  %13475 = vmatpush3.msra.mxu0 %v358_v62  ;;  %v398_v61 = vld [vmem:[%s20089_s1 + $0x380] sm:$0xff] }
  0x43   :  { %646 = vmatprep.mubr.f32.mxu0 %v159_v63  ;;  %791 = vmatprep.mubr.f32.mxu1 %v161_v0  ;;  %v350_v62 = vld [vmem:[%s20089_s1 + $0x200] sm:$0xff]  ;;  %v35_v63 = vld [vmem:[%s20090_s0 + $0x28] sm:$0xff] }
  0x44   :  { %13555 = vmatpush3.msra.mxu1 %v390_v1  ;;  %647 = vmatmul.mubr.f32.gmra.mxu0 %v158_v2  ;;  %v382_v0 = vld [vmem:[%s20089_s1 + $0x300] sm:$0xff]  ;;  %v37_v1 = vld [vmem:[%s20090_s0 + $0x38] sm:$0xff] }
  0x45   :  { %792 = vmatmul.mubr.f32.gmra.mxu1 %v160_v3  ;;  %13476 = vmatprep.subr.mxu0 %v373_v4  ;;  %v34_v2 = vld [vmem:[%s20090_s0 + $0x20] sm:$0xff]  ;;  %v445_v3 = vld [vmem:[%s20089_s1 + $0x4f8] sm:$0xff]  ;;  %v36_v4 = vld [vmem:[%s20090_s0 + $0x30] sm:$0xff] }
  0x46   :  { %13556 = vmatprep.subr.mxu1 %v405_v5  ;;  %13477 = vmatpush3.msra.mxu0 %v357_v6  ;;  %v429_v5 = vld [vmem:[%s20089_s1 + $0x478] sm:$0xff] }
  0x47   :  { %651 = vmatprep.mubr.f32.mxu0 %v175_v7  ;;  %796 = vmatprep.mubr.f32.mxu1 %v177_v8  ;;  %v477_v6 = vld [vmem:[%s20089_s1 + $0x5f8] sm:$0xff]  ;;  %v51_v7 = vld [vmem:[%s20090_s0 + $0xa8] sm:$0xff] }
  0x48   :  { %13557 = vmatpush3.msra.mxu1 %v389_v9  ;;  %652 = vmatmul.mubr.f32.gmra.mxu0 %v174_v10  ;;  %v461_v8 = vld [vmem:[%s20089_s1 + $0x578] sm:$0xff]  ;;  %v50_v10 = vld [vmem:[%s20090_s0 + $0xa0] sm:$0xff] }
  0x49   :  { %797 = vmatmul.mubr.f32.gmra.mxu1 %v176_v11  ;;  %13478 = vmatprep.subr.mxu0 %v372_v12  ;;  %v53_v9 = vld [vmem:[%s20090_s0 + $0xb8] sm:$0xff]  ;;  %v444_v11 = vld [vmem:[%s20089_s1 + $0x4f0] sm:$0xff] }
  0x4a   :  { %13558 = vmatprep.subr.mxu1 %v404_v13  ;;  %13479 = vmatpush3.msra.mxu0 %v356_v14  ;;  %v52_v12 = vld [vmem:[%s20090_s0 + $0xb0] sm:$0xff] }
  0x4b   :  { %656 = vmatprep.mubr.f32.mxu0 %v191_v15  ;;  %801 = vmatprep.mubr.f32.mxu1 %v193_v16  ;;  %v428_v13 = vld [vmem:[%s20089_s1 + $0x470] sm:$0xff]  ;;  %v67_v15 = vld [vmem:[%s20090_s0 + $0x128] sm:$0xff] }
  0x4c   :  { %13559 = vmatpush3.msra.mxu1 %v388_v17  ;;  %657 = vmatmul.mubr.f32.gmra.mxu0 %v190_v18  ;;  %v476_v14 = vld [vmem:[%s20089_s1 + $0x5f0] sm:$0xff]  ;;  %v69_v17 = vld [vmem:[%s20090_s0 + $0x138] sm:$0xff]  ;;  %v66_v18 = vld [vmem:[%s20090_s0 + $0x120] sm:$0xff] }
  0x4d   :  { %802 = vmatmul.mubr.f32.gmra.mxu1 %v192_v19  ;;  %13480 = vmatprep.subr.mxu0 %v371_v20  ;;  %v460_v16 = vld [vmem:[%s20089_s1 + $0x570] sm:$0xff]  ;;  %v443_v19 = vld [vmem:[%s20089_s1 + $0x4e8] sm:$0xff] }
  0x4e   :  { %13560 = vmatprep.subr.mxu1 %v403_v21  ;;  %13481 = vmatpush3.msra.mxu0 %v355_v22  ;;  %v68_v20 = vld [vmem:[%s20090_s0 + $0x130] sm:$0xff]  ;;  %v427_v21 = vld [vmem:[%s20089_s1 + $0x468] sm:$0xff] }
  0x4f   :  { %661 = vmatprep.mubr.f32.mxu0 %v207_v23  ;;  %806 = vmatprep.mubr.f32.mxu1 %v209_v24  ;;  %v475_v22 = vld [vmem:[%s20089_s1 + $0x5e8] sm:$0xff] }
  0x50   :  { %13561 = vmatpush3.msra.mxu1 %v387_v25  ;;  %662 = vmatmul.mubr.f32.gmra.mxu0 %v206_v26  ;;  %v83_v23 = vld [vmem:[%s20090_s0 + $0x1a8] sm:$0xff]  ;;  %v85_v25 = vld [vmem:[%s20090_s0 + $0x1b8] sm:$0xff]  ;;  %v82_v26 = vld [vmem:[%s20090_s0 + $0x1a0] sm:$0xff] }
  0x51   :  { %807 = vmatmul.mubr.f32.gmra.mxu1 %v208_v27  ;;  %13482 = vmatprep.subr.mxu0 %v370_v28  ;;  %v459_v24 = vld [vmem:[%s20089_s1 + $0x568] sm:$0xff]  ;;  %v442_v27 = vld [vmem:[%s20089_s1 + $0x4e0] sm:$0xff]  ;;  %v84_v28 = vld [vmem:[%s20090_s0 + $0x1b0] sm:$0xff] }
  0x52   :  { %13562 = vmatprep.subr.mxu1 %v402_v29  ;;  %13483 = vmatpush3.msra.mxu0 %v354_v30  ;;  %v426_v29 = vld [vmem:[%s20089_s1 + $0x460] sm:$0xff] }
  0x53   :  { %666 = vmatprep.mubr.f32.mxu0 %v223_v31  ;;  %811 = vmatprep.mubr.f32.mxu1 %v225_v32  ;;  %v474_v30 = vld [vmem:[%s20089_s1 + $0x5e0] sm:$0xff]  ;;  %v99_v31 = vld [vmem:[%s20090_s0 + $0x228] sm:$0xff] }
  0x54   :  { %13563 = vmatpush3.msra.mxu1 %v386_v33  ;;  %667 = vmatmul.mubr.f32.gmra.mxu0 %v222_v34  ;;  %v458_v32 = vld [vmem:[%s20089_s1 + $0x560] sm:$0xff]  ;;  %v101_v33 = vld [vmem:[%s20090_s0 + $0x238] sm:$0xff] }
  0x55   :  { %812 = vmatmul.mubr.f32.gmra.mxu1 %v224_v35  ;;  %13484 = vmatprep.subr.mxu0 %v369_v36  ;;  %v98_v34 = vld [vmem:[%s20090_s0 + $0x220] sm:$0xff]  ;;  %v441_v35 = vld [vmem:[%s20089_s1 + $0x4d8] sm:$0xff]  ;;  %v100_v36 = vld [vmem:[%s20090_s0 + $0x230] sm:$0xff] }
  0x56   :  { %13564 = vmatprep.subr.mxu1 %v401_v37  ;;  %13485 = vmatpush3.msra.mxu0 %v353_v38  ;;  %v425_v37 = vld [vmem:[%s20089_s1 + $0x458] sm:$0xff] }
  0x57   :  { %671 = vmatprep.mubr.f32.mxu0 %v239_v39  ;;  %816 = vmatprep.mubr.f32.mxu1 %v241_v40  ;;  %v473_v38 = vld [vmem:[%s20089_s1 + $0x5d8] sm:$0xff]  ;;  %v115_v39 = vld [vmem:[%s20090_s0 + $0x2a8] sm:$0xff] }
  0x58   :  { %13565 = vmatpush3.msra.mxu1 %v385_v41  ;;  %672 = vmatmul.mubr.f32.gmra.mxu0 %v238_v42  ;;  %v457_v40 = vld [vmem:[%s20089_s1 + $0x558] sm:$0xff]  ;;  %v114_v42 = vld [vmem:[%s20090_s0 + $0x2a0] sm:$0xff] }
  0x59   :  { %817 = vmatmul.mubr.f32.gmra.mxu1 %v240_v43  ;;  %13486 = vmatprep.subr.mxu0 %v368_v44  ;;  %v117_v41 = vld [vmem:[%s20090_s0 + $0x2b8] sm:$0xff]  ;;  %v440_v43 = vld [vmem:[%s20089_s1 + $0x4d0] sm:$0xff] }
  0x5a   :  { %13566 = vmatprep.subr.mxu1 %v400_v45  ;;  %13487 = vmatpush3.msra.mxu0 %v352_v46  ;;  %v116_v44 = vld [vmem:[%s20090_s0 + $0x2b0] sm:$0xff] }
  0x5b   :  { %676 = vmatprep.mubr.f32.mxu0 %v255_v47  ;;  %821 = vmatprep.mubr.f32.mxu1 %v257_v48  ;;  %v424_v45 = vld [vmem:[%s20089_s1 + $0x450] sm:$0xff]  ;;  %v131_v47 = vld [vmem:[%s20090_s0 + $0x328] sm:$0xff] }
  0x5c   :  { %13567 = vmatpush3.msra.mxu1 %v384_v49  ;;  %677 = vmatmul.mubr.f32.gmra.mxu0 %v254_v50  ;;  %v472_v46 = vld [vmem:[%s20089_s1 + $0x5d0] sm:$0xff]  ;;  %v133_v49 = vld [vmem:[%s20090_s0 + $0x338] sm:$0xff]  ;;  %v130_v50 = vld [vmem:[%s20090_s0 + $0x320] sm:$0xff] }
  0x5d   :  { %822 = vmatmul.mubr.f32.gmra.mxu1 %v256_v51  ;;  %13488 = vmatprep.subr.mxu0 %v367_v52  ;;  %v456_v48 = vld [vmem:[%s20089_s1 + $0x550] sm:$0xff]  ;;  %v439_v51 = vld [vmem:[%s20089_s1 + $0x4c8] sm:$0xff] }
  0x5e   :  { %13568 = vmatprep.subr.mxu1 %v399_v53  ;;  %13489 = vmatpush3.msra.mxu0 %v351_v54  ;;  %v132_v52 = vld [vmem:[%s20090_s0 + $0x330] sm:$0xff]  ;;  %v423_v53 = vld [vmem:[%s20089_s1 + $0x448] sm:$0xff] }
  0x5f   :  { %681 = vmatprep.mubr.f32.mxu0 %v271_v55  ;;  %826 = vmatprep.mubr.f32.mxu1 %v273_v56  ;;  %v471_v54 = vld [vmem:[%s20089_s1 + $0x5c8] sm:$0xff] }
  0x60   :  { %13569 = vmatpush3.msra.mxu1 %v383_v57  ;;  %682 = vmatmul.mubr.f32.gmra.mxu0 %v270_v58  ;;  %v147_v55 = vld [vmem:[%s20090_s0 + $0x3a8] sm:$0xff]  ;;  %v149_v57 = vld [vmem:[%s20090_s0 + $0x3b8] sm:$0xff]  ;;  %v146_v58 = vld [vmem:[%s20090_s0 + $0x3a0] sm:$0xff] }
  0x61   :  { %827 = vmatmul.mubr.f32.gmra.mxu1 %v272_v59  ;;  %13490 = vmatprep.subr.mxu0 %v366_v60  ;;  %v455_v56 = vld [vmem:[%s20089_s1 + $0x548] sm:$0xff]  ;;  %v438_v59 = vld [vmem:[%s20089_s1 + $0x4c0] sm:$0xff]  ;;  %v148_v60 = vld [vmem:[%s20090_s0 + $0x3b0] sm:$0xff] }
  0x62   :  { %13570 = vmatprep.subr.mxu1 %v398_v61  ;;  %13491 = vmatpush3.msra.mxu0 %v350_v62  ;;  %v422_v61 = vld [vmem:[%s20089_s1 + $0x440] sm:$0xff] }
  0x63   :  { %896 = vmatprep.mubr.f32.mxu0 %v35_v63  ;;  %13571 = vmatpush3.msra.mxu1 %v382_v0  ;;  %v470_v62 = vld [vmem:[%s20089_s1 + $0x5c0] sm:$0xff]  ;;  %v163_v63 = vld [vmem:[%s20090_s0 + $0x428] sm:$0xff] }
  0x64   :  { %1041 = vmatprep.mubr.f32.mxu1 %v37_v1  ;;  %897 = vmatmul.mubr.f32.vlgmr.msra.gmra.mxu0 %v34_v2  ;;  %v454_v0 = vld [vmem:[%s20089_s1 + $0x540] sm:$0xff]  ;;  %v165_v1 = vld [vmem:[%s20090_s0 + $0x438] sm:$0xff] }
  0x65   :  { %13620 = vmatprep.subr.mxu0 %v445_v3  ;;  %1042 = vmatmul.mubr.f32.vlgmr.msra.gmra.mxu1 %v36_v4  ;;  %v162_v2 = vld [vmem:[%s20090_s0 + $0x420] sm:$0xff]  ;;  %v437_v3 = vld [vmem:[%s20089_s1 + $0x4b8] sm:$0xff]  ;;  %v164_v4 = vld [vmem:[%s20090_s0 + $0x430] sm:$0xff] }
  0x66   :  { %13621 = vmatpush3.msra.mxu0 %v429_v5  ;;  %13700 = vmatprep.subr.mxu1 %v477_v6  ;;  %v421_v5 = vld [vmem:[%s20089_s1 + $0x438] sm:$0xff] }
  0x67   :  { %901 = vmatprep.mubr.f32.mxu0 %v51_v7  ;;  %13701 = vmatpush3.msra.mxu1 %v461_v8  ;;  %v469_v6 = vld [vmem:[%s20089_s1 + $0x5b8] sm:$0xff]  ;;  %v179_v7 = vld [vmem:[%s20090_s0 + $0x4a8] sm:$0xff] }
  0x68   :  { %1046 = vmatprep.mubr.f32.mxu1 %v53_v9  ;;  %902 = vmatmul.mubr.f32.gmra.mxu0 %v50_v10  ;;  %v453_v8 = vld [vmem:[%s20089_s1 + $0x538] sm:$0xff]  ;;  %v178_v10 = vld [vmem:[%s20090_s0 + $0x4a0] sm:$0xff] }
  0x69   :  { %13622 = vmatprep.subr.mxu0 %v444_v11  ;;  %1047 = vmatmul.mubr.f32.gmra.mxu1 %v52_v12  ;;  %v181_v9 = vld [vmem:[%s20090_s0 + $0x4b8] sm:$0xff]  ;;  %v436_v11 = vld [vmem:[%s20089_s1 + $0x4b0] sm:$0xff] }
  0x6a   :  { %13623 = vmatpush3.msra.mxu0 %v428_v13  ;;  %13702 = vmatprep.subr.mxu1 %v476_v14  ;;  %v180_v12 = vld [vmem:[%s20090_s0 + $0x4b0] sm:$0xff] }
  0x6b   :  { %906 = vmatprep.mubr.f32.mxu0 %v67_v15  ;;  %13703 = vmatpush3.msra.mxu1 %v460_v16  ;;  %v420_v13 = vld [vmem:[%s20089_s1 + $0x430] sm:$0xff]  ;;  %v195_v15 = vld [vmem:[%s20090_s0 + $0x528] sm:$0xff] }
  0x6c   :  { %1051 = vmatprep.mubr.f32.mxu1 %v69_v17  ;;  %907 = vmatmul.mubr.f32.gmra.mxu0 %v66_v18  ;;  %v468_v14 = vld [vmem:[%s20089_s1 + $0x5b0] sm:$0xff]  ;;  %v197_v17 = vld [vmem:[%s20090_s0 + $0x538] sm:$0xff]  ;;  %v194_v18 = vld [vmem:[%s20090_s0 + $0x520] sm:$0xff] }
  0x6d   :  { %13624 = vmatprep.subr.mxu0 %v443_v19  ;;  %1052 = vmatmul.mubr.f32.gmra.mxu1 %v68_v20  ;;  %v452_v16 = vld [vmem:[%s20089_s1 + $0x530] sm:$0xff]  ;;  %v435_v19 = vld [vmem:[%s20089_s1 + $0x4a8] sm:$0xff] }
  0x6e   :  { %13625 = vmatpush3.msra.mxu0 %v427_v21  ;;  %13704 = vmatprep.subr.mxu1 %v475_v22  ;;  %v196_v20 = vld [vmem:[%s20090_s0 + $0x530] sm:$0xff]  ;;  %v419_v21 = vld [vmem:[%s20089_s1 + $0x428] sm:$0xff] }
  0x6f   :  { %911 = vmatprep.mubr.f32.mxu0 %v83_v23  ;;  %13705 = vmatpush3.msra.mxu1 %v459_v24  ;;  %v467_v22 = vld [vmem:[%s20089_s1 + $0x5a8] sm:$0xff] }
  0x70   :  { %1056 = vmatprep.mubr.f32.mxu1 %v85_v25  ;;  %912 = vmatmul.mubr.f32.gmra.mxu0 %v82_v26  ;;  %v211_v23 = vld [vmem:[%s20090_s0 + $0x5a8] sm:$0xff]  ;;  %v213_v25 = vld [vmem:[%s20090_s0 + $0x5b8] sm:$0xff]  ;;  %v210_v26 = vld [vmem:[%s20090_s0 + $0x5a0] sm:$0xff] }
  0x71   :  { %13626 = vmatprep.subr.mxu0 %v442_v27  ;;  %1057 = vmatmul.mubr.f32.gmra.mxu1 %v84_v28  ;;  %v451_v24 = vld [vmem:[%s20089_s1 + $0x528] sm:$0xff]  ;;  %v434_v27 = vld [vmem:[%s20089_s1 + $0x4a0] sm:$0xff]  ;;  %v212_v28 = vld [vmem:[%s20090_s0 + $0x5b0] sm:$0xff] }
  0x72   :  { %13627 = vmatpush3.msra.mxu0 %v426_v29  ;;  %13706 = vmatprep.subr.mxu1 %v474_v30  ;;  %v418_v29 = vld [vmem:[%s20089_s1 + $0x420] sm:$0xff] }
  0x73   :  { %916 = vmatprep.mubr.f32.mxu0 %v99_v31  ;;  %13707 = vmatpush3.msra.mxu1 %v458_v32  ;;  %v466_v30 = vld [vmem:[%s20089_s1 + $0x5a0] sm:$0xff]  ;;  %v227_v31 = vld [vmem:[%s20090_s0 + $0x628] sm:$0xff] }
  0x74   :  { %1061 = vmatprep.mubr.f32.mxu1 %v101_v33  ;;  %917 = vmatmul.mubr.f32.gmra.mxu0 %v98_v34  ;;  %v450_v32 = vld [vmem:[%s20089_s1 + $0x520] sm:$0xff]  ;;  %v229_v33 = vld [vmem:[%s20090_s0 + $0x638] sm:$0xff] }
  0x75   :  { %13628 = vmatprep.subr.mxu0 %v441_v35  ;;  %1062 = vmatmul.mubr.f32.gmra.mxu1 %v100_v36  ;;  %v226_v34 = vld [vmem:[%s20090_s0 + $0x620] sm:$0xff]  ;;  %v433_v35 = vld [vmem:[%s20089_s1 + $0x498] sm:$0xff]  ;;  %v228_v36 = vld [vmem:[%s20090_s0 + $0x630] sm:$0xff] }
  0x76   :  { %13629 = vmatpush3.msra.mxu0 %v425_v37  ;;  %13708 = vmatprep.subr.mxu1 %v473_v38  ;;  %v417_v37 = vld [vmem:[%s20089_s1 + $0x418] sm:$0xff] }
  0x77   :  { %921 = vmatprep.mubr.f32.mxu0 %v115_v39  ;;  %13709 = vmatpush3.msra.mxu1 %v457_v40  ;;  %v465_v38 = vld [vmem:[%s20089_s1 + $0x598] sm:$0xff]  ;;  %v243_v39 = vld [vmem:[%s20090_s0 + $0x6a8] sm:$0xff] }
  0x78   :  { %1066 = vmatprep.mubr.f32.mxu1 %v117_v41  ;;  %922 = vmatmul.mubr.f32.gmra.mxu0 %v114_v42  ;;  %v449_v40 = vld [vmem:[%s20089_s1 + $0x518] sm:$0xff]  ;;  %v242_v42 = vld [vmem:[%s20090_s0 + $0x6a0] sm:$0xff] }
  0x79   :  { %13630 = vmatprep.subr.mxu0 %v440_v43  ;;  %1067 = vmatmul.mubr.f32.gmra.mxu1 %v116_v44  ;;  %v245_v41 = vld [vmem:[%s20090_s0 + $0x6b8] sm:$0xff]  ;;  %v432_v43 = vld [vmem:[%s20089_s1 + $0x490] sm:$0xff] }
  0x7a   :  { %13631 = vmatpush3.msra.mxu0 %v424_v45  ;;  %13710 = vmatprep.subr.mxu1 %v472_v46  ;;  %v244_v44 = vld [vmem:[%s20090_s0 + $0x6b0] sm:$0xff] }
  0x7b   :  { %926 = vmatprep.mubr.f32.mxu0 %v131_v47  ;;  %13711 = vmatpush3.msra.mxu1 %v456_v48  ;;  %v416_v45 = vld [vmem:[%s20089_s1 + $0x410] sm:$0xff]  ;;  %v259_v47 = vld [vmem:[%s20090_s0 + $0x728] sm:$0xff] }
  0x7c   :  { %1071 = vmatprep.mubr.f32.mxu1 %v133_v49  ;;  %927 = vmatmul.mubr.f32.gmra.mxu0 %v130_v50  ;;  %v464_v46 = vld [vmem:[%s20089_s1 + $0x590] sm:$0xff]  ;;  %v261_v49 = vld [vmem:[%s20090_s0 + $0x738] sm:$0xff]  ;;  %v258_v50 = vld [vmem:[%s20090_s0 + $0x720] sm:$0xff] }
  0x7d   :  { %13632 = vmatprep.subr.mxu0 %v439_v51  ;;  %1072 = vmatmul.mubr.f32.gmra.mxu1 %v132_v52  ;;  %v448_v48 = vld [vmem:[%s20089_s1 + $0x510] sm:$0xff]  ;;  %v431_v51 = vld [vmem:[%s20089_s1 + $0x488] sm:$0xff] }
  0x7e   :  { %13633 = vmatpush3.msra.mxu0 %v423_v53  ;;  %13712 = vmatprep.subr.mxu1 %v471_v54  ;;  %v260_v52 = vld [vmem:[%s20090_s0 + $0x730] sm:$0xff]  ;;  %v415_v53 = vld [vmem:[%s20089_s1 + $0x408] sm:$0xff] }
  0x7f   :  { %931 = vmatprep.mubr.f32.mxu0 %v147_v55  ;;  %13713 = vmatpush3.msra.mxu1 %v455_v56  ;;  %v463_v54 = vld [vmem:[%s20089_s1 + $0x588] sm:$0xff] }
  0x80   :  { %1076 = vmatprep.mubr.f32.mxu1 %v149_v57  ;;  %932 = vmatmul.mubr.f32.gmra.mxu0 %v146_v58  ;;  %v275_v55 = vld [vmem:[%s20090_s0 + $0x7a8] sm:$0xff]  ;;  %v277_v57 = vld [vmem:[%s20090_s0 + $0x7b8] sm:$0xff]  ;;  %v274_v58 = vld [vmem:[%s20090_s0 + $0x7a0] sm:$0xff] }
  0x81   :  { %13634 = vmatprep.subr.mxu0 %v438_v59  ;;  %1077 = vmatmul.mubr.f32.gmra.mxu1 %v148_v60  ;;  %v447_v56 = vld [vmem:[%s20089_s1 + $0x508] sm:$0xff]  ;;  %v430_v59 = vld [vmem:[%s20089_s1 + $0x480] sm:$0xff]  ;;  %v276_v60 = vld [vmem:[%s20090_s0 + $0x7b0] sm:$0xff] }
  0x82   :  { %13635 = vmatpush3.msra.mxu0 %v422_v61  ;;  %13714 = vmatprep.subr.mxu1 %v470_v62  ;;  %v414_v61 = vld [vmem:[%s20089_s1 + $0x400] sm:$0xff] }
  0x83   :  { %936 = vmatprep.mubr.f32.mxu0 %v163_v63  ;;  %13715 = vmatpush3.msra.mxu1 %v454_v0  ;;  %v462_v62 = vld [vmem:[%s20089_s1 + $0x580] sm:$0xff]  ;;  %v39_v63 = vld [vmem:[%s20090_s0 + $0x48] sm:$0xff] }
  0x84   :  { %1081 = vmatprep.mubr.f32.mxu1 %v165_v1  ;;  %937 = vmatmul.mubr.f32.gmra.mxu0 %v162_v2  ;;  %v446_v0 = vld [vmem:[%s20089_s1 + $0x500] sm:$0xff]  ;;  %v41_v1 = vld [vmem:[%s20090_s0 + $0x58] sm:$0xff] }
  0x85   :  { %13636 = vmatprep.subr.mxu0 %v437_v3  ;;  %1082 = vmatmul.mubr.f32.gmra.mxu1 %v164_v4  ;;  %v38_v2 = vld [vmem:[%s20090_s0 + $0x40] sm:$0xff]  ;;  %v509_v3 = vld [vmem:[%s20089_s1 + $0x6f8] sm:$0xff]  ;;  %v40_v4 = vld [vmem:[%s20090_s0 + $0x50] sm:$0xff] }
  0x86   :  { %13637 = vmatpush3.msra.mxu0 %v421_v5  ;;  %13716 = vmatprep.subr.mxu1 %v469_v6  ;;  %v493_v5 = vld [vmem:[%s20089_s1 + $0x678] sm:$0xff] }
  0x87   :  { %941 = vmatprep.mubr.f32.mxu0 %v179_v7  ;;  %13717 = vmatpush3.msra.mxu1 %v453_v8  ;;  %v541_v6 = vld [vmem:[%s20089_s1 + $0x7f8] sm:$0xff]  ;;  %v55_v7 = vld [vmem:[%s20090_s0 + $0xc8] sm:$0xff] }
  0x88   :  { %1086 = vmatprep.mubr.f32.mxu1 %v181_v9  ;;  %942 = vmatmul.mubr.f32.gmra.mxu0 %v178_v10  ;;  %v525_v8 = vld [vmem:[%s20089_s1 + $0x778] sm:$0xff]  ;;  %v54_v10 = vld [vmem:[%s20090_s0 + $0xc0] sm:$0xff] }
  0x89   :  { %13638 = vmatprep.subr.mxu0 %v436_v11  ;;  %1087 = vmatmul.mubr.f32.gmra.mxu1 %v180_v12  ;;  %v57_v9 = vld [vmem:[%s20090_s0 + $0xd8] sm:$0xff]  ;;  %v508_v11 = vld [vmem:[%s20089_s1 + $0x6f0] sm:$0xff] }
  0x8a   :  { %13639 = vmatpush3.msra.mxu0 %v420_v13  ;;  %13718 = vmatprep.subr.mxu1 %v468_v14  ;;  %v56_v12 = vld [vmem:[%s20090_s0 + $0xd0] sm:$0xff] }
  0x8b   :  { %946 = vmatprep.mubr.f32.mxu0 %v195_v15  ;;  %13719 = vmatpush3.msra.mxu1 %v452_v16  ;;  %v492_v13 = vld [vmem:[%s20089_s1 + $0x670] sm:$0xff]  ;;  %v71_v15 = vld [vmem:[%s20090_s0 + $0x148] sm:$0xff] }
  0x8c   :  { %1091 = vmatprep.mubr.f32.mxu1 %v197_v17  ;;  %947 = vmatmul.mubr.f32.gmra.mxu0 %v194_v18  ;;  %v540_v14 = vld [vmem:[%s20089_s1 + $0x7f0] sm:$0xff]  ;;  %v73_v17 = vld [vmem:[%s20090_s0 + $0x158] sm:$0xff]  ;;  %v70_v18 = vld [vmem:[%s20090_s0 + $0x140] sm:$0xff] }
  0x8d   :  { %13640 = vmatprep.subr.mxu0 %v435_v19  ;;  %1092 = vmatmul.mubr.f32.gmra.mxu1 %v196_v20  ;;  %v524_v16 = vld [vmem:[%s20089_s1 + $0x770] sm:$0xff]  ;;  %v507_v19 = vld [vmem:[%s20089_s1 + $0x6e8] sm:$0xff] }
  0x8e   :  { %13641 = vmatpush3.msra.mxu0 %v419_v21  ;;  %13720 = vmatprep.subr.mxu1 %v467_v22  ;;  %v72_v20 = vld [vmem:[%s20090_s0 + $0x150] sm:$0xff]  ;;  %v491_v21 = vld [vmem:[%s20089_s1 + $0x668] sm:$0xff] }
  0x8f   :  { %951 = vmatprep.mubr.f32.mxu0 %v211_v23  ;;  %13721 = vmatpush3.msra.mxu1 %v451_v24  ;;  %v539_v22 = vld [vmem:[%s20089_s1 + $0x7e8] sm:$0xff] }
  0x90   :  { %1096 = vmatprep.mubr.f32.mxu1 %v213_v25  ;;  %952 = vmatmul.mubr.f32.gmra.mxu0 %v210_v26  ;;  %v87_v23 = vld [vmem:[%s20090_s0 + $0x1c8] sm:$0xff]  ;;  %v89_v25 = vld [vmem:[%s20090_s0 + $0x1d8] sm:$0xff]  ;;  %v86_v26 = vld [vmem:[%s20090_s0 + $0x1c0] sm:$0xff] }
  0x91   :  { %13642 = vmatprep.subr.mxu0 %v434_v27  ;;  %1097 = vmatmul.mubr.f32.gmra.mxu1 %v212_v28  ;;  %v523_v24 = vld [vmem:[%s20089_s1 + $0x768] sm:$0xff]  ;;  %v506_v27 = vld [vmem:[%s20089_s1 + $0x6e0] sm:$0xff]  ;;  %v88_v28 = vld [vmem:[%s20090_s0 + $0x1d0] sm:$0xff] }
  0x92   :  { %13643 = vmatpush3.msra.mxu0 %v418_v29  ;;  %13722 = vmatprep.subr.mxu1 %v466_v30  ;;  %v490_v29 = vld [vmem:[%s20089_s1 + $0x660] sm:$0xff] }
  0x93   :  { %956 = vmatprep.mubr.f32.mxu0 %v227_v31  ;;  %13723 = vmatpush3.msra.mxu1 %v450_v32  ;;  %v538_v30 = vld [vmem:[%s20089_s1 + $0x7e0] sm:$0xff]  ;;  %v103_v31 = vld [vmem:[%s20090_s0 + $0x248] sm:$0xff] }
  0x94   :  { %1101 = vmatprep.mubr.f32.mxu1 %v229_v33  ;;  %957 = vmatmul.mubr.f32.gmra.mxu0 %v226_v34  ;;  %v522_v32 = vld [vmem:[%s20089_s1 + $0x760] sm:$0xff]  ;;  %v105_v33 = vld [vmem:[%s20090_s0 + $0x258] sm:$0xff] }
  0x95   :  { %13644 = vmatprep.subr.mxu0 %v433_v35  ;;  %1102 = vmatmul.mubr.f32.gmra.mxu1 %v228_v36  ;;  %v102_v34 = vld [vmem:[%s20090_s0 + $0x240] sm:$0xff]  ;;  %v505_v35 = vld [vmem:[%s20089_s1 + $0x6d8] sm:$0xff]  ;;  %v104_v36 = vld [vmem:[%s20090_s0 + $0x250] sm:$0xff] }
  0x96   :  { %13645 = vmatpush3.msra.mxu0 %v417_v37  ;;  %13724 = vmatprep.subr.mxu1 %v465_v38  ;;  %v489_v37 = vld [vmem:[%s20089_s1 + $0x658] sm:$0xff] }
  0x97   :  { %961 = vmatprep.mubr.f32.mxu0 %v243_v39  ;;  %13725 = vmatpush3.msra.mxu1 %v449_v40  ;;  %v537_v38 = vld [vmem:[%s20089_s1 + $0x7d8] sm:$0xff]  ;;  %v119_v39 = vld [vmem:[%s20090_s0 + $0x2c8] sm:$0xff] }
  0x98   :  { %1106 = vmatprep.mubr.f32.mxu1 %v245_v41  ;;  %962 = vmatmul.mubr.f32.gmra.mxu0 %v242_v42  ;;  %v521_v40 = vld [vmem:[%s20089_s1 + $0x758] sm:$0xff]  ;;  %v118_v42 = vld [vmem:[%s20090_s0 + $0x2c0] sm:$0xff] }
  0x99   :  { %13646 = vmatprep.subr.mxu0 %v432_v43  ;;  %1107 = vmatmul.mubr.f32.gmra.mxu1 %v244_v44  ;;  %v121_v41 = vld [vmem:[%s20090_s0 + $0x2d8] sm:$0xff]  ;;  %v504_v43 = vld [vmem:[%s20089_s1 + $0x6d0] sm:$0xff] }
  0x9a   :  { %13647 = vmatpush3.msra.mxu0 %v416_v45  ;;  %13726 = vmatprep.subr.mxu1 %v464_v46  ;;  %v120_v44 = vld [vmem:[%s20090_s0 + $0x2d0] sm:$0xff] }
  0x9b   :  { %966 = vmatprep.mubr.f32.mxu0 %v259_v47  ;;  %13727 = vmatpush3.msra.mxu1 %v448_v48  ;;  %v488_v45 = vld [vmem:[%s20089_s1 + $0x650] sm:$0xff]  ;;  %v135_v47 = vld [vmem:[%s20090_s0 + $0x348] sm:$0xff] }
  0x9c   :  { %1111 = vmatprep.mubr.f32.mxu1 %v261_v49  ;;  %967 = vmatmul.mubr.f32.gmra.mxu0 %v258_v50  ;;  %v536_v46 = vld [vmem:[%s20089_s1 + $0x7d0] sm:$0xff]  ;;  %v137_v49 = vld [vmem:[%s20090_s0 + $0x358] sm:$0xff]  ;;  %v134_v50 = vld [vmem:[%s20090_s0 + $0x340] sm:$0xff] }
  0x9d   :  { %13648 = vmatprep.subr.mxu0 %v431_v51  ;;  %1112 = vmatmul.mubr.f32.gmra.mxu1 %v260_v52  ;;  %v520_v48 = vld [vmem:[%s20089_s1 + $0x750] sm:$0xff]  ;;  %v503_v51 = vld [vmem:[%s20089_s1 + $0x6c8] sm:$0xff] }
  0x9e   :  { %13649 = vmatpush3.msra.mxu0 %v415_v53  ;;  %13728 = vmatprep.subr.mxu1 %v463_v54  ;;  %v136_v52 = vld [vmem:[%s20090_s0 + $0x350] sm:$0xff]  ;;  %v487_v53 = vld [vmem:[%s20089_s1 + $0x648] sm:$0xff] }
  0x9f   :  { %971 = vmatprep.mubr.f32.mxu0 %v275_v55  ;;  %13729 = vmatpush3.msra.mxu1 %v447_v56  ;;  %v535_v54 = vld [vmem:[%s20089_s1 + $0x7c8] sm:$0xff] }
  0xa0   :  { %1116 = vmatprep.mubr.f32.mxu1 %v277_v57  ;;  %972 = vmatmul.mubr.f32.gmra.mxu0 %v274_v58  ;;  %v151_v55 = vld [vmem:[%s20090_s0 + $0x3c8] sm:$0xff]  ;;  %v153_v57 = vld [vmem:[%s20090_s0 + $0x3d8] sm:$0xff]  ;;  %v150_v58 = vld [vmem:[%s20090_s0 + $0x3c0] sm:$0xff] }
  0xa1   :  { %13650 = vmatprep.subr.mxu0 %v430_v59  ;;  %1117 = vmatmul.mubr.f32.gmra.mxu1 %v276_v60  ;;  %v519_v56 = vld [vmem:[%s20089_s1 + $0x748] sm:$0xff]  ;;  %v502_v59 = vld [vmem:[%s20089_s1 + $0x6c0] sm:$0xff]  ;;  %v152_v60 = vld [vmem:[%s20090_s0 + $0x3d0] sm:$0xff] }
  0xa2   :  { %13651 = vmatpush3.msra.mxu0 %v414_v61  ;;  %13730 = vmatprep.subr.mxu1 %v462_v62  ;;  %v486_v61 = vld [vmem:[%s20089_s1 + $0x640] sm:$0xff] }
  0xa3   :  { %1186 = vmatprep.mubr.f32.mxu0 %v39_v63  ;;  %13731 = vmatpush3.msra.mxu1 %v446_v0  ;;  %v534_v62 = vld [vmem:[%s20089_s1 + $0x7c0] sm:$0xff]  ;;  %v167_v63 = vld [vmem:[%s20090_s0 + $0x448] sm:$0xff] }
  0xa4   :  { %1331 = vmatprep.mubr.f32.mxu1 %v41_v1  ;;  %1187 = vmatmul.mubr.f32.vlgmr.msra.gmra.mxu0 %v38_v2  ;;  %v518_v0 = vld [vmem:[%s20089_s1 + $0x740] sm:$0xff]  ;;  %v169_v1 = vld [vmem:[%s20090_s0 + $0x458] sm:$0xff] }
  0xa5   :  { %13780 = vmatprep.subr.mxu0 %v509_v3  ;;  %1332 = vmatmul.mubr.f32.vlgmr.msra.gmra.mxu1 %v40_v4  ;;  %v166_v2 = vld [vmem:[%s20090_s0 + $0x440] sm:$0xff]  ;;  %v501_v3 = vld [vmem:[%s20089_s1 + $0x6b8] sm:$0xff]  ;;  %v168_v4 = vld [vmem:[%s20090_s0 + $0x450] sm:$0xff] }
  0xa6   :  { %13781 = vmatpush3.msra.mxu0 %v493_v5  ;;  %13860 = vmatprep.subr.mxu1 %v541_v6  ;;  %v485_v5 = vld [vmem:[%s20089_s1 + $0x638] sm:$0xff] }
  0xa7   :  { %1191 = vmatprep.mubr.f32.mxu0 %v55_v7  ;;  %13861 = vmatpush3.msra.mxu1 %v525_v8  ;;  %v533_v6 = vld [vmem:[%s20089_s1 + $0x7b8] sm:$0xff]  ;;  %v183_v7 = vld [vmem:[%s20090_s0 + $0x4c8] sm:$0xff] }
  0xa8   :  { %1336 = vmatprep.mubr.f32.mxu1 %v57_v9  ;;  %1192 = vmatmul.mubr.f32.gmra.mxu0 %v54_v10  ;;  %v517_v8 = vld [vmem:[%s20089_s1 + $0x738] sm:$0xff]  ;;  %v182_v10 = vld [vmem:[%s20090_s0 + $0x4c0] sm:$0xff] }
  0xa9   :  { %13782 = vmatprep.subr.mxu0 %v508_v11  ;;  %1337 = vmatmul.mubr.f32.gmra.mxu1 %v56_v12  ;;  %v185_v9 = vld [vmem:[%s20090_s0 + $0x4d8] sm:$0xff]  ;;  %v500_v11 = vld [vmem:[%s20089_s1 + $0x6b0] sm:$0xff] }
  0xaa   :  { %13783 = vmatpush3.msra.mxu0 %v492_v13  ;;  %13862 = vmatprep.subr.mxu1 %v540_v14  ;;  %v184_v12 = vld [vmem:[%s20090_s0 + $0x4d0] sm:$0xff] }
  0xab   :  { %1196 = vmatprep.mubr.f32.mxu0 %v71_v15  ;;  %13863 = vmatpush3.msra.mxu1 %v524_v16  ;;  %v484_v13 = vld [vmem:[%s20089_s1 + $0x630] sm:$0xff]  ;;  %v199_v15 = vld [vmem:[%s20090_s0 + $0x548] sm:$0xff] }
  0xac   :  { %1341 = vmatprep.mubr.f32.mxu1 %v73_v17  ;;  %1197 = vmatmul.mubr.f32.gmra.mxu0 %v70_v18  ;;  %v532_v14 = vld [vmem:[%s20089_s1 + $0x7b0] sm:$0xff]  ;;  %v201_v17 = vld [vmem:[%s20090_s0 + $0x558] sm:$0xff]  ;;  %v198_v18 = vld [vmem:[%s20090_s0 + $0x540] sm:$0xff] }
  0xad   :  { %13784 = vmatprep.subr.mxu0 %v507_v19  ;;  %1342 = vmatmul.mubr.f32.gmra.mxu1 %v72_v20  ;;  %v516_v16 = vld [vmem:[%s20089_s1 + $0x730] sm:$0xff]  ;;  %v499_v19 = vld [vmem:[%s20089_s1 + $0x6a8] sm:$0xff] }
  0xae   :  { %13785 = vmatpush3.msra.mxu0 %v491_v21  ;;  %13864 = vmatprep.subr.mxu1 %v539_v22  ;;  %v200_v20 = vld [vmem:[%s20090_s0 + $0x550] sm:$0xff]  ;;  %v483_v21 = vld [vmem:[%s20089_s1 + $0x628] sm:$0xff] }
  0xaf   :  { %1201 = vmatprep.mubr.f32.mxu0 %v87_v23  ;;  %13865 = vmatpush3.msra.mxu1 %v523_v24  ;;  %v531_v22 = vld [vmem:[%s20089_s1 + $0x7a8] sm:$0xff] }
  0xb0   :  { %1346 = vmatprep.mubr.f32.mxu1 %v89_v25  ;;  %1202 = vmatmul.mubr.f32.gmra.mxu0 %v86_v26  ;;  %v215_v23 = vld [vmem:[%s20090_s0 + $0x5c8] sm:$0xff]  ;;  %v217_v25 = vld [vmem:[%s20090_s0 + $0x5d8] sm:$0xff]  ;;  %v214_v26 = vld [vmem:[%s20090_s0 + $0x5c0] sm:$0xff] }
  0xb1   :  { %13786 = vmatprep.subr.mxu0 %v506_v27  ;;  %1347 = vmatmul.mubr.f32.gmra.mxu1 %v88_v28  ;;  %v515_v24 = vld [vmem:[%s20089_s1 + $0x728] sm:$0xff]  ;;  %v498_v27 = vld [vmem:[%s20089_s1 + $0x6a0] sm:$0xff]  ;;  %v216_v28 = vld [vmem:[%s20090_s0 + $0x5d0] sm:$0xff] }
  0xb2   :  { %13787 = vmatpush3.msra.mxu0 %v490_v29  ;;  %13866 = vmatprep.subr.mxu1 %v538_v30  ;;  %v482_v29 = vld [vmem:[%s20089_s1 + $0x620] sm:$0xff] }
  0xb3   :  { %1206 = vmatprep.mubr.f32.mxu0 %v103_v31  ;;  %13867 = vmatpush3.msra.mxu1 %v522_v32  ;;  %v530_v30 = vld [vmem:[%s20089_s1 + $0x7a0] sm:$0xff]  ;;  %v231_v31 = vld [vmem:[%s20090_s0 + $0x648] sm:$0xff] }
  0xb4   :  { %1351 = vmatprep.mubr.f32.mxu1 %v105_v33  ;;  %1207 = vmatmul.mubr.f32.gmra.mxu0 %v102_v34  ;;  %v514_v32 = vld [vmem:[%s20089_s1 + $0x720] sm:$0xff]  ;;  %v233_v33 = vld [vmem:[%s20090_s0 + $0x658] sm:$0xff] }
  0xb5   :  { %13788 = vmatprep.subr.mxu0 %v505_v35  ;;  %1352 = vmatmul.mubr.f32.gmra.mxu1 %v104_v36  ;;  %v230_v34 = vld [vmem:[%s20090_s0 + $0x640] sm:$0xff]  ;;  %v497_v35 = vld [vmem:[%s20089_s1 + $0x698] sm:$0xff]  ;;  %v232_v36 = vld [vmem:[%s20090_s0 + $0x650] sm:$0xff] }
  0xb6   :  { %13789 = vmatpush3.msra.mxu0 %v489_v37  ;;  %13868 = vmatprep.subr.mxu1 %v537_v38  ;;  %v481_v37 = vld [vmem:[%s20089_s1 + $0x618] sm:$0xff] }
  0xb7   :  { %1211 = vmatprep.mubr.f32.mxu0 %v119_v39  ;;  %13869 = vmatpush3.msra.mxu1 %v521_v40  ;;  %v529_v38 = vld [vmem:[%s20089_s1 + $0x798] sm:$0xff]  ;;  %v247_v39 = vld [vmem:[%s20090_s0 + $0x6c8] sm:$0xff] }
  0xb8   :  { %1356 = vmatprep.mubr.f32.mxu1 %v121_v41  ;;  %1212 = vmatmul.mubr.f32.gmra.mxu0 %v118_v42  ;;  %v513_v40 = vld [vmem:[%s20089_s1 + $0x718] sm:$0xff]  ;;  %v246_v42 = vld [vmem:[%s20090_s0 + $0x6c0] sm:$0xff] }
  0xb9   :  { %13790 = vmatprep.subr.mxu0 %v504_v43  ;;  %1357 = vmatmul.mubr.f32.gmra.mxu1 %v120_v44  ;;  %v249_v41 = vld [vmem:[%s20090_s0 + $0x6d8] sm:$0xff]  ;;  %v496_v43 = vld [vmem:[%s20089_s1 + $0x690] sm:$0xff] }
  0xba   :  { %13791 = vmatpush3.msra.mxu0 %v488_v45  ;;  %13870 = vmatprep.subr.mxu1 %v536_v46  ;;  %v248_v44 = vld [vmem:[%s20090_s0 + $0x6d0] sm:$0xff] }
  0xbb   :  { %1216 = vmatprep.mubr.f32.mxu0 %v135_v47  ;;  %13871 = vmatpush3.msra.mxu1 %v520_v48  ;;  %v480_v45 = vld [vmem:[%s20089_s1 + $0x610] sm:$0xff]  ;;  %v263_v47 = vld [vmem:[%s20090_s0 + $0x748] sm:$0xff] }
  0xbc   :  { %1361 = vmatprep.mubr.f32.mxu1 %v137_v49  ;;  %1217 = vmatmul.mubr.f32.gmra.mxu0 %v134_v50  ;;  %v528_v46 = vld [vmem:[%s20089_s1 + $0x790] sm:$0xff]  ;;  %v265_v49 = vld [vmem:[%s20090_s0 + $0x758] sm:$0xff]  ;;  %v262_v50 = vld [vmem:[%s20090_s0 + $0x740] sm:$0xff] }
  0xbd   :  { %13792 = vmatprep.subr.mxu0 %v503_v51  ;;  %1362 = vmatmul.mubr.f32.gmra.mxu1 %v136_v52  ;;  %v512_v48 = vld [vmem:[%s20089_s1 + $0x710] sm:$0xff]  ;;  %v495_v51 = vld [vmem:[%s20089_s1 + $0x688] sm:$0xff] }
  0xbe   :  { %13793 = vmatpush3.msra.mxu0 %v487_v53  ;;  %13872 = vmatprep.subr.mxu1 %v535_v54  ;;  %v264_v52 = vld [vmem:[%s20090_s0 + $0x750] sm:$0xff]  ;;  %v479_v53 = vld [vmem:[%s20089_s1 + $0x608] sm:$0xff] }
  0xbf   :  { %1221 = vmatprep.mubr.f32.mxu0 %v151_v55  ;;  %13873 = vmatpush3.msra.mxu1 %v519_v56  ;;  %v527_v54 = vld [vmem:[%s20089_s1 + $0x788] sm:$0xff] }
  0xc0   :  { %1366 = vmatprep.mubr.f32.mxu1 %v153_v57  ;;  %1222 = vmatmul.mubr.f32.gmra.mxu0 %v150_v58  ;;  %v279_v55 = vld [vmem:[%s20090_s0 + $0x7c8] sm:$0xff]  ;;  %v281_v57 = vld [vmem:[%s20090_s0 + $0x7d8] sm:$0xff]  ;;  %v278_v58 = vld [vmem:[%s20090_s0 + $0x7c0] sm:$0xff] }
  0xc1   :  { %13794 = vmatprep.subr.mxu0 %v502_v59  ;;  %1367 = vmatmul.mubr.f32.gmra.mxu1 %v152_v60  ;;  %v511_v56 = vld [vmem:[%s20089_s1 + $0x708] sm:$0xff]  ;;  %v494_v59 = vld [vmem:[%s20089_s1 + $0x680] sm:$0xff]  ;;  %v280_v60 = vld [vmem:[%s20090_s0 + $0x7d0] sm:$0xff] }
  0xc2   :  { %13795 = vmatpush3.msra.mxu0 %v486_v61  ;;  %13874 = vmatprep.subr.mxu1 %v534_v62  ;;  %v478_v61 = vld [vmem:[%s20089_s1 + $0x600] sm:$0xff] }
  0xc3   :  { %1226 = vmatprep.mubr.f32.mxu0 %v167_v63  ;;  %13875 = vmatpush3.msra.mxu1 %v518_v0  ;;  %v526_v62 = vld [vmem:[%s20089_s1 + $0x780] sm:$0xff]  ;;  %v43_v63 = vld [vmem:[%s20090_s0 + $0x68] sm:$0xff] }
  0xc4   :  { %1371 = vmatprep.mubr.f32.mxu1 %v169_v1  ;;  %1227 = vmatmul.mubr.f32.gmra.mxu0 %v166_v2  ;;  %v510_v0 = vld [vmem:[%s20089_s1 + $0x700] sm:$0xff]  ;;  %v45_v1 = vld [vmem:[%s20090_s0 + $0x78] sm:$0xff] }
  0xc5   :  { %13796 = vmatprep.subr.mxu0 %v501_v3  ;;  %1372 = vmatmul.mubr.f32.gmra.mxu1 %v168_v4  ;;  %v42_v2 = vld [vmem:[%s20090_s0 + $0x60] sm:$0xff]  ;;  %v44_v3 = vld [vmem:[%s20090_s0 + $0x70] sm:$0xff]  ;;  %v59_v4 = vld [vmem:[%s20090_s0 + $0xe8] sm:$0xff] }
  0xc6   :  { %13797 = vmatpush3.msra.mxu0 %v485_v5  ;;  %13876 = vmatprep.subr.mxu1 %v533_v6  ;;  %v61_v5 = vld [vmem:[%s20090_s0 + $0xf8] sm:$0xff] }
  0xc7   :  { %1231 = vmatprep.mubr.f32.mxu0 %v183_v7  ;;  %13877 = vmatpush3.msra.mxu1 %v517_v8  ;;  %v58_v8 = vld [vmem:[%s20090_s0 + $0xe0] sm:$0xff] }
  0xc8   :  { %1376 = vmatprep.mubr.f32.mxu1 %v185_v9  ;;  %1232 = vmatmul.mubr.f32.gmra.mxu0 %v182_v10 }
  0xc9   :  { %13798 = vmatprep.subr.mxu0 %v500_v11  ;;  %1377 = vmatmul.mubr.f32.gmra.mxu1 %v184_v12  ;;  %v60_v11 = vld [vmem:[%s20090_s0 + $0xf0] sm:$0xff]  ;;  %v75_v12 = vld [vmem:[%s20090_s0 + $0x168] sm:$0xff] }
  0xca   :  { %13799 = vmatpush3.msra.mxu0 %v484_v13  ;;  %13878 = vmatprep.subr.mxu1 %v532_v14 }
  0xcb   :  { %1236 = vmatprep.mubr.f32.mxu0 %v199_v15  ;;  %13879 = vmatpush3.msra.mxu1 %v516_v16  ;;  %v77_v15 = vld [vmem:[%s20090_s0 + $0x178] sm:$0xff] }
  0xcc   :  { %1381 = vmatprep.mubr.f32.mxu1 %v201_v17  ;;  %1237 = vmatmul.mubr.f32.gmra.mxu0 %v198_v18 }
  0xcd   :  { %13800 = vmatprep.subr.mxu0 %v499_v19  ;;  %1382 = vmatmul.mubr.f32.gmra.mxu1 %v200_v20  ;;  %v74_v19 = vld [vmem:[%s20090_s0 + $0x160] sm:$0xff] }
  0xce   :  { %13801 = vmatpush3.msra.mxu0 %v483_v21  ;;  %13880 = vmatprep.subr.mxu1 %v531_v22  ;;  %v76_v22 = vld [vmem:[%s20090_s0 + $0x170] sm:$0xff] }
  0xcf   :  { %1241 = vmatprep.mubr.f32.mxu0 %v215_v23  ;;  %13881 = vmatpush3.msra.mxu1 %v515_v24  ;;  %v91_v23 = vld [vmem:[%s20090_s0 + $0x1e8] sm:$0xff] }
  0xd0   :  { %1386 = vmatprep.mubr.f32.mxu1 %v217_v25  ;;  %1242 = vmatmul.mubr.f32.gmra.mxu0 %v214_v26  ;;  %v93_v26 = vld [vmem:[%s20090_s0 + $0x1f8] sm:$0xff] }
  0xd1   :  { %13802 = vmatprep.subr.mxu0 %v498_v27  ;;  %1387 = vmatmul.mubr.f32.gmra.mxu1 %v216_v28 }
  0xd2   :  { %13803 = vmatpush3.msra.mxu0 %v482_v29  ;;  %13882 = vmatprep.subr.mxu1 %v530_v30  ;;  %v90_v30 = vld [vmem:[%s20090_s0 + $0x1e0] sm:$0xff] }
  0xd3   :  { %1246 = vmatprep.mubr.f32.mxu0 %v231_v31  ;;  %13883 = vmatpush3.msra.mxu1 %v514_v32 }
  0xd4   :  { %1391 = vmatprep.mubr.f32.mxu1 %v233_v33  ;;  %1247 = vmatmul.mubr.f32.gmra.mxu0 %v230_v34  ;;  %v92_v33 = vld [vmem:[%s20090_s0 + $0x1f0] sm:$0xff]  ;;  %v107_v34 = vld [vmem:[%s20090_s0 + $0x268] sm:$0xff] }
  0xd5   :  { %13804 = vmatprep.subr.mxu0 %v497_v35  ;;  %1392 = vmatmul.mubr.f32.gmra.mxu1 %v232_v36 }
  0xd6   :  { %13805 = vmatpush3.msra.mxu0 %v481_v37  ;;  %13884 = vmatprep.subr.mxu1 %v529_v38  ;;  %v109_v37 = vld [vmem:[%s20090_s0 + $0x278] sm:$0xff] }
  0xd7   :  { %1251 = vmatprep.mubr.f32.mxu0 %v247_v39  ;;  %13885 = vmatpush3.msra.mxu1 %v513_v40 }
  0xd8   :  { %1396 = vmatprep.mubr.f32.mxu1 %v249_v41  ;;  %1252 = vmatmul.mubr.f32.gmra.mxu0 %v246_v42  ;;  %v106_v41 = vld [vmem:[%s20090_s0 + $0x260] sm:$0xff] }
  0xd9   :  { %13806 = vmatprep.subr.mxu0 %v496_v43  ;;  %1397 = vmatmul.mubr.f32.gmra.mxu1 %v248_v44  ;;  %v108_v44 = vld [vmem:[%s20090_s0 + $0x270] sm:$0xff] }
  0xda   :  { %13807 = vmatpush3.msra.mxu0 %v480_v45  ;;  %13886 = vmatprep.subr.mxu1 %v528_v46  ;;  %v123_v45 = vld [vmem:[%s20090_s0 + $0x2e8] sm:$0xff] }
  0xdb   :  { %1256 = vmatprep.mubr.f32.mxu0 %v263_v47  ;;  %13887 = vmatpush3.msra.mxu1 %v512_v48  ;;  %v125_v48 = vld [vmem:[%s20090_s0 + $0x2f8] sm:$0xff] }
  0xdc   :  { %1401 = vmatprep.mubr.f32.mxu1 %v265_v49  ;;  %1257 = vmatmul.mubr.f32.gmra.mxu0 %v262_v50 }
  0xdd   :  { %13808 = vmatprep.subr.mxu0 %v495_v51  ;;  %1402 = vmatmul.mubr.f32.gmra.mxu1 %v264_v52  ;;  %v1702_v51 = vld [vmem:[%s20091_s2] sm:$0xf] }
  0xde   :  { %13809 = vmatpush3.msra.mxu0 %v479_v53  ;;  %13888 = vmatprep.subr.mxu1 %v527_v54  ;;  %v122_v53 = vld [vmem:[%s20090_s0 + $0x2e0] sm:$0xff] }
  0xdf   :  { %1261 = vmatprep.mubr.f32.mxu0 %v279_v55  ;;  %13889 = vmatpush3.msra.mxu1 %v511_v56  ;;  %v124_v56 = vld [vmem:[%s20090_s0 + $0x2f0] sm:$0xff] }
  0xe0   :  { %1406 = vmatprep.mubr.f32.mxu1 %v281_v57  ;;  %1262 = vmatmul.mubr.f32.gmra.mxu0 %v278_v58  ;;  %v139_v57 = vld [vmem:[%s20090_s0 + $0x368] sm:$0xff] }
  0xe1   :  { %13810 = vmatprep.subr.mxu0 %v494_v59  ;;  %1407 = vmatmul.mubr.f32.gmra.mxu1 %v280_v60  ;;  %v141_v60 = vld [vmem:[%s20090_s0 + $0x378] sm:$0xff] }
  0xe2   :  { %13811 = vmatpush3.msra.mxu0 %v478_v61  ;;  %13890 = vmatprep.subr.mxu1 %v526_v62 }
  0xe3   :  { %1476 = vmatprep.mubr.f32.mxu0 %v43_v63  ;;  %13891 = vmatpush3.msra.mxu1 %v510_v0  ;;  %v138_v0 = vld [vmem:[%s20090_s0 + $0x360] sm:$0xff] }
  0xe4   :  { %1621 = vmatprep.mubr.f32.mxu1 %v45_v1  ;;  %v13332_v6 = vpop.f32.mrf.mxu0  ;;  %1477 = vmatmul.mubr.f32.vlgmr.msra.gmra.mxu0 %v42_v2 }
  0xe5   :  { %v13412_v7 = vpop.f32.mrf.mxu1  ;;  %1622 = vmatmul.mubr.f32.vlgmr.msra.gmra.mxu1 %v44_v3  ;;  %1481 = vmatprep.mubr.f32.mxu0 %v59_v4  ;;  %v140_v3 = vld [vmem:[%s20090_s0 + $0x370] sm:$0xff]  ;;  %v155_v4 = vld [vmem:[%s20090_s0 + $0x3e8] sm:$0xff] }
  0xe6   :  { %v13333_v9 = vpop.f32.mrf.mxu0  ;;  %1626 = vmatprep.mubr.f32.mxu1 %v61_v5  ;;  %14097 = vmatprep.subr.msk.mxu0 %vm1759_vm0, %v1702_v51 }
  0xe7   :  { %v13413_v10 = vpop.f32.mrf.mxu1  ;;  %v13334_v13 = vadd.f32 %v13333_v9, %v13332_v6  ;;  %14098 = vmatpush3.msk.msra.mxu0 %vm1759_vm0, %v1702_v51  ;;  %v219_v51 = vld [vmem:[%s20090_s0 + $0x5e8] sm:$0xff] }
  0xe8   :  { %v13414_v14 = vadd.f32 %v13413_v10, %v13412_v7  ;;  %v13335_v16 = vpop.f32.mrf.mxu0  ;;  %1482 = vmatmul.mubr.f32.gmra.mxu0 %v58_v8  ;;  %v157_v7 = vld [vmem:[%s20090_s0 + $0x3f8] sm:$0xff] }
  0xe9   :  { %v13415_v17 = vpop.f32.mrf.mxu1  ;;  %1627 = vmatmul.mubr.f32.gmra.mxu1 %v60_v11  ;;  %1486 = vmatprep.mubr.f32.mxu0 %v75_v12  ;;  %v154_v11 = vld [vmem:[%s20090_s0 + $0x3e0] sm:$0xff] }
  0xea   :  { %v15547_v18 = vadd.f32 %v13414_v14, %v13334_v13  ;;  %v13336_v20 = vpop.f32.mrf.mxu0  ;;  %1631 = vmatprep.mubr.f32.mxu1 %v77_v15  ;;  %v156_v14 = vld [vmem:[%s20090_s0 + $0x3f0] sm:$0xff]  ;;  %v171_v15 = vld [vmem:[%s20090_s0 + $0x468] sm:$0xff] }
  0xeb   :  { %v13416_v21 = vpop.f32.mrf.mxu1  ;;  %v13337_v24 = vadd.f32 %v13336_v20, %v13335_v16 }
  0xec   :  { %v13417_v25 = vadd.f32 %v13416_v21, %v13415_v17  ;;  %v13338_v27 = vpop.f32.mrf.mxu0  ;;  %1487 = vmatmul.mubr.f32.gmra.mxu0 %v74_v19  ;;  %v173_v19 = vld [vmem:[%s20090_s0 + $0x478] sm:$0xff] }
  0xed   :  { %v13418_v28 = vpop.f32.mrf.mxu1  ;;  %1632 = vmatmul.mubr.f32.gmra.mxu1 %v76_v22  ;;  %1491 = vmatprep.mubr.f32.mxu0 %v91_v23  ;;  %v170_v23 = vld [vmem:[%s20090_s0 + $0x460] sm:$0xff] }
  0xee   :  { %v15561_v29 = vadd.f32 %v13417_v25, %v13337_v24  ;;  %v13339_v31 = vpop.f32.mrf.mxu0  ;;  %1636 = vmatprep.mubr.f32.mxu1 %v93_v26  ;;  %v172_v26 = vld [vmem:[%s20090_s0 + $0x470] sm:$0xff] }
  0xef   :  { %v13419_v32 = vpop.f32.mrf.mxu1  ;;  %v13340_v35 = vadd.f32 %v13339_v31, %v13338_v27  ;;  %v187_v27 = vld [vmem:[%s20090_s0 + $0x4e8] sm:$0xff]  ;;  %v189_v31 = vld [vmem:[%s20090_s0 + $0x4f8] sm:$0xff] }
  0xf0   :  { %v13420_v36 = vadd.f32 %v13419_v32, %v13418_v28  ;;  %v13341_v38 = vpop.f32.mrf.mxu0  ;;  %1492 = vmatmul.mubr.f32.gmra.mxu0 %v90_v30 }
  0xf1   :  { %v13421_v39 = vpop.f32.mrf.mxu1  ;;  %1637 = vmatmul.mubr.f32.gmra.mxu1 %v92_v33  ;;  %1496 = vmatprep.mubr.f32.mxu0 %v107_v34 }
  0xf2   :  { %v15575_v40 = vadd.f32 %v13420_v36, %v13340_v35  ;;  %v13342_v42 = vpop.f32.mrf.mxu0  ;;  %1641 = vmatprep.mubr.f32.mxu1 %v109_v37  ;;  %v186_v35 = vld [vmem:[%s20090_s0 + $0x4e0] sm:$0xff] }
  0xf3   :  { %v13422_v43 = vpop.f32.mrf.mxu1  ;;  %v13343_v46 = vadd.f32 %v13342_v42, %v13341_v38  ;;  %v188_v38 = vld [vmem:[%s20090_s0 + $0x4f0] sm:$0xff] }
  0xf4   :  { %v13423_v47 = vadd.f32 %v13422_v43, %v13421_v39  ;;  %v13344_v49 = vpop.f32.mrf.mxu0  ;;  %1497 = vmatmul.mubr.f32.gmra.mxu0 %v106_v41  ;;  %v203_v39 = vld [vmem:[%s20090_s0 + $0x568] sm:$0xff]  ;;  %v205_v43 = vld [vmem:[%s20090_s0 + $0x578] sm:$0xff] }
  0xf5   :  { %v13424_v50 = vpop.f32.mrf.mxu1  ;;  %1642 = vmatmul.mubr.f32.gmra.mxu1 %v108_v44  ;;  %1501 = vmatprep.mubr.f32.mxu0 %v123_v45 }
  0xf6   :  { %v15592_v52 = vadd.f32 %v13423_v47, %v13343_v46  ;;  %v13345_v54 = vpop.f32.mrf.mxu0  ;;  %1646 = vmatprep.mubr.f32.mxu1 %v125_v48  ;;  %v202_v47 = vld [vmem:[%s20090_s0 + $0x560] sm:$0xff] }
  0xf7   :  { %v13425_v55 = vpop.f32.mrf.mxu1  ;;  %v13346_v58 = vadd.f32 %v13345_v54, %v13344_v49 }
  0xf8   :  { %v13426_v59 = vadd.f32 %v13425_v55, %v13424_v50  ;;  %v13347_v61 = vpop.f32.mrf.mxu0  ;;  %1502 = vmatmul.mubr.f32.gmra.mxu0 %v122_v53  ;;  %v204_v50 = vld [vmem:[%s20090_s0 + $0x570] sm:$0xff]  ;;  %v221_v55 = vld [vmem:[%s20090_s0 + $0x5f8] sm:$0xff] }
  0xf9   :  { %v13427_v62 = vpop.f32.mrf.mxu1  ;;  %1647 = vmatmul.mubr.f32.gmra.mxu1 %v124_v56  ;;  %1506 = vmatprep.mubr.f32.mxu0 %v139_v57 }
  0xfa   :  { %v15608_v63 = vadd.f32 %v13426_v59, %v13346_v58  ;;  %v13348_v1 = vpop.f32.mrf.mxu0  ;;  %1651 = vmatprep.mubr.f32.mxu1 %v141_v60  ;;  %v218_v59 = vld [vmem:[%s20090_s0 + $0x5e0] sm:$0xff] }
  0xfb   :  { %v13428_v2 = vpop.f32.mrf.mxu1  ;;  %v13349_v5 = vadd.f32 %v13348_v1, %v13347_v61 }
  0xfc   :  { %v13429_v6 = vadd.f32 %v13428_v2, %v13427_v62  ;;  %v13350_v8 = vpop.f32.mrf.mxu0  ;;  %1507 = vmatmul.mubr.f32.gmra.mxu0 %v138_v0  ;;  %v220_v62 = vld [vmem:[%s20090_s0 + $0x5f0] sm:$0xff]  ;;  %v235_v0 = vld [vmem:[%s20090_s0 + $0x668] sm:$0xff] }
  0xfd   :  { %v13430_v9 = vpop.f32.mrf.mxu1  ;;  %1652 = vmatmul.mubr.f32.gmra.mxu1 %v140_v3  ;;  %1511 = vmatprep.mubr.f32.mxu0 %v155_v4  ;;  %v237_v3 = vld [vmem:[%s20090_s0 + $0x678] sm:$0xff] }
  0xfe   :  { %v15622_v10 = vadd.f32 %v13429_v6, %v13349_v5  ;;  %v13351_v12 = vpop.f32.mrf.mxu0  ;;  %1656 = vmatprep.mubr.f32.mxu1 %v157_v7  ;;  %v234_v7 = vld [vmem:[%s20090_s0 + $0x660] sm:$0xff] }
  0xff   :  { %v13431_v13 = vpop.f32.mrf.mxu1  ;;  %v13352_v16 = vadd.f32 %v13351_v12, %v13350_v8  ;;  %v251_v12 = vld [vmem:[%s20090_s0 + $0x6e8] sm:$0xff] }
 0x100   :  { %v13432_v17 = vadd.f32 %v13431_v13, %v13430_v9  ;;  %v13353_v20 = vpop.f32.mrf.mxu0  ;;  %1512 = vmatmul.mubr.f32.gmra.mxu0 %v154_v11  ;;  %v236_v11 = vld [vmem:[%s20090_s0 + $0x670] sm:$0xff] }
 0x101   :  { %v13433_v21 = vpop.f32.mrf.mxu1  ;;  %1657 = vmatmul.mubr.f32.gmra.mxu1 %v156_v14  ;;  %1516 = vmatprep.mubr.f32.mxu0 %v171_v15  ;;  %v253_v15 = vld [vmem:[%s20090_s0 + $0x6f8] sm:$0xff] }
 0x102   :  { %v15636_v22 = vadd.f32 %v13432_v17, %v13352_v16  ;;  %v13354_v24 = vpop.f32.mrf.mxu0  ;;  %1661 = vmatprep.mubr.f32.mxu1 %v173_v19 }
 0x103   :  { %v13434_v25 = vpop.f32.mrf.mxu1  ;;  %v13355_v28 = vadd.f32 %v13354_v24, %v13353_v20  ;;  %v250_v20 = vld [vmem:[%s20090_s0 + $0x6e0] sm:$0xff]  ;;  %v252_v24 = vld [vmem:[%s20090_s0 + $0x6f0] sm:$0xff] }
 0x104   :  { %v13435_v30 = vadd.f32 %v13434_v25, %v13433_v21  ;;  %v13356_v32 = vpop.f32.mrf.mxu0  ;;  %1517 = vmatmul.mubr.f32.gmra.mxu0 %v170_v23  ;;  %v267_v25 = vld [vmem:[%s20090_s0 + $0x768] sm:$0xff] }
 0x105   :  { %v13436_v33 = vpop.f32.mrf.mxu1  ;;  %1662 = vmatmul.mubr.f32.gmra.mxu1 %v172_v26  ;;  %1521 = vmatprep.mubr.f32.mxu0 %v187_v27 }
 0x106   :  { %v15650_v34 = vadd.f32 %v13435_v30, %v13355_v28  ;;  %v13357_v36 = vpop.f32.mrf.mxu0  ;;  %1666 = vmatprep.mubr.f32.mxu1 %v189_v31  ;;  %v269_v28 = vld [vmem:[%s20090_s0 + $0x778] sm:$0xff] }
 0x107   :  { %v13437_v37 = vpop.f32.mrf.mxu1  ;;  %v13358_v41 = vadd.f32 %v13357_v36, %v13356_v32 }
 0x108   :  { %v13438_v42 = vadd.f32 %v13437_v37, %v13436_v33  ;;  %v13359_v44 = vpop.f32.mrf.mxu0  ;;  %1522 = vmatmul.mubr.f32.gmra.mxu0 %v186_v35  ;;  %v266_v33 = vld [vmem:[%s20090_s0 + $0x760] sm:$0xff]  ;;  %v268_v37 = vld [vmem:[%s20090_s0 + $0x770] sm:$0xff] }
 0x109   :  { %v13439_v45 = vpop.f32.mrf.mxu1  ;;  %1667 = vmatmul.mubr.f32.gmra.mxu1 %v188_v38  ;;  %1526 = vmatprep.mubr.f32.mxu0 %v203_v39  ;;  %v283_v38 = vld [vmem:[%s20090_s0 + $0x7e8] sm:$0xff] }
 0x10a   :  { %v15664_v46 = vadd.f32 %v13438_v42, %v13358_v41  ;;  %v13360_v48 = vpop.f32.mrf.mxu0  ;;  %1671 = vmatprep.mubr.f32.mxu1 %v205_v43  ;;  %v285_v42 = vld [vmem:[%s20090_s0 + $0x7f8] sm:$0xff] }
 0x10b   :  { %v13440_v49 = vpop.f32.mrf.mxu1  ;;  %v13361_v53 = vadd.f32 %v13360_v48, %v13359_v44 }
 0x10c   :  { %v13441_v54 = vadd.f32 %v13440_v49, %v13439_v45  ;;  %v13362_v56 = vpop.f32.mrf.mxu0  ;;  %1527 = vmatmul.mubr.f32.gmra.mxu0 %v202_v47  ;;  %v282_v47 = vld [vmem:[%s20090_s0 + $0x7e0] sm:$0xff] }
 0x10d   :  { %v13442_v57 = vpop.f32.mrf.mxu1  ;;  %1672 = vmatmul.mubr.f32.gmra.mxu1 %v204_v50  ;;  %1531 = vmatprep.mubr.f32.mxu0 %v219_v51  ;;  %v284_v50 = vld [vmem:[%s20090_s0 + $0x7f0] sm:$0xff] }
 0x10e   :  { %v15678_v58 = vadd.f32 %v13441_v54, %v13361_v53  ;;  %v13363_v60 = vpop.f32.mrf.mxu0  ;;  %1676 = vmatprep.mubr.f32.mxu1 %v221_v55 }
 0x10f   :  { %v13443_v61 = vpop.f32.mrf.mxu1  ;;  %v13364_v1 = vadd.f32 %v13363_v60, %v13362_v56 }
 0x110   :  { %v13444_v2 = vadd.f32 %v13443_v61, %v13442_v57  ;;  %v13365_v4 = vpop.f32.mrf.mxu0  ;;  %1532 = vmatmul.mubr.f32.gmra.mxu0 %v218_v59 }
 0x111   :  { %v13445_v5 = vpop.f32.mrf.mxu1  ;;  %1677 = vmatmul.mubr.f32.gmra.mxu1 %v220_v62  ;;  %1536 = vmatprep.mubr.f32.mxu0 %v235_v0 }
 0x112   :  { %v15692_v6 = vadd.f32 %v13444_v2, %v13364_v1  ;;  %v13366_v8 = vpop.f32.mrf.mxu0  ;;  %1681 = vmatprep.mubr.f32.mxu1 %v237_v3 }
 0x113   :  { %v13446_v9 = vpop.f32.mrf.mxu1  ;;  %v13367_v13 = vadd.f32 %v13366_v8, %v13365_v4 }
 0x114   :  { %v13447_v14 = vadd.f32 %v13446_v9, %v13445_v5  ;;  %v13368_v16 = vpop.f32.mrf.mxu0  ;;  %1537 = vmatmul.mubr.f32.gmra.mxu0 %v234_v7 }
 0x115   :  { %v13448_v17 = vpop.f32.mrf.mxu1  ;;  %1682 = vmatmul.mubr.f32.gmra.mxu1 %v236_v11  ;;  %1541 = vmatprep.mubr.f32.mxu0 %v251_v12 }
 0x116   :  { %v15706_v19 = vadd.f32 %v13447_v14, %v13367_v13  ;;  %v13369_v21 = vpop.f32.mrf.mxu0  ;;  %1686 = vmatprep.mubr.f32.mxu1 %v253_v15 }
 0x117   :  { %v13449_v23 = vpop.f32.mrf.mxu1  ;;  %v13370_v26 = vadd.f32 %v13369_v21, %v13368_v16 }
 0x118   :  { %v13450_v27 = vadd.f32 %v13449_v23, %v13448_v17  ;;  %v13371_v30 = vpop.f32.mrf.mxu0  ;;  %1542 = vmatmul.mubr.f32.gmra.mxu0 %v250_v20 }
 0x119   :  { %v13451_v31 = vpop.f32.mrf.mxu1  ;;  %1687 = vmatmul.mubr.f32.gmra.mxu1 %v252_v24  ;;  %1546 = vmatprep.mubr.f32.mxu0 %v267_v25 }
 0x11a   :  { %v15720_v32 = vadd.f32 %v13450_v27, %v13370_v26  ;;  %v13372_v35 = vpop.f32.mrf.mxu0  ;;  %1691 = vmatprep.mubr.f32.mxu1 %v269_v28 }
 0x11b   :  { %v13452_v36 = vpop.f32.mrf.mxu1  ;;  %v13373_v39 = vadd.f32 %v13372_v35, %v13371_v30 }
 0x11c   :  { %v13453_v41 = vadd.f32 %v13452_v36, %v13451_v31  ;;  %v13374_v43 = vpop.f32.mrf.mxu0  ;;  %1547 = vmatmul.mubr.f32.gmra.mxu0 %v266_v33 }
 0x11d   :  { %v13454_v44 = vpop.f32.mrf.mxu1  ;;  %1692 = vmatmul.mubr.f32.gmra.mxu1 %v268_v37  ;;  %1551 = vmatprep.mubr.f32.mxu0 %v283_v38 }
 0x11e   :  { %v15734_v45 = vadd.f32 %v13453_v41, %v13373_v39  ;;  %v13375_v48 = vpop.f32.mrf.mxu0  ;;  %1696 = vmatprep.mubr.f32.mxu1 %v285_v42 }
 0x11f   :  { %v13455_v49 = vpop.f32.mrf.mxu1  ;;  %v13376_v51 = vadd.f32 %v13375_v48, %v13374_v43 }
 0x120   :  { %v13456_v53 = vadd.f32 %v13455_v49, %v13454_v44  ;;  %v13377_v54 = vpop.f32.mrf.mxu0  ;;  %1552 = vmatmul.mubr.f32.gmra.mxu0 %v282_v47 }
 0x121   :  { %v13457_v55 = vpop.f32.mrf.mxu1  ;;  %1697 = vmatmul.mubr.f32.gmra.mxu1 %v284_v50 }
 0x122   :  { %v15742_v56 = vadd.f32 %v13456_v53, %v13376_v51  ;;  %v13378_v57 = vpop.f32.mrf.mxu0 }
 0x123   :  { %v13458_v59 = vpop.f32.mrf.mxu1  ;;  %v13379_v60 = vadd.f32 %v13378_v57, %v13377_v54 }
 0x124   :  { %v13459_v61 = vadd.f32 %v13458_v59, %v13457_v55  ;;  %v13492_v62 = vpop.f32.mrf.mxu0 }
 0x125   :  { %v13572_v1 = vpop.f32.mrf.mxu1 }
 0x126   :  { %v15744_v0 = vadd.f32 %v13459_v61, %v13379_v60  ;;  %v13493_v2 = vpop.f32.mrf.mxu0 }
 0x127   :  { %v13494_v3 = vadd.f32 %v13493_v2, %v13492_v62  ;;  %v13573_v4 = vpop.f32.mrf.mxu1 }
 0x128   :  { %v13574_v5 = vadd.f32 %v13573_v4, %v13572_v1  ;;  %v13495_v7 = vpop.f32.mrf.mxu0 }
 0x129   :  { %v899_v8 = vadd.f32 %v13494_v3, %v15547_v18  ;;  %v13575_v9 = vpop.f32.mrf.mxu1 }
 0x12a   :  { %v13496_v11 = vpop.f32.mrf.mxu0 }
 0x12b   :  { %v15747_v12 = vadd.f32 %v13574_v5, %v899_v8  ;;  %v13497_v13 = vadd.f32 %v13496_v11, %v13495_v7  ;;  %v13576_v14 = vpop.f32.mrf.mxu1 }
 0x12c   :  { %v13498_v15 = vpop.f32.mrf.mxu0  ;;  %v13577_v17 = vadd.f32 %v13576_v14, %v13575_v9 }
 0x12d   :  { %v904_v16 = vadd.f32 %v13497_v13, %v15561_v29  ;;  %v13578_v20 = vpop.f32.mrf.mxu1 }
 0x12e   :  { %v13499_v21 = vpop.f32.mrf.mxu0 }
 0x12f   :  { %v15750_v23 = vadd.f32 %v13577_v17, %v904_v16  ;;  %v13500_v24 = vadd.f32 %v13499_v21, %v13498_v15  ;;  %v13579_v25 = vpop.f32.mrf.mxu1 }
 0x130   :  { %v13580_v26 = vadd.f32 %v13579_v25, %v13578_v20  ;;  %v13501_v27 = vpop.f32.mrf.mxu0 }
 0x131   :  { %v909_v18 = vadd.f32 %v13500_v24, %v15575_v40  ;;  %v13581_v28 = vpop.f32.mrf.mxu1 }
 0x132   :  { %v13502_v30 = vpop.f32.mrf.mxu0 }
 0x133   :  { %v15753_v31 = vadd.f32 %v13580_v26, %v909_v18  ;;  %v13503_v33 = vadd.f32 %v13502_v30, %v13501_v27  ;;  %v13582_v35 = vpop.f32.mrf.mxu1 }
 0x134   :  { %v13504_v36 = vpop.f32.mrf.mxu0  ;;  %v13583_v37 = vadd.f32 %v13582_v35, %v13581_v28 }
 0x135   :  { %v914_v29 = vadd.f32 %v13503_v33, %v15592_v52  ;;  %v13584_v38 = vpop.f32.mrf.mxu1 }
 0x136   :  { %v13505_v39 = vpop.f32.mrf.mxu0 }
 0x137   :  { %v15756_v41 = vadd.f32 %v13583_v37, %v914_v29  ;;  %v13506_v42 = vadd.f32 %v13505_v39, %v13504_v36  ;;  %v13585_v43 = vpop.f32.mrf.mxu1 }
 0x138   :  { %v13586_v44 = vadd.f32 %v13585_v43, %v13584_v38  ;;  %v13507_v47 = vpop.f32.mrf.mxu0 }
 0x139   :  { %v919_v40 = vadd.f32 %v13506_v42, %v15608_v63  ;;  %v13587_v48 = vpop.f32.mrf.mxu1 }
 0x13a   :  { %v13508_v49 = vpop.f32.mrf.mxu0 }
 0x13b   :  { %v15759_v50 = vadd.f32 %v13586_v44, %v919_v40  ;;  %v13509_v51 = vadd.f32 %v13508_v49, %v13507_v47  ;;  %v13588_v53 = vpop.f32.mrf.mxu1 }
 0x13c   :  { %v13510_v54 = vpop.f32.mrf.mxu0  ;;  %v13589_v55 = vadd.f32 %v13588_v53, %v13587_v48 }
 0x13d   :  { %v924_v52 = vadd.f32 %v13509_v51, %v15622_v10  ;;  %v13590_v57 = vpop.f32.mrf.mxu1 }
 0x13e   :  { %v13511_v59 = vpop.f32.mrf.mxu0 }
 0x13f   :  { %v15762_v60 = vadd.f32 %v13589_v55, %v924_v52  ;;  %v13512_v61 = vadd.f32 %v13511_v59, %v13510_v54  ;;  %v13591_v62 = vpop.f32.mrf.mxu1 }
 0x140   :  { %v13592_v1 = vadd.f32 %v13591_v62, %v13590_v57  ;;  %v13513_v2 = vpop.f32.mrf.mxu0 }
 0x141   :  { %v929_v63 = vadd.f32 %v13512_v61, %v15636_v22  ;;  %v13593_v3 = vpop.f32.mrf.mxu1 }
 0x142   :  { %v13514_v4 = vpop.f32.mrf.mxu0 }
 0x143   :  { %v15765_v5 = vadd.f32 %v13592_v1, %v929_v63  ;;  %v13515_v7 = vadd.f32 %v13514_v4, %v13513_v2  ;;  %v13594_v8 = vpop.f32.mrf.mxu1 }
 0x144   :  { %v13516_v9 = vpop.f32.mrf.mxu0  ;;  %v13595_v11 = vadd.f32 %v13594_v8, %v13593_v3 }
 0x145   :  { %v934_v10 = vadd.f32 %v13515_v7, %v15650_v34  ;;  %v13596_v13 = vpop.f32.mrf.mxu1 }
 0x146   :  { %v13517_v14 = vpop.f32.mrf.mxu0 }
 0x147   :  { %v15768_v15 = vadd.f32 %v13595_v11, %v934_v10  ;;  %v13518_v16 = vadd.f32 %v13517_v14, %v13516_v9  ;;  %v13597_v17 = vpop.f32.mrf.mxu1 }
 0x148   :  { %v13598_v20 = vadd.f32 %v13597_v17, %v13596_v13  ;;  %v13519_v21 = vpop.f32.mrf.mxu0 }
 0x149   :  { %v939_v22 = vadd.f32 %v13518_v16, %v15664_v46  ;;  %v13599_v24 = vpop.f32.mrf.mxu1 }
 0x14a   :  { %v13520_v25 = vpop.f32.mrf.mxu0 }
 0x14b   :  { %v15771_v26 = vadd.f32 %v13598_v20, %v939_v22  ;;  %v13521_v27 = vadd.f32 %v13520_v25, %v13519_v21  ;;  %v13600_v18 = vpop.f32.mrf.mxu1 }
 0x14c   :  { %v13522_v28 = vpop.f32.mrf.mxu0  ;;  %v13601_v30 = vadd.f32 %v13600_v18, %v13599_v24 }
 0x14d   :  { %v944_v34 = vadd.f32 %v13521_v27, %v15678_v58  ;;  %v13602_v33 = vpop.f32.mrf.mxu1 }
 0x14e   :  { %v13523_v35 = vpop.f32.mrf.mxu0 }
 0x14f   :  { %v15774_v36 = vadd.f32 %v13601_v30, %v944_v34  ;;  %v13524_v29 = vadd.f32 %v13523_v35, %v13522_v28  ;;  %v13603_v37 = vpop.f32.mrf.mxu1  ;;  %v11371_v35 = vld [vmem:[%s20092_s4 + $0x3c0] sm:$0xff] }
 0x150   :  { %v13604_v38 = vadd.f32 %v13603_v37, %v13602_v33  ;;  %v13525_v39 = vpop.f32.mrf.mxu0 }
 0x151   :  { %20098 = vst [vmem:[#allocation2_spill] sm:$0xff] %v15774_v36  ;;  %v949_v46 = vadd.f32 %v13524_v29, %v15692_v6  ;;  %v13605_v42 = vpop.f32.mrf.mxu1  ;;  %v11363_v29 = vld [vmem:[%s20092_s4 + $0x380] sm:$0xff] }
 0x152   :  { %v13526_v43 = vpop.f32.mrf.mxu0 }
 0x153   :  { %v15777_v44 = vadd.f32 %v13604_v38, %v949_v46  ;;  %v13527_v47 = vadd.f32 %v13526_v43, %v13525_v39  ;;  %v13606_v40 = vpop.f32.mrf.mxu1  ;;  %v11367_v46 = vld [vmem:[%s20092_s4 + $0x3a0] sm:$0xff] }
 0x154   :  { %v13528_v48 = vpop.f32.mrf.mxu0  ;;  %v13607_v49 = vadd.f32 %v13606_v40, %v13605_v42  ;;  %v11428_v43 = vcombine.high %v11363_v29, %v11367_v46  ;;  %v11359_v40 = vld [vmem:[%s20092_s4 + $0x360] sm:$0xff] }
 0x155   :  { %20099 = vst [vmem:[#allocation3_spill] sm:$0xff] %v15777_v44  ;;  %v954_v58 = vadd.f32 %v13527_v47, %v15706_v19  ;;  %v13608_v51 = vpop.f32.mrf.mxu1  ;;  %v11355_v47 = vld [vmem:[%s20092_s4 + $0x340] sm:$0xff] }
 0x156   :  { %v13529_v53 = vpop.f32.mrf.mxu0 }
 0x157   :  { %v15780_v54 = vadd.f32 %v13607_v49, %v954_v58  ;;  %v13530_v52 = vadd.f32 %v13529_v53, %v13528_v48  ;;  %v13609_v55 = vpop.f32.mrf.mxu1  ;;  %v15833_v48 = vld [vmem:[%s20092_s4 + $0x3c8] sm:$0xff]  ;;  %v11427_v53 = vcombine.low %v11363_v29, %v11367_v46  ;;  %v11327_v46 = vld [vmem:[%s20092_s4 + $0x260] sm:$0xff] }
 0x158   :  { %v13610_v57 = vadd.f32 %v13609_v55, %v13608_v51  ;;  %v13531_v59 = vpop.f32.mrf.mxu0  ;;  %v15840_v49 = vld [vmem:[%s20092_s4 + $0x3e8] sm:$0xff] }
 0x159   :  { %20100 = vst [vmem:[#allocation4_spill] sm:$0xff] %v15780_v54  ;;  %v959_v6 = vadd.f32 %v13530_v52, %v15720_v32  ;;  %v13611_v61 = vpop.f32.mrf.mxu1  ;;  %v11438_v55 = vcombine.high %v15833_v48, %v15840_v49 }
 0x15a   :  { %v13532_v62 = vpop.f32.mrf.mxu0 }
 0x15b   :  { %v15783_v1 = vadd.f32 %v13610_v57, %v959_v6  ;;  %v13533_v2 = vadd.f32 %v13532_v62, %v13531_v59  ;;  %v13612_v63 = vpop.f32.mrf.mxu1  ;;  %v11420_v59 = vcombine.high %v11355_v47, %v11359_v40  ;;  %v11351_v62 = vld [vmem:[%s20092_s4 + $0x320] sm:$0xff]  ;;  %2400 = vmatprep.subr.bf16.mxu0 %v11438_v55 }
 0x15c   :  { %v13534_v3 = vpop.f32.mrf.mxu0  ;;  %v13613_v4 = vadd.f32 %v13612_v63, %v13611_v61  ;;  %v11347_v61 = vld [vmem:[%s20092_s4 + $0x300] sm:$0xff] }
 0x15d   :  { %20101 = vst [vmem:[#allocation5_spill] sm:$0xff] %v15783_v1  ;;  %v964_v19 = vadd.f32 %v13533_v2, %v15734_v45  ;;  %v13614_v7 = vpop.f32.mrf.mxu1 }
 0x15e   :  { %v13535_v8 = vpop.f32.mrf.mxu0 }
 0x15f   :  { %v15786_v9 = vadd.f32 %v13613_v4, %v964_v19  ;;  %v13536_v10 = vadd.f32 %v13535_v8, %v13534_v3  ;;  %v13615_v11 = vpop.f32.mrf.mxu1  ;;  %v11419_v3 = vcombine.low %v11355_v47, %v11359_v40  ;;  %v11412_v4 = vcombine.high %v11347_v61, %v11351_v62  ;;  %v11339_v8 = vld [vmem:[%s20092_s4 + $0x2c0] sm:$0xff] }
 0x160   :  { %v13616_v13 = vadd.f32 %v13615_v11, %v13614_v7  ;;  %v13537_v14 = vpop.f32.mrf.mxu0 }
 0x161   :  { %20102 = vst [vmem:[#allocation6_spill] sm:$0xff] %v15786_v9  ;;  %v969_v32 = vadd.f32 %v13536_v10, %v15742_v56  ;;  %v13617_v16 = vpop.f32.mrf.mxu1  ;;  %v11343_v10 = vld [vmem:[%s20092_s4 + $0x2e0] sm:$0xff] }
 0x162   :  { %v13538_v17 = vpop.f32.mrf.mxu0 }
 0x163   :  { %v15789_v20 = vadd.f32 %v13616_v13, %v969_v32  ;;  %v13539_v21 = vadd.f32 %v13538_v17, %v13537_v14  ;;  %v13618_v22 = vpop.f32.mrf.mxu1  ;;  %v11411_v14 = vcombine.low %v11347_v61, %v11351_v62  ;;  %v11315_v61 = vld [vmem:[%s20092_s4 + $0x200] sm:$0xff] }
 0x164   :  { %v15791_v24 = vpop.f32.mrf.mxu0  ;;  %v13619_v25 = vadd.f32 %v13618_v22, %v13617_v16  ;;  %v11404_v16 = vcombine.high %v11339_v8, %v11343_v10  ;;  %v11335_v22 = vld [vmem:[%s20092_s4 + $0x2a0] sm:$0xff] }
 0x165   :  { %20103 = vst [vmem:[#allocation7_spill] sm:$0xff] %v15789_v20  ;;  %v974_v45 = vadd.f32 %v13539_v21, %v15744_v0  ;;  %v15794_v27 = vpop.f32.mrf.mxu1  ;;  %v11375_v0 = vld [vmem:[%s20092_s4 + $0x3e0] sm:$0xff] }
 0x166   :  { %v15796_v18 = vpop.f32.mrf.mxu0  ;;  %v11435_v38 = vcombine.low %v11371_v35, %v11375_v0  ;;  %v11436_v39 = vcombine.high %v11371_v35, %v11375_v0  ;;  %v11331_v21 = vld [vmem:[%s20092_s4 + $0x280] sm:$0xff]  ;;  %v11403_v35 = vcombine.low %v11339_v8, %v11343_v10 }
 0x167   :  { %v15798_v28 = vadd.f32 %v13619_v25, %v974_v45  ;;  %v15800_v34 = vpop.f32.mrf.mxu1  ;;  %v11396_v29 = vcombine.high %v11331_v21, %v11335_v22  ;;  %v11395_v40 = vcombine.low %v11331_v21, %v11335_v22  ;;  %v11319_v62 = vld [vmem:[%s20092_s4 + $0x220] sm:$0xff] }
 0x168   :  { %v15802_v56 = vpop.f32.mrf.mxu0  ;;  %2359 = vmatprep.subr.bf16.mxu1 %v11436_v39  ;;  %v11323_v39 = vld [vmem:[%s20092_s4 + $0x240] sm:$0xff] }
 0x169   :  { %20104 = vst [vmem:[#allocation8_spill] sm:$0xff] %v15798_v28  ;;  %v15804_v30 = vpop.f32.mrf.mxu1  ;;  %2360 = vmatpush1.bf16.msra.mxu1 %v11435_v38  ;;  %v11388_v55 = vcombine.high %v11323_v39, %v11327_v46  ;;  %v11387_v8 = vcombine.low %v11323_v39, %v11327_v46 }
 0x16a   :  { %v15806_v33 = vpop.f32.mrf.mxu0  ;;  %2361 = vmatprep.subr.bf16.mxu1 %v11428_v43 }
 0x16b   :  { %v15817_v37 = vpop.f32.mrf.mxu1 }
 0x16c   :  { %v15822_v42 = vpop.f32.mrf.mxu0 }
 0x16d   :  { %v15835_v58 = vpop.f32.mrf.mxu1  ;;  %2362 = vmatpush1.bf16.msra.mxu1 %v11427_v53 }
 0x16e   :  { %v15842_v51 = vpop.f32.mrf.mxu0  ;;  %2363 = vmatprep.subr.bf16.mxu1 %v11420_v59 }
 0x16f   :  { %v15848_v57 = vpop.f32.mrf.mxu1 }
 0x170   :  { %v15850_v6 = vpop.f32.mrf.mxu0 }
 0x171   :  { %v15858_v2 = vpop.f32.mrf.mxu1  ;;  %2364 = vmatpush1.bf16.msra.mxu1 %v11419_v3 }
 0x172   :  { %v15860_v63 = vpop.f32.mrf.mxu0  ;;  %2365 = vmatprep.subr.bf16.mxu1 %v11412_v4 }
 0x173   :  { %v15862_v19 = vpop.f32.mrf.mxu1 }
 0x174   :  { %v15864_v7 = vpop.f32.mrf.mxu0 }
 0x175   :  { %v15872_v11 = vpop.f32.mrf.mxu1  ;;  %2366 = vmatpush1.bf16.msra.mxu1 %v11411_v14  ;;  %v11380_v14 = vcombine.high %v11315_v61, %v11319_v62 }
 0x176   :  { %v15874_v13 = vpop.f32.mrf.mxu0  ;;  %2367 = vmatprep.subr.bf16.mxu1 %v11404_v16 }
 0x177   :  { %v15876_v32 = vpop.f32.mrf.mxu1 }
 0x178   :  { %v15878_v17 = vpop.f32.mrf.mxu0 }
 0x179   :  { %v15886_v45 = vpop.f32.mrf.mxu1  ;;  %2368 = vmatpush1.bf16.msra.mxu1 %v11403_v35  ;;  %v11379_v35 = vcombine.low %v11315_v61, %v11319_v62 }
 0x17a   :  { %v15888_v25 = vpop.f32.mrf.mxu0  ;;  %2369 = vmatprep.subr.bf16.mxu1 %v11396_v29 }
 0x17b   :  { %v15890_v0 = vpop.f32.mrf.mxu1 }
 0x17c   :  { %v15892_v38 = vpop.f32.mrf.mxu0 }
 0x17d   :  { %v15900_v43 = vpop.f32.mrf.mxu1  ;;  %2370 = vmatpush1.bf16.msra.mxu1 %v11395_v40 }
 0x17e   :  { %v15902_v47 = vpop.f32.mrf.mxu0  ;;  %2371 = vmatprep.subr.bf16.mxu1 %v11388_v55 }
 0x17f   :  { %v15904_v53 = vpop.f32.mrf.mxu1 }
 0x180   :  { %v15906_v59 = vpop.f32.mrf.mxu0 }
 0x181   :  { %v15914_v3 = vpop.f32.mrf.mxu1  ;;  %2372 = vmatpush1.bf16.msra.mxu1 %v11387_v8 }
 0x182   :  { %v15916_v4 = vpop.f32.mrf.mxu0  ;;  %2373 = vmatprep.subr.bf16.mxu1 %v11380_v14 }
 0x183   :  { %v15918_v10 = vpop.f32.mrf.mxu1 }
 0x184   :  { %v15920_v16 = vpop.f32.mrf.mxu0 }
 0x185   :  { %v15922_v21 = vpop.f32.mrf.mxu1  ;;  %2374 = vmatpush1.bf16.msra.mxu1 %v11379_v35 }
 0x186   :  { %v15924_v22 = vpop.f32.mrf.mxu0 }
 0x187   :  { %v15926_v29 = vpop.f32.mrf.mxu1 }
 0x188   :  { %v15928_v52 = vpop.f32.mrf.mxu0 }
 0x189   :  { %v15930_v28 = vpop.f32.mrf.mxu1 }
 0x18a   :  { %20105 = vst [vmem:[#allocation9_spill] sm:$0xff] %v15930_v28  ;;  %v15932_v39 = vpop.f32.mrf.mxu0 }
 0x18b   :  { %v15934_v46 = vpop.f32.mrf.mxu1 }
 0x18c   :  { %20106 = vst [vmem:[#allocation10_spill] sm:$0xff] %v15934_v46  ;;  %v15936_v40 = vpop.f32.mrf.mxu0 }
 0x18d   :  { %v15938_v55 = vpop.f32.mrf.mxu1 }
 0x18e   :  { %20107 = vst [vmem:[#allocation11_spill] sm:$0xff] %v15938_v55  ;;  %v15940_v20 = vpop.f32.mrf.mxu0 }
 0x18f   :  { %v15942_v8 = vpop.f32.mrf.mxu1 }
 0x190   :  { %20108 = vst [vmem:[#allocation12_spill] sm:$0xff] %v15942_v8  ;;  %v15944_v61 = vpop.f32.mrf.mxu0 }
 0x191   :  { %20109 = vst [vmem:[#allocation13_spill] sm:$0xff] %v15944_v61  ;;  %v15946_v62 = vpop.f32.mrf.mxu1 }
 0x192   :  { %20110 = vst [vmem:[#allocation14_spill] sm:$0xff] %v15946_v62  ;;  %v15948_v14 = vpop.f32.mrf.mxu0 }
 0x193   :  { %20111 = vst [vmem:[#allocation15_spill] sm:$0xff] %v15948_v14  ;;  %v15950_v9 = vpop.f32.mrf.mxu1 }
 0x194   :  { %20112 = vst [vmem:[#allocation16_spill] sm:$0xff] %v15950_v9  ;;  %v15952_v1 = vpop.f32.mrf.mxu0 }
 0x195   :  { %20113 = vst [vmem:[#allocation17_spill] sm:$0xff] %v15952_v1  ;;  %v15954_v35 = vpop.f32.mrf.mxu1 }
 0x196   :  { %20114 = vst [vmem:[#allocation18_spill] sm:$0xff] %v15954_v35  ;;  %v15956_v54 = vpop.f32.mrf.mxu0  ;;  %v13654_v35 = vadd.f32 %v15796_v18, %v15791_v24 }
 0x197   :  { %20115 = vst [vmem:[#allocation19_spill] sm:$0xff] %v15956_v54  ;;  %v15958_v44 = vpop.f32.mrf.mxu1 }
 0x198   :  { %20116 = vst [vmem:[#allocation20_spill] sm:$0xff] %v15958_v44  ;;  %v15960_v55 = vpop.f32.mrf.mxu0 }
 0x199   :  { %20117 = vst [vmem:[#allocation21_spill] sm:$0xff] %v15960_v55  ;;  %v15962_v46 = vpop.f32.mrf.mxu1 }
 0x19a   :  { %20118 = vst [vmem:[#allocation22_spill] sm:$0xff] %v15962_v46  ;;  %v15964_v8 = vpop.f32.mrf.mxu0  ;;  %v13657_v46 = vadd.f32 %v15806_v33, %v15802_v56  ;;  %v13737_v33 = vadd.f32 %v15817_v37, %v15804_v30  ;;  %v13740_v30 = vadd.f32 %v15848_v57, %v15835_v58  ;;  %v11356_v58 = vld [vmem:[%s20092_s4 + $0x348] sm:$0xff] }
 0x19b   :  { %20119 = vst [vmem:[#allocation23_spill] sm:$0xff] %v15964_v8  ;;  %v15966_v61 = vpop.f32.mrf.mxu1 }
 0x19c   :  { %20120 = vst [vmem:[#allocation24_spill] sm:$0xff] %v15966_v61  ;;  %v15968_v62 = vpop.f32.mrf.mxu0  ;;  %v1189_v61 = vadd.f32 %v13654_v35, %v15747_v12  ;;  %v1194_v18 = vadd.f32 %v13657_v46, %v15750_v23  ;;  %v13663_v23 = vadd.f32 %v15860_v63, %v15850_v6 }
 0x19d   :  { %20121 = vst [vmem:[#allocation25_spill] sm:$0xff] %v15968_v62  ;;  %v15970_v14 = vpop.f32.mrf.mxu1 }
 0x19e   :  { %20122 = vst [vmem:[#allocation26_spill] sm:$0xff] %v15970_v14  ;;  %v15972_v9 = vpop.f32.mrf.mxu0  ;;  %v1339_v28 = vadd.f32 %v13737_v33, %v1194_v18 }
 0x19f   :  { %20123 = vst [vmem:[#allocation27_spill] sm:$0xff] %v15972_v9  ;;  %v15976_v54 = vpop.f32.mrf.mxu1  ;;  %v13734_v9 = vadd.f32 %v15800_v34, %v15794_v27 }
 0x1a0   :  { %20124 = vst [vmem:[#allocation28_spill] sm:$0xff] %v15976_v54  ;;  %v15978_v44 = vpop.f32.mrf.mxu0 }
 0x1a1   :  { %20125 = vst [vmem:[#allocation29_spill] sm:$0xff] %v15978_v44  ;;  %v15980_v55 = vpop.f32.mrf.mxu1  ;;  %v1334_v44 = vadd.f32 %v13734_v9, %v1189_v61 }
 0x1a2   :  { %20126 = vst [vmem:[#allocation30_spill] sm:$0xff] %v15980_v55  ;;  %v15984_v8 = vpop.f32.mrf.mxu0  ;;  %v13660_v55 = vadd.f32 %v15842_v51, %v15822_v42 }
 0x1a3   :  { %20127 = vst [vmem:[#allocation31_spill] sm:$0xff] %v15984_v8  ;;  %v15987_v62 = vpop.f32.mrf.mxu1 }
 0x1a4   :  { %20128 = vst [vmem:[#allocation32_spill] sm:$0xff] %v15987_v62  ;;  %v13812_v14 = vpop.f32.mrf.mxu0  ;;  %v1199_v27 = vadd.f32 %v13660_v55, %v15753_v31  ;;  %v1204_v55 = vadd.f32 %v13663_v23, %v15756_v41 }
 0x1a5   :  { %v13892_v24 = vpop.f32.mrf.mxu1 }
 0x1a6   :  { %v13813_v54 = vpop.f32.mrf.mxu0  ;;  %v1344_v46 = vadd.f32 %v13740_v30, %v1199_v27  ;;  %v13669_v27 = vadd.f32 %v15888_v25, %v15878_v17 }
 0x1a7   :  { %v13814_v1 = vadd.f32 %v13813_v54, %v13812_v14  ;;  %v13893_v56 = vpop.f32.mrf.mxu1  ;;  %v11364_v54 = vld [vmem:[%s20092_s4 + $0x388] sm:$0xff] }
 0x1a8   :  { %v13815_v12 = vpop.f32.mrf.mxu0  ;;  %v13894_v62 = vadd.f32 %v13893_v56, %v13892_v24  ;;  %v20129_v56 = vcombine.low %v15833_v48, %v15840_v49  ;;  %v13746_v48 = vadd.f32 %v15876_v32, %v15872_v11  ;;  %v1214_v30 = vadd.f32 %v13669_v27, %v15762_v60  ;;  %v11340_v11 = vld [vmem:[%s20092_s4 + $0x2c8] sm:$0xff] }
 0x1a9   :  { %v1479_v35 = vadd.f32 %v13814_v1, %v1334_v44  ;;  %v13895_v8 = vpop.f32.mrf.mxu1  ;;  %v11368_v44 = vld [vmem:[%s20092_s4 + $0x3a8] sm:$0xff]  ;;  %v13749_v60 = vadd.f32 %v15890_v0, %v15886_v45 }
 0x1aa   :  { %v13816_v36 = vpop.f32.mrf.mxu0  ;;  %v11430_v63 = vcombine.high %v11364_v54, %v11368_v44  ;;  %v11429_v33 = vcombine.low %v11364_v54, %v11368_v44  ;;  %v11344_v32 = vld [vmem:[%s20092_s4 + $0x2e8] sm:$0xff] }
 0x1ab   :  { %v1624_v9 = vadd.f32 %v13894_v62, %v1479_v35  ;;  %v13817_v34 = vadd.f32 %v13816_v36, %v13815_v12  ;;  %v13896_v42 = vpop.f32.mrf.mxu1  ;;  %v13666_v36 = vadd.f32 %v15874_v13, %v15864_v7  ;;  %v13743_v7 = vadd.f32 %v15862_v19, %v15858_v2  ;;  %v11348_v19 = vld [vmem:[%s20092_s4 + $0x308] sm:$0xff] }
 0x1ac   :  { %v13818_v1 = vpop.f32.mrf.mxu0  ;;  %v13897_v31 = vadd.f32 %v13896_v42, %v13895_v8  ;;  %v11332_v45 = vld [vmem:[%s20092_s4 + $0x288] sm:$0xff] }
 0x1ad   :  { %v1484_v37 = vadd.f32 %v13817_v34, %v1339_v28  ;;  %14099 = vmatprep.mubr.msk.f32.mxu0 %vm1710_vm1, %v1624_v9  ;;  %v13898_v51 = vpop.f32.mrf.mxu1  ;;  %v11360_v28 = vld [vmem:[%s20092_s4 + $0x368] sm:$0xff]  ;;  %v1209_v24 = vadd.f32 %v13666_v36, %v15759_v50  ;;  %v1349_v35 = vadd.f32 %v13743_v7, %v1204_v55  ;;  %v13752_v7 = vadd.f32 %v15904_v53, %v15900_v43 }
 0x1ae   :  { %v13819_v6 = vpop.f32.mrf.mxu0  ;;  %v11422_v12 = vcombine.high %v11356_v58, %v11360_v28  ;;  %v11352_v50 = vld [vmem:[%s20092_s4 + $0x328] sm:$0xff]  ;;  %v11421_v44 = vcombine.low %v11356_v58, %v11360_v28  ;;  %v13755_v53 = vadd.f32 %v15918_v10, %v15914_v3 }
 0x1af   :  { %v1629_v61 = vadd.f32 %v13897_v31, %v1484_v37  ;;  %v13820_v62 = vadd.f32 %v13819_v6, %v13818_v1  ;;  %v13899_v14 = vpop.f32.mrf.mxu1  ;;  %v1354_v25 = vadd.f32 %v13746_v48, %v1209_v24  ;;  %v11414_v1 = vcombine.high %v11348_v19, %v11352_v50  ;;  %v11336_v0 = vld [vmem:[%s20092_s4 + $0x2a8] sm:$0xff] }
 0x1b0   :  { %v13821_v57 = vpop.f32.mrf.mxu0  ;;  %v13900_v8 = vadd.f32 %v13899_v14, %v13898_v51  ;;  %v13672_v37 = vadd.f32 %v15902_v47, %v15892_v38  ;;  %v13675_v47 = vadd.f32 %v15916_v4, %v15906_v59  ;;  %v1359_v14 = vadd.f32 %v13749_v60, %v1214_v30  ;;  %v11324_v43 = vld [vmem:[%s20092_s4 + $0x248] sm:$0xff] }
 0x1b1   :  { %v1489_v13 = vadd.f32 %v13820_v62, %v1344_v46  ;;  %14100 = vmatmul.mubr.msk.f32.vlgmr.msra.gmra.mxu0 %vm1710_vm1, %v1629_v61  ;;  %v13901_v41 = vpop.f32.mrf.mxu1  ;;  %v11413_v61 = vcombine.low %v11348_v19, %v11352_v50  ;;  %v11406_v62 = vcombine.high %v11340_v11, %v11344_v32  ;;  %v11397_v48 = vcombine.low %v11332_v45, %v11336_v0 }
 0x1b2   :  { %v13822_v18 = vpop.f32.mrf.mxu0  ;;  %2401 = vmatpush1.bf16.msra.mxu0 %v20129_v56  ;;  %v1219_v58 = vadd.f32 %v13672_v37, %v15765_v5  ;;  %v11398_v56 = vcombine.high %v11332_v45, %v11336_v0  ;;  %v13684_v37 = vadd.f32 %v15940_v20, %v15936_v40  ;;  %v20133_v20 = vld [vmem:[#allocation3_spill] sm:$0xff]  ;;  %v20137_v45 = vld [vmem:[#allocation12_spill] sm:$0xff] }
 0x1b3   :  { %v1634_v23 = vadd.f32 %v13900_v8, %v1489_v13  ;;  %v13823_v9 = vadd.f32 %v13822_v18, %v13821_v57  ;;  %v13902_v2 = vpop.f32.mrf.mxu1  ;;  %2402 = vmatprep.subr.bf16.mxu0 %v11430_v63  ;;  %v11405_v18 = vcombine.low %v11340_v11, %v11344_v32 }
 0x1b4   :  { %v13824_v49 = vpop.f32.mrf.mxu0  ;;  %v13903_v34 = vadd.f32 %v13902_v2, %v13901_v41  ;;  %v1224_v41 = vadd.f32 %v13675_v47, %v15768_v15  ;;  %v11328_v15 = vld [vmem:[%s20092_s4 + $0x268] sm:$0xff]  ;;  %v1239_v40 = vadd.f32 %v13684_v37, %v20133_v20 }
 0x1b5   :  { %v1494_v42 = vadd.f32 %v13823_v9, %v1349_v35  ;;  %14102 = vmatprep.mubr.msk.f32.mxu0 %vm1710_vm1, %v1634_v23  ;;  %v13904_v17 = vpop.f32.mrf.mxu1 }
 0x1b6   :  { %v13825_v54 = vpop.f32.mrf.mxu0  ;;  %2403 = vmatpush1.bf16.msra.mxu0 %v11429_v33  ;;  %v1364_v33 = vadd.f32 %v13752_v7, %v1219_v58 }
 0x1b7   :  { %v1639_v31 = vadd.f32 %v13903_v34, %v1494_v42  ;;  %v13826_v51 = vadd.f32 %v13825_v54, %v13824_v49  ;;  %v13905_v36 = vpop.f32.mrf.mxu1  ;;  %2404 = vmatprep.subr.bf16.mxu0 %v11422_v12  ;;  %v13678_v12 = vadd.f32 %v15924_v22, %v15920_v16  ;;  %v1369_v22 = vadd.f32 %v13755_v53, %v1224_v41  ;;  %v20141_v53 = vld [vmem:[#allocation14_spill] sm:$0xff] }
 0x1b8   :  { %v13827_v6 = vpop.f32.mrf.mxu0  ;;  %v13906_v63 = vadd.f32 %v13905_v36, %v13904_v17  ;;  %v11390_v49 = vcombine.high %v11324_v43, %v11328_v15  ;;  %v13681_v42 = vadd.f32 %v15932_v39, %v15928_v52  ;;  %v20130_v39 = vld [vmem:[#allocation2_spill] sm:$0xff] }
 0x1b9   :  { %v1499_v46 = vadd.f32 %v13826_v51, %v1354_v25  ;;  %14103 = vmatmul.mubr.msk.f32.gmra.mxu0 %vm1710_vm1, %v1639_v31  ;;  %v13907_v38 = vpop.f32.mrf.mxu1  ;;  %v1229_v34 = vadd.f32 %v13678_v12, %v15771_v26  ;;  %v11389_v31 = vcombine.low %v11324_v43, %v11328_v15 }
 0x1ba   :  { %v13828_v55 = vpop.f32.mrf.mxu0  ;;  %2405 = vmatpush1.bf16.msra.mxu0 %v11421_v44  ;;  %v13758_v44 = vadd.f32 %v15926_v29, %v15922_v21  ;;  %v1234_v51 = vadd.f32 %v13681_v42, %v20130_v39  ;;  %v20131_v21 = vld [vmem:[#allocation9_spill] sm:$0xff]  ;;  %v20132_v29 = vld [vmem:[#allocation10_spill] sm:$0xff] }
 0x1bb   :  { %v1644_v28 = vadd.f32 %v13906_v63, %v1499_v46  ;;  %v13829_v57 = vadd.f32 %v13828_v55, %v13827_v6  ;;  %v13908_v8 = vpop.f32.mrf.mxu1  ;;  %2406 = vmatprep.subr.bf16.mxu0 %v11414_v1  ;;  %v13761_v60 = vadd.f32 %v20132_v29, %v20131_v21  ;;  %v20145_v42 = vld [vmem:[#allocation5_spill] sm:$0xff] }
 0x1bc   :  { %v13830_v59 = vpop.f32.mrf.mxu0  ;;  %v13909_v4 = vadd.f32 %v13908_v8, %v13907_v38  ;;  %v1374_v52 = vadd.f32 %v13758_v44, %v1229_v34  ;;  %v20136_v8 = vld [vmem:[#allocation11_spill] sm:$0xff] }
 0x1bd   :  { %v1504_v13 = vadd.f32 %v13829_v57, %v1359_v14  ;;  %14105 = vmatprep.mubr.msk.f32.mxu0 %vm1710_vm1, %v1644_v28  ;;  %v13910_v5 = vpop.f32.mrf.mxu1  ;;  %v1379_v55 = vadd.f32 %v13761_v60, %v1234_v51  ;;  %v13764_v0 = vadd.f32 %v20137_v45, %v20136_v8  ;;  %v20151_v60 = vld [vmem:[#allocation22_spill] sm:$0xff] }
 0x1be   :  { %v13831_v24 = vpop.f32.mrf.mxu0  ;;  %2407 = vmatpush1.bf16.msra.mxu0 %v11413_v61  ;;  %v20134_v61 = vld [vmem:[#allocation13_spill] sm:$0xff] }
 0x1bf   :  { %v1649_v35 = vadd.f32 %v13909_v4, %v1504_v13  ;;  %v13832_v27 = vadd.f32 %v13831_v24, %v13830_v59  ;;  %v13911_v23 = vpop.f32.mrf.mxu1  ;;  %2408 = vmatprep.subr.bf16.mxu0 %v11406_v62  ;;  %v20135_v62 = vld [vmem:[#allocation15_spill] sm:$0xff]  ;;  %v20138_v24 = vld [vmem:[#allocation4_spill] sm:$0xff] }
 0x1c0   :  { %v13833_v9 = vpop.f32.mrf.mxu0  ;;  %v13912_v2 = vadd.f32 %v13911_v23, %v13910_v5  ;;  %v13687_v14 = vadd.f32 %v20135_v62, %v20134_v61  ;;  %v1384_v5 = vadd.f32 %v13764_v0, %v1239_v40 }
 0x1c1   :  { %v1509_v19 = vadd.f32 %v13832_v27, %v1364_v33  ;;  %14106 = vmatmul.mubr.msk.f32.gmra.mxu0 %vm1710_vm1, %v1649_v35  ;;  %v13913_v16 = vpop.f32.mrf.mxu1  ;;  %v20140_v33 = vld [vmem:[#allocation19_spill] sm:$0xff] }
 0x1c2   :  { %v13834_v50 = vpop.f32.mrf.mxu0  ;;  %2409 = vmatpush1.bf16.msra.mxu0 %v11405_v18  ;;  %v1244_v18 = vadd.f32 %v13687_v14, %v20138_v24  ;;  %v20153_v14 = vld [vmem:[#allocation7_spill] sm:$0xff] }
 0x1c3   :  { %v1654_v17 = vadd.f32 %v13912_v2, %v1509_v19  ;;  %v13835_v25 = vadd.f32 %v13834_v50, %v13833_v9  ;;  %v13914_v54 = vpop.f32.mrf.mxu1  ;;  %2410 = vmatprep.subr.bf16.mxu0 %v11398_v56  ;;  %v20139_v56 = vld [vmem:[#allocation17_spill] sm:$0xff]  ;;  %v20142_v9 = vld [vmem:[#allocation16_spill] sm:$0xff]  ;;  %v20144_v50 = vld [vmem:[#allocation23_spill] sm:$0xff] }
 0x1c4   :  { %v13836_v3 = vpop.f32.mrf.mxu0  ;;  %v13915_v10 = vadd.f32 %v13914_v54, %v13913_v16  ;;  %v13690_v12 = vadd.f32 %v20140_v33, %v20139_v56  ;;  %v13767_v2 = vadd.f32 %v20142_v9, %v20141_v53  ;;  %v20159_v9 = vld [vmem:[#allocation30_spill] sm:$0xff] }
 0x1c5   :  { %v1514_v1 = vadd.f32 %v13835_v25, %v1369_v22  ;;  %14108 = vmatprep.mubr.msk.f32.mxu0 %vm1710_vm1, %v1654_v17  ;;  %v13916_v30 = vpop.f32.mrf.mxu1  ;;  %v20143_v22 = vld [vmem:[#allocation21_spill] sm:$0xff] }
 0x1c6   :  { %v13837_v26 = vpop.f32.mrf.mxu0  ;;  %2411 = vmatpush1.bf16.msra.mxu0 %v11397_v48  ;;  %v13693_v48 = vadd.f32 %v20144_v50, %v20143_v22  ;;  %v1389_v34 = vadd.f32 %v13767_v2, %v1244_v18  ;;  %v1249_v17 = vadd.f32 %v13690_v12, %v20145_v42  ;;  %v20158_v12 = vld [vmem:[#allocation8_spill] sm:$0xff] }
 0x1c7   :  { %v1659_v36 = vadd.f32 %v13915_v10, %v1514_v1  ;;  %v13838_v11 = vadd.f32 %v13837_v26, %v13836_v3  ;;  %v13917_v32 = vpop.f32.mrf.mxu1  ;;  %2412 = vmatprep.subr.bf16.mxu0 %v11390_v49  ;;  %v20146_v1 = vld [vmem:[#allocation18_spill] sm:$0xff]  ;;  %v20160_v2 = vld [vmem:[#allocation32_spill] sm:$0xff] }
 0x1c8   :  { %v13839_v6 = vpop.f32.mrf.mxu0  ;;  %v13918_v63 = vadd.f32 %v13917_v32, %v13916_v30  ;;  %v20147_v30 = vld [vmem:[#allocation20_spill] sm:$0xff]  ;;  %v20150_v32 = vld [vmem:[#allocation27_spill] sm:$0xff] }
 0x1c9   :  { %v1519_v46 = vadd.f32 %v13838_v11, %v1374_v52  ;;  %14109 = vmatmul.mubr.msk.f32.gmra.mxu0 %vm1710_vm1, %v1659_v36  ;;  %v13919_v38 = vpop.f32.mrf.mxu1  ;;  %v13770_v37 = vadd.f32 %v20147_v30, %v20146_v1  ;;  %v20148_v52 = vld [vmem:[#allocation6_spill] sm:$0xff]  ;;  %v20149_v11 = vld [vmem:[#allocation25_spill] sm:$0xff]  ;;  %v11373_v30 = vld [vmem:[%s20092_s4 + $0x3d0] sm:$0xff] }
 0x1ca   :  { %v13840_v47 = vpop.f32.mrf.mxu0  ;;  %2413 = vmatpush1.bf16.msra.mxu0 %v11389_v31  ;;  %v1254_v39 = vadd.f32 %v13693_v48, %v20148_v52  ;;  %v11378_v52 = vld [vmem:[%s20092_s4 + $0x3f8] sm:$0xff] }
 0x1cb   :  { %v1664_v58 = vadd.f32 %v13918_v63, %v1519_v46  ;;  %v13841_v28 = vadd.f32 %v13840_v47, %v13839_v6  ;;  %v13920_v57 = vpop.f32.mrf.mxu1  ;;  %v1394_v36 = vadd.f32 %v13770_v37, %v1249_v17  ;;  %v13696_v6 = vadd.f32 %v20150_v32, %v20149_v11  ;;  %v20152_v46 = vld [vmem:[#allocation24_spill] sm:$0xff]  ;;  %v16142_v32 = vld [vmem:[%s20093_s3] ss:$0 sm:$0xff] }
 0x1cc   :  { %v13842_v59 = vpop.f32.mrf.mxu0  ;;  %v13921_v4 = vadd.f32 %v13920_v57, %v13919_v38  ;;  %v13773_v38 = vadd.f32 %v20152_v46, %v20151_v60  ;;  %v20155_v57 = vld [vmem:[#allocation31_spill] sm:$0xff]  ;;  %v11377_v37 = vld [vmem:[%s20092_s4 + $0x3f0] sm:$0xff]  ;;  %v14127_v11 = vmov 0   ;;  %v11370_v60 = vld [vmem:[%s20092_s4 + $0x3b8] sm:$0xff] }
 0x1cd   :  { %v1524_v7 = vadd.f32 %v13841_v28, %v1379_v55  ;;  %14111 = vmatprep.mubr.msk.f32.mxu0 %vm1710_vm1, %v1664_v58  ;;  %v13922_v13 = vpop.f32.mrf.mxu1  ;;  %v1259_v58 = vadd.f32 %v13696_v6, %v20153_v14  ;;  %v20154_v28 = vld [vmem:[#allocation29_spill] sm:$0xff]  ;;  %2391 = vmatprep.mubr.bf16.mxu1 %v14127_v11  ;;  %v11365_v6 = vld [vmem:[%s20092_s4 + $0x390] sm:$0xff] }
 0x1ce   :  { %v13843_v41 = vpop.f32.mrf.mxu0  ;;  %v1399_v61 = vadd.f32 %v13773_v38, %v1254_v39  ;;  %v13699_v8 = vadd.f32 %v20155_v57, %v20154_v28  ;;  %v11439_v39 = vcombine.low %v11373_v30, %v11377_v37 }
 0x1cf   :  { %v1669_v35 = vadd.f32 %v13921_v4, %v1524_v7  ;;  %v13844_v27 = vadd.f32 %v13843_v41, %v13842_v59  ;;  %v13923_v23 = vpop.f32.mrf.mxu1 }
 0x1d0   :  { %v13845_v43 = vpop.f32.mrf.mxu0  ;;  %v13924_v15 = vadd.f32 %v13923_v23, %v13922_v13  ;;  %v20156_v13 = vld [vmem:[#allocation26_spill] sm:$0xff] }
 0x1d1   :  { %v1529_v19 = vadd.f32 %v13844_v27, %v1384_v5  ;;  %14112 = vmatmul.mubr.msk.f32.gmra.mxu0 %vm1710_vm1, %v1669_v35  ;;  %v13925_v16 = vpop.f32.mrf.mxu1  ;;  %v20157_v5 = vld [vmem:[#allocation28_spill] sm:$0xff]  ;;  %v1264_v35 = vadd.f32 %v13699_v8, %v20158_v12  ;;  %v11342_v12 = vld [vmem:[%s20092_s4 + $0x2d8] sm:$0xff] }
 0x1d2   :  { %v13846_v49 = vpop.f32.mrf.mxu0  ;;  %v13776_v41 = vadd.f32 %v20157_v5, %v20156_v13 }
 0x1d3   :  { %v1674_v25 = vadd.f32 %v13924_v15, %v1529_v19  ;;  %v13847_v54 = vadd.f32 %v13846_v49, %v13845_v43  ;;  %v13926_v3 = vpop.f32.mrf.mxu1  ;;  %v13779_v19 = vadd.f32 %v20160_v2, %v20159_v9  ;;  %v11333_v9 = vld [vmem:[%s20092_s4 + $0x290] sm:$0xff] }
 0x1d4   :  { %v13848_v10 = vpop.f32.mrf.mxu0  ;;  %v13927_v44 = vadd.f32 %v13926_v3, %v13925_v16  ;;  %v1404_v33 = vadd.f32 %v13776_v41, %v1259_v58  ;;  %v11316_v3 = vld [vmem:[%s20092_s4 + $0x208] sm:$0xff] }
 0x1d5   :  { %v1534_v26 = vadd.f32 %v13847_v54, %v1389_v34  ;;  %14114 = vmatprep.mubr.msk.f32.mxu0 %vm1710_vm1, %v1674_v25  ;;  %v13928_v31 = vpop.f32.mrf.mxu1  ;;  %v1409_v48 = vadd.f32 %v13779_v19, %v1264_v35  ;;  %v11346_v35 = vld [vmem:[%s20092_s4 + $0x2f8] sm:$0xff]  ;;  %v11337_v19 = vld [vmem:[%s20092_s4 + $0x2b0] sm:$0xff] }
 0x1d6   :  { %v13849_v51 = vpop.f32.mrf.mxu0 }
 0x1d7   :  { %v1679_v63 = vadd.f32 %v13927_v44, %v1534_v26  ;;  %v13850_v21 = vadd.f32 %v13849_v51, %v13848_v10  ;;  %v13929_v29 = vpop.f32.mrf.mxu1  ;;  %v11320_v10 = vld [vmem:[%s20092_s4 + $0x228] sm:$0xff]  ;;  %v11374_v26 = vld [vmem:[%s20092_s4 + $0x3d8] sm:$0xff] }
 0x1d8   :  { %v13851_v20 = vpop.f32.mrf.mxu0  ;;  %v13930_v40 = vadd.f32 %v13929_v29, %v13928_v31  ;;  %v11382_v44 = vcombine.high %v11316_v3, %v11320_v10  ;;  %v11381_v1 = vcombine.low %v11316_v3, %v11320_v10  ;;  %v11440_v31 = vcombine.high %v11373_v30, %v11377_v37  ;;  %v11366_v29 = vld [vmem:[%s20092_s4 + $0x398] sm:$0xff]  ;;  %v11329_v3 = vld [vmem:[%s20092_s4 + $0x270] sm:$0xff] }
 0x1d9   :  { %v1539_v47 = vadd.f32 %v13850_v21, %v1394_v36  ;;  %14115 = vmatmul.mubr.msk.f32.gmra.mxu0 %vm1710_vm1, %v1679_v63  ;;  %v13931_v55 = vpop.f32.mrf.mxu1  ;;  %v11441_v51 = vcombine.low %v11374_v26, %v11378_v52  ;;  %v11442_v36 = vcombine.high %v11374_v26, %v11378_v52  ;;  %v11369_v21 = vld [vmem:[%s20092_s4 + $0x3b0] sm:$0xff]  ;;  %v11433_v28 = vcombine.low %v11366_v29, %v11370_v60  ;;  %v11326_v10 = vld [vmem:[%s20092_s4 + $0x258] sm:$0xff] }
 0x1da   :  { %v13852_v62 = vpop.f32.mrf.mxu0  ;;  %2414 = vmatprep.subr.bf16.mxu0 %v11382_v44  ;;  %2441 = vmatprep.subr.bf16.mxu1 %v11440_v31  ;;  %v11431_v58 = vcombine.low %v11365_v6, %v11369_v21  ;;  %v11330_v44 = vld [vmem:[%s20092_s4 + $0x278] sm:$0xff]  ;;  %v11317_v31 = vld [vmem:[%s20092_s4 + $0x210] sm:$0xff] }
 0x1db   :  { %v1684_v45 = vadd.f32 %v13930_v40, %v1539_v47  ;;  %v13853_v0 = vadd.f32 %v13852_v62, %v13851_v20  ;;  %v13932_v59 = vpop.f32.mrf.mxu1  ;;  %2415 = vmatpush1.bf16.msra.mxu0 %v11381_v1  ;;  %v11432_v20 = vcombine.high %v11365_v6, %v11369_v21  ;;  %v11434_v40 = vcombine.high %v11366_v29, %v11370_v60  ;;  %v11357_v47 = vld [vmem:[%s20092_s4 + $0x350] sm:$0xff]  ;;  %v11362_v62 = vld [vmem:[%s20092_s4 + $0x378] sm:$0xff] }
 0x1dc   :  { %v13854_v4 = vpop.f32.mrf.mxu0  ;;  %v13933_v7 = vadd.f32 %v13932_v59, %v13931_v55  ;;  %2482 = vmatprep.subr.bf16.mxu0 %v11442_v36  ;;  %v11361_v55 = vld [vmem:[%s20092_s4 + $0x370] sm:$0xff]  ;;  %v11399_v1 = vcombine.low %v11333_v9, %v11337_v19  ;;  %v11394_v26 = vcombine.high %v11326_v10, %v11330_v44  ;;  %v11322_v36 = vld [vmem:[%s20092_s4 + $0x238] sm:$0xff]  ;;  %v11393_v21 = vcombine.low %v11326_v10, %v11330_v44  ;;  %v1934_v10 = vld [vmem:[%s20092_s4 + $0xc8] sm:$0xff] }
 0x1dd   :  { %v1544_v24 = vadd.f32 %v13853_v0, %v1399_v61  ;;  %14117 = vmatprep.mubr.msk.f32.mxu0 %vm1710_vm1, %v1684_v45  ;;  %v13934_v18 = vpop.f32.mrf.mxu1  ;;  %v11358_v61 = vld [vmem:[%s20092_s4 + $0x358] sm:$0xff]  ;;  %v11424_v57 = vcombine.high %v11357_v47, %v11361_v55  ;;  %v11349_v45 = vld [vmem:[%s20092_s4 + $0x310] sm:$0xff]  ;;  %v11423_v5 = vcombine.low %v11357_v47, %v11361_v55  ;;  %v1970_v47 = vld [vmem:[%s20092_s4 + $0x1e8] sm:$0xff] }
 0x1de   :  { %v13855_v56 = vpop.f32.mrf.mxu0  ;;  %v11426_v8 = vcombine.high %v11358_v61, %v11362_v62  ;;  %v11353_v59 = vld [vmem:[%s20092_s4 + $0x330] sm:$0xff]  ;;  %v11425_v41 = vcombine.low %v11358_v61, %v11362_v62  ;;  %v1938_v44 = vld [vmem:[%s20092_s4 + $0xe8] sm:$0xff] }
 0x1df   :  { %v1689_v27 = vadd.f32 %v13933_v7, %v1544_v24  ;;  %v13856_v23 = vadd.f32 %v13855_v56, %v13854_v4  ;;  %v13935_v43 = vpop.f32.mrf.mxu1  ;;  %v11350_v4 = vld [vmem:[%s20092_s4 + $0x318] sm:$0xff]  ;;  %v11416_v24 = vcombine.high %v11349_v45, %v11353_v59  ;;  %v11341_v56 = vld [vmem:[%s20092_s4 + $0x2d0] sm:$0xff] }
 0x1e0   :  { %v13857_v15 = vpop.f32.mrf.mxu0  ;;  %v13936_v53 = vadd.f32 %v13935_v43, %v13934_v18  ;;  %v11354_v7 = vld [vmem:[%s20092_s4 + $0x338] sm:$0xff] }
 0x1e1   :  { %v1549_v16 = vadd.f32 %v13856_v23, %v1404_v33  ;;  %14118 = vmatmul.mubr.msk.f32.gmra.mxu0 %vm1710_vm1, %v1689_v27  ;;  %v13937_v22 = vpop.f32.mrf.mxu1  ;;  %v11418_v18 = vcombine.high %v11350_v4, %v11354_v7  ;;  %v11345_v33 = vld [vmem:[%s20092_s4 + $0x2f0] sm:$0xff]  ;;  %v11415_v23 = vcombine.low %v11349_v45, %v11353_v59  ;;  %v11417_v43 = vcombine.low %v11350_v4, %v11354_v7  ;;  %v1961_v45 = vld [vmem:[%s20092_s4 + $0x1a0] sm:$0xff]  ;;  %v1962_v59 = vld [vmem:[%s20092_s4 + $0x1a8] sm:$0xff] }
 0x1e2   :  { %v13858_v50 = vpop.f32.mrf.mxu0 }
 0x1e3   :  { %v1694_v49 = vadd.f32 %v13936_v53, %v1549_v16  ;;  %v13859_v34 = vadd.f32 %v13858_v50, %v13857_v15  ;;  %v13938_v42 = vpop.f32.mrf.mxu1  ;;  %v11408_v15 = vcombine.high %v11341_v56, %v11345_v33  ;;  %v11410_v53 = vcombine.high %v11342_v12, %v11346_v35  ;;  %v11334_v16 = vld [vmem:[%s20092_s4 + $0x298] sm:$0xff] }
 0x1e4   :  { %v13939_v17 = vadd.f32 %v13938_v42, %v13937_v22  ;;  %v11338_v22 = vld [vmem:[%s20092_s4 + $0x2b8] sm:$0xff] }
 0x1e5   :  { %v1554_v25 = vadd.f32 %v13859_v34, %v1409_v48  ;;  %14120 = vmatprep.mubr.msk.f32.mxu0 %vm1710_vm1, %v1694_v49  ;;  %v11407_v49 = vcombine.low %v11341_v56, %v11345_v33  ;;  %v11409_v34 = vcombine.low %v11342_v12, %v11346_v35  ;;  %v11401_v30 = vcombine.low %v11334_v16, %v11338_v22  ;;  %v1949_v33 = vld [vmem:[%s20092_s4 + $0x140] sm:$0xff]  ;;  %v1950_v35 = vld [vmem:[%s20092_s4 + $0x148] sm:$0xff] }
 0x1e6   :  { %v1953_v12 = vld [vmem:[%s20092_s4 + $0x160] sm:$0xff] }
 0x1e7   :  { %v1699_v54 = vadd.f32 %v13939_v17, %v1554_v25  ;;  %v11400_v17 = vcombine.high %v11333_v9, %v11337_v19  ;;  %v11402_v25 = vcombine.high %v11334_v16, %v11338_v22  ;;  %v1945_v16 = vld [vmem:[%s20092_s4 + $0x120] sm:$0xff]  ;;  %v1946_v22 = vld [vmem:[%s20092_s4 + $0x128] sm:$0xff] }
 0x1e9   :  { %14121 = vmatmul.mubr.msk.f32.gmra.mxu0 %vm1710_vm1, %v1699_v54  ;;  %v11325_v54 = vld [vmem:[%s20092_s4 + $0x250] sm:$0xff] }
 0x1ea   :  { %2432 = vmatprep.mubr.bf16.mxu0 %v14127_v11  ;;  %v11392_v37 = vcombine.high %v11325_v54, %v11329_v3 }
 0x271   :  { %v14101_v63 = vpop.f32.mrf.mxu0 }
 0x272   :  { %v1835_v46 = vadd.f32 %v14101_v63, %v16142_v32  ;;  %v11391_v63 = vcombine.low %v11325_v54, %v11329_v3  ;;  %v1933_v54 = vld [vmem:[%s20092_s4 + $0xc0] sm:$0xff] }
 0x273   :  { %v16173_v14 = vpop.f32.mrf.mxu0  ;;  %v1937_v3 = vld [vmem:[%s20092_s4 + $0xe0] sm:$0xff] }
 0x274   :  { %v16157_v38 = vpack.c.bf16 %v1835_v46, %v1835_v46  ;;  %v1965_v46 = vld [vmem:[%s20092_s4 + $0x1c0] sm:$0xff] }
 0x276   :  { %2392 = vmatmul.mubr.bf16.vlgmr.msra.gmra.mxu1 %v16157_v38  ;;  %2433 = vmatmul.mubr.bf16.vlgmr.msra.gmra.mxu0 %v16157_v38 }
 0x277   :  { %2442 = vmatpush1.bf16.msra.mxu1 %v11439_v39  ;;  %2483 = vmatpush1.bf16.msra.mxu0 %v11441_v51  ;;  %v11321_v39 = vld [vmem:[%s20092_s4 + $0x230] sm:$0xff]  ;;  %v11318_v51 = vld [vmem:[%s20092_s4 + $0x218] sm:$0xff] }
 0x278   :  { %2443 = vmatprep.subr.bf16.mxu1 %v11432_v20  ;;  %2484 = vmatprep.subr.bf16.mxu0 %v11434_v40  ;;  %v11384_v29 = vcombine.high %v11317_v31, %v11321_v39  ;;  %v11386_v60 = vcombine.high %v11318_v51, %v11322_v36  ;;  %v1969_v20 = vld [vmem:[%s20092_s4 + $0x1e0] sm:$0xff]  ;;  %v1966_v40 = vld [vmem:[%s20092_s4 + $0x1c8] sm:$0xff]  ;;  %v11383_v61 = vcombine.low %v11317_v31, %v11321_v39 }
 0x279   :  { %v14104_v0 = vpop.f32.mrf.mxu0  ;;  %2473 = vmatprep.mubr.bf16.mxu1 %v14127_v11  ;;  %2514 = vmatprep.mubr.bf16.mxu0 %v14127_v11  ;;  %v11385_v62 = vcombine.low %v11318_v51, %v11322_v36  ;;  %v11470_v31 = vcombine.high %v1934_v10, %v1938_v44  ;;  %v1929_v51 = vld [vmem:[%s20092_s4 + $0xa0] sm:$0xff]  ;;  %v1926_v36 = vld [vmem:[%s20092_s4 + $0x88] sm:$0xff] }
 0x27a   :  { %v16190_v13 = vadd.f32 %v14104_v0, %v16142_v32  ;;  %v1958_v0 = vld [vmem:[%s20092_s4 + $0x188] sm:$0xff] }
 0x27b   :  { %2444 = vmatpush1.bf16.msra.mxu1 %v11431_v58  ;;  %2485 = vmatpush1.bf16.msra.mxu0 %v11433_v28  ;;  %v16204_v27 = vpop.f32.mrf.mxu0  ;;  %v11500_v58 = vcombine.high %v1965_v46, %v1969_v20  ;;  %v11502_v28 = vcombine.high %v1966_v40, %v1970_v47  ;;  %v11494_v56 = vcombine.high %v1958_v0, %v1962_v59 }
 0x27c   :  { %2445 = vmatprep.subr.bf16.mxu1 %v11424_v57  ;;  %2486 = vmatprep.subr.bf16.mxu0 %v11426_v8  ;;  %v1957_v57 = vld [vmem:[%s20092_s4 + $0x180] sm:$0xff] }
 0x27f   :  { %2446 = vmatpush1.bf16.msra.mxu1 %v11423_v5  ;;  %2487 = vmatpush1.bf16.msra.mxu0 %v11425_v41  ;;  %v11499_v5 = vcombine.low %v1965_v46, %v1969_v20  ;;  %v11501_v41 = vcombine.low %v1966_v40, %v1970_v47  ;;  %v11469_v46 = vcombine.low %v1934_v10, %v1938_v44 }
 0x280   :  { %2447 = vmatprep.subr.bf16.mxu1 %v11416_v24  ;;  %2488 = vmatprep.subr.bf16.mxu0 %v11418_v18  ;;  %v11492_v18 = vcombine.high %v1957_v57, %v1961_v45 }
 0x281   :  { %v14107_v2 = vpop.f32.mrf.mxu0 }
 0x282   :  { %v16219_v50 = vadd.f32 %v14107_v2, %v16142_v32  ;;  %v1941_v2 = vld [vmem:[%s20092_s4 + $0x100] sm:$0xff] }
 0x283   :  { %2448 = vmatpush1.bf16.msra.mxu1 %v11415_v23  ;;  %2489 = vmatpush1.bf16.msra.mxu0 %v11417_v43  ;;  %v1849_v48 = vpop.f32.mrf.mxu0  ;;  %v1954_v23 = vld [vmem:[%s20092_s4 + $0x168] sm:$0xff]  ;;  %v11491_v43 = vcombine.low %v1957_v57, %v1961_v45 }
 0x284   :  { %v16222_v42 = vadd.f32 %v16142_v32, %v1849_v48  ;;  %2449 = vmatprep.subr.bf16.mxu1 %v11408_v15  ;;  %2490 = vmatprep.subr.bf16.mxu0 %v11410_v53  ;;  %v11493_v15 = vcombine.low %v1958_v0, %v1962_v59  ;;  %v11484_v53 = vcombine.high %v1949_v33, %v1953_v12  ;;  %v1909_v59 = vld [vmem:[%s20092_s4] sm:$0xff] }
 0x285   :  { %v11486_v9 = vcombine.high %v1950_v35, %v1954_v23 }
 0x287   :  { %2450 = vmatpush1.bf16.msra.mxu1 %v11407_v49  ;;  %2491 = vmatpush1.bf16.msra.mxu0 %v11409_v34  ;;  %v11483_v49 = vcombine.low %v1949_v33, %v1953_v12  ;;  %v11485_v34 = vcombine.low %v1950_v35, %v1954_v23 }
 0x288   :  { %2451 = vmatprep.subr.bf16.mxu1 %v11400_v17  ;;  %2492 = vmatprep.subr.bf16.mxu0 %v11402_v25  ;;  %v11476_v17 = vcombine.high %v1941_v2, %v1945_v16 }
 0x289   :  { %v14110_v52 = vpop.f32.mrf.mxu0 }
 0x28a   :  { %v16249_v6 = vadd.f32 %v14110_v52, %v16142_v32  ;;  %v1925_v52 = vld [vmem:[%s20092_s4 + $0x80] sm:$0xff] }
 0x28b   :  { %2452 = vmatpush1.bf16.msra.mxu1 %v11399_v1  ;;  %2493 = vmatpush1.bf16.msra.mxu0 %v11401_v30  ;;  %v16263_v55 = vpop.f32.mrf.mxu0  ;;  %v11475_v30 = vcombine.low %v1941_v2, %v1945_v16  ;;  %v11460_v40 = vcombine.high %v1925_v52, %v1929_v51  ;;  %v11459_v57 = vcombine.low %v1925_v52, %v1929_v51 }
 0x28c   :  { %2453 = vmatprep.subr.bf16.mxu1 %v11392_v37  ;;  %2494 = vmatprep.subr.bf16.mxu0 %v11394_v26  ;;  %v11468_v26 = vcombine.high %v1933_v54, %v1937_v3  ;;  %v1830_v16 = vadd.f32 %v16142_v32, %v16173_v14  ;;  %v1964_v14 = vld [vmem:[%s20092_s4 + $0x1b8] sm:$0xff] }
 0x28f   :  { %2454 = vmatpush1.bf16.msra.mxu1 %v11391_v63  ;;  %2495 = vmatpush1.bf16.msra.mxu0 %v11393_v21  ;;  %v1930_v63 = vld [vmem:[%s20092_s4 + $0xa8] sm:$0xff] }
 0x290   :  { %2455 = vmatprep.subr.bf16.mxu1 %v11384_v29  ;;  %2496 = vmatprep.subr.bf16.mxu0 %v11386_v60  ;;  %v11467_v60 = vcombine.low %v1933_v54, %v1937_v3  ;;  %v11462_v47 = vcombine.high %v1926_v36, %v1930_v63  ;;  %v16399_v3 = vpack.c.bf16 %v1830_v16, %v1830_v16 }
 0x291   :  { %v14113_v8 = vpop.f32.mrf.mxu0 }
 0x292   :  { %v16278_v4 = vadd.f32 %v14113_v8, %v16142_v32  ;;  %v11461_v8 = vcombine.low %v1926_v36, %v1930_v63  ;;  %v1943_v63 = vld [vmem:[%s20092_s4 + $0x110] sm:$0xff] }
 0x293   :  { %2456 = vmatpush1.bf16.msra.mxu1 %v11383_v61  ;;  %2497 = vmatpush1.bf16.msra.mxu0 %v11385_v62  ;;  %v1869_v7 = vpop.f32.mrf.mxu0  ;;  %v1917_v61 = vld [vmem:[%s20092_s4 + $0x40] sm:$0xff] }
 0x294   :  { %v16281_v24 = vadd.f32 %v16142_v32, %v1869_v7  ;;  %2843 = vmatprep.subr.bf16.mxu1 %v11500_v58  ;;  %2884 = vmatprep.subr.bf16.mxu0 %v11502_v28  ;;  %v1921_v62 = vld [vmem:[%s20092_s4 + $0x60] sm:$0xff]  ;;  %v1918_v58 = vld [vmem:[%s20092_s4 + $0x48] sm:$0xff] }
 0x295   :  { %v1922_v28 = vld [vmem:[%s20092_s4 + $0x68] sm:$0xff]  ;;  %v11452_v45 = vcombine.high %v1917_v61, %v1921_v62  ;;  %v11451_v33 = vcombine.low %v1917_v61, %v1921_v62 }
 0x296   :  { %2474 = vmatmul.mubr.bf16.vlgmr.msra.gmra.mxu1 %v16157_v38  ;;  %2515 = vmatmul.mubr.bf16.vlgmr.msra.gmra.mxu0 %v16157_v38  ;;  %v1942_v38 = vld [vmem:[%s20092_s4 + $0x108] sm:$0xff]  ;;  %v11454_v0 = vcombine.high %v1918_v58, %v1922_v28  ;;  %v11453_v12 = vcombine.low %v1918_v58, %v1922_v28  ;;  %v1935_v58 = vld [vmem:[%s20092_s4 + $0xd0] sm:$0xff] }
 0x297   :  { %2844 = vmatpush1.bf16.msra.mxu1 %v11499_v5  ;;  %2885 = vmatpush1.bf16.msra.mxu0 %v11501_v41  ;;  %v11478_v25 = vcombine.high %v1942_v38, %v1946_v22  ;;  %v11477_v37 = vcombine.low %v1942_v38, %v1946_v22  ;;  %v1913_v5 = vld [vmem:[%s20092_s4 + $0x20] sm:$0xff]  ;;  %v1910_v41 = vld [vmem:[%s20092_s4 + $0x8] sm:$0xff]  ;;  %v1939_v28 = vld [vmem:[%s20092_s4 + $0xf0] sm:$0xff] }
 0x298   :  { %2845 = vmatprep.subr.bf16.mxu1 %v11492_v18  ;;  %2886 = vmatprep.subr.bf16.mxu0 %v11494_v56  ;;  %v1914_v18 = vld [vmem:[%s20092_s4 + $0x28] sm:$0xff]  ;;  %v11444_v35 = vcombine.high %v1909_v59, %v1913_v5  ;;  %v11443_v2 = vcombine.low %v1909_v59, %v1913_v5  ;;  %v11472_v59 = vcombine.high %v1935_v58, %v1939_v28  ;;  %v1927_v5 = vld [vmem:[%s20092_s4 + $0x90] sm:$0xff] }
 0x299   :  { %v14116_v19 = vpop.f32.mrf.mxu0  ;;  %2875 = vmatprep.mubr.bf16.mxu1 %v14127_v11  ;;  %2916 = vmatprep.mubr.bf16.mxu0 %v14127_v11  ;;  %v11446_v23 = vcombine.high %v1910_v41, %v1914_v18 }
 0x29a   :  { %v16312_v48 = vadd.f32 %v14116_v19, %v16142_v32  ;;  %v11445_v19 = vcombine.low %v1910_v41, %v1914_v18  ;;  %v1931_v41 = vld [vmem:[%s20092_s4 + $0xb0] sm:$0xff]  ;;  %v1928_v18 = vld [vmem:[%s20092_s4 + $0x98] sm:$0xff] }
 0x29b   :  { %2846 = vmatpush1.bf16.msra.mxu1 %v11491_v43  ;;  %2887 = vmatpush1.bf16.msra.mxu0 %v11493_v15  ;;  %v16326_v1 = vpop.f32.mrf.mxu0  ;;  %v1967_v43 = vld [vmem:[%s20092_s4 + $0x1d0] sm:$0xff] }
 0x29c   :  { %2847 = vmatprep.subr.bf16.mxu1 %v11484_v53  ;;  %2888 = vmatprep.subr.bf16.mxu0 %v11486_v9  ;;  %v1971_v15 = vld [vmem:[%s20092_s4 + $0x1f0] sm:$0xff]  ;;  %v1968_v53 = vld [vmem:[%s20092_s4 + $0x1d8] sm:$0xff] }
 0x29d   :  { %v1972_v9 = vld [vmem:[%s20092_s4 + $0x1f8] sm:$0xff]  ;;  %v11504_v38 = vcombine.high %v1967_v43, %v1971_v15 }
 0x29e   :  { %v11506_v22 = vcombine.high %v1968_v53, %v1972_v9  ;;  %v11505_v54 = vcombine.low %v1968_v53, %v1972_v9  ;;  %v1923_v53 = vld [vmem:[%s20092_s4 + $0x70] sm:$0xff]  ;;  %v1920_v9 = vld [vmem:[%s20092_s4 + $0x58] sm:$0xff] }
 0x29f   :  { %2848 = vmatpush1.bf16.msra.mxu1 %v11483_v49  ;;  %2889 = vmatpush1.bf16.msra.mxu0 %v11485_v34  ;;  %v1959_v49 = vld [vmem:[%s20092_s4 + $0x190] sm:$0xff] }
 0x2a0   :  { %2849 = vmatprep.subr.bf16.mxu1 %v11476_v17  ;;  %2890 = vmatprep.subr.bf16.mxu0 %v11478_v25  ;;  %v1963_v34 = vld [vmem:[%s20092_s4 + $0x1b0] sm:$0xff]  ;;  %v1960_v17 = vld [vmem:[%s20092_s4 + $0x198] sm:$0xff]  ;;  %v11503_v25 = vcombine.low %v1967_v43, %v1971_v15 }
 0x2a1   :  { %v14119_v39 = vpop.f32.mrf.mxu0  ;;  %v11496_v10 = vcombine.high %v1959_v49, %v1963_v34  ;;  %v11498_v44 = vcombine.high %v1960_v17, %v1964_v14  ;;  %v11495_v52 = vcombine.low %v1959_v49, %v1963_v34  ;;  %v1919_v15 = vld [vmem:[%s20092_s4 + $0x50] sm:$0xff] }
 0x2a2   :  { %v16341_v21 = vadd.f32 %v14119_v39, %v16142_v32  ;;  %v11497_v39 = vcombine.low %v1960_v17, %v1964_v14  ;;  %v1911_v49 = vld [vmem:[%s20092_s4 + $0x10] sm:$0xff]  ;;  %v1912_v17 = vld [vmem:[%s20092_s4 + $0x18] sm:$0xff] }
 0x2a3   :  { %2850 = vmatpush1.bf16.msra.mxu1 %v11475_v30  ;;  %2891 = vmatpush1.bf16.msra.mxu0 %v11477_v37  ;;  %v1889_v29 = vpop.f32.mrf.mxu0  ;;  %v1951_v30 = vld [vmem:[%s20092_s4 + $0x150] sm:$0xff]  ;;  %v1916_v14 = vld [vmem:[%s20092_s4 + $0x38] sm:$0xff] }
 0x2a4   :  { %v16344_v20 = vadd.f32 %v16142_v32, %v1889_v29  ;;  %2851 = vmatprep.subr.bf16.mxu1 %v11468_v26  ;;  %2892 = vmatprep.subr.bf16.mxu0 %v11470_v31  ;;  %v1955_v37 = vld [vmem:[%s20092_s4 + $0x170] sm:$0xff]  ;;  %v1952_v26 = vld [vmem:[%s20092_s4 + $0x158] sm:$0xff] }
 0x2a5   :  { %v1956_v31 = vld [vmem:[%s20092_s4 + $0x178] sm:$0xff]  ;;  %v11488_v51 = vcombine.high %v1951_v30, %v1955_v37  ;;  %v1947_v29 = vld [vmem:[%s20092_s4 + $0x130] sm:$0xff] }
 0x2a6   :  { %v11490_v36 = vcombine.high %v1952_v26, %v1956_v31  ;;  %v11480_v61 = vcombine.high %v1943_v63, %v1947_v29  ;;  %v1915_v34 = vld [vmem:[%s20092_s4 + $0x30] sm:$0xff] }
 0x2a7   :  { %2852 = vmatpush1.bf16.msra.mxu1 %v11467_v60  ;;  %2893 = vmatpush1.bf16.msra.mxu0 %v11469_v46  ;;  %v1944_v60 = vld [vmem:[%s20092_s4 + $0x118] sm:$0xff] }
 0x2a8   :  { %2853 = vmatprep.subr.bf16.mxu1 %v11460_v40  ;;  %2894 = vmatprep.subr.bf16.mxu0 %v11462_v47  ;;  %v1948_v46 = vld [vmem:[%s20092_s4 + $0x138] sm:$0xff]  ;;  %v11487_v40 = vcombine.low %v1951_v30, %v1955_v37  ;;  %v11489_v47 = vcombine.low %v1952_v26, %v1956_v31  ;;  %v11563_v30 = vld [vmem:[%s20092_s4 + $0x5c0] sm:$0xff]  ;;  %v11564_v26 = vld [vmem:[%s20092_s4 + $0x5c8] sm:$0xff] }
 0x2a9   :  { %v14122_v7 = vpop.f32.mrf.mxu0  ;;  %v11482_v62 = vcombine.high %v1944_v60, %v1948_v46  ;;  %v11567_v37 = vld [vmem:[%s20092_s4 + $0x5e0] sm:$0xff]  ;;  %v11568_v31 = vld [vmem:[%s20092_s4 + $0x5e8] sm:$0xff] }
 0x2aa   :  { %v16371_v56 = vadd.f32 %v14122_v7, %v16142_v32 }
 0x2ab   :  { %2854 = vmatpush1.bf16.msra.mxu1 %v11459_v57  ;;  %2895 = vmatpush1.bf16.msra.mxu0 %v11461_v8  ;;  %v1936_v57 = vld [vmem:[%s20092_s4 + $0xd8] sm:$0xff] }
 0x2ac   :  { %2855 = vmatprep.subr.bf16.mxu1 %v11452_v45  ;;  %2896 = vmatprep.subr.bf16.mxu0 %v11454_v0  ;;  %v1940_v8 = vld [vmem:[%s20092_s4 + $0xf8] sm:$0xff]  ;;  %v11479_v45 = vcombine.low %v1943_v63, %v1947_v29  ;;  %v11481_v0 = vcombine.low %v1944_v60, %v1948_v46  ;;  %v11555_v63 = vld [vmem:[%s20092_s4 + $0x580] sm:$0xff]  ;;  %v11556_v60 = vld [vmem:[%s20092_s4 + $0x588] sm:$0xff] }
 0x2ad   :  { %v11474_v7 = vcombine.high %v1936_v57, %v1940_v8  ;;  %v11559_v29 = vld [vmem:[%s20092_s4 + $0x5a0] sm:$0xff]  ;;  %v11560_v46 = vld [vmem:[%s20092_s4 + $0x5a8] sm:$0xff] }
 0x2af   :  { %2856 = vmatpush1.bf16.msra.mxu1 %v11451_v33  ;;  %2897 = vmatpush1.bf16.msra.mxu0 %v11453_v12  ;;  %v1932_v33 = vld [vmem:[%s20092_s4 + $0xb8] sm:$0xff]  ;;  %v11471_v12 = vcombine.low %v1935_v58, %v1939_v28  ;;  %v11547_v58 = vld [vmem:[%s20092_s4 + $0x540] sm:$0xff] }
 0x2b0   :  { %2857 = vmatprep.subr.bf16.mxu1 %v11444_v35  ;;  %2898 = vmatprep.subr.bf16.mxu0 %v11446_v23  ;;  %v11473_v35 = vcombine.low %v1936_v57, %v1940_v8  ;;  %v11464_v23 = vcombine.high %v1927_v5, %v1931_v41  ;;  %v11466_v43 = vcombine.high %v1928_v18, %v1932_v33  ;;  %v11551_v28 = vld [vmem:[%s20092_s4 + $0x560] sm:$0xff]  ;;  %v11548_v57 = vld [vmem:[%s20092_s4 + $0x548] sm:$0xff] }
 0x2b1   :  { %v11465_v16 = vcombine.low %v1928_v18, %v1932_v33  ;;  %v11552_v8 = vld [vmem:[%s20092_s4 + $0x568] sm:$0xff]  ;;  %v11611_v33 = vcombine.low %v11547_v58, %v11551_v28 }
 0x2b2   :  { %v11544_v18 = vld [vmem:[%s20092_s4 + $0x528] sm:$0xff] }
 0x2b3   :  { %2858 = vmatpush1.bf16.msra.mxu1 %v11443_v2  ;;  %2899 = vmatpush1.bf16.msra.mxu0 %v11445_v19  ;;  %v1924_v2 = vld [vmem:[%s20092_s4 + $0x78] sm:$0xff]  ;;  %v11463_v19 = vcombine.low %v1927_v5, %v1931_v41  ;;  %v11539_v5 = vld [vmem:[%s20092_s4 + $0x500] sm:$0xff] }
 0x2b4   :  { %2925 = vmatprep.subr.bf16.mxu1 %v11504_v38  ;;  %2966 = vmatprep.subr.bf16.mxu0 %v11506_v22  ;;  %v11456_v38 = vcombine.high %v1919_v15, %v1923_v53  ;;  %v11458_v22 = vcombine.high %v1920_v9, %v1924_v2  ;;  %v11543_v41 = vld [vmem:[%s20092_s4 + $0x520] sm:$0xff] }
 0x2b6   :  { %2876 = vmatmul.mubr.bf16.vlgmr.msra.gmra.mxu1 %v16399_v3  ;;  %2917 = vmatmul.mubr.bf16.vlgmr.msra.gmra.mxu0 %v16399_v3 }
 0x2b7   :  { %2926 = vmatpush1.bf16.msra.mxu1 %v11503_v25  ;;  %2967 = vmatpush1.bf16.msra.mxu0 %v11505_v54  ;;  %v11455_v25 = vcombine.low %v1919_v15, %v1923_v53  ;;  %v11457_v54 = vcombine.low %v1920_v9, %v1924_v2  ;;  %v11535_v15 = vld [vmem:[%s20092_s4 + $0x4e0] sm:$0xff]  ;;  %v11532_v53 = vld [vmem:[%s20092_s4 + $0x4c8] sm:$0xff]  ;;  %v11603_v2 = vcombine.low %v11539_v5, %v11543_v41 }
 0x2b8   :  { %2927 = vmatprep.subr.bf16.mxu1 %v11496_v10  ;;  %2968 = vmatprep.subr.bf16.mxu0 %v11498_v44  ;;  %v11448_v10 = vcombine.high %v1911_v49, %v1915_v34  ;;  %v11450_v44 = vcombine.high %v1912_v17, %v1916_v14  ;;  %v11536_v9 = vld [vmem:[%s20092_s4 + $0x4e8] sm:$0xff] }
 0x2b9   :  { %2957 = vmatprep.mubr.bf16.mxu1 %v14127_v11  ;;  %2998 = vmatprep.mubr.bf16.mxu0 %v14127_v11 }
 0x2bb   :  { %2928 = vmatpush1.bf16.msra.mxu1 %v11495_v52  ;;  %2969 = vmatpush1.bf16.msra.mxu0 %v11497_v39  ;;  %v11447_v52 = vcombine.low %v1911_v49, %v1915_v34  ;;  %v11449_v39 = vcombine.low %v1912_v17, %v1916_v14  ;;  %v11527_v49 = vld [vmem:[%s20092_s4 + $0x4a0] sm:$0xff]  ;;  %v11524_v34 = vld [vmem:[%s20092_s4 + $0x488] sm:$0xff] }
 0x2bc   :  { %2929 = vmatprep.subr.bf16.mxu1 %v11488_v51  ;;  %2970 = vmatprep.subr.bf16.mxu0 %v11490_v36  ;;  %v11628_v51 = vcombine.high %v11563_v30, %v11567_v37  ;;  %v11630_v36 = vcombine.high %v11564_v26, %v11568_v31  ;;  %v11528_v17 = vld [vmem:[%s20092_s4 + $0x4a8] sm:$0xff] }
 0x2bf   :  { %2930 = vmatpush1.bf16.msra.mxu1 %v11487_v40  ;;  %2971 = vmatpush1.bf16.msra.mxu0 %v11489_v47  ;;  %v11627_v40 = vcombine.low %v11563_v30, %v11567_v37  ;;  %v11629_v47 = vcombine.low %v11564_v26, %v11568_v31  ;;  %v11519_v30 = vld [vmem:[%s20092_s4 + $0x460] sm:$0xff]  ;;  %v11516_v37 = vld [vmem:[%s20092_s4 + $0x448] sm:$0xff] }
 0x2c0   :  { %2931 = vmatprep.subr.bf16.mxu1 %v11480_v61  ;;  %2972 = vmatprep.subr.bf16.mxu0 %v11482_v62  ;;  %v11620_v61 = vcombine.high %v11555_v63, %v11559_v29  ;;  %v11622_v62 = vcombine.high %v11556_v60, %v11560_v46  ;;  %v11520_v26 = vld [vmem:[%s20092_s4 + $0x468] sm:$0xff] }
 0x2c3   :  { %2932 = vmatpush1.bf16.msra.mxu1 %v11479_v45  ;;  %2973 = vmatpush1.bf16.msra.mxu0 %v11481_v0  ;;  %v11619_v45 = vcombine.low %v11555_v63, %v11559_v29  ;;  %v11621_v0 = vcombine.low %v11556_v60, %v11560_v46  ;;  %v11511_v63 = vld [vmem:[%s20092_s4 + $0x420] sm:$0xff]  ;;  %v11508_v29 = vld [vmem:[%s20092_s4 + $0x408] sm:$0xff] }
 0x2c4   :  { %2933 = vmatprep.subr.bf16.mxu1 %v11472_v59  ;;  %2974 = vmatprep.subr.bf16.mxu0 %v11474_v7  ;;  %v11612_v59 = vcombine.high %v11547_v58, %v11551_v28  ;;  %v11614_v7 = vcombine.high %v11548_v57, %v11552_v8  ;;  %v11512_v60 = vld [vmem:[%s20092_s4 + $0x428] sm:$0xff]  ;;  %v11569_v58 = vld [vmem:[%s20092_s4 + $0x5f0] sm:$0xff]  ;;  %v11566_v28 = vld [vmem:[%s20092_s4 + $0x5d8] sm:$0xff] }
 0x2c7   :  { %2934 = vmatpush1.bf16.msra.mxu1 %v11471_v12  ;;  %2975 = vmatpush1.bf16.msra.mxu0 %v11473_v35  ;;  %v11613_v12 = vcombine.low %v11548_v57, %v11552_v8  ;;  %v11604_v35 = vcombine.high %v11539_v5, %v11543_v41  ;;  %v11570_v57 = vld [vmem:[%s20092_s4 + $0x5f8] sm:$0xff]  ;;  %v11557_v5 = vld [vmem:[%s20092_s4 + $0x590] sm:$0xff] }
 0x2c8   :  { %2935 = vmatprep.subr.bf16.mxu1 %v11464_v23  ;;  %2976 = vmatprep.subr.bf16.mxu0 %v11466_v43  ;;  %v11531_v43 = vld [vmem:[%s20092_s4 + $0x4c0] sm:$0xff]  ;;  %v11561_v41 = vld [vmem:[%s20092_s4 + $0x5b0] sm:$0xff] }
 0x2c9   :  { %v11595_v14 = vcombine.low %v11531_v43, %v11535_v15 }
 0x2cb   :  { %2936 = vmatpush1.bf16.msra.mxu1 %v11463_v19  ;;  %2977 = vmatpush1.bf16.msra.mxu0 %v11465_v16  ;;  %v11596_v16 = vcombine.high %v11531_v43, %v11535_v15  ;;  %v11553_v43 = vld [vmem:[%s20092_s4 + $0x570] sm:$0xff]  ;;  %v11550_v15 = vld [vmem:[%s20092_s4 + $0x558] sm:$0xff] }
 0x2cc   :  { %2937 = vmatprep.subr.bf16.mxu1 %v11456_v38  ;;  %2978 = vmatprep.subr.bf16.mxu0 %v11458_v22  ;;  %v11598_v38 = vcombine.high %v11532_v53, %v11536_v9  ;;  %v11523_v22 = vld [vmem:[%s20092_s4 + $0x480] sm:$0xff] }
 0x2cd   :  { %v11587_v31 = vcombine.low %v11523_v22, %v11527_v49 }
 0x2cf   :  { %2938 = vmatpush1.bf16.msra.mxu1 %v11455_v25  ;;  %2979 = vmatpush1.bf16.msra.mxu0 %v11457_v54  ;;  %v11597_v25 = vcombine.low %v11532_v53, %v11536_v9  ;;  %v11588_v54 = vcombine.high %v11523_v22, %v11527_v49  ;;  %v11554_v53 = vld [vmem:[%s20092_s4 + $0x578] sm:$0xff]  ;;  %v11623_v9 = vcombine.low %v11557_v5, %v11561_v41  ;;  %v11545_v22 = vld [vmem:[%s20092_s4 + $0x530] sm:$0xff] }
 0x2d0   :  { %2939 = vmatprep.subr.bf16.mxu1 %v11448_v10  ;;  %2980 = vmatprep.subr.bf16.mxu0 %v11450_v44  ;;  %v11590_v10 = vcombine.high %v11524_v34, %v11528_v17  ;;  %v11515_v44 = vld [vmem:[%s20092_s4 + $0x440] sm:$0xff]  ;;  %v11542_v49 = vld [vmem:[%s20092_s4 + $0x518] sm:$0xff] }
 0x2d1   :  { %v11579_v46 = vcombine.low %v11515_v44, %v11519_v30 }
 0x2d3   :  { %2940 = vmatpush1.bf16.msra.mxu1 %v11447_v52  ;;  %2981 = vmatpush1.bf16.msra.mxu0 %v11449_v39  ;;  %v11589_v52 = vcombine.low %v11524_v34, %v11528_v17  ;;  %v11580_v39 = vcombine.high %v11515_v44, %v11519_v30  ;;  %v11546_v34 = vld [vmem:[%s20092_s4 + $0x538] sm:$0xff]  ;;  %v11537_v44 = vld [vmem:[%s20092_s4 + $0x4f0] sm:$0xff] }
 0x2d4   :  { %3393 = vmatprep.subr.bf16.mxu1 %v11628_v51  ;;  %3434 = vmatprep.subr.bf16.mxu0 %v11630_v36  ;;  %v11582_v51 = vcombine.high %v11516_v37, %v11520_v26  ;;  %v11507_v36 = vld [vmem:[%s20092_s4 + $0x400] sm:$0xff]  ;;  %v11534_v30 = vld [vmem:[%s20092_s4 + $0x4d8] sm:$0xff] }
 0x2d5   :  { %v11571_v8 = vcombine.low %v11507_v36, %v11511_v63 }
 0x2d6   :  { %2958 = vmatmul.mubr.bf16.vlgmr.msra.gmra.mxu1 %v16399_v3  ;;  %2999 = vmatmul.mubr.bf16.vlgmr.msra.gmra.mxu0 %v16399_v3  ;;  %v11540_v3 = vld [vmem:[%s20092_s4 + $0x508] sm:$0xff] }
 0x2d7   :  { %3394 = vmatpush1.bf16.msra.mxu1 %v11627_v40  ;;  %3435 = vmatpush1.bf16.msra.mxu0 %v11629_v47  ;;  %v11606_v23 = vcombine.high %v11540_v3, %v11544_v18  ;;  %v11605_v19 = vcombine.low %v11540_v3, %v11544_v18  ;;  %v11581_v40 = vcombine.low %v11516_v37, %v11520_v26  ;;  %v11558_v3 = vld [vmem:[%s20092_s4 + $0x598] sm:$0xff] }
 0x2d8   :  { %3395 = vmatprep.subr.bf16.mxu1 %v11620_v61  ;;  %3436 = vmatprep.subr.bf16.mxu0 %v11622_v62  ;;  %v11572_v47 = vcombine.high %v11507_v36, %v11511_v63  ;;  %v11574_v61 = vcombine.high %v11508_v29, %v11512_v60  ;;  %v11565_v62 = vld [vmem:[%s20092_s4 + $0x5d0] sm:$0xff]  ;;  %v11633_v18 = vcombine.low %v11566_v28, %v11570_v57  ;;  %v11538_v37 = vld [vmem:[%s20092_s4 + $0x4f8] sm:$0xff] }
 0x2d9   :  { %3425 = vmatprep.mubr.bf16.mxu1 %v14127_v11  ;;  %3466 = vmatprep.mubr.bf16.mxu0 %v14127_v11  ;;  %v11529_v36 = vld [vmem:[%s20092_s4 + $0x4b0] sm:$0xff]  ;;  %v11526_v63 = vld [vmem:[%s20092_s4 + $0x498] sm:$0xff] }
 0x2db   :  { %3396 = vmatpush1.bf16.msra.mxu1 %v11619_v45  ;;  %3437 = vmatpush1.bf16.msra.mxu0 %v11621_v0  ;;  %v11573_v45 = vcombine.low %v11508_v29, %v11512_v60  ;;  %v1840_v0 = vadd.f32 %v16142_v32, %v16204_v27  ;;  %v11562_v32 = vld [vmem:[%s20092_s4 + $0x5b8] sm:$0xff]  ;;  %v11631_v27 = vcombine.low %v11565_v62, %v11569_v58 }
 0x2dc   :  { %3397 = vmatprep.subr.bf16.mxu1 %v11612_v59  ;;  %3438 = vmatprep.subr.bf16.mxu0 %v11614_v7  ;;  %v11632_v59 = vcombine.high %v11565_v62, %v11569_v58  ;;  %v11634_v7 = vcombine.high %v11566_v28, %v11570_v57  ;;  %v11530_v29 = vld [vmem:[%s20092_s4 + $0x4b8] sm:$0xff]  ;;  %v11521_v62 = vld [vmem:[%s20092_s4 + $0x470] sm:$0xff] }
 0x2dd   :  { %v11518_v58 = vld [vmem:[%s20092_s4 + $0x458] sm:$0xff] }
 0x2de   :  { %v11522_v28 = vld [vmem:[%s20092_s4 + $0x478] sm:$0xff] }
 0x2df   :  { %3398 = vmatpush1.bf16.msra.mxu1 %v11611_v33  ;;  %3439 = vmatpush1.bf16.msra.mxu0 %v11613_v12  ;;  %v16603_v33 = vpack.c.bf16 %v1840_v0, %v1840_v0  ;;  %v11624_v12 = vcombine.high %v11557_v5, %v11561_v41  ;;  %v11586_v0 = vcombine.high %v11518_v58, %v11522_v28  ;;  %v11510_v5 = vld [vmem:[%s20092_s4 + $0x418] sm:$0xff] }
 0x2e0   :  { %3399 = vmatprep.subr.bf16.mxu1 %v11604_v35  ;;  %3440 = vmatprep.subr.bf16.mxu0 %v11606_v23  ;;  %v11626_v35 = vcombine.high %v11558_v3, %v11562_v32  ;;  %v11549_v23 = vld [vmem:[%s20092_s4 + $0x550] sm:$0xff]  ;;  %v11514_v41 = vld [vmem:[%s20092_s4 + $0x438] sm:$0xff] }
 0x2e1   :  { %v11615_v17 = vcombine.low %v11549_v23, %v11553_v43 }
 0x2e3   :  { %3400 = vmatpush1.bf16.msra.mxu1 %v11603_v2  ;;  %3441 = vmatpush1.bf16.msra.mxu0 %v11605_v19  ;;  %v11625_v2 = vcombine.low %v11558_v3, %v11562_v32  ;;  %v11616_v19 = vcombine.high %v11549_v23, %v11553_v43  ;;  %v11585_v32 = vcombine.low %v11518_v58, %v11522_v28  ;;  %v11692_v23 = vld [vmem:[%s20092_s4 + $0x7c8] sm:$0xff] }
 0x2e4   :  { %3401 = vmatprep.subr.bf16.mxu1 %v11596_v16  ;;  %3442 = vmatprep.subr.bf16.mxu0 %v11598_v38  ;;  %v11618_v16 = vcombine.high %v11550_v15, %v11554_v53  ;;  %v11541_v38 = vld [vmem:[%s20092_s4 + $0x510] sm:$0xff]  ;;  %v11696_v43 = vld [vmem:[%s20092_s4 + $0x7e8] sm:$0xff] }
 0x2e5   :  { %v11607_v26 = vcombine.low %v11541_v38, %v11545_v22 }
 0x2e7   :  { %3402 = vmatpush1.bf16.msra.mxu1 %v11595_v14  ;;  %3443 = vmatpush1.bf16.msra.mxu0 %v11597_v25  ;;  %v11617_v14 = vcombine.low %v11550_v15, %v11554_v53  ;;  %v11608_v25 = vcombine.high %v11541_v38, %v11545_v22  ;;  %v11577_v53 = vcombine.low %v11510_v5, %v11514_v41  ;;  %v11684_v38 = vld [vmem:[%s20092_s4 + $0x788] sm:$0xff] }
 0x2e8   :  { %3403 = vmatprep.subr.bf16.mxu1 %v11588_v54  ;;  %3444 = vmatprep.subr.bf16.mxu0 %v11590_v10  ;;  %v11610_v54 = vcombine.high %v11542_v49, %v11546_v34  ;;  %v11533_v10 = vld [vmem:[%s20092_s4 + $0x4d0] sm:$0xff]  ;;  %v11688_v22 = vld [vmem:[%s20092_s4 + $0x7a8] sm:$0xff] }
 0x2e9   :  { %v11599_v60 = vcombine.low %v11533_v10, %v11537_v44 }
 0x2eb   :  { %3404 = vmatpush1.bf16.msra.mxu1 %v11587_v31  ;;  %3445 = vmatpush1.bf16.msra.mxu0 %v11589_v52  ;;  %v11609_v31 = vcombine.low %v11542_v49, %v11546_v34  ;;  %v11600_v52 = vcombine.high %v11533_v10, %v11537_v44  ;;  %v11757_v34 = vcombine.low %v11692_v23, %v11696_v43  ;;  %v11676_v10 = vld [vmem:[%s20092_s4 + $0x748] sm:$0xff] }
 0x2ec   :  { %3405 = vmatprep.subr.bf16.mxu1 %v11580_v39  ;;  %3446 = vmatprep.subr.bf16.mxu0 %v11582_v51  ;;  %v11602_v39 = vcombine.high %v11534_v30, %v11538_v37  ;;  %v11525_v51 = vld [vmem:[%s20092_s4 + $0x490] sm:$0xff]  ;;  %v11680_v44 = vld [vmem:[%s20092_s4 + $0x768] sm:$0xff] }
 0x2ed   :  { %v11591_v57 = vcombine.low %v11525_v51, %v11529_v36 }
 0x2ef   :  { %3406 = vmatpush1.bf16.msra.mxu1 %v11579_v46  ;;  %3447 = vmatpush1.bf16.msra.mxu0 %v11581_v40  ;;  %v11601_v46 = vcombine.low %v11534_v30, %v11538_v37  ;;  %v11592_v40 = vcombine.high %v11525_v51, %v11529_v36  ;;  %v11749_v37 = vcombine.low %v11684_v38, %v11688_v22  ;;  %v11672_v51 = vld [vmem:[%s20092_s4 + $0x728] sm:$0xff] }
 0x2f0   :  { %3407 = vmatprep.subr.bf16.mxu1 %v11572_v47  ;;  %3448 = vmatprep.subr.bf16.mxu0 %v11574_v61  ;;  %v11594_v47 = vcombine.high %v11526_v63, %v11530_v29  ;;  %v11517_v61 = vld [vmem:[%s20092_s4 + $0x450] sm:$0xff] }
 0x2f1   :  { %v11583_v3 = vcombine.low %v11517_v61, %v11521_v62 }
 0x2f3   :  { %3408 = vmatpush1.bf16.msra.mxu1 %v11571_v8  ;;  %3449 = vmatpush1.bf16.msra.mxu0 %v11573_v45  ;;  %v11593_v8 = vcombine.low %v11526_v63, %v11530_v29  ;;  %v11584_v45 = vcombine.high %v11517_v61, %v11521_v62  ;;  %v11741_v63 = vcombine.low %v11676_v10, %v11680_v44  ;;  %v11664_v61 = vld [vmem:[%s20092_s4 + $0x6e8] sm:$0xff] }
 0x2f4   :  { %3475 = vmatprep.subr.bf16.mxu1 %v11632_v59  ;;  %3516 = vmatprep.subr.bf16.mxu0 %v11634_v7  ;;  %v11509_v59 = vld [vmem:[%s20092_s4 + $0x410] sm:$0xff] }
 0x2f5   :  { %v11513_v7 = vld [vmem:[%s20092_s4 + $0x430] sm:$0xff] }
 0x2f6   :  { %3426 = vmatmul.mubr.bf16.vlgmr.msra.gmra.mxu1 %v16603_v33  ;;  %3467 = vmatmul.mubr.bf16.vlgmr.msra.gmra.mxu0 %v16603_v33  ;;  %v11575_v15 = vcombine.low %v11509_v59, %v11513_v7 }
 0x2f7   :  { %3476 = vmatpush1.bf16.msra.mxu1 %v11631_v27  ;;  %3517 = vmatpush1.bf16.msra.mxu0 %v11633_v18  ;;  %v11576_v27 = vcombine.high %v11509_v59, %v11513_v7  ;;  %v11578_v18 = vcombine.high %v11510_v5, %v11514_v41  ;;  %v11656_v59 = vld [vmem:[%s20092_s4 + $0x6a8] sm:$0xff] }
 0x2f8   :  { %3477 = vmatprep.subr.bf16.mxu1 %v11624_v12  ;;  %3518 = vmatprep.subr.bf16.mxu0 %v11626_v35  ;;  %v11691_v12 = vld [vmem:[%s20092_s4 + $0x7c0] sm:$0xff] }
 0x2f9   :  { %3507 = vmatprep.mubr.bf16.mxu1 %v14127_v11  ;;  %3548 = vmatprep.mubr.bf16.mxu0 %v14127_v11  ;;  %v11695_v35 = vld [vmem:[%s20092_s4 + $0x7e0] sm:$0xff] }
 0x2fa   :  { %v11755_v49 = vcombine.low %v11691_v12, %v11695_v35 }
 0x2fb   :  { %3478 = vmatpush1.bf16.msra.mxu1 %v11623_v9  ;;  %3519 = vmatpush1.bf16.msra.mxu0 %v11625_v2  ;;  %v11756_v9 = vcombine.high %v11691_v12, %v11695_v35  ;;  %v11758_v2 = vcombine.high %v11692_v23, %v11696_v43  ;;  %v11648_v12 = vld [vmem:[%s20092_s4 + $0x668] sm:$0xff] }
 0x2fc   :  { %3479 = vmatprep.subr.bf16.mxu1 %v11616_v19  ;;  %3520 = vmatprep.subr.bf16.mxu0 %v11618_v16  ;;  %v11683_v19 = vld [vmem:[%s20092_s4 + $0x780] sm:$0xff] }
 0x2fd   :  { %v11687_v16 = vld [vmem:[%s20092_s4 + $0x7a0] sm:$0xff] }
 0x2fe   :  { %v11747_v30 = vcombine.low %v11683_v19, %v11687_v16 }
 0x2ff   :  { %3480 = vmatpush1.bf16.msra.mxu1 %v11615_v17  ;;  %3521 = vmatpush1.bf16.msra.mxu0 %v11617_v14  ;;  %v11748_v17 = vcombine.high %v11683_v19, %v11687_v16  ;;  %v11750_v14 = vcombine.high %v11684_v38, %v11688_v22  ;;  %v11640_v19 = vld [vmem:[%s20092_s4 + $0x628] sm:$0xff] }
 0x300   :  { %3481 = vmatprep.subr.bf16.mxu1 %v11608_v25  ;;  %3522 = vmatprep.subr.bf16.mxu0 %v11610_v54  ;;  %v11675_v25 = vld [vmem:[%s20092_s4 + $0x740] sm:$0xff] }
 0x301   :  { %v11679_v54 = vld [vmem:[%s20092_s4 + $0x760] sm:$0xff] }
 0x302   :  { %v11739_v36 = vcombine.low %v11675_v25, %v11679_v54 }
 0x303   :  { %3482 = vmatpush1.bf16.msra.mxu1 %v11607_v26  ;;  %3523 = vmatpush1.bf16.msra.mxu0 %v11609_v31  ;;  %v11740_v26 = vcombine.high %v11675_v25, %v11679_v54  ;;  %v11742_v31 = vcombine.high %v11676_v10, %v11680_v44  ;;  %v11698_v25 = vld [vmem:[%s20092_s4 + $0x7f8] sm:$0xff] }
 0x304   :  { %3483 = vmatprep.subr.bf16.mxu1 %v11600_v52  ;;  %3524 = vmatprep.subr.bf16.mxu0 %v11602_v39  ;;  %v11667_v52 = vld [vmem:[%s20092_s4 + $0x700] sm:$0xff] }
 0x305   :  { %v11671_v39 = vld [vmem:[%s20092_s4 + $0x720] sm:$0xff] }
 0x306   :  { %v11732_v29 = vcombine.high %v11667_v52, %v11671_v39  ;;  %v11731_v62 = vcombine.low %v11667_v52, %v11671_v39  ;;  %v11690_v52 = vld [vmem:[%s20092_s4 + $0x7b8] sm:$0xff] }
 0x307   :  { %3484 = vmatpush1.bf16.msra.mxu1 %v11599_v60  ;;  %3525 = vmatpush1.bf16.msra.mxu0 %v11601_v46  ;;  %v11659_v46 = vld [vmem:[%s20092_s4 + $0x6c0] sm:$0xff] }
 0x308   :  { %3485 = vmatprep.subr.bf16.mxu1 %v11592_v40  ;;  %3526 = vmatprep.subr.bf16.mxu0 %v11594_v47  ;;  %v11663_v40 = vld [vmem:[%s20092_s4 + $0x6e0] sm:$0xff]  ;;  %v11660_v47 = vld [vmem:[%s20092_s4 + $0x6c8] sm:$0xff] }
 0x309   :  { %v11724_v28 = vcombine.high %v11659_v46, %v11663_v40  ;;  %v11723_v7 = vcombine.low %v11659_v46, %v11663_v40  ;;  %v11725_v5 = vcombine.low %v11660_v47, %v11664_v61  ;;  %v11681_v46 = vld [vmem:[%s20092_s4 + $0x770] sm:$0xff]  ;;  %v11678_v40 = vld [vmem:[%s20092_s4 + $0x758] sm:$0xff] }
 0x30b   :  { %3486 = vmatpush1.bf16.msra.mxu1 %v11591_v57  ;;  %3527 = vmatpush1.bf16.msra.mxu0 %v11593_v8  ;;  %v11726_v57 = vcombine.high %v11660_v47, %v11664_v61  ;;  %v11651_v8 = vld [vmem:[%s20092_s4 + $0x680] sm:$0xff] }
 0x30c   :  { %3487 = vmatprep.subr.bf16.mxu1 %v11584_v45  ;;  %3528 = vmatprep.subr.bf16.mxu0 %v11586_v0  ;;  %v11655_v45 = vld [vmem:[%s20092_s4 + $0x6a0] sm:$0xff]  ;;  %v11652_v0 = vld [vmem:[%s20092_s4 + $0x688] sm:$0xff] }
 0x30d   :  { %v11716_v41 = vcombine.high %v11651_v8, %v11655_v45  ;;  %v11715_v35 = vcombine.low %v11651_v8, %v11655_v45  ;;  %v11717_v23 = vcombine.low %v11652_v0, %v11656_v59 }
 0x30f   :  { %3488 = vmatpush1.bf16.msra.mxu1 %v11583_v3  ;;  %3529 = vmatpush1.bf16.msra.mxu0 %v11585_v32  ;;  %v11718_v3 = vcombine.high %v11652_v0, %v11656_v59  ;;  %v11643_v32 = vld [vmem:[%s20092_s4 + $0x640] sm:$0xff]  ;;  %v11669_v0 = vld [vmem:[%s20092_s4 + $0x710] sm:$0xff] }
 0x310   :  { %3489 = vmatprep.subr.bf16.mxu1 %v11576_v27  ;;  %3530 = vmatprep.subr.bf16.mxu0 %v11578_v18  ;;  %v11647_v27 = vld [vmem:[%s20092_s4 + $0x660] sm:$0xff]  ;;  %v11644_v18 = vld [vmem:[%s20092_s4 + $0x648] sm:$0xff]  ;;  %v11673_v59 = vld [vmem:[%s20092_s4 + $0x730] sm:$0xff] }
 0x311   :  { %v11708_v43 = vcombine.high %v11643_v32, %v11647_v27  ;;  %v11707_v16 = vcombine.low %v11643_v32, %v11647_v27  ;;  %v11709_v38 = vcombine.low %v11644_v18, %v11648_v12 }
 0x313   :  { %3490 = vmatpush1.bf16.msra.mxu1 %v11575_v15  ;;  %3531 = vmatpush1.bf16.msra.mxu0 %v11577_v53  ;;  %v11710_v15 = vcombine.high %v11644_v18, %v11648_v12  ;;  %v11635_v53 = vld [vmem:[%s20092_s4 + $0x600] sm:$0xff] }
 0x314   :  { %3951 = vmatprep.subr.bf16.mxu1 %v11756_v9  ;;  %3992 = vmatprep.subr.bf16.mxu0 %v11758_v2  ;;  %v11639_v9 = vld [vmem:[%s20092_s4 + $0x620] sm:$0xff]  ;;  %v11636_v2 = vld [vmem:[%s20092_s4 + $0x608] sm:$0xff] }
 0x315   :  { %v11700_v22 = vcombine.high %v11635_v53, %v11639_v9  ;;  %v11699_v54 = vcombine.low %v11635_v53, %v11639_v9  ;;  %v11701_v10 = vcombine.low %v11636_v2, %v11640_v19  ;;  %v11662_v53 = vld [vmem:[%s20092_s4 + $0x6d8] sm:$0xff] }
 0x316   :  { %3508 = vmatmul.mubr.bf16.vlgmr.msra.gmra.mxu1 %v16603_v33  ;;  %3549 = vmatmul.mubr.bf16.vlgmr.msra.gmra.mxu0 %v16603_v33  ;;  %v11668_v33 = vld [vmem:[%s20092_s4 + $0x708] sm:$0xff]  ;;  %v11666_v9 = vld [vmem:[%s20092_s4 + $0x6f8] sm:$0xff] }
 0x317   :  { %3952 = vmatpush1.bf16.msra.mxu1 %v11755_v49  ;;  %3993 = vmatpush1.bf16.msra.mxu0 %v11757_v34  ;;  %v11734_v60 = vcombine.high %v11668_v33, %v11672_v51  ;;  %v11733_v58 = vcombine.low %v11668_v33, %v11672_v51  ;;  %v11702_v49 = vcombine.high %v11636_v2, %v11640_v19  ;;  %v11693_v34 = vld [vmem:[%s20092_s4 + $0x7d0] sm:$0xff] }
 0x318   :  { %3953 = vmatprep.subr.bf16.mxu1 %v11748_v17  ;;  %3994 = vmatprep.subr.bf16.mxu0 %v11750_v14  ;;  %v11697_v17 = vld [vmem:[%s20092_s4 + $0x7f0] sm:$0xff]  ;;  %v11694_v14 = vld [vmem:[%s20092_s4 + $0x7d8] sm:$0xff]  ;;  %v16807_v51 = vpack.c.bf16 %v16190_v13, %v16190_v13  ;;  %v11735_v2 = vcombine.low %v11669_v0, %v11673_v59 }
 0x319   :  { %3983 = vmatprep.mubr.bf16.mxu1 %v14127_v11  ;;  %4024 = vmatprep.mubr.bf16.mxu0 %v14127_v11  ;;  %v11760_v44 = vcombine.high %v11693_v34, %v11697_v17  ;;  %v11759_v39 = vcombine.low %v11693_v34, %v11697_v17  ;;  %v11761_v33 = vcombine.low %v11694_v14, %v11698_v25  ;;  %v11682_v13 = vld [vmem:[%s20092_s4 + $0x778] sm:$0xff] }
 0x31a   :  { %v11746_v45 = vcombine.high %v11678_v40, %v11682_v13  ;;  %v11745_v27 = vcombine.low %v11678_v40, %v11682_v13  ;;  %v11654_v34 = vld [vmem:[%s20092_s4 + $0x698] sm:$0xff] }
 0x31b   :  { %3954 = vmatpush1.bf16.msra.mxu1 %v11747_v30  ;;  %3995 = vmatpush1.bf16.msra.mxu0 %v11749_v37  ;;  %v11762_v30 = vcombine.high %v11694_v14, %v11698_v25  ;;  %v11685_v37 = vld [vmem:[%s20092_s4 + $0x790] sm:$0xff]  ;;  %v11658_v17 = vld [vmem:[%s20092_s4 + $0x6b8] sm:$0xff]  ;;  %v11729_v25 = vcombine.low %v11662_v53, %v11666_v9 }
 0x31c   :  { %3955 = vmatprep.subr.bf16.mxu1 %v11740_v26  ;;  %3996 = vmatprep.subr.bf16.mxu0 %v11742_v31  ;;  %v11689_v26 = vld [vmem:[%s20092_s4 + $0x7b0] sm:$0xff]  ;;  %v11686_v31 = vld [vmem:[%s20092_s4 + $0x798] sm:$0xff] }
 0x31f   :  { %3956 = vmatpush1.bf16.msra.mxu1 %v11739_v36  ;;  %3997 = vmatpush1.bf16.msra.mxu0 %v11741_v63  ;;  %v16809_v36 = vpop.f32.mrf.mxu0  ;;  %v11752_v63 = vcombine.high %v11685_v37, %v11689_v26 }
 0x320   :  { %3957 = vmatprep.subr.bf16.mxu1 %v11732_v29  ;;  %3998 = vmatprep.subr.bf16.mxu0 %v11734_v60  ;;  %v11754_v29 = vcombine.high %v11686_v31, %v11690_v52  ;;  %v11677_v60 = vld [vmem:[%s20092_s4 + $0x750] sm:$0xff] }
 0x321   :  { %v11744_v8 = vcombine.high %v11677_v60, %v11681_v46  ;;  %v11743_v32 = vcombine.low %v11677_v60, %v11681_v46  ;;  %v11638_v60 = vld [vmem:[%s20092_s4 + $0x618] sm:$0xff] }
 0x322   :  { %v11642_v46 = vld [vmem:[%s20092_s4 + $0x638] sm:$0xff] }
 0x323   :  { %3958 = vmatpush1.bf16.msra.mxu1 %v11731_v62  ;;  %3999 = vmatpush1.bf16.msra.mxu0 %v11733_v58  ;;  %v11751_v62 = vcombine.low %v11685_v37, %v11689_v26  ;;  %v11753_v58 = vcombine.low %v11686_v31, %v11690_v52  ;;  %v11646_v37 = vld [vmem:[%s20092_s4 + $0x658] sm:$0xff]  ;;  %v11721_v52 = vcombine.low %v11654_v34, %v11658_v17 }
 0x324   :  { %3959 = vmatprep.subr.bf16.mxu1 %v11724_v28  ;;  %4000 = vmatprep.subr.bf16.mxu0 %v11726_v57  ;;  %v11650_v26 = vld [vmem:[%s20092_s4 + $0x678] sm:$0xff] }
 0x325   :  { %v11713_v13 = vcombine.low %v11646_v37, %v11650_v26 }
 0x327   :  { %3960 = vmatpush1.bf16.msra.mxu1 %v11723_v7  ;;  %4001 = vmatpush1.bf16.msra.mxu0 %v11725_v5  ;;  %v11670_v7 = vld [vmem:[%s20092_s4 + $0x718] sm:$0xff] }
 0x328   :  { %3961 = vmatprep.subr.bf16.mxu1 %v11716_v41  ;;  %4002 = vmatprep.subr.bf16.mxu0 %v11718_v3  ;;  %v11674_v5 = vld [vmem:[%s20092_s4 + $0x738] sm:$0xff] }
 0x329   :  { %v11737_v19 = vcombine.low %v11670_v7, %v11674_v5 }
 0x32b   :  { %3962 = vmatpush1.bf16.msra.mxu1 %v11715_v35  ;;  %4003 = vmatpush1.bf16.msra.mxu0 %v11717_v23  ;;  %v11736_v35 = vcombine.high %v11669_v0, %v11673_v59  ;;  %v11738_v23 = vcombine.high %v11670_v7, %v11674_v5  ;;  %v11820_v0 = vld [vmem:[%s20092_s4 + $0x9c8] sm:$0xff]  ;;  %v11705_v5 = vcombine.low %v11638_v60, %v11642_v46 }
 0x32c   :  { %3963 = vmatprep.subr.bf16.mxu1 %v11708_v43  ;;  %4004 = vmatprep.subr.bf16.mxu0 %v11710_v15  ;;  %v11661_v43 = vld [vmem:[%s20092_s4 + $0x6d0] sm:$0xff]  ;;  %v11824_v59 = vld [vmem:[%s20092_s4 + $0x9e8] sm:$0xff] }
 0x32d   :  { %v11665_v15 = vld [vmem:[%s20092_s4 + $0x6f0] sm:$0xff] }
 0x32e   :  { %v11727_v14 = vcombine.low %v11661_v43, %v11665_v15 }
 0x32f   :  { %3964 = vmatpush1.bf16.msra.mxu1 %v11707_v16  ;;  %4005 = vmatpush1.bf16.msra.mxu0 %v11709_v38  ;;  %v11728_v16 = vcombine.high %v11661_v43, %v11665_v15  ;;  %v11730_v38 = vcombine.high %v11662_v53, %v11666_v9  ;;  %v11803_v53 = vld [vmem:[%s20092_s4 + $0x940] sm:$0xff] }
 0x330   :  { %3965 = vmatprep.subr.bf16.mxu1 %v11700_v22  ;;  %4006 = vmatprep.subr.bf16.mxu0 %v11702_v49  ;;  %v11653_v22 = vld [vmem:[%s20092_s4 + $0x690] sm:$0xff]  ;;  %v11807_v9 = vld [vmem:[%s20092_s4 + $0x960] sm:$0xff] }
 0x331   :  { %v11657_v49 = vld [vmem:[%s20092_s4 + $0x6b0] sm:$0xff] }
 0x332   :  { %v11719_v31 = vcombine.low %v11653_v22, %v11657_v49 }
 0x333   :  { %3966 = vmatpush1.bf16.msra.mxu1 %v11699_v54  ;;  %4007 = vmatpush1.bf16.msra.mxu0 %v11701_v10  ;;  %v11720_v54 = vcombine.high %v11653_v22, %v11657_v49  ;;  %v11722_v10 = vcombine.high %v11654_v34, %v11658_v17 }
 0x334   :  { %4033 = vmatprep.subr.bf16.mxu1 %v11760_v44  ;;  %4074 = vmatprep.subr.bf16.mxu0 %v11762_v30  ;;  %v11645_v44 = vld [vmem:[%s20092_s4 + $0x650] sm:$0xff] }
 0x335   :  { %v11649_v30 = vld [vmem:[%s20092_s4 + $0x670] sm:$0xff] }
 0x336   :  { %3984 = vmatmul.mubr.bf16.vlgmr.msra.gmra.mxu1 %v16807_v51  ;;  %4025 = vmatmul.mubr.bf16.vlgmr.msra.gmra.mxu0 %v16807_v51  ;;  %v16825_v47 = vpop.f32.mrf.mxu1  ;;  %v16827_v61 = vpop.f32.mrf.mxu0  ;;  %v11711_v40 = vcombine.low %v11645_v44, %v11649_v30 }
 0x337   :  { %4034 = vmatpush1.bf16.msra.mxu1 %v11759_v39  ;;  %4075 = vmatpush1.bf16.msra.mxu0 %v11761_v33  ;;  %v11712_v39 = vcombine.high %v11645_v44, %v11649_v30  ;;  %v11714_v33 = vcombine.high %v11646_v37, %v11650_v26  ;;  %v11800_v44 = vld [vmem:[%s20092_s4 + $0x928] sm:$0xff]  ;;  %v11867_v26 = vcombine.low %v11803_v53, %v11807_v9 }
 0x338   :  { %v16829_v28 = vpop.f32.mrf.mxu1  ;;  %v16831_v57 = vpop.f32.mrf.mxu0  ;;  %4035 = vmatprep.subr.bf16.mxu1 %v11752_v63  ;;  %4076 = vmatprep.subr.bf16.mxu0 %v11754_v29  ;;  %v11637_v63 = vld [vmem:[%s20092_s4 + $0x610] sm:$0xff] }
 0x339   :  { %4065 = vmatprep.mubr.bf16.mxu1 %v14127_v11  ;;  %4106 = vmatprep.mubr.bf16.mxu0 %v14127_v11  ;;  %v11641_v29 = vld [vmem:[%s20092_s4 + $0x630] sm:$0xff] }
 0x33a   :  { %v2397_v41 = vpop.f32.mrf.mxu1  ;;  %v2438_v3 = vpop.f32.mrf.mxu0  ;;  %v11703_v7 = vcombine.low %v11637_v63, %v11641_v29 }
 0x33b   :  { %4036 = vmatpush1.bf16.msra.mxu1 %v11751_v62  ;;  %4077 = vmatpush1.bf16.msra.mxu0 %v11753_v58  ;;  %v11704_v62 = vcombine.high %v11637_v63, %v11641_v29  ;;  %v11706_v58 = vcombine.high %v11638_v60, %v11642_v46  ;;  %v11886_v3 = vcombine.high %v11820_v0, %v11824_v59  ;;  %v11787_v29 = vld [vmem:[%s20092_s4 + $0x8c0] sm:$0xff]  ;;  %v11788_v46 = vld [vmem:[%s20092_s4 + $0x8c8] sm:$0xff] }
 0x33c   :  { %v2398_v18 = vpop.f32.mrf.mxu1  ;;  %v2439_v12 = vpop.f32.mrf.mxu0  ;;  %4037 = vmatprep.subr.bf16.mxu1 %v11744_v8  ;;  %4078 = vmatprep.subr.bf16.mxu0 %v11746_v45  ;;  %v11819_v8 = vld [vmem:[%s20092_s4 + $0x9c0] sm:$0xff] }
 0x33d   :  { %v11823_v45 = vld [vmem:[%s20092_s4 + $0x9e0] sm:$0xff]  ;;  %v11812_v18 = vld [vmem:[%s20092_s4 + $0x988] sm:$0xff] }
 0x33e   :  { %v11884_v41 = vcombine.high %v11819_v8, %v11823_v45  ;;  %v11816_v12 = vld [vmem:[%s20092_s4 + $0x9a8] sm:$0xff]  ;;  %v11791_v60 = vld [vmem:[%s20092_s4 + $0x8e0] sm:$0xff] }
 0x33f   :  { %4038 = vmatpush1.bf16.msra.mxu1 %v11743_v32  ;;  %4079 = vmatpush1.bf16.msra.mxu0 %v11745_v27  ;;  %v11811_v32 = vld [vmem:[%s20092_s4 + $0x980] sm:$0xff]  ;;  %v11878_v15 = vcombine.high %v11812_v18, %v11816_v12  ;;  %v11877_v49 = vcombine.low %v11812_v18, %v11816_v12  ;;  %v11772_v12 = vld [vmem:[%s20092_s4 + $0x848] sm:$0xff] }
 0x340   :  { %4039 = vmatprep.subr.bf16.mxu1 %v11736_v35  ;;  %4080 = vmatprep.subr.bf16.mxu0 %v11738_v23  ;;  %v11815_v27 = vld [vmem:[%s20092_s4 + $0x9a0] sm:$0xff]  ;;  %v11883_v35 = vcombine.low %v11819_v8, %v11823_v45  ;;  %v11885_v23 = vcombine.low %v11820_v0, %v11824_v59  ;;  %v11780_v59 = vld [vmem:[%s20092_s4 + $0x888] sm:$0xff] }
 0x341   :  { %v11876_v43 = vcombine.high %v11811_v32, %v11815_v27  ;;  %v11875_v22 = vcombine.low %v11811_v32, %v11815_v27  ;;  %v11779_v45 = vld [vmem:[%s20092_s4 + $0x880] sm:$0xff] }
 0x342   :  { %v11783_v0 = vld [vmem:[%s20092_s4 + $0x8a0] sm:$0xff] }
 0x343   :  { %4040 = vmatpush1.bf16.msra.mxu1 %v11735_v2  ;;  %4081 = vmatpush1.bf16.msra.mxu0 %v11737_v19  ;;  %v11804_v2 = vld [vmem:[%s20092_s4 + $0x948] sm:$0xff]  ;;  %v11771_v27 = vld [vmem:[%s20092_s4 + $0x840] sm:$0xff] }
 0x344   :  { %4041 = vmatprep.subr.bf16.mxu1 %v11728_v16  ;;  %4082 = vmatprep.subr.bf16.mxu0 %v11730_v38  ;;  %v11808_v19 = vld [vmem:[%s20092_s4 + $0x968] sm:$0xff]  ;;  %v11775_v18 = vld [vmem:[%s20092_s4 + $0x860] sm:$0xff] }
 0x347   :  { %4042 = vmatpush1.bf16.msra.mxu1 %v11727_v14  ;;  %4083 = vmatpush1.bf16.msra.mxu0 %v11729_v25  ;;  %v11868_v14 = vcombine.high %v11803_v53, %v11807_v9  ;;  %v11870_v25 = vcombine.high %v11804_v2, %v11808_v19  ;;  %v11763_v9 = vld [vmem:[%s20092_s4 + $0x800] sm:$0xff] }
 0x348   :  { %4043 = vmatprep.subr.bf16.mxu1 %v11720_v54  ;;  %4084 = vmatprep.subr.bf16.mxu0 %v11722_v10  ;;  %v11795_v54 = vld [vmem:[%s20092_s4 + $0x900] sm:$0xff]  ;;  %v11796_v10 = vld [vmem:[%s20092_s4 + $0x908] sm:$0xff] }
 0x349   :  { %v11862_v63 = vcombine.high %v11796_v10, %v11800_v44 }
 0x34b   :  { %4044 = vmatpush1.bf16.msra.mxu1 %v11719_v31  ;;  %4085 = vmatpush1.bf16.msra.mxu0 %v11721_v52  ;;  %v11869_v31 = vcombine.low %v11804_v2, %v11808_v19  ;;  %v11767_v2 = vld [vmem:[%s20092_s4 + $0x820] sm:$0xff]  ;;  %v11764_v19 = vld [vmem:[%s20092_s4 + $0x808] sm:$0xff] }
 0x34c   :  { %4045 = vmatprep.subr.bf16.mxu1 %v11712_v39  ;;  %4086 = vmatprep.subr.bf16.mxu0 %v11714_v33 }
 0x34f   :  { %4046 = vmatpush1.bf16.msra.mxu1 %v11711_v40  ;;  %4087 = vmatpush1.bf16.msra.mxu0 %v11713_v13  ;;  %v11792_v40 = vld [vmem:[%s20092_s4 + $0x8e8] sm:$0xff] }
 0x350   :  { %4047 = vmatprep.subr.bf16.mxu1 %v11704_v62  ;;  %4088 = vmatprep.subr.bf16.mxu0 %v11706_v58  ;;  %v11861_v62 = vcombine.low %v11796_v10, %v11800_v44  ;;  %v11852_v58 = vcombine.high %v11787_v29, %v11791_v60  ;;  %v11854_v8 = vcombine.high %v11788_v46, %v11792_v40  ;;  %v11825_v10 = vld [vmem:[%s20092_s4 + $0x9f0] sm:$0xff]  ;;  %v11822_v44 = vld [vmem:[%s20092_s4 + $0x9d8] sm:$0xff] }
 0x353   :  { %4048 = vmatpush1.bf16.msra.mxu1 %v11703_v7  ;;  %4089 = vmatpush1.bf16.msra.mxu0 %v11705_v5  ;;  %v11784_v7 = vld [vmem:[%s20092_s4 + $0x8a8] sm:$0xff]  ;;  %v11851_v5 = vcombine.low %v11787_v29, %v11791_v60  ;;  %v11818_v29 = vld [vmem:[%s20092_s4 + $0x9b8] sm:$0xff] }
 0x354   :  { %4509 = vmatprep.subr.bf16.mxu1 %v11884_v41  ;;  %4550 = vmatprep.subr.bf16.mxu0 %v11886_v3  ;;  %v11853_v41 = vcombine.low %v11788_v46, %v11792_v40  ;;  %v11844_v3 = vcombine.high %v11779_v45, %v11783_v0  ;;  %v11846_v32 = vcombine.high %v11780_v59, %v11784_v7 }
 0x355   :  { %v17029_v40 = vpack.c.bf16 %v16222_v42, %v16222_v42  ;;  %v11810_v42 = vld [vmem:[%s20092_s4 + $0x978] sm:$0xff] }
 0x356   :  { %v16931_v16 = vpop.f32.mrf.mxu1  ;;  %v16933_v38 = vpop.f32.mrf.mxu0  ;;  %4066 = vmatmul.mubr.bf16.vlgmr.msra.gmra.mxu1 %v16807_v51  ;;  %4107 = vmatmul.mubr.bf16.vlgmr.msra.gmra.mxu0 %v16807_v51  ;;  %v11799_v51 = vld [vmem:[%s20092_s4 + $0x920] sm:$0xff] }
 0x357   :  { %4510 = vmatpush1.bf16.msra.mxu1 %v11883_v35  ;;  %4551 = vmatpush1.bf16.msra.mxu0 %v11885_v23  ;;  %v11860_v33 = vcombine.high %v11795_v54, %v11799_v51  ;;  %v11859_v13 = vcombine.low %v11795_v54, %v11799_v51  ;;  %v11776_v35 = vld [vmem:[%s20092_s4 + $0x868] sm:$0xff]  ;;  %v11843_v23 = vcombine.low %v11779_v45, %v11783_v0  ;;  %v11821_v51 = vld [vmem:[%s20092_s4 + $0x9d0] sm:$0xff]  ;;  %v11806_v45 = vld [vmem:[%s20092_s4 + $0x958] sm:$0xff] }
 0x358   :  { %v16937_v34 = vpop.f32.mrf.mxu1  ;;  %v16939_v17 = vpop.f32.mrf.mxu0  ;;  %4511 = vmatprep.subr.bf16.mxu1 %v11876_v43  ;;  %4552 = vmatprep.subr.bf16.mxu0 %v11878_v15  ;;  %v11845_v43 = vcombine.low %v11780_v59, %v11784_v7  ;;  %v11836_v15 = vcombine.high %v11771_v27, %v11775_v18  ;;  %v11838_v53 = vcombine.high %v11772_v12, %v11776_v35 }
 0x359   :  { %4541 = vmatprep.mubr.bf16.mxu1 %v14127_v11  ;;  %4582 = vmatprep.mubr.bf16.mxu0 %v14127_v11  ;;  %v11887_v60 = vcombine.low %v11821_v51, %v11825_v10 }
 0x35a   :  { %v2479_v30 = vpop.f32.mrf.mxu1  ;;  %v2520_v37 = vpop.f32.mrf.mxu0 }
 0x35b   :  { %4512 = vmatpush1.bf16.msra.mxu1 %v11875_v22  ;;  %4553 = vmatpush1.bf16.msra.mxu0 %v11877_v49  ;;  %v11768_v22 = vld [vmem:[%s20092_s4 + $0x828] sm:$0xff]  ;;  %v11835_v49 = vcombine.low %v11771_v27, %v11775_v18  ;;  %v11826_v30 = vld [vmem:[%s20092_s4 + $0x9f8] sm:$0xff]  ;;  %v11827_v37 = vcombine.low %v11763_v9, %v11767_v2 }
 0x35c   :  { %v2480_v52 = vpop.f32.mrf.mxu1  ;;  %v2521_v39 = vpop.f32.mrf.mxu0  ;;  %4513 = vmatprep.subr.bf16.mxu1 %v11868_v14  ;;  %4554 = vmatprep.subr.bf16.mxu0 %v11870_v25  ;;  %v11837_v14 = vcombine.low %v11772_v12, %v11776_v35  ;;  %v11828_v25 = vcombine.high %v11763_v9, %v11767_v2  ;;  %v11830_v54 = vcombine.high %v11764_v19, %v11768_v22  ;;  %v11797_v35 = vld [vmem:[%s20092_s4 + $0x910] sm:$0xff] }
 0x35d   :  { %v11890_v52 = vcombine.high %v11822_v44, %v11826_v30  ;;  %v11813_v39 = vld [vmem:[%s20092_s4 + $0x990] sm:$0xff]  ;;  %v11889_v46 = vcombine.low %v11822_v44, %v11826_v30  ;;  %v11874_v12 = vcombine.high %v11806_v45, %v11810_v42  ;;  %v11873_v9 = vcombine.low %v11806_v45, %v11810_v42 }
 0x35f   :  { %4514 = vmatpush1.bf16.msra.mxu1 %v11867_v26  ;;  %4555 = vmatpush1.bf16.msra.mxu0 %v11869_v31  ;;  %v11829_v26 = vcombine.low %v11764_v19, %v11768_v22  ;;  %v11888_v31 = vcombine.high %v11821_v51, %v11825_v10  ;;  %v11794_v51 = vld [vmem:[%s20092_s4 + $0x8f8] sm:$0xff] }
 0x360   :  { %4515 = vmatprep.subr.bf16.mxu1 %v11860_v33  ;;  %4556 = vmatprep.subr.bf16.mxu0 %v11862_v63  ;;  %v11817_v33 = vld [vmem:[%s20092_s4 + $0x9b0] sm:$0xff]  ;;  %v11814_v63 = vld [vmem:[%s20092_s4 + $0x998] sm:$0xff] }
 0x361   :  { %v11879_v7 = vcombine.low %v11813_v39, %v11817_v33 }
 0x363   :  { %4516 = vmatpush1.bf16.msra.mxu1 %v11859_v13  ;;  %4557 = vmatpush1.bf16.msra.mxu0 %v11861_v62  ;;  %v11880_v13 = vcombine.high %v11813_v39, %v11817_v33  ;;  %v11882_v62 = vcombine.high %v11814_v63, %v11818_v29  ;;  %v11786_v39 = vld [vmem:[%s20092_s4 + $0x8b8] sm:$0xff] }
 0x364   :  { %4517 = vmatprep.subr.bf16.mxu1 %v11852_v58  ;;  %4558 = vmatprep.subr.bf16.mxu0 %v11854_v8  ;;  %v11805_v58 = vld [vmem:[%s20092_s4 + $0x950] sm:$0xff] }
 0x365   :  { %v11809_v8 = vld [vmem:[%s20092_s4 + $0x970] sm:$0xff] }
 0x366   :  { %v11872_v18 = vcombine.high %v11805_v58, %v11809_v8 }
 0x367   :  { %4518 = vmatpush1.bf16.msra.mxu1 %v11851_v5  ;;  %4559 = vmatpush1.bf16.msra.mxu0 %v11853_v41 }
 0x368   :  { %4519 = vmatprep.subr.bf16.mxu1 %v11844_v3  ;;  %4560 = vmatprep.subr.bf16.mxu0 %v11846_v32  ;;  %v11881_v3 = vcombine.low %v11814_v63, %v11818_v29 }
 0x36b   :  { %4520 = vmatpush1.bf16.msra.mxu1 %v11843_v23  ;;  %4561 = vmatpush1.bf16.msra.mxu0 %v11845_v43  ;;  %v11798_v43 = vld [vmem:[%s20092_s4 + $0x918] sm:$0xff] }
 0x36c   :  { %4521 = vmatprep.subr.bf16.mxu1 %v11836_v15  ;;  %4562 = vmatprep.subr.bf16.mxu0 %v11838_v53  ;;  %v11802_v15 = vld [vmem:[%s20092_s4 + $0x938] sm:$0xff] }
 0x36d   :  { %v11865_v44 = vcombine.low %v11798_v43, %v11802_v15 }
 0x36f   :  { %4522 = vmatpush1.bf16.msra.mxu1 %v11835_v49  ;;  %4563 = vmatpush1.bf16.msra.mxu0 %v11837_v14  ;;  %v11866_v49 = vcombine.high %v11798_v43, %v11802_v15  ;;  %v11789_v14 = vld [vmem:[%s20092_s4 + $0x8d0] sm:$0xff]  ;;  %v11951_v43 = vld [vmem:[%s20092_s4 + $0xbe0] sm:$0xff]  ;;  %v11948_v15 = vld [vmem:[%s20092_s4 + $0xbc8] sm:$0xff] }
 0x370   :  { %4523 = vmatprep.subr.bf16.mxu1 %v11828_v25  ;;  %4564 = vmatprep.subr.bf16.mxu0 %v11830_v54  ;;  %v11793_v25 = vld [vmem:[%s20092_s4 + $0x8f0] sm:$0xff]  ;;  %v11790_v54 = vld [vmem:[%s20092_s4 + $0x8d8] sm:$0xff] }
 0x371   :  { %v11856_v30 = vcombine.high %v11789_v14, %v11793_v25  ;;  %v11855_v33 = vcombine.low %v11789_v14, %v11793_v25  ;;  %v11857_v63 = vcombine.low %v11790_v54, %v11794_v51  ;;  %v11944_v14 = vld [vmem:[%s20092_s4 + $0xba8] sm:$0xff] }
 0x373   :  { %4524 = vmatpush1.bf16.msra.mxu1 %v11827_v37  ;;  %4565 = vmatpush1.bf16.msra.mxu0 %v11829_v26  ;;  %v11858_v37 = vcombine.high %v11790_v54, %v11794_v51  ;;  %v11781_v26 = vld [vmem:[%s20092_s4 + $0x890] sm:$0xff] }
 0x374   :  { %4591 = vmatprep.subr.bf16.mxu1 %v11888_v31  ;;  %4632 = vmatprep.subr.bf16.mxu0 %v11890_v52  ;;  %v11785_v31 = vld [vmem:[%s20092_s4 + $0x8b0] sm:$0xff]  ;;  %v11782_v52 = vld [vmem:[%s20092_s4 + $0x898] sm:$0xff] }
 0x375   :  { %v11848_v29 = vcombine.high %v11781_v26, %v11785_v31  ;;  %v11849_v45 = vcombine.low %v11782_v52, %v11786_v39 }
 0x376   :  { %v2877_v0 = vpop.f32.mrf.mxu1  ;;  %v2918_v59 = vpop.f32.mrf.mxu0  ;;  %4542 = vmatmul.mubr.bf16.vlgmr.msra.gmra.mxu1 %v17029_v40  ;;  %4583 = vmatmul.mubr.bf16.vlgmr.msra.gmra.mxu0 %v17029_v40 }
 0x377   :  { %v17046_v5 = vadd.f32 %v2877_v0, %v16825_v47  ;;  %v17049_v41 = vadd.f32 %v2918_v59, %v16827_v61  ;;  %4592 = vmatpush1.bf16.msra.mxu1 %v11887_v60  ;;  %4633 = vmatpush1.bf16.msra.mxu0 %v11889_v46  ;;  %v11801_v61 = vld [vmem:[%s20092_s4 + $0x930] sm:$0xff]  ;;  %v11850_v60 = vcombine.high %v11782_v52, %v11786_v39 }
 0x378   :  { %v2879_v32 = vpop.f32.mrf.mxu1  ;;  %v2920_v27 = vpop.f32.mrf.mxu0  ;;  %4593 = vmatprep.subr.bf16.mxu1 %v11880_v13  ;;  %4634 = vmatprep.subr.bf16.mxu0 %v11882_v62  ;;  %v11864_v22 = vcombine.high %v11797_v35, %v11801_v61  ;;  %v11863_v10 = vcombine.low %v11797_v35, %v11801_v61  ;;  %v11773_v46 = vld [vmem:[%s20092_s4 + $0x850] sm:$0xff]  ;;  %v11774_v62 = vld [vmem:[%s20092_s4 + $0x858] sm:$0xff]  ;;  %v11947_v61 = vld [vmem:[%s20092_s4 + $0xbc0] sm:$0xff] }
 0x379   :  { %v17055_v23 = vadd.f32 %v2879_v32, %v16829_v28  ;;  %v17058_v47 = vadd.f32 %v2920_v27, %v16831_v57  ;;  %4623 = vmatprep.mubr.bf16.mxu1 %v14127_v11  ;;  %4664 = vmatprep.mubr.bf16.mxu0 %v14127_v11  ;;  %v11871_v57 = vcombine.low %v11805_v58, %v11809_v8  ;;  %v11777_v13 = vld [vmem:[%s20092_s4 + $0x870] sm:$0xff]  ;;  %v11778_v58 = vld [vmem:[%s20092_s4 + $0x878] sm:$0xff] }
 0x37a   :  { %v2881_v28 = vpop.f32.mrf.mxu1  ;;  %v2922_v53 = vpop.f32.mrf.mxu0  ;;  %v11847_v8 = vcombine.low %v11781_v26, %v11785_v31  ;;  %v11840_v42 = vcombine.high %v11773_v46, %v11777_v13  ;;  %v11842_v0 = vcombine.high %v11774_v62, %v11778_v58  ;;  %v11765_v59 = vld [vmem:[%s20092_s4 + $0x810] sm:$0xff]  ;;  %v11770_v32 = vld [vmem:[%s20092_s4 + $0x838] sm:$0xff]  ;;  %v11839_v27 = vcombine.low %v11773_v46, %v11777_v13  ;;  %v11936_v26 = vld [vmem:[%s20092_s4 + $0xb68] sm:$0xff] }
 0x37b   :  { %4594 = vmatpush1.bf16.msra.mxu1 %v11879_v7  ;;  %4635 = vmatpush1.bf16.msra.mxu0 %v11881_v3  ;;  %v11769_v7 = vld [vmem:[%s20092_s4 + $0x830] sm:$0xff]  ;;  %v11766_v3 = vld [vmem:[%s20092_s4 + $0x818] sm:$0xff]  ;;  %v11952_v28 = vld [vmem:[%s20092_s4 + $0xbe8] sm:$0xff]  ;;  %v12011_v25 = vcombine.low %v11947_v61, %v11951_v43 }
 0x37c   :  { %v2882_v2 = vpop.f32.mrf.mxu1  ;;  %v2923_v19 = vpop.f32.mrf.mxu0  ;;  %4595 = vmatprep.subr.bf16.mxu1 %v11872_v18  ;;  %4636 = vmatprep.subr.bf16.mxu0 %v11874_v12  ;;  %v11841_v18 = vcombine.low %v11774_v62, %v11778_v58  ;;  %v11832_v12 = vcombine.high %v11765_v59, %v11769_v7  ;;  %v11834_v35 = vcombine.high %v11766_v3, %v11770_v32 }
 0x37d   :  { %v11831_v53 = vcombine.low %v11765_v59, %v11769_v7  ;;  %v12014_v2 = vcombine.high %v11948_v15, %v11952_v28  ;;  %v11939_v19 = vld [vmem:[%s20092_s4 + $0xb80] sm:$0xff]  ;;  %v12013_v54 = vcombine.low %v11948_v15, %v11952_v28 }
 0x37f   :  { %4596 = vmatpush1.bf16.msra.mxu1 %v11871_v57  ;;  %4637 = vmatpush1.bf16.msra.mxu0 %v11873_v9  ;;  %v11833_v57 = vcombine.low %v11766_v3, %v11770_v32  ;;  %v12012_v9 = vcombine.high %v11947_v61, %v11951_v43 }
 0x380   :  { %4597 = vmatprep.subr.bf16.mxu1 %v11864_v22  ;;  %4638 = vmatprep.subr.bf16.mxu0 %v11866_v49  ;;  %v11943_v22 = vld [vmem:[%s20092_s4 + $0xba0] sm:$0xff]  ;;  %v11940_v49 = vld [vmem:[%s20092_s4 + $0xb88] sm:$0xff] }
 0x381   :  { %v12004_v51 = vcombine.high %v11939_v19, %v11943_v22  ;;  %v12003_v39 = vcombine.low %v11939_v19, %v11943_v22 }
 0x383   :  { %4598 = vmatpush1.bf16.msra.mxu1 %v11863_v10  ;;  %4639 = vmatpush1.bf16.msra.mxu0 %v11865_v44  ;;  %v12006_v10 = vcombine.high %v11940_v49, %v11944_v14  ;;  %v11931_v44 = vld [vmem:[%s20092_s4 + $0xb40] sm:$0xff] }
 0x384   :  { %4599 = vmatprep.subr.bf16.mxu1 %v11856_v30  ;;  %4640 = vmatprep.subr.bf16.mxu0 %v11858_v37  ;;  %v11935_v30 = vld [vmem:[%s20092_s4 + $0xb60] sm:$0xff]  ;;  %v11932_v37 = vld [vmem:[%s20092_s4 + $0xb48] sm:$0xff] }
 0x385   :  { %v11996_v13 = vcombine.high %v11931_v44, %v11935_v30  ;;  %v11998_v62 = vcombine.high %v11932_v37, %v11936_v26 }
 0x387   :  { %4600 = vmatpush1.bf16.msra.mxu1 %v11855_v33  ;;  %4641 = vmatpush1.bf16.msra.mxu0 %v11857_v63 }
 0x388   :  { %4601 = vmatprep.subr.bf16.mxu1 %v11848_v29  ;;  %4642 = vmatprep.subr.bf16.mxu0 %v11850_v60  ;;  %v12005_v29 = vcombine.low %v11940_v49, %v11944_v14 }
 0x38b   :  { %4602 = vmatpush1.bf16.msra.mxu1 %v11847_v8  ;;  %4643 = vmatpush1.bf16.msra.mxu0 %v11849_v45  ;;  %v11924_v8 = vld [vmem:[%s20092_s4 + $0xb08] sm:$0xff] }
 0x38c   :  { %4603 = vmatprep.subr.bf16.mxu1 %v11840_v42  ;;  %4644 = vmatprep.subr.bf16.mxu0 %v11842_v0  ;;  %v11928_v45 = vld [vmem:[%s20092_s4 + $0xb28] sm:$0xff]  ;;  %v11997_v0 = vcombine.low %v11932_v37, %v11936_v26 }
 0x38d   :  { %v11990_v32 = vcombine.high %v11924_v8, %v11928_v45  ;;  %v11989_v43 = vcombine.low %v11924_v8, %v11928_v45  ;;  %v11950_v8 = vld [vmem:[%s20092_s4 + $0xbd8] sm:$0xff] }
 0x38e   :  { %v11954_v45 = vld [vmem:[%s20092_s4 + $0xbf8] sm:$0xff] }
 0x38f   :  { %4604 = vmatpush1.bf16.msra.mxu1 %v11839_v27  ;;  %4645 = vmatpush1.bf16.msra.mxu0 %v11841_v18  ;;  %v11915_v27 = vld [vmem:[%s20092_s4 + $0xac0] sm:$0xff] }
 0x390   :  { %4605 = vmatprep.subr.bf16.mxu1 %v11832_v12  ;;  %4646 = vmatprep.subr.bf16.mxu0 %v11834_v35  ;;  %v11919_v18 = vld [vmem:[%s20092_s4 + $0xae0] sm:$0xff]  ;;  %v11916_v12 = vld [vmem:[%s20092_s4 + $0xac8] sm:$0xff] }
 0x391   :  { %v11920_v35 = vld [vmem:[%s20092_s4 + $0xae8] sm:$0xff]  ;;  %v11980_v15 = vcombine.high %v11915_v27, %v11919_v18  ;;  %v11979_v19 = vcombine.low %v11915_v27, %v11919_v18  ;;  %v12017_v18 = vcombine.low %v11950_v8, %v11954_v45 }
 0x392   :  { %v11982_v28 = vcombine.high %v11916_v12, %v11920_v35  ;;  %v11981_v22 = vcombine.low %v11916_v12, %v11920_v35  ;;  %v17257_v12 = vpack.c.bf16 %v16219_v50, %v16219_v50  ;;  %v11938_v50 = vld [vmem:[%s20092_s4 + $0xb78] sm:$0xff] }
 0x393   :  { %4606 = vmatpush1.bf16.msra.mxu1 %v11831_v53  ;;  %4647 = vmatpush1.bf16.msra.mxu0 %v11833_v57  ;;  %v11907_v53 = vld [vmem:[%s20092_s4 + $0xa80] sm:$0xff] }
 0x394   :  { %5067 = vmatprep.subr.bf16.mxu1 %v12012_v9  ;;  %5108 = vmatprep.subr.bf16.mxu0 %v12014_v2  ;;  %v11911_v57 = vld [vmem:[%s20092_s4 + $0xaa0] sm:$0xff]  ;;  %v11908_v9 = vld [vmem:[%s20092_s4 + $0xa88] sm:$0xff] }
 0x395   :  { %v11912_v2 = vld [vmem:[%s20092_s4 + $0xaa8] sm:$0xff]  ;;  %v11972_v49 = vcombine.high %v11907_v53, %v11911_v57 }
 0x396   :  { %v2959_v31 = vpop.f32.mrf.mxu1  ;;  %v3000_v52 = vpop.f32.mrf.mxu0  ;;  %4624 = vmatmul.mubr.bf16.vlgmr.msra.gmra.mxu1 %v17029_v40  ;;  %4665 = vmatmul.mubr.bf16.vlgmr.msra.gmra.mxu0 %v17029_v40  ;;  %v11923_v40 = vld [vmem:[%s20092_s4 + $0xb00] sm:$0xff]  ;;  %v11974_v14 = vcombine.high %v11908_v9, %v11912_v2 }
 0x397   :  { %v17158_v33 = vadd.f32 %v2959_v31, %v16931_v16  ;;  %v17161_v63 = vadd.f32 %v3000_v52, %v16933_v38  ;;  %5068 = vmatpush1.bf16.msra.mxu1 %v12011_v25  ;;  %5109 = vmatpush1.bf16.msra.mxu0 %v12013_v54  ;;  %v11927_v38 = vld [vmem:[%s20092_s4 + $0xb20] sm:$0xff] }
 0x398   :  { %v2961_v60 = vpop.f32.mrf.mxu1  ;;  %v3002_v46 = vpop.f32.mrf.mxu0  ;;  %5069 = vmatprep.subr.bf16.mxu1 %v12004_v51  ;;  %5110 = vmatprep.subr.bf16.mxu0 %v12006_v10  ;;  %v11988_v3 = vcombine.high %v11923_v40, %v11927_v38  ;;  %v11987_v61 = vcombine.low %v11923_v40, %v11927_v38  ;;  %v11899_v25 = vld [vmem:[%s20092_s4 + $0xa40] sm:$0xff]  ;;  %v11900_v51 = vld [vmem:[%s20092_s4 + $0xa48] sm:$0xff]  ;;  %v11949_v40 = vld [vmem:[%s20092_s4 + $0xbd0] sm:$0xff] }
 0x399   :  { %v17167_v58 = vadd.f32 %v2961_v60, %v16937_v34  ;;  %v17170_v16 = vadd.f32 %v3002_v46, %v16939_v17  ;;  %5099 = vmatprep.mubr.bf16.mxu1 %v14127_v11  ;;  %5140 = vmatprep.mubr.bf16.mxu0 %v14127_v11  ;;  %v11995_v17 = vcombine.low %v11931_v44, %v11935_v30  ;;  %v11903_v54 = vld [vmem:[%s20092_s4 + $0xa60] sm:$0xff]  ;;  %v11904_v10 = vld [vmem:[%s20092_s4 + $0xa68] sm:$0xff]  ;;  %v11953_v38 = vld [vmem:[%s20092_s4 + $0xbf0] sm:$0xff] }
 0x39a   :  { %v2963_v34 = vpop.f32.mrf.mxu1  ;;  %v3004_v42 = vpop.f32.mrf.mxu0  ;;  %v11971_v44 = vcombine.low %v11907_v53, %v11911_v57  ;;  %v11973_v30 = vcombine.low %v11908_v9, %v11912_v2  ;;  %v11964_v37 = vcombine.high %v11899_v25, %v11903_v54  ;;  %v11966_v26 = vcombine.high %v11900_v51, %v11904_v10  ;;  %v11891_v31 = vld [vmem:[%s20092_s4 + $0xa00] sm:$0xff] }
 0x39b   :  { %5070 = vmatpush1.bf16.msra.mxu1 %v12003_v39  ;;  %5111 = vmatpush1.bf16.msra.mxu0 %v12005_v29  ;;  %v11895_v52 = vld [vmem:[%s20092_s4 + $0xa20] sm:$0xff]  ;;  %v11892_v39 = vld [vmem:[%s20092_s4 + $0xa08] sm:$0xff]  ;;  %v11963_v60 = vcombine.low %v11899_v25, %v11903_v54  ;;  %v11965_v46 = vcombine.low %v11900_v51, %v11904_v10  ;;  %v12015_v27 = vcombine.low %v11949_v40, %v11953_v38  ;;  %v11925_v51 = vld [vmem:[%s20092_s4 + $0xb10] sm:$0xff] }
 0x39c   :  { %v2964_v59 = vpop.f32.mrf.mxu1  ;;  %v3005_v7 = vpop.f32.mrf.mxu0  ;;  %5071 = vmatprep.subr.bf16.mxu1 %v11996_v13  ;;  %5112 = vmatprep.subr.bf16.mxu0 %v11998_v62  ;;  %v11896_v29 = vld [vmem:[%s20092_s4 + $0xa28] sm:$0xff]  ;;  %v11956_v13 = vcombine.high %v11891_v31, %v11895_v52  ;;  %v11955_v34 = vcombine.low %v11891_v31, %v11895_v52  ;;  %v11930_v10 = vld [vmem:[%s20092_s4 + $0xb38] sm:$0xff] }
 0x39d   :  { %v11958_v62 = vcombine.high %v11892_v39, %v11896_v29  ;;  %v11957_v42 = vcombine.low %v11892_v39, %v11896_v29  ;;  %v11941_v59 = vld [vmem:[%s20092_s4 + $0xb90] sm:$0xff] }
 0x39e   :  { %v11945_v7 = vld [vmem:[%s20092_s4 + $0xbb0] sm:$0xff] }
 0x39f   :  { %5072 = vmatpush1.bf16.msra.mxu1 %v11995_v17  ;;  %5113 = vmatpush1.bf16.msra.mxu0 %v11997_v0  ;;  %v12016_v17 = vcombine.high %v11949_v40, %v11953_v38  ;;  %v12018_v0 = vcombine.high %v11950_v8, %v11954_v45  ;;  %v12008_v35 = vcombine.high %v11941_v59, %v11945_v7 }
 0x3a0   :  { %5073 = vmatprep.subr.bf16.mxu1 %v11988_v3  ;;  %5114 = vmatprep.subr.bf16.mxu0 %v11990_v32  ;;  %v11942_v3 = vld [vmem:[%s20092_s4 + $0xb98] sm:$0xff]  ;;  %v12007_v9 = vcombine.low %v11941_v59, %v11945_v7 }
 0x3a1   :  { %v11946_v32 = vld [vmem:[%s20092_s4 + $0xbb8] sm:$0xff] }
 0x3a3   :  { %5074 = vmatpush1.bf16.msra.mxu1 %v11987_v61  ;;  %5115 = vmatpush1.bf16.msra.mxu0 %v11989_v43  ;;  %v12010_v61 = vcombine.high %v11942_v3, %v11946_v32  ;;  %v11933_v43 = vld [vmem:[%s20092_s4 + $0xb50] sm:$0xff] }
 0x3a4   :  { %5075 = vmatprep.subr.bf16.mxu1 %v11980_v15  ;;  %5116 = vmatprep.subr.bf16.mxu0 %v11982_v28  ;;  %v11937_v15 = vld [vmem:[%s20092_s4 + $0xb70] sm:$0xff]  ;;  %v11934_v28 = vld [vmem:[%s20092_s4 + $0xb58] sm:$0xff] }
 0x3a5   :  { %v12000_v25 = vcombine.high %v11933_v43, %v11937_v15  ;;  %v12002_v54 = vcombine.high %v11934_v28, %v11938_v50 }
 0x3a7   :  { %5076 = vmatpush1.bf16.msra.mxu1 %v11979_v19  ;;  %5117 = vmatpush1.bf16.msra.mxu0 %v11981_v22  ;;  %v12009_v22 = vcombine.low %v11942_v3, %v11946_v32 }
 0x3a8   :  { %5077 = vmatprep.subr.bf16.mxu1 %v11972_v49  ;;  %5118 = vmatprep.subr.bf16.mxu0 %v11974_v14 }
 0x3ab   :  { %5078 = vmatpush1.bf16.msra.mxu1 %v11971_v44  ;;  %5119 = vmatpush1.bf16.msra.mxu0 %v11973_v30 }
 0x3ac   :  { %5079 = vmatprep.subr.bf16.mxu1 %v11964_v37  ;;  %5120 = vmatprep.subr.bf16.mxu0 %v11966_v26  ;;  %v11999_v37 = vcombine.low %v11933_v43, %v11937_v15  ;;  %v12001_v26 = vcombine.low %v11934_v28, %v11938_v50 }
 0x3af   :  { %5080 = vmatpush1.bf16.msra.mxu1 %v11963_v60  ;;  %5121 = vmatpush1.bf16.msra.mxu0 %v11965_v46  ;;  %v11917_v60 = vld [vmem:[%s20092_s4 + $0xad0] sm:$0xff] }
 0x3b0   :  { %5081 = vmatprep.subr.bf16.mxu1 %v11956_v13  ;;  %5122 = vmatprep.subr.bf16.mxu0 %v11958_v62  ;;  %v11921_v46 = vld [vmem:[%s20092_s4 + $0xaf0] sm:$0xff]  ;;  %v11918_v13 = vld [vmem:[%s20092_s4 + $0xad8] sm:$0xff] }
 0x3b1   :  { %v11922_v62 = vld [vmem:[%s20092_s4 + $0xaf8] sm:$0xff]  ;;  %v11984_v8 = vcombine.high %v11917_v60, %v11921_v46  ;;  %v11983_v59 = vcombine.low %v11917_v60, %v11921_v46  ;;  %v12068_v60 = vld [vmem:[%s20092_s4 + $0xd88] sm:$0xff] }
 0x3b2   :  { %v11986_v45 = vcombine.high %v11918_v13, %v11922_v62  ;;  %v11985_v7 = vcombine.low %v11918_v13, %v11922_v62  ;;  %v12072_v46 = vld [vmem:[%s20092_s4 + $0xda8] sm:$0xff] }
 0x3b3   :  { %5082 = vmatpush1.bf16.msra.mxu1 %v11955_v34  ;;  %5123 = vmatpush1.bf16.msra.mxu0 %v11957_v42  ;;  %v11909_v34 = vld [vmem:[%s20092_s4 + $0xa90] sm:$0xff] }
 0x3b4   :  { %5149 = vmatprep.subr.bf16.mxu1 %v12016_v17  ;;  %5190 = vmatprep.subr.bf16.mxu0 %v12018_v0  ;;  %v11913_v42 = vld [vmem:[%s20092_s4 + $0xab0] sm:$0xff]  ;;  %v11910_v17 = vld [vmem:[%s20092_s4 + $0xa98] sm:$0xff] }
 0x3b5   :  { %v11914_v0 = vld [vmem:[%s20092_s4 + $0xab8] sm:$0xff]  ;;  %v11976_v3 = vcombine.high %v11909_v34, %v11913_v42  ;;  %v11975_v43 = vcombine.low %v11909_v34, %v11913_v42  ;;  %v12060_v34 = vld [vmem:[%s20092_s4 + $0xd48] sm:$0xff] }
 0x3b6   :  { %v3427_v53 = vpop.f32.mrf.mxu1  ;;  %v3468_v57 = vpop.f32.mrf.mxu0  ;;  %5100 = vmatmul.mubr.bf16.vlgmr.msra.gmra.mxu1 %v17257_v12  ;;  %5141 = vmatmul.mubr.bf16.vlgmr.msra.gmra.mxu0 %v17257_v12  ;;  %v11978_v32 = vcombine.high %v11910_v17, %v11914_v0  ;;  %v11977_v15 = vcombine.low %v11910_v17, %v11914_v0  ;;  %v12064_v42 = vld [vmem:[%s20092_s4 + $0xd68] sm:$0xff] }
 0x3b7   :  { %v17274_v2 = vadd.f32 %v3427_v53, %v17046_v5  ;;  %v17277_v19 = vadd.f32 %v3468_v57, %v17049_v41  ;;  %5150 = vmatpush1.bf16.msra.mxu1 %v12015_v27  ;;  %5191 = vmatpush1.bf16.msra.mxu0 %v12017_v18  ;;  %v11929_v5 = vld [vmem:[%s20092_s4 + $0xb30] sm:$0xff]  ;;  %v11926_v41 = vld [vmem:[%s20092_s4 + $0xb18] sm:$0xff] }
 0x3b8   :  { %v17279_v49 = vpop.f32.mrf.mxu1  ;;  %v17281_v14 = vpop.f32.mrf.mxu0  ;;  %5151 = vmatprep.subr.bf16.mxu1 %v12008_v35  ;;  %5192 = vmatprep.subr.bf16.mxu0 %v12010_v61  ;;  %v11992_v39 = vcombine.high %v11925_v51, %v11929_v5  ;;  %v11994_v29 = vcombine.high %v11926_v41, %v11930_v10  ;;  %v11991_v40 = vcombine.low %v11925_v51, %v11929_v5  ;;  %v11901_v27 = vld [vmem:[%s20092_s4 + $0xa50] sm:$0xff]  ;;  %v11902_v35 = vld [vmem:[%s20092_s4 + $0xa58] sm:$0xff] }
 0x3b9   :  { %5181 = vmatprep.mubr.bf16.mxu1 %v14127_v11  ;;  %5222 = vmatprep.mubr.bf16.mxu0 %v14127_v11  ;;  %v11993_v38 = vcombine.low %v11926_v41, %v11930_v10  ;;  %v11905_v18 = vld [vmem:[%s20092_s4 + $0xa70] sm:$0xff]  ;;  %v11906_v61 = vld [vmem:[%s20092_s4 + $0xa78] sm:$0xff]  ;;  %v12075_v41 = vld [vmem:[%s20092_s4 + $0xdc0] sm:$0xff] }
 0x3ba   :  { %v3431_v44 = vpop.f32.mrf.mxu1  ;;  %v3472_v30 = vpop.f32.mrf.mxu0  ;;  %v11968_v28 = vcombine.high %v11901_v27, %v11905_v18  ;;  %v11970_v50 = vcombine.high %v11902_v35, %v11906_v61  ;;  %v11893_v53 = vld [vmem:[%s20092_s4 + $0xa10] sm:$0xff]  ;;  %v12079_v10 = vld [vmem:[%s20092_s4 + $0xde0] sm:$0xff] }
 0x3bb   :  { %5152 = vmatpush1.bf16.msra.mxu1 %v12007_v9  ;;  %5193 = vmatpush1.bf16.msra.mxu0 %v12009_v22  ;;  %v11897_v57 = vld [vmem:[%s20092_s4 + $0xa30] sm:$0xff]  ;;  %v11894_v9 = vld [vmem:[%s20092_s4 + $0xa18] sm:$0xff]  ;;  %v12076_v44 = vld [vmem:[%s20092_s4 + $0xdc8] sm:$0xff]  ;;  %v12139_v13 = vcombine.low %v12075_v41, %v12079_v10 }
 0x3bc   :  { %v3432_v31 = vpop.f32.mrf.mxu1  ;;  %v3473_v52 = vpop.f32.mrf.mxu0  ;;  %5153 = vmatprep.subr.bf16.mxu1 %v12000_v25  ;;  %5194 = vmatprep.subr.bf16.mxu0 %v12002_v54  ;;  %v11898_v22 = vld [vmem:[%s20092_s4 + $0xa38] sm:$0xff]  ;;  %v11967_v25 = vcombine.low %v11901_v27, %v11905_v18  ;;  %v11969_v54 = vcombine.low %v11902_v35, %v11906_v61  ;;  %v11960_v51 = vcombine.high %v11893_v53, %v11897_v57  ;;  %v12080_v30 = vld [vmem:[%s20092_s4 + $0xde8] sm:$0xff] }
 0x3bd   :  { %v11962_v5 = vcombine.high %v11894_v9, %v11898_v22  ;;  %v12140_v31 = vcombine.high %v12075_v41, %v12079_v10  ;;  %v12142_v52 = vcombine.high %v12076_v44, %v12080_v30  ;;  %v12141_v62 = vcombine.low %v12076_v44, %v12080_v30  ;;  %v12048_v41 = vld [vmem:[%s20092_s4 + $0xce8] sm:$0xff] }
 0x3be   :  { %v12126_v61 = vcombine.high %v12060_v34, %v12064_v42 }
 0x3bf   :  { %5154 = vmatpush1.bf16.msra.mxu1 %v11999_v37  ;;  %5195 = vmatpush1.bf16.msra.mxu0 %v12001_v26  ;;  %v11959_v37 = vcombine.low %v11893_v53, %v11897_v57  ;;  %v11961_v26 = vcombine.low %v11894_v9, %v11898_v22  ;;  %v12125_v53 = vcombine.low %v12060_v34, %v12064_v42 }
 0x3c0   :  { %5155 = vmatprep.subr.bf16.mxu1 %v11992_v39  ;;  %5196 = vmatprep.subr.bf16.mxu0 %v11994_v29  ;;  %v12067_v39 = vld [vmem:[%s20092_s4 + $0xd80] sm:$0xff] }
 0x3c1   :  { %v12071_v29 = vld [vmem:[%s20092_s4 + $0xda0] sm:$0xff] }
 0x3c3   :  { %5156 = vmatpush1.bf16.msra.mxu1 %v11991_v40  ;;  %5197 = vmatpush1.bf16.msra.mxu0 %v11993_v38  ;;  %v12132_v40 = vcombine.high %v12067_v39, %v12071_v29  ;;  %v12134_v38 = vcombine.high %v12068_v60, %v12072_v46 }
 0x3c4   :  { %5157 = vmatprep.subr.bf16.mxu1 %v11984_v8  ;;  %5198 = vmatprep.subr.bf16.mxu0 %v11986_v45  ;;  %v12059_v8 = vld [vmem:[%s20092_s4 + $0xd40] sm:$0xff] }
 0x3c5   :  { %v12063_v45 = vld [vmem:[%s20092_s4 + $0xd60] sm:$0xff] }
 0x3c6   :  { %v12124_v35 = vcombine.high %v12059_v8, %v12063_v45 }
 0x3c7   :  { %5158 = vmatpush1.bf16.msra.mxu1 %v11983_v59  ;;  %5199 = vmatpush1.bf16.msra.mxu0 %v11985_v7  ;;  %v12131_v59 = vcombine.low %v12067_v39, %v12071_v29  ;;  %v12040_v39 = vld [vmem:[%s20092_s4 + $0xca8] sm:$0xff] }
 0x3c8   :  { %5159 = vmatprep.subr.bf16.mxu1 %v11976_v3  ;;  %5200 = vmatprep.subr.bf16.mxu0 %v11978_v32  ;;  %v12133_v32 = vcombine.low %v12068_v60, %v12072_v46 }
 0x3cb   :  { %5160 = vmatpush1.bf16.msra.mxu1 %v11975_v43  ;;  %5201 = vmatpush1.bf16.msra.mxu0 %v11977_v15  ;;  %v12052_v15 = vld [vmem:[%s20092_s4 + $0xd08] sm:$0xff] }
 0x3cc   :  { %5161 = vmatprep.subr.bf16.mxu1 %v11968_v28  ;;  %5202 = vmatprep.subr.bf16.mxu0 %v11970_v50  ;;  %v12056_v28 = vld [vmem:[%s20092_s4 + $0xd28] sm:$0xff] }
 0x3cd   :  { %v12117_v44 = vcombine.low %v12052_v15, %v12056_v28 }
 0x3cf   :  { %5162 = vmatpush1.bf16.msra.mxu1 %v11967_v25  ;;  %5203 = vmatpush1.bf16.msra.mxu0 %v11969_v54  ;;  %v12118_v25 = vcombine.high %v12052_v15, %v12056_v28  ;;  %v12043_v54 = vld [vmem:[%s20092_s4 + $0xcc0] sm:$0xff]  ;;  %v12081_v15 = vld [vmem:[%s20092_s4 + $0xdf0] sm:$0xff]  ;;  %v12078_v28 = vld [vmem:[%s20092_s4 + $0xdd8] sm:$0xff] }
 0x3d0   :  { %5163 = vmatprep.subr.bf16.mxu1 %v11960_v51  ;;  %5204 = vmatprep.subr.bf16.mxu0 %v11962_v5  ;;  %v12047_v51 = vld [vmem:[%s20092_s4 + $0xce0] sm:$0xff]  ;;  %v12044_v5 = vld [vmem:[%s20092_s4 + $0xcc8] sm:$0xff] }
 0x3d1   :  { %v12108_v30 = vcombine.high %v12043_v54, %v12047_v51  ;;  %v12107_v29 = vcombine.low %v12043_v54, %v12047_v51  ;;  %v12109_v60 = vcombine.low %v12044_v5, %v12048_v41  ;;  %v12073_v54 = vld [vmem:[%s20092_s4 + $0xdb0] sm:$0xff]  ;;  %v12070_v51 = vld [vmem:[%s20092_s4 + $0xd98] sm:$0xff] }
 0x3d3   :  { %5164 = vmatpush1.bf16.msra.mxu1 %v11959_v37  ;;  %5205 = vmatpush1.bf16.msra.mxu0 %v11961_v26  ;;  %v12110_v37 = vcombine.high %v12044_v5, %v12048_v41  ;;  %v12035_v26 = vld [vmem:[%s20092_s4 + $0xc80] sm:$0xff] }
 0x3d4   :  { %5625 = vmatprep.subr.bf16.mxu1 %v12140_v31  ;;  %5666 = vmatprep.subr.bf16.mxu0 %v12142_v52  ;;  %v12039_v31 = vld [vmem:[%s20092_s4 + $0xca0] sm:$0xff]  ;;  %v12036_v52 = vld [vmem:[%s20092_s4 + $0xc88] sm:$0xff] }
 0x3d5   :  { %v12100_v46 = vcombine.high %v12035_v26, %v12039_v31  ;;  %v12101_v34 = vcombine.low %v12036_v52, %v12040_v39 }
 0x3d6   :  { %v3509_v17 = vpop.f32.mrf.mxu1  ;;  %v3550_v0 = vpop.f32.mrf.mxu0  ;;  %5182 = vmatmul.mubr.bf16.vlgmr.msra.gmra.mxu1 %v17257_v12  ;;  %5223 = vmatmul.mubr.bf16.vlgmr.msra.gmra.mxu0 %v17257_v12  ;;  %v12051_v12 = vld [vmem:[%s20092_s4 + $0xd00] sm:$0xff] }
 0x3d7   :  { %v17384_v7 = vadd.f32 %v3509_v17, %v17158_v33  ;;  %v17387_v3 = vadd.f32 %v3550_v0, %v17161_v63  ;;  %5626 = vmatpush1.bf16.msra.mxu1 %v12139_v13  ;;  %5667 = vmatpush1.bf16.msra.mxu0 %v12141_v62  ;;  %v12055_v63 = vld [vmem:[%s20092_s4 + $0xd20] sm:$0xff]  ;;  %v12102_v13 = vcombine.high %v12036_v52, %v12040_v39  ;;  %v12066_v52 = vld [vmem:[%s20092_s4 + $0xd78] sm:$0xff] }
 0x3d8   :  { %v3511_v27 = vpop.f32.mrf.mxu1  ;;  %v3552_v18 = vpop.f32.mrf.mxu0  ;;  %5627 = vmatprep.subr.bf16.mxu1 %v12132_v40  ;;  %5668 = vmatprep.subr.bf16.mxu0 %v12134_v38  ;;  %v12116_v22 = vcombine.high %v12051_v12, %v12055_v63  ;;  %v12115_v10 = vcombine.low %v12051_v12, %v12055_v63  ;;  %v12027_v62 = vld [vmem:[%s20092_s4 + $0xc40] sm:$0xff]  ;;  %v12028_v38 = vld [vmem:[%s20092_s4 + $0xc48] sm:$0xff]  ;;  %v12077_v63 = vld [vmem:[%s20092_s4 + $0xdd0] sm:$0xff]  ;;  %v3558_v39 = vadd.f32 %v17279_v49, %v17055_v23 }
 0x3d9   :  { %v17393_v43 = vadd.f32 %v3511_v27, %v17167_v58  ;;  %v17396_v33 = vadd.f32 %v3552_v18, %v17170_v16  ;;  %5657 = vmatprep.mubr.bf16.mxu1 %v14127_v11  ;;  %5698 = vmatprep.mubr.bf16.mxu0 %v14127_v11  ;;  %v12123_v16 = vcombine.low %v12059_v8, %v12063_v45  ;;  %v12031_v40 = vld [vmem:[%s20092_s4 + $0xc60] sm:$0xff]  ;;  %v12032_v8 = vld [vmem:[%s20092_s4 + $0xc68] sm:$0xff] }
 0x3da   :  { %v3513_v58 = vpop.f32.mrf.mxu1  ;;  %v3554_v50 = vpop.f32.mrf.mxu0  ;;  %v12099_v45 = vcombine.low %v12035_v26, %v12039_v31  ;;  %v12092_v42 = vcombine.high %v12027_v62, %v12031_v40  ;;  %v12094_v17 = vcombine.high %v12028_v38, %v12032_v8  ;;  %v12019_v0 = vld [vmem:[%s20092_s4 + $0xc00] sm:$0xff]  ;;  %v12024_v27 = vld [vmem:[%s20092_s4 + $0xc28] sm:$0xff]  ;;  %v12091_v18 = vcombine.low %v12027_v62, %v12031_v40  ;;  %v12065_v26 = vld [vmem:[%s20092_s4 + $0xd70] sm:$0xff] }
 0x3db   :  { %5628 = vmatpush1.bf16.msra.mxu1 %v12131_v59  ;;  %5669 = vmatpush1.bf16.msra.mxu0 %v12133_v32  ;;  %v12023_v59 = vld [vmem:[%s20092_s4 + $0xc20] sm:$0xff]  ;;  %v12020_v32 = vld [vmem:[%s20092_s4 + $0xc08] sm:$0xff]  ;;  %v12082_v58 = vld [vmem:[%s20092_s4 + $0xdf8] sm:$0xff]  ;;  %v12143_v5 = vcombine.low %v12077_v63, %v12081_v15  ;;  %v3560_v62 = vadd.f32 %v17281_v14, %v17058_v47 }
 0x3dc   :  { %v3514_v57 = vpop.f32.mrf.mxu1  ;;  %v3555_v9 = vpop.f32.mrf.mxu0  ;;  %5629 = vmatprep.subr.bf16.mxu1 %v12124_v35  ;;  %5670 = vmatprep.subr.bf16.mxu0 %v12126_v61  ;;  %v12093_v35 = vcombine.low %v12028_v38, %v12032_v8  ;;  %v12084_v61 = vcombine.high %v12019_v0, %v12023_v59  ;;  %v12086_v12 = vcombine.high %v12020_v32, %v12024_v27  ;;  %v12062_v31 = vld [vmem:[%s20092_s4 + $0xd58] sm:$0xff] }
 0x3dd   :  { %v12083_v50 = vcombine.low %v12019_v0, %v12023_v59  ;;  %v12144_v9 = vcombine.high %v12077_v63, %v12081_v15  ;;  %v12145_v41 = vcombine.low %v12078_v28, %v12082_v58  ;;  %v12058_v14 = vld [vmem:[%s20092_s4 + $0xd38] sm:$0xff]  ;;  %v12049_v63 = vld [vmem:[%s20092_s4 + $0xcf0] sm:$0xff] }
 0x3de   :  { %v12046_v15 = vld [vmem:[%s20092_s4 + $0xcd8] sm:$0xff] }
 0x3df   :  { %5630 = vmatpush1.bf16.msra.mxu1 %v12123_v16  ;;  %5671 = vmatpush1.bf16.msra.mxu0 %v12125_v53  ;;  %v12085_v16 = vcombine.low %v12020_v32, %v12024_v27  ;;  %v14124_v53 = vld [vmem:[%s20093_s3] ss:$0 sm:$0xff]  ;;  %v12129_v32 = vcombine.low %v12062_v31, %v12066_v52 }
 0x3e0   :  { %5631 = vmatprep.subr.bf16.mxu1 %v12116_v22  ;;  %5672 = vmatprep.subr.bf16.mxu0 %v12118_v25  ;;  %v1860_v57 = vadd.f32 %v14124_v53, %v16263_v55  ;;  %v12146_v22 = vcombine.high %v12078_v28, %v12082_v58  ;;  %v12069_v25 = vld [vmem:[%s20092_s4 + $0xd90] sm:$0xff]  ;;  %v12074_v55 = vld [vmem:[%s20092_s4 + $0xdb8] sm:$0xff] }
 0x3e1   :  { %v12050_v28 = vld [vmem:[%s20092_s4 + $0xcf8] sm:$0xff] }
 0x3e2   :  { %v12114_v53 = vcombine.high %v12046_v15, %v12050_v28 }
 0x3e3   :  { %5632 = vmatpush1.bf16.msra.mxu1 %v12115_v10  ;;  %5673 = vmatpush1.bf16.msra.mxu0 %v12117_v44  ;;  %v17485_v10 = vpack.c.bf16 %v1860_v57, %v1860_v57  ;;  %v12136_v44 = vcombine.high %v12069_v25, %v12073_v54  ;;  %v12037_v57 = vld [vmem:[%s20092_s4 + $0xc90] sm:$0xff] }
 0x3e4   :  { %5633 = vmatprep.subr.bf16.mxu1 %v12108_v30  ;;  %5674 = vmatprep.subr.bf16.mxu0 %v12110_v37  ;;  %v12138_v30 = vcombine.high %v12070_v51, %v12074_v55  ;;  %v12061_v37 = vld [vmem:[%s20092_s4 + $0xd50] sm:$0xff] }
 0x3e5   :  { %v12128_v8 = vcombine.high %v12061_v37, %v12065_v26  ;;  %v12127_v59 = vcombine.low %v12061_v37, %v12065_v26  ;;  %v12034_v37 = vld [vmem:[%s20092_s4 + $0xc78] sm:$0xff] }
 0x3e7   :  { %5634 = vmatpush1.bf16.msra.mxu1 %v12107_v29  ;;  %5675 = vmatpush1.bf16.msra.mxu0 %v12109_v60 }
 0x3e8   :  { %5635 = vmatprep.subr.bf16.mxu1 %v12100_v46  ;;  %5676 = vmatprep.subr.bf16.mxu0 %v12102_v13  ;;  %v12135_v46 = vcombine.low %v12069_v25, %v12073_v54  ;;  %v12137_v13 = vcombine.low %v12070_v51, %v12074_v55  ;;  %v12042_v25 = vld [vmem:[%s20092_s4 + $0xcb8] sm:$0xff]  ;;  %v12113_v51 = vcombine.low %v12046_v15, %v12050_v28  ;;  %v12187_v28 = vld [vmem:[%s20092_s4 + $0xf40] sm:$0xff] }
 0x3eb   :  { %5636 = vmatpush1.bf16.msra.mxu1 %v12099_v45  ;;  %5677 = vmatpush1.bf16.msra.mxu0 %v12101_v34  ;;  %v12130_v45 = vcombine.high %v12062_v31, %v12066_v52  ;;  %v12053_v34 = vld [vmem:[%s20092_s4 + $0xd10] sm:$0xff] }
 0x3ec   :  { %5637 = vmatprep.subr.bf16.mxu1 %v12092_v42  ;;  %5678 = vmatprep.subr.bf16.mxu0 %v12094_v17 }
 0x3ef   :  { %5638 = vmatpush1.bf16.msra.mxu1 %v12091_v18  ;;  %5679 = vmatpush1.bf16.msra.mxu0 %v12093_v35 }
 0x3f0   :  { %5639 = vmatprep.subr.bf16.mxu1 %v12084_v61  ;;  %5680 = vmatprep.subr.bf16.mxu0 %v12086_v12  ;;  %v12045_v12 = vld [vmem:[%s20092_s4 + $0xcd0] sm:$0xff] }
 0x3f1   :  { %v12111_v54 = vcombine.low %v12045_v12, %v12049_v63 }
 0x3f3   :  { %5640 = vmatpush1.bf16.msra.mxu1 %v12083_v50  ;;  %5681 = vmatpush1.bf16.msra.mxu0 %v12085_v16  ;;  %v12112_v16 = vcombine.high %v12045_v12, %v12049_v63 }
 0x3f4   :  { %5707 = vmatprep.subr.bf16.mxu1 %v12144_v9  ;;  %5748 = vmatprep.subr.bf16.mxu0 %v12146_v22  ;;  %v12041_v9 = vld [vmem:[%s20092_s4 + $0xcb0] sm:$0xff]  ;;  %v12038_v22 = vld [vmem:[%s20092_s4 + $0xc98] sm:$0xff] }
 0x3f5   :  { %v12104_v55 = vcombine.high %v12037_v57, %v12041_v9  ;;  %v12103_v26 = vcombine.low %v12037_v57, %v12041_v9  ;;  %v12105_v31 = vcombine.low %v12038_v22, %v12042_v25 }
 0x3f6   :  { %v3985_v29 = vpop.f32.mrf.mxu1  ;;  %v4026_v60 = vpop.f32.mrf.mxu0  ;;  %5658 = vmatmul.mubr.bf16.vlgmr.msra.gmra.mxu1 %v17485_v10  ;;  %5699 = vmatmul.mubr.bf16.vlgmr.msra.gmra.mxu0 %v17485_v10 }
 0x3f7   :  { %v17506_v40 = vadd.f32 %v3985_v29, %v17274_v2  ;;  %v17509_v38 = vadd.f32 %v4026_v60, %v17277_v19  ;;  %5708 = vmatpush1.bf16.msra.mxu1 %v12143_v5  ;;  %5749 = vmatpush1.bf16.msra.mxu0 %v12145_v41  ;;  %v12057_v2 = vld [vmem:[%s20092_s4 + $0xd30] sm:$0xff]  ;;  %v12054_v19 = vld [vmem:[%s20092_s4 + $0xd18] sm:$0xff]  ;;  %v12106_v5 = vcombine.high %v12038_v22, %v12042_v25 }
 0x3f8   :  { %v3987_v23 = vpop.f32.mrf.mxu1  ;;  %v4028_v49 = vpop.f32.mrf.mxu0  ;;  %5709 = vmatprep.subr.bf16.mxu1 %v12136_v44  ;;  %5750 = vmatprep.subr.bf16.mxu0 %v12138_v30  ;;  %v12120_v35 = vcombine.high %v12053_v34, %v12057_v2  ;;  %v12122_v61 = vcombine.high %v12054_v19, %v12058_v14  ;;  %v12119_v58 = vcombine.low %v12053_v34, %v12057_v2  ;;  %v12029_v41 = vld [vmem:[%s20092_s4 + $0xc50] sm:$0xff]  ;;  %v12030_v30 = vld [vmem:[%s20092_s4 + $0xc58] sm:$0xff]  ;;  %v12207_v34 = vld [vmem:[%s20092_s4 + $0xfe0] sm:$0xff] }
 0x3f9   :  { %v17514_v42 = vadd.f32 %v3987_v23, %v3558_v39  ;;  %v17516_v47 = vadd.f32 %v4028_v49, %v3560_v62  ;;  %5739 = vmatprep.mubr.bf16.mxu1 %v14127_v11  ;;  %5780 = vmatprep.mubr.bf16.mxu0 %v14127_v11  ;;  %v12121_v50 = vcombine.low %v12054_v19, %v12058_v14  ;;  %v12033_v44 = vld [vmem:[%s20092_s4 + $0xc70] sm:$0xff]  ;;  %v12204_v2 = vld [vmem:[%s20092_s4 + $0xfc8] sm:$0xff] }
 0x3fa   :  { %v3989_v17 = vpop.f32.mrf.mxu1  ;;  %v4030_v0 = vpop.f32.mrf.mxu0  ;;  %v12096_v52 = vcombine.high %v12029_v41, %v12033_v44  ;;  %v12098_v39 = vcombine.high %v12030_v30, %v12034_v37  ;;  %v12021_v29 = vld [vmem:[%s20092_s4 + $0xc10] sm:$0xff]  ;;  %v12095_v62 = vcombine.low %v12029_v41, %v12033_v44  ;;  %v12097_v23 = vcombine.low %v12030_v30, %v12034_v37  ;;  %v12208_v19 = vld [vmem:[%s20092_s4 + $0xfe8] sm:$0xff] }
 0x3fb   :  { %5710 = vmatpush1.bf16.msra.mxu1 %v12135_v46  ;;  %5751 = vmatpush1.bf16.msra.mxu0 %v12137_v13  ;;  %v12025_v60 = vld [vmem:[%s20092_s4 + $0xc30] sm:$0xff]  ;;  %v12022_v46 = vld [vmem:[%s20092_s4 + $0xc18] sm:$0xff]  ;;  %v12269_v12 = vcombine.low %v12204_v2, %v12208_v19  ;;  %v12180_v30 = vld [vmem:[%s20092_s4 + $0xf08] sm:$0xff] }
 0x3fc   :  { %v3990_v27 = vpop.f32.mrf.mxu1  ;;  %v4031_v18 = vpop.f32.mrf.mxu0  ;;  %5711 = vmatprep.subr.bf16.mxu1 %v12128_v8  ;;  %5752 = vmatprep.subr.bf16.mxu0 %v12130_v45  ;;  %v12026_v13 = vld [vmem:[%s20092_s4 + $0xc38] sm:$0xff]  ;;  %v12088_v49 = vcombine.high %v12021_v29, %v12025_v60  ;;  %v12203_v45 = vld [vmem:[%s20092_s4 + $0xfc0] sm:$0xff]  ;;  %v12087_v14 = vcombine.low %v12021_v29, %v12025_v60  ;;  %v12184_v37 = vld [vmem:[%s20092_s4 + $0xf28] sm:$0xff] }
 0x3fd   :  { %v12090_v8 = vcombine.high %v12022_v46, %v12026_v13  ;;  %v12089_v17 = vcombine.low %v12022_v46, %v12026_v13  ;;  %v12268_v0 = vcombine.high %v12203_v45, %v12207_v34  ;;  %v12199_v27 = vld [vmem:[%s20092_s4 + $0xfa0] sm:$0xff]  ;;  %v12196_v18 = vld [vmem:[%s20092_s4 + $0xf88] sm:$0xff]  ;;  %v12246_v60 = vcombine.high %v12180_v30, %v12184_v37 }
 0x3fe   :  { %v12171_v46 = vld [vmem:[%s20092_s4 + $0xec0] sm:$0xff] }
 0x3ff   :  { %5712 = vmatpush1.bf16.msra.mxu1 %v12127_v59  ;;  %5753 = vmatpush1.bf16.msra.mxu0 %v12129_v32  ;;  %v12270_v59 = vcombine.high %v12204_v2, %v12208_v19  ;;  %v12195_v32 = vld [vmem:[%s20092_s4 + $0xf80] sm:$0xff] }
 0x400   :  { %5713 = vmatprep.subr.bf16.mxu1 %v12120_v35  ;;  %5754 = vmatprep.subr.bf16.mxu0 %v12122_v61  ;;  %v12200_v35 = vld [vmem:[%s20092_s4 + $0xfa8] sm:$0xff]  ;;  %v12267_v61 = vcombine.low %v12203_v45, %v12207_v34  ;;  %v12260_v63 = vcombine.high %v12195_v32, %v12199_v27  ;;  %v12259_v9 = vcombine.low %v12195_v32, %v12199_v27  ;;  %v12175_v13 = vld [vmem:[%s20092_s4 + $0xee0] sm:$0xff] }
 0x401   :  { %v12262_v15 = vcombine.high %v12196_v18, %v12200_v35  ;;  %v12236_v45 = vcombine.high %v12171_v46, %v12175_v13  ;;  %v12163_v2 = vld [vmem:[%s20092_s4 + $0xe80] sm:$0xff] }
 0x402   :  { %v12167_v19 = vld [vmem:[%s20092_s4 + $0xea0] sm:$0xff] }
 0x403   :  { %5714 = vmatpush1.bf16.msra.mxu1 %v12119_v58  ;;  %5755 = vmatpush1.bf16.msra.mxu0 %v12121_v50  ;;  %v12191_v58 = vld [vmem:[%s20092_s4 + $0xf60] sm:$0xff]  ;;  %v12188_v50 = vld [vmem:[%s20092_s4 + $0xf48] sm:$0xff]  ;;  %v12228_v32 = vcombine.high %v12163_v2, %v12167_v19 }
 0x404   :  { %5715 = vmatprep.subr.bf16.mxu1 %v12112_v16  ;;  %5756 = vmatprep.subr.bf16.mxu0 %v12114_v53  ;;  %v12192_v16 = vld [vmem:[%s20092_s4 + $0xf68] sm:$0xff] }
 0x405   :  { %v12254_v41 = vcombine.high %v12188_v50, %v12192_v16 }
 0x407   :  { %5716 = vmatpush1.bf16.msra.mxu1 %v12111_v54  ;;  %5757 = vmatpush1.bf16.msra.mxu0 %v12113_v51  ;;  %v12261_v54 = vcombine.low %v12196_v18, %v12200_v35  ;;  %v12155_v18 = vld [vmem:[%s20092_s4 + $0xe40] sm:$0xff] }
 0x408   :  { %5717 = vmatprep.subr.bf16.mxu1 %v12104_v55  ;;  %5758 = vmatprep.subr.bf16.mxu0 %v12106_v5  ;;  %v12252_v5 = vcombine.high %v12187_v28, %v12191_v58  ;;  %v12159_v35 = vld [vmem:[%s20092_s4 + $0xe60] sm:$0xff] }
 0x40b   :  { %5718 = vmatpush1.bf16.msra.mxu1 %v12103_v26  ;;  %5759 = vmatpush1.bf16.msra.mxu0 %v12105_v31  ;;  %v12253_v31 = vcombine.low %v12188_v50, %v12192_v16  ;;  %v12147_v50 = vld [vmem:[%s20092_s4 + $0xe00] sm:$0xff] }
 0x40c   :  { %5719 = vmatprep.subr.bf16.mxu1 %v12096_v52  ;;  %5760 = vmatprep.subr.bf16.mxu0 %v12098_v39  ;;  %v12151_v16 = vld [vmem:[%s20092_s4 + $0xe20] sm:$0xff] }
 0x40f   :  { %5720 = vmatpush1.bf16.msra.mxu1 %v12095_v62  ;;  %5761 = vmatpush1.bf16.msra.mxu0 %v12097_v23  ;;  %v12172_v62 = vld [vmem:[%s20092_s4 + $0xec8] sm:$0xff] }
 0x410   :  { %5721 = vmatprep.subr.bf16.mxu1 %v12088_v49  ;;  %5762 = vmatprep.subr.bf16.mxu0 %v12090_v8  ;;  %v12176_v23 = vld [vmem:[%s20092_s4 + $0xee8] sm:$0xff]  ;;  %v12245_v8 = vcombine.low %v12180_v30, %v12184_v37  ;;  %v12211_v30 = vcombine.low %v12147_v50, %v12151_v16 }
 0x411   :  { %v12238_v34 = vcombine.high %v12172_v62, %v12176_v23 }
 0x413   :  { %5722 = vmatpush1.bf16.msra.mxu1 %v12087_v14  ;;  %5763 = vmatpush1.bf16.msra.mxu0 %v12089_v17  ;;  %v12164_v14 = vld [vmem:[%s20092_s4 + $0xe88] sm:$0xff] }
 0x414   :  { %6183 = vmatprep.subr.bf16.mxu1 %v12268_v0  ;;  %6224 = vmatprep.subr.bf16.mxu0 %v12270_v59  ;;  %v12168_v17 = vld [vmem:[%s20092_s4 + $0xea8] sm:$0xff]  ;;  %v12235_v0 = vcombine.low %v12171_v46, %v12175_v13  ;;  %v12237_v59 = vcombine.low %v12172_v62, %v12176_v23  ;;  %v17715_v46 = vpack.c.bf16 %v16249_v6, %v16249_v6  ;;  %v12189_v23 = vld [vmem:[%s20092_s4 + $0xf50] sm:$0xff]  ;;  %v12194_v6 = vld [vmem:[%s20092_s4 + $0xf78] sm:$0xff] }
 0x415   :  { %v12230_v27 = vcombine.high %v12164_v14, %v12168_v17 }
 0x416   :  { %v4067_v53 = vpop.f32.mrf.mxu1  ;;  %v4108_v57 = vpop.f32.mrf.mxu0  ;;  %5740 = vmatmul.mubr.bf16.vlgmr.msra.gmra.mxu1 %v17485_v10  ;;  %5781 = vmatmul.mubr.bf16.vlgmr.msra.gmra.mxu0 %v17485_v10  ;;  %v12179_v10 = vld [vmem:[%s20092_s4 + $0xf00] sm:$0xff] }
 0x417   :  { %v17616_v22 = vadd.f32 %v4067_v53, %v17384_v7  ;;  %v17619_v25 = vadd.f32 %v4108_v57, %v17387_v3  ;;  %6184 = vmatpush1.bf16.msra.mxu1 %v12267_v61  ;;  %6225 = vmatpush1.bf16.msra.mxu0 %v12269_v12  ;;  %v12183_v3 = vld [vmem:[%s20092_s4 + $0xf20] sm:$0xff]  ;;  %v12156_v61 = vld [vmem:[%s20092_s4 + $0xe48] sm:$0xff] }
 0x418   :  { %v4069_v51 = vpop.f32.mrf.mxu1  ;;  %v4110_v55 = vpop.f32.mrf.mxu0  ;;  %6185 = vmatprep.subr.bf16.mxu1 %v12260_v63  ;;  %6226 = vmatprep.subr.bf16.mxu0 %v12262_v15  ;;  %v12244_v29 = vcombine.high %v12179_v10, %v12183_v3  ;;  %v12243_v49 = vcombine.low %v12179_v10, %v12183_v3  ;;  %v12160_v12 = vld [vmem:[%s20092_s4 + $0xe68] sm:$0xff]  ;;  %v12227_v63 = vcombine.low %v12163_v2, %v12167_v19  ;;  %v12206_v10 = vld [vmem:[%s20092_s4 + $0xfd8] sm:$0xff] }
 0x419   :  { %v17625_v44 = vadd.f32 %v4069_v51, %v17393_v43  ;;  %v17628_v7 = vadd.f32 %v4110_v55, %v17396_v33  ;;  %6215 = vmatprep.mubr.bf16.mxu1 %v14127_v11  ;;  %6256 = vmatprep.mubr.bf16.mxu0 %v14127_v11  ;;  %v12251_v33 = vcombine.low %v12187_v28, %v12191_v58  ;;  %v12148_v53 = vld [vmem:[%s20092_s4 + $0xe08] sm:$0xff]  ;;  %v12210_v3 = vld [vmem:[%s20092_s4 + $0xff8] sm:$0xff] }
 0x41a   :  { %v4071_v43 = vpop.f32.mrf.mxu1  ;;  %v4112_v26 = vpop.f32.mrf.mxu0  ;;  %v12229_v15 = vcombine.low %v12164_v14, %v12168_v17  ;;  %v12220_v28 = vcombine.high %v12155_v18, %v12159_v35  ;;  %v12222_v58 = vcombine.high %v12156_v61, %v12160_v12  ;;  %v12152_v57 = vld [vmem:[%s20092_s4 + $0xe28] sm:$0xff]  ;;  %v12212_v51 = vcombine.high %v12147_v50, %v12151_v16 }
 0x41b   :  { %6186 = vmatpush1.bf16.msra.mxu1 %v12259_v9  ;;  %6227 = vmatpush1.bf16.msra.mxu0 %v12261_v54  ;;  %v12219_v9 = vcombine.low %v12155_v18, %v12159_v35  ;;  %v12221_v54 = vcombine.low %v12156_v61, %v12160_v12  ;;  %v12214_v55 = vcombine.high %v12148_v53, %v12152_v57  ;;  %v12181_v18 = vld [vmem:[%s20092_s4 + $0xf10] sm:$0xff]  ;;  %v12182_v61 = vld [vmem:[%s20092_s4 + $0xf18] sm:$0xff] }
 0x41c   :  { %v4072_v52 = vpop.f32.mrf.mxu1  ;;  %v4113_v39 = vpop.f32.mrf.mxu0  ;;  %6187 = vmatprep.subr.bf16.mxu1 %v12252_v5  ;;  %6228 = vmatprep.subr.bf16.mxu0 %v12254_v41  ;;  %v12205_v5 = vld [vmem:[%s20092_s4 + $0xfd0] sm:$0xff]  ;;  %v12213_v37 = vcombine.low %v12148_v53, %v12152_v57  ;;  %v12274_v26 = vcombine.high %v12206_v10, %v12210_v3  ;;  %v12186_v12 = vld [vmem:[%s20092_s4 + $0xf38] sm:$0xff] }
 0x41d   :  { %v12209_v41 = vld [vmem:[%s20092_s4 + $0xff0] sm:$0xff]  ;;  %v12198_v52 = vld [vmem:[%s20092_s4 + $0xf98] sm:$0xff]  ;;  %v12250_v16 = vcombine.high %v12182_v61, %v12186_v12 }
 0x41e   :  { %v12272_v43 = vcombine.high %v12205_v5, %v12209_v41  ;;  %v12202_v39 = vld [vmem:[%s20092_s4 + $0xfb8] sm:$0xff]  ;;  %v12173_v53 = vld [vmem:[%s20092_s4 + $0xed0] sm:$0xff] }
 0x41f   :  { %6188 = vmatpush1.bf16.msra.mxu1 %v12251_v33  ;;  %6229 = vmatpush1.bf16.msra.mxu0 %v12253_v31  ;;  %v12197_v33 = vld [vmem:[%s20092_s4 + $0xf90] sm:$0xff]  ;;  %v12266_v62 = vcombine.high %v12198_v52, %v12202_v39  ;;  %v12265_v17 = vcombine.low %v12198_v52, %v12202_v39 }
 0x420   :  { %6189 = vmatprep.subr.bf16.mxu1 %v12244_v29  ;;  %6230 = vmatprep.subr.bf16.mxu0 %v12246_v60  ;;  %v12201_v31 = vld [vmem:[%s20092_s4 + $0xfb0] sm:$0xff]  ;;  %v12271_v29 = vcombine.low %v12205_v5, %v12209_v41  ;;  %v12273_v60 = vcombine.low %v12206_v10, %v12210_v3 }
 0x421   :  { %v12264_v13 = vcombine.high %v12197_v33, %v12201_v31  ;;  %v12263_v2 = vcombine.low %v12197_v33, %v12201_v31  ;;  %v12177_v57 = vld [vmem:[%s20092_s4 + $0xef0] sm:$0xff] }
 0x422   :  { %v12240_v5 = vcombine.high %v12173_v53, %v12177_v57  ;;  %v12165_v10 = vld [vmem:[%s20092_s4 + $0xe90] sm:$0xff] }
 0x423   :  { %6190 = vmatpush1.bf16.msra.mxu1 %v12243_v49  ;;  %6231 = vmatpush1.bf16.msra.mxu0 %v12245_v8  ;;  %v12193_v49 = vld [vmem:[%s20092_s4 + $0xf70] sm:$0xff]  ;;  %v12190_v8 = vld [vmem:[%s20092_s4 + $0xf58] sm:$0xff] }
 0x424   :  { %6191 = vmatprep.subr.bf16.mxu1 %v12236_v45  ;;  %6232 = vmatprep.subr.bf16.mxu0 %v12238_v34  ;;  %v12169_v3 = vld [vmem:[%s20092_s4 + $0xeb0] sm:$0xff] }
 0x425   :  { %v12232_v33 = vcombine.high %v12165_v10, %v12169_v3  ;;  %v12157_v52 = vld [vmem:[%s20092_s4 + $0xe50] sm:$0xff] }
 0x426   :  { %v12161_v39 = vld [vmem:[%s20092_s4 + $0xe70] sm:$0xff] }
 0x427   :  { %6192 = vmatpush1.bf16.msra.mxu1 %v12235_v0  ;;  %6233 = vmatpush1.bf16.msra.mxu0 %v12237_v59 }
 0x428   :  { %6193 = vmatprep.subr.bf16.mxu1 %v12228_v32  ;;  %6234 = vmatprep.subr.bf16.mxu0 %v12230_v27  ;;  %v12256_v32 = vcombine.high %v12189_v23, %v12193_v49  ;;  %v12258_v27 = vcombine.high %v12190_v8, %v12194_v6 }
 0x42b   :  { %6194 = vmatpush1.bf16.msra.mxu1 %v12227_v63  ;;  %6235 = vmatpush1.bf16.msra.mxu0 %v12229_v15  ;;  %v12257_v15 = vcombine.low %v12190_v8, %v12194_v6  ;;  %v12149_v8 = vld [vmem:[%s20092_s4 + $0xe10] sm:$0xff] }
 0x42c   :  { %6195 = vmatprep.subr.bf16.mxu1 %v12220_v28  ;;  %6236 = vmatprep.subr.bf16.mxu0 %v12222_v58  ;;  %v12153_v6 = vld [vmem:[%s20092_s4 + $0xe30] sm:$0xff] }
 0x42f   :  { %6196 = vmatpush1.bf16.msra.mxu1 %v12219_v9  ;;  %6237 = vmatpush1.bf16.msra.mxu0 %v12221_v54  ;;  %v12174_v9 = vld [vmem:[%s20092_s4 + $0xed8] sm:$0xff] }
 0x430   :  { %6197 = vmatprep.subr.bf16.mxu1 %v12212_v51  ;;  %6238 = vmatprep.subr.bf16.mxu0 %v12214_v55  ;;  %v12178_v54 = vld [vmem:[%s20092_s4 + $0xef8] sm:$0xff]  ;;  %v12249_v55 = vcombine.low %v12182_v61, %v12186_v12  ;;  %v12215_v61 = vcombine.low %v12149_v8, %v12153_v6 }
 0x431   :  { %v12242_v41 = vcombine.high %v12174_v9, %v12178_v54 }
 0x433   :  { %6198 = vmatpush1.bf16.msra.mxu1 %v12211_v30  ;;  %6239 = vmatpush1.bf16.msra.mxu0 %v12213_v37  ;;  %v12166_v30 = vld [vmem:[%s20092_s4 + $0xe98] sm:$0xff] }
 0x434   :  { %6265 = vmatprep.subr.bf16.mxu1 %v12272_v43  ;;  %6306 = vmatprep.subr.bf16.mxu0 %v12274_v26  ;;  %v12170_v37 = vld [vmem:[%s20092_s4 + $0xeb8] sm:$0xff]  ;;  %v12239_v43 = vcombine.low %v12173_v53, %v12177_v57  ;;  %v12241_v26 = vcombine.low %v12174_v9, %v12178_v54  ;;  %v12315_v9 = vld [vmem:[%s20092_s4 + $0x1140] sm:$0xff] }
 0x435   :  { %v12234_v31 = vcombine.high %v12166_v30, %v12170_v37  ;;  %v12319_v54 = vld [vmem:[%s20092_s4 + $0x1160] sm:$0xff] }
 0x436   :  { %v4543_v45 = vpop.f32.mrf.mxu1  ;;  %v4584_v34 = vpop.f32.mrf.mxu0  ;;  %6216 = vmatmul.mubr.bf16.vlgmr.msra.gmra.mxu1 %v17715_v46  ;;  %6257 = vmatmul.mubr.bf16.vlgmr.msra.gmra.mxu0 %v17715_v46 }
 0x437   :  { %v17732_v19 = vadd.f32 %v4543_v45, %v17506_v40  ;;  %v17735_v14 = vadd.f32 %v4584_v34, %v17509_v38  ;;  %6266 = vmatpush1.bf16.msra.mxu1 %v12271_v29  ;;  %6307 = vmatpush1.bf16.msra.mxu0 %v12273_v60  ;;  %v12185_v38 = vld [vmem:[%s20092_s4 + $0xf30] sm:$0xff]  ;;  %v12158_v29 = vld [vmem:[%s20092_s4 + $0xe58] sm:$0xff] }
 0x438   :  { %v4545_v0 = vpop.f32.mrf.mxu1  ;;  %v4586_v59 = vpop.f32.mrf.mxu0  ;;  %6267 = vmatprep.subr.bf16.mxu1 %v12264_v13  ;;  %6308 = vmatprep.subr.bf16.mxu0 %v12266_v62  ;;  %v12248_v50 = vcombine.high %v12181_v18, %v12185_v38  ;;  %v12247_v51 = vcombine.low %v12181_v18, %v12185_v38  ;;  %v12162_v60 = vld [vmem:[%s20092_s4 + $0xe78] sm:$0xff]  ;;  %v12231_v13 = vcombine.low %v12165_v10, %v12169_v3  ;;  %v12332_v18 = vld [vmem:[%s20092_s4 + $0x11c8] sm:$0xff] }
 0x439   :  { %v17741_v35 = vadd.f32 %v4545_v0, %v17514_v42  ;;  %v17744_v40 = vadd.f32 %v4586_v59, %v17516_v47  ;;  %6297 = vmatprep.mubr.bf16.mxu1 %v14127_v11  ;;  %6338 = vmatprep.mubr.bf16.mxu0 %v14127_v11  ;;  %v12255_v47 = vcombine.low %v12189_v23, %v12193_v49  ;;  %v12150_v45 = vld [vmem:[%s20092_s4 + $0xe18] sm:$0xff]  ;;  %v12336_v38 = vld [vmem:[%s20092_s4 + $0x11e8] sm:$0xff] }
 0x43a   :  { %v4547_v42 = vpop.f32.mrf.mxu1  ;;  %v4588_v63 = vpop.f32.mrf.mxu0  ;;  %v12233_v62 = vcombine.low %v12166_v30, %v12170_v37  ;;  %v12224_v23 = vcombine.high %v12157_v52, %v12161_v39  ;;  %v12226_v49 = vcombine.high %v12158_v29, %v12162_v60  ;;  %v12154_v34 = vld [vmem:[%s20092_s4 + $0xe38] sm:$0xff]  ;;  %v12216_v0 = vcombine.high %v12149_v8, %v12153_v6  ;;  %v12299_v6 = vld [vmem:[%s20092_s4 + $0x10c0] sm:$0xff] }
 0x43b   :  { %6268 = vmatpush1.bf16.msra.mxu1 %v12263_v2  ;;  %6309 = vmatpush1.bf16.msra.mxu0 %v12265_v17  ;;  %v12223_v2 = vcombine.low %v12157_v52, %v12161_v39  ;;  %v12225_v17 = vcombine.low %v12158_v29, %v12162_v60  ;;  %v12218_v59 = vcombine.high %v12150_v45, %v12154_v34  ;;  %v12308_v39 = vld [vmem:[%s20092_s4 + $0x1108] sm:$0xff] }
 0x43c   :  { %v4548_v28 = vpop.f32.mrf.mxu1  ;;  %v4589_v58 = vpop.f32.mrf.mxu0  ;;  %6269 = vmatprep.subr.bf16.mxu1 %v12256_v32  ;;  %6310 = vmatprep.subr.bf16.mxu0 %v12258_v27  ;;  %v12331_v32 = vld [vmem:[%s20092_s4 + $0x11c0] sm:$0xff]  ;;  %v12217_v12 = vcombine.low %v12150_v45, %v12154_v34  ;;  %v12398_v63 = vcombine.high %v12332_v18, %v12336_v38  ;;  %v12312_v29 = vld [vmem:[%s20092_s4 + $0x1128] sm:$0xff] }
 0x43d   :  { %v12335_v27 = vld [vmem:[%s20092_s4 + $0x11e0] sm:$0xff]  ;;  %v12324_v28 = vld [vmem:[%s20092_s4 + $0x1188] sm:$0xff]  ;;  %v12374_v8 = vcombine.high %v12308_v39, %v12312_v29 }
 0x43e   :  { %v12396_v42 = vcombine.high %v12331_v32, %v12335_v27  ;;  %v12328_v58 = vld [vmem:[%s20092_s4 + $0x11a8] sm:$0xff]  ;;  %v12303_v45 = vld [vmem:[%s20092_s4 + $0x10e0] sm:$0xff] }
 0x43f   :  { %6270 = vmatpush1.bf16.msra.mxu1 %v12255_v47  ;;  %6311 = vmatpush1.bf16.msra.mxu0 %v12257_v15  ;;  %v12323_v47 = vld [vmem:[%s20092_s4 + $0x1180] sm:$0xff]  ;;  %v12390_v57 = vcombine.high %v12324_v28, %v12328_v58  ;;  %v12389_v37 = vcombine.low %v12324_v28, %v12328_v58  ;;  %v12300_v34 = vld [vmem:[%s20092_s4 + $0x10c8] sm:$0xff] }
 0x440   :  { %6271 = vmatprep.subr.bf16.mxu1 %v12248_v50  ;;  %6312 = vmatprep.subr.bf16.mxu0 %v12250_v16  ;;  %v12327_v15 = vld [vmem:[%s20092_s4 + $0x11a0] sm:$0xff]  ;;  %v12395_v50 = vcombine.low %v12331_v32, %v12335_v27  ;;  %v12397_v16 = vcombine.low %v12332_v18, %v12336_v38  ;;  %v12292_v38 = vld [vmem:[%s20092_s4 + $0x1088] sm:$0xff] }
 0x441   :  { %v12388_v53 = vcombine.high %v12323_v47, %v12327_v15  ;;  %v12387_v10 = vcombine.low %v12323_v47, %v12327_v15  ;;  %v12291_v27 = vld [vmem:[%s20092_s4 + $0x1080] sm:$0xff]  ;;  %v12284_v58 = vld [vmem:[%s20092_s4 + $0x1048] sm:$0xff] }
 0x442   :  { %v12295_v18 = vld [vmem:[%s20092_s4 + $0x10a0] sm:$0xff] }
 0x443   :  { %6272 = vmatpush1.bf16.msra.mxu1 %v12247_v51  ;;  %6313 = vmatpush1.bf16.msra.mxu0 %v12249_v55  ;;  %v12316_v51 = vld [vmem:[%s20092_s4 + $0x1148] sm:$0xff]  ;;  %v12283_v15 = vld [vmem:[%s20092_s4 + $0x1040] sm:$0xff] }
 0x444   :  { %6273 = vmatprep.subr.bf16.mxu1 %v12240_v5  ;;  %6314 = vmatprep.subr.bf16.mxu0 %v12242_v41  ;;  %v12320_v55 = vld [vmem:[%s20092_s4 + $0x1168] sm:$0xff]  ;;  %v12287_v28 = vld [vmem:[%s20092_s4 + $0x1060] sm:$0xff] }
 0x447   :  { %6274 = vmatpush1.bf16.msra.mxu1 %v12239_v43  ;;  %6315 = vmatpush1.bf16.msra.mxu0 %v12241_v26 }
 0x448   :  { %6275 = vmatprep.subr.bf16.mxu1 %v12232_v33  ;;  %6316 = vmatprep.subr.bf16.mxu0 %v12234_v31  ;;  %v12380_v33 = vcombine.high %v12315_v9, %v12319_v54  ;;  %v12382_v31 = vcombine.high %v12316_v51, %v12320_v55 }
 0x44b   :  { %6276 = vmatpush1.bf16.msra.mxu1 %v12231_v13  ;;  %6317 = vmatpush1.bf16.msra.mxu0 %v12233_v62  ;;  %v12381_v13 = vcombine.low %v12316_v51, %v12320_v55  ;;  %v12279_v51 = vld [vmem:[%s20092_s4 + $0x1020] sm:$0xff]  ;;  %v12276_v55 = vld [vmem:[%s20092_s4 + $0x1008] sm:$0xff] }
 0x44c   :  { %6277 = vmatprep.subr.bf16.mxu1 %v12224_v23  ;;  %6318 = vmatprep.subr.bf16.mxu0 %v12226_v49 }
 0x44f   :  { %6278 = vmatpush1.bf16.msra.mxu1 %v12223_v2  ;;  %6319 = vmatpush1.bf16.msra.mxu0 %v12225_v17  ;;  %v12304_v2 = vld [vmem:[%s20092_s4 + $0x10e8] sm:$0xff] }
 0x450   :  { %6279 = vmatprep.subr.bf16.mxu1 %v12216_v0  ;;  %6320 = vmatprep.subr.bf16.mxu0 %v12218_v59  ;;  %v12373_v0 = vcombine.low %v12308_v39, %v12312_v29  ;;  %v12364_v59 = vcombine.high %v12299_v6, %v12303_v45  ;;  %v12366_v32 = vcombine.high %v12300_v34, %v12304_v2 }
 0x453   :  { %6280 = vmatpush1.bf16.msra.mxu1 %v12215_v61  ;;  %6321 = vmatpush1.bf16.msra.mxu0 %v12217_v12  ;;  %v12296_v61 = vld [vmem:[%s20092_s4 + $0x10a8] sm:$0xff]  ;;  %v12363_v12 = vcombine.low %v12299_v6, %v12303_v45 }
 0x454   :  { %6741 = vmatprep.subr.bf16.mxu1 %v12396_v42  ;;  %6782 = vmatprep.subr.bf16.mxu0 %v12398_v63  ;;  %v12365_v42 = vcombine.low %v12300_v34, %v12304_v2  ;;  %v12356_v63 = vcombine.high %v12291_v27, %v12295_v18  ;;  %v12358_v47 = vcombine.high %v12292_v38, %v12296_v61  ;;  %v12317_v34 = vld [vmem:[%s20092_s4 + $0x1150] sm:$0xff] }
 0x455   :  { %v12321_v2 = vld [vmem:[%s20092_s4 + $0x1170] sm:$0xff] }
 0x456   :  { %v4625_v5 = vpop.f32.mrf.mxu1  ;;  %v4666_v41 = vpop.f32.mrf.mxu0  ;;  %6298 = vmatmul.mubr.bf16.vlgmr.msra.gmra.mxu1 %v17715_v46  ;;  %6339 = vmatmul.mubr.bf16.vlgmr.msra.gmra.mxu0 %v17715_v46  ;;  %v12307_v46 = vld [vmem:[%s20092_s4 + $0x1100] sm:$0xff] }
 0x457   :  { %v17844_v3 = vadd.f32 %v4625_v5, %v17616_v22  ;;  %v17847_v30 = vadd.f32 %v4666_v41, %v17619_v25  ;;  %6742 = vmatpush1.bf16.msra.mxu1 %v12395_v50  ;;  %6783 = vmatpush1.bf16.msra.mxu0 %v12397_v16  ;;  %v12311_v25 = vld [vmem:[%s20092_s4 + $0x1120] sm:$0xff]  ;;  %v12288_v50 = vld [vmem:[%s20092_s4 + $0x1068] sm:$0xff]  ;;  %v12355_v16 = vcombine.low %v12291_v27, %v12295_v18 }
 0x458   :  { %v4627_v43 = vpop.f32.mrf.mxu1  ;;  %v4668_v26 = vpop.f32.mrf.mxu0  ;;  %6743 = vmatprep.subr.bf16.mxu1 %v12388_v53  ;;  %6784 = vmatprep.subr.bf16.mxu0 %v12390_v57  ;;  %v12372_v49 = vcombine.high %v12307_v46, %v12311_v25  ;;  %v12371_v17 = vcombine.low %v12307_v46, %v12311_v25  ;;  %v12357_v53 = vcombine.low %v12292_v38, %v12296_v61  ;;  %v12280_v5 = vld [vmem:[%s20092_s4 + $0x1028] sm:$0xff]  ;;  %v12338_v46 = vld [vmem:[%s20092_s4 + $0x11f8] sm:$0xff] }
 0x459   :  { %v17853_v52 = vadd.f32 %v4627_v43, %v17625_v44  ;;  %v17856_v22 = vadd.f32 %v4668_v26, %v17628_v7  ;;  %6773 = vmatprep.mubr.bf16.mxu1 %v14127_v11  ;;  %6814 = vmatprep.mubr.bf16.mxu0 %v14127_v11  ;;  %v12379_v7 = vcombine.low %v12315_v9, %v12319_v54  ;;  %v12275_v54 = vld [vmem:[%s20092_s4 + $0x1000] sm:$0xff]  ;;  %v12333_v26 = vld [vmem:[%s20092_s4 + $0x11d0] sm:$0xff] }
 0x45a   :  { %v4629_v44 = vpop.f32.mrf.mxu1  ;;  %v4670_v60 = vpop.f32.mrf.mxu0  ;;  %v12348_v57 = vcombine.high %v12283_v15, %v12287_v28  ;;  %v12350_v9 = vcombine.high %v12284_v58, %v12288_v50  ;;  %v12347_v41 = vcombine.low %v12283_v15, %v12287_v28  ;;  %v12342_v43 = vcombine.high %v12276_v55, %v12280_v5  ;;  %v12310_v28 = vld [vmem:[%s20092_s4 + $0x1118] sm:$0xff] }
 0x45b   :  { %6744 = vmatpush1.bf16.msra.mxu1 %v12387_v10  ;;  %6785 = vmatpush1.bf16.msra.mxu0 %v12389_v37  ;;  %v12349_v10 = vcombine.low %v12284_v58, %v12288_v50  ;;  %v12340_v37 = vcombine.high %v12275_v54, %v12279_v51  ;;  %v12339_v25 = vcombine.low %v12275_v54, %v12279_v51  ;;  %v12325_v60 = vld [vmem:[%s20092_s4 + $0x1190] sm:$0xff]  ;;  %v12314_v58 = vld [vmem:[%s20092_s4 + $0x1138] sm:$0xff] }
 0x45c   :  { %v4630_v62 = vpop.f32.mrf.mxu1  ;;  %v4671_v23 = vpop.f32.mrf.mxu0  ;;  %6745 = vmatprep.subr.bf16.mxu1 %v12380_v33  ;;  %6786 = vmatprep.subr.bf16.mxu0 %v12382_v31  ;;  %v12337_v33 = vld [vmem:[%s20092_s4 + $0x11f0] sm:$0xff]  ;;  %v12334_v31 = vld [vmem:[%s20092_s4 + $0x11d8] sm:$0xff]  ;;  %v12341_v39 = vcombine.low %v12276_v55, %v12280_v5  ;;  %v12378_v54 = vcombine.high %v12310_v28, %v12314_v58 }
 0x45d   :  { %v12400_v29 = vcombine.high %v12333_v26, %v12337_v33  ;;  %v12402_v44 = vcombine.high %v12334_v31, %v12338_v46  ;;  %v12330_v62 = vld [vmem:[%s20092_s4 + $0x11b8] sm:$0xff]  ;;  %v12399_v23 = vcombine.low %v12333_v26, %v12337_v33  ;;  %v12301_v51 = vld [vmem:[%s20092_s4 + $0x10d0] sm:$0xff] }
 0x45e   :  { %v12305_v55 = vld [vmem:[%s20092_s4 + $0x10f0] sm:$0xff]  ;;  %v12302_v5 = vld [vmem:[%s20092_s4 + $0x10d8] sm:$0xff] }
 0x45f   :  { %6746 = vmatpush1.bf16.msra.mxu1 %v12379_v7  ;;  %6787 = vmatpush1.bf16.msra.mxu0 %v12381_v13  ;;  %v12329_v7 = vld [vmem:[%s20092_s4 + $0x11b0] sm:$0xff]  ;;  %v12326_v13 = vld [vmem:[%s20092_s4 + $0x1198] sm:$0xff] }
 0x460   :  { %6747 = vmatprep.subr.bf16.mxu1 %v12372_v49  ;;  %6788 = vmatprep.subr.bf16.mxu0 %v12374_v8  ;;  %v12401_v49 = vcombine.low %v12334_v31, %v12338_v46  ;;  %v17943_v8 = vpack.c.bf16 %v16281_v24, %v16281_v24  ;;  %v12392_v6 = vcombine.high %v12325_v60, %v12329_v7  ;;  %v12322_v24 = vld [vmem:[%s20092_s4 + $0x1178] sm:$0xff]  ;;  %v12293_v33 = vld [vmem:[%s20092_s4 + $0x1090] sm:$0xff] }
 0x461   :  { %v12394_v45 = vcombine.high %v12326_v13, %v12330_v62  ;;  %v12393_v38 = vcombine.low %v12326_v13, %v12330_v62  ;;  %v12297_v31 = vld [vmem:[%s20092_s4 + $0x10b0] sm:$0xff]  ;;  %v12294_v46 = vld [vmem:[%s20092_s4 + $0x1098] sm:$0xff] }
 0x462   :  { %v12289_v13 = vld [vmem:[%s20092_s4 + $0x1070] sm:$0xff]  ;;  %v12286_v62 = vld [vmem:[%s20092_s4 + $0x1058] sm:$0xff] }
 0x463   :  { %6748 = vmatpush1.bf16.msra.mxu1 %v12371_v17  ;;  %6789 = vmatpush1.bf16.msra.mxu0 %v12373_v0  ;;  %v12318_v17 = vld [vmem:[%s20092_s4 + $0x1158] sm:$0xff] }
 0x464   :  { %6749 = vmatprep.subr.bf16.mxu1 %v12364_v59  ;;  %6790 = vmatprep.subr.bf16.mxu0 %v12366_v32  ;;  %v12391_v32 = vcombine.low %v12325_v60, %v12329_v7  ;;  %v12285_v7 = vld [vmem:[%s20092_s4 + $0x1050] sm:$0xff] }
 0x467   :  { %6750 = vmatpush1.bf16.msra.mxu1 %v12363_v12  ;;  %6791 = vmatpush1.bf16.msra.mxu0 %v12365_v42  ;;  %v12384_v42 = vcombine.high %v12317_v34, %v12321_v2 }
 0x468   :  { %6751 = vmatprep.subr.bf16.mxu1 %v12356_v63  ;;  %6792 = vmatprep.subr.bf16.mxu0 %v12358_v47  ;;  %v12386_v63 = vcombine.high %v12318_v17, %v12322_v24  ;;  %v12309_v47 = vld [vmem:[%s20092_s4 + $0x1110] sm:$0xff] }
 0x46b   :  { %6752 = vmatpush1.bf16.msra.mxu1 %v12355_v16  ;;  %6793 = vmatpush1.bf16.msra.mxu0 %v12357_v53  ;;  %v12385_v16 = vcombine.low %v12318_v17, %v12322_v24  ;;  %v12281_v17 = vld [vmem:[%s20092_s4 + $0x1030] sm:$0xff]  ;;  %v12278_v24 = vld [vmem:[%s20092_s4 + $0x1018] sm:$0xff] }
 0x46c   :  { %6753 = vmatprep.subr.bf16.mxu1 %v12348_v57  ;;  %6794 = vmatprep.subr.bf16.mxu0 %v12350_v9 }
 0x46f   :  { %6754 = vmatpush1.bf16.msra.mxu1 %v12347_v41  ;;  %6795 = vmatpush1.bf16.msra.mxu0 %v12349_v10  ;;  %v12306_v41 = vld [vmem:[%s20092_s4 + $0x10f8] sm:$0xff] }
 0x470   :  { %6755 = vmatprep.subr.bf16.mxu1 %v12340_v37  ;;  %6796 = vmatprep.subr.bf16.mxu0 %v12342_v43  ;;  %v12377_v37 = vcombine.low %v12310_v28, %v12314_v58  ;;  %v12368_v43 = vcombine.high %v12301_v51, %v12305_v55  ;;  %v12370_v26 = vcombine.high %v12302_v5, %v12306_v41 }
 0x473   :  { %6756 = vmatpush1.bf16.msra.mxu1 %v12339_v25  ;;  %6797 = vmatpush1.bf16.msra.mxu0 %v12341_v39  ;;  %v12298_v25 = vld [vmem:[%s20092_s4 + $0x10b8] sm:$0xff]  ;;  %v12367_v39 = vcombine.low %v12301_v51, %v12305_v55  ;;  %v12443_v55 = vld [vmem:[%s20092_s4 + $0x1340] sm:$0xff] }
 0x474   :  { %6823 = vmatprep.subr.bf16.mxu1 %v12400_v29  ;;  %6864 = vmatprep.subr.bf16.mxu0 %v12402_v44  ;;  %v12369_v29 = vcombine.low %v12302_v5, %v12306_v41  ;;  %v12360_v44 = vcombine.high %v12293_v33, %v12297_v31  ;;  %v12362_v60 = vcombine.high %v12294_v46, %v12298_v25  ;;  %v12447_v5 = vld [vmem:[%s20092_s4 + $0x1360] sm:$0xff]  ;;  %v12444_v41 = vld [vmem:[%s20092_s4 + $0x1348] sm:$0xff] }
 0x476   :  { %v5101_v0 = vpop.f32.mrf.mxu1  ;;  %v5142_v59 = vpop.f32.mrf.mxu0  ;;  %6774 = vmatmul.mubr.bf16.vlgmr.msra.gmra.mxu1 %v17943_v8  ;;  %6815 = vmatmul.mubr.bf16.vlgmr.msra.gmra.mxu0 %v17943_v8 }
 0x477   :  { %v17960_v27 = vadd.f32 %v5101_v0, %v17732_v19  ;;  %v17963_v18 = vadd.f32 %v5142_v59, %v17735_v14  ;;  %6824 = vmatpush1.bf16.msra.mxu1 %v12399_v23  ;;  %6865 = vmatpush1.bf16.msra.mxu0 %v12401_v49  ;;  %v12313_v14 = vld [vmem:[%s20092_s4 + $0x1130] sm:$0xff]  ;;  %v12290_v23 = vld [vmem:[%s20092_s4 + $0x1078] sm:$0xff]  ;;  %v12359_v49 = vcombine.low %v12293_v33, %v12297_v31 }
 0x478   :  { %v5103_v61 = vpop.f32.mrf.mxu1  ;;  %v5144_v12 = vpop.f32.mrf.mxu0  ;;  %6825 = vmatprep.subr.bf16.mxu1 %v12392_v6  ;;  %6866 = vmatprep.subr.bf16.mxu0 %v12394_v45  ;;  %v12376_v9 = vcombine.high %v12309_v47, %v12313_v14  ;;  %v12375_v10 = vcombine.low %v12309_v47, %v12313_v14  ;;  %v12361_v6 = vcombine.low %v12294_v46, %v12298_v25  ;;  %v12282_v0 = vld [vmem:[%s20092_s4 + $0x1038] sm:$0xff]  ;;  %v12464_v47 = vld [vmem:[%s20092_s4 + $0x13e8] sm:$0xff] }
 0x479   :  { %v17969_v15 = vadd.f32 %v5103_v61, %v17741_v35  ;;  %v17972_v19 = vadd.f32 %v5144_v12, %v17744_v40  ;;  %6855 = vmatprep.mubr.bf16.mxu1 %v14127_v11  ;;  %6896 = vmatprep.mubr.bf16.mxu0 %v14127_v11  ;;  %v12383_v40 = vcombine.low %v12317_v34, %v12321_v2  ;;  %v12277_v2 = vld [vmem:[%s20092_s4 + $0x1010] sm:$0xff]  ;;  %v12459_v12 = vld [vmem:[%s20092_s4 + $0x13c0] sm:$0xff] }
 0x47a   :  { %v5105_v35 = vpop.f32.mrf.mxu1  ;;  %v5146_v50 = vpop.f32.mrf.mxu0  ;;  %v12352_v45 = vcombine.high %v12285_v7, %v12289_v13  ;;  %v12354_v34 = vcombine.high %v12286_v62, %v12290_v23  ;;  %v12351_v59 = vcombine.low %v12285_v7, %v12289_v13  ;;  %v12346_v61 = vcombine.high %v12278_v24, %v12282_v0  ;;  %v12436_v7 = vld [vmem:[%s20092_s4 + $0x1308] sm:$0xff] }
 0x47b   :  { %6826 = vmatpush1.bf16.msra.mxu1 %v12391_v32  ;;  %6867 = vmatpush1.bf16.msra.mxu0 %v12393_v38  ;;  %v12353_v32 = vcombine.low %v12286_v62, %v12290_v23  ;;  %v12344_v38 = vcombine.high %v12277_v2, %v12281_v17  ;;  %v12343_v14 = vcombine.low %v12277_v2, %v12281_v17  ;;  %v12451_v50 = vld [vmem:[%s20092_s4 + $0x1380] sm:$0xff]  ;;  %v12440_v13 = vld [vmem:[%s20092_s4 + $0x1328] sm:$0xff] }
 0x47c   :  { %v5106_v53 = vpop.f32.mrf.mxu1  ;;  %v5147_v57 = vpop.f32.mrf.mxu0  ;;  %6827 = vmatprep.subr.bf16.mxu1 %v12384_v42  ;;  %6868 = vmatprep.subr.bf16.mxu0 %v12386_v63  ;;  %v12463_v42 = vld [vmem:[%s20092_s4 + $0x13e0] sm:$0xff]  ;;  %v12460_v63 = vld [vmem:[%s20092_s4 + $0x13c8] sm:$0xff]  ;;  %v12345_v28 = vcombine.low %v12278_v24, %v12282_v0 }
 0x47d   :  { %v12524_v58 = vcombine.high %v12459_v12, %v12463_v42  ;;  %v12526_v35 = vcombine.high %v12460_v63, %v12464_v47  ;;  %v12456_v53 = vld [vmem:[%s20092_s4 + $0x13a8] sm:$0xff]  ;;  %v12523_v57 = vcombine.low %v12459_v12, %v12463_v42  ;;  %v12427_v2 = vld [vmem:[%s20092_s4 + $0x12c0] sm:$0xff] }
 0x47e   :  { %v12431_v17 = vld [vmem:[%s20092_s4 + $0x12e0] sm:$0xff]  ;;  %v12428_v24 = vld [vmem:[%s20092_s4 + $0x12c8] sm:$0xff] }
 0x47f   :  { %6828 = vmatpush1.bf16.msra.mxu1 %v12383_v40  ;;  %6869 = vmatpush1.bf16.msra.mxu0 %v12385_v16  ;;  %v12455_v40 = vld [vmem:[%s20092_s4 + $0x13a0] sm:$0xff]  ;;  %v12452_v16 = vld [vmem:[%s20092_s4 + $0x1388] sm:$0xff] }
 0x480   :  { %6829 = vmatprep.subr.bf16.mxu1 %v12376_v9  ;;  %6870 = vmatprep.subr.bf16.mxu0 %v12378_v54  ;;  %v12525_v9 = vcombine.low %v12460_v63, %v12464_v47  ;;  %v12516_v54 = vcombine.high %v12451_v50, %v12455_v40  ;;  %v12518_v51 = vcombine.high %v12452_v16, %v12456_v53  ;;  %v12432_v0 = vld [vmem:[%s20092_s4 + $0x12e8] sm:$0xff]  ;;  %v12419_v12 = vld [vmem:[%s20092_s4 + $0x1280] sm:$0xff] }
 0x481   :  { %v12517_v46 = vcombine.low %v12452_v16, %v12456_v53  ;;  %v12423_v42 = vld [vmem:[%s20092_s4 + $0x12a0] sm:$0xff]  ;;  %v12420_v63 = vld [vmem:[%s20092_s4 + $0x1288] sm:$0xff] }
 0x482   :  { %v12424_v47 = vld [vmem:[%s20092_s4 + $0x12a8] sm:$0xff] }
 0x483   :  { %6830 = vmatpush1.bf16.msra.mxu1 %v12375_v10  ;;  %6871 = vmatpush1.bf16.msra.mxu0 %v12377_v37  ;;  %v12448_v10 = vld [vmem:[%s20092_s4 + $0x1368] sm:$0xff] }
 0x484   :  { %6831 = vmatprep.subr.bf16.mxu1 %v12368_v43  ;;  %6872 = vmatprep.subr.bf16.mxu0 %v12370_v26  ;;  %v12515_v26 = vcombine.low %v12451_v50, %v12455_v40  ;;  %v12509_v23 = vcombine.low %v12444_v41, %v12448_v10  ;;  %v12411_v50 = vld [vmem:[%s20092_s4 + $0x1240] sm:$0xff]  ;;  %v12412_v16 = vld [vmem:[%s20092_s4 + $0x1248] sm:$0xff] }
 0x485   :  { %v12415_v40 = vld [vmem:[%s20092_s4 + $0x1260] sm:$0xff]  ;;  %v12416_v53 = vld [vmem:[%s20092_s4 + $0x1268] sm:$0xff] }
 0x487   :  { %6832 = vmatpush1.bf16.msra.mxu1 %v12367_v39  ;;  %6873 = vmatpush1.bf16.msra.mxu0 %v12369_v29  ;;  %v12508_v29 = vcombine.high %v12443_v55, %v12447_v5 }
 0x488   :  { %6833 = vmatprep.subr.bf16.mxu1 %v12360_v44  ;;  %6874 = vmatprep.subr.bf16.mxu0 %v12362_v60  ;;  %v12510_v44 = vcombine.high %v12444_v41, %v12448_v10  ;;  %v12404_v41 = vld [vmem:[%s20092_s4 + $0x1208] sm:$0xff] }
 0x489   :  { %v12408_v10 = vld [vmem:[%s20092_s4 + $0x1228] sm:$0xff] }
 0x48b   :  { %6834 = vmatpush1.bf16.msra.mxu1 %v12359_v49  ;;  %6875 = vmatpush1.bf16.msra.mxu0 %v12361_v6 }
 0x48c   :  { %6835 = vmatprep.subr.bf16.mxu1 %v12352_v45  ;;  %6876 = vmatprep.subr.bf16.mxu0 %v12354_v34  ;;  %v12502_v34 = vcombine.high %v12436_v7, %v12440_v13 }
 0x48f   :  { %6836 = vmatpush1.bf16.msra.mxu1 %v12351_v59  ;;  %6877 = vmatpush1.bf16.msra.mxu0 %v12353_v32  ;;  %v12501_v32 = vcombine.low %v12436_v7, %v12440_v13 }
 0x490   :  { %6837 = vmatprep.subr.bf16.mxu1 %v12344_v38  ;;  %6878 = vmatprep.subr.bf16.mxu0 %v12346_v61  ;;  %v12492_v38 = vcombine.high %v12427_v2, %v12431_v17  ;;  %v12494_v61 = vcombine.high %v12428_v24, %v12432_v0 }
 0x493   :  { %6838 = vmatpush1.bf16.msra.mxu1 %v12343_v14  ;;  %6879 = vmatpush1.bf16.msra.mxu0 %v12345_v28  ;;  %v12491_v14 = vcombine.low %v12427_v2, %v12431_v17  ;;  %v12493_v28 = vcombine.low %v12428_v24, %v12432_v0  ;;  %v12445_v17 = vld [vmem:[%s20092_s4 + $0x1350] sm:$0xff]  ;;  %v12446_v0 = vld [vmem:[%s20092_s4 + $0x1358] sm:$0xff] }
 0x494   :  { %7299 = vmatprep.subr.bf16.mxu1 %v12524_v58  ;;  %7340 = vmatprep.subr.bf16.mxu0 %v12526_v35  ;;  %v12484_v58 = vcombine.high %v12419_v12, %v12423_v42  ;;  %v12486_v35 = vcombine.high %v12420_v63, %v12424_v47  ;;  %v12449_v24 = vld [vmem:[%s20092_s4 + $0x1370] sm:$0xff] }
 0x496   :  { %v5183_v37 = vpop.f32.mrf.mxu1  ;;  %v5224_v43 = vpop.f32.mrf.mxu0  ;;  %6856 = vmatmul.mubr.bf16.vlgmr.msra.gmra.mxu1 %v17943_v8  ;;  %6897 = vmatmul.mubr.bf16.vlgmr.msra.gmra.mxu0 %v17943_v8  ;;  %v12435_v8 = vld [vmem:[%s20092_s4 + $0x1300] sm:$0xff] }
 0x497   :  { %v18072_v33 = vadd.f32 %v5183_v37, %v17844_v3  ;;  %v18075_v31 = vadd.f32 %v5224_v43, %v17847_v30  ;;  %7300 = vmatpush1.bf16.msra.mxu1 %v12523_v57  ;;  %7341 = vmatpush1.bf16.msra.mxu0 %v12525_v9  ;;  %v12439_v30 = vld [vmem:[%s20092_s4 + $0x1320] sm:$0xff]  ;;  %v12483_v57 = vcombine.low %v12419_v12, %v12423_v42 }
 0x498   :  { %v5185_v25 = vpop.f32.mrf.mxu1  ;;  %v5226_v39 = vpop.f32.mrf.mxu0  ;;  %7301 = vmatprep.subr.bf16.mxu1 %v12516_v54  ;;  %7342 = vmatprep.subr.bf16.mxu0 %v12518_v51  ;;  %v12500_v45 = vcombine.high %v12435_v8, %v12439_v30  ;;  %v12499_v59 = vcombine.low %v12435_v8, %v12439_v30  ;;  %v12485_v9 = vcombine.low %v12420_v63, %v12424_v47 }
 0x499   :  { %v18081_v60 = vadd.f32 %v5185_v25, %v17853_v52  ;;  %v18084_v3 = vadd.f32 %v5226_v39, %v17856_v22  ;;  %7331 = vmatprep.mubr.bf16.mxu1 %v14127_v11  ;;  %7372 = vmatprep.mubr.bf16.mxu0 %v14127_v11  ;;  %v12507_v22 = vcombine.low %v12443_v55, %v12447_v5  ;;  %v12403_v55 = vld [vmem:[%s20092_s4 + $0x1200] sm:$0xff]  ;;  %v12461_v25 = vld [vmem:[%s20092_s4 + $0x13d0] sm:$0xff] }
 0x49a   :  { %v5187_v52 = vpop.f32.mrf.mxu1  ;;  %v5228_v62 = vpop.f32.mrf.mxu0  ;;  %v12476_v54 = vcombine.high %v12411_v50, %v12415_v40  ;;  %v12478_v51 = vcombine.high %v12412_v16, %v12416_v53  ;;  %v12407_v5 = vld [vmem:[%s20092_s4 + $0x1220] sm:$0xff]  ;;  %v12475_v37 = vcombine.low %v12411_v50, %v12415_v40  ;;  %v12477_v43 = vcombine.low %v12412_v16, %v12416_v53  ;;  %v12465_v39 = vld [vmem:[%s20092_s4 + $0x13f0] sm:$0xff]  ;;  %v12438_v50 = vld [vmem:[%s20092_s4 + $0x1318] sm:$0xff] }
 0x49b   :  { %7302 = vmatpush1.bf16.msra.mxu1 %v12515_v26  ;;  %7343 = vmatpush1.bf16.msra.mxu0 %v12517_v46  ;;  %v12468_v26 = vcombine.high %v12403_v55, %v12407_v5  ;;  %v12470_v46 = vcombine.high %v12404_v41, %v12408_v10  ;;  %v12467_v8 = vcombine.low %v12403_v55, %v12407_v5  ;;  %v12453_v52 = vld [vmem:[%s20092_s4 + $0x1390] sm:$0xff]  ;;  %v12442_v40 = vld [vmem:[%s20092_s4 + $0x1338] sm:$0xff] }
 0x49c   :  { %v5188_v49 = vpop.f32.mrf.mxu1  ;;  %v5229_v6 = vpop.f32.mrf.mxu0  ;;  %7303 = vmatprep.subr.bf16.mxu1 %v12508_v29  ;;  %7344 = vmatprep.subr.bf16.mxu0 %v12510_v44  ;;  %v12462_v29 = vld [vmem:[%s20092_s4 + $0x13d8] sm:$0xff]  ;;  %v12469_v30 = vcombine.low %v12404_v41, %v12408_v10  ;;  %v12528_v7 = vcombine.high %v12461_v25, %v12465_v39  ;;  %v12457_v62 = vld [vmem:[%s20092_s4 + $0x13b0] sm:$0xff] }
 0x49d   :  { %v12466_v44 = vld [vmem:[%s20092_s4 + $0x13f8] sm:$0xff]  ;;  %v12527_v49 = vcombine.low %v12461_v25, %v12465_v39  ;;  %v12429_v55 = vld [vmem:[%s20092_s4 + $0x12d0] sm:$0xff] }
 0x49e   :  { %v12530_v13 = vcombine.high %v12462_v29, %v12466_v44  ;;  %v12529_v6 = vcombine.low %v12462_v29, %v12466_v44  ;;  %v12433_v5 = vld [vmem:[%s20092_s4 + $0x12f0] sm:$0xff]  ;;  %v12430_v41 = vld [vmem:[%s20092_s4 + $0x12d8] sm:$0xff] }
 0x49f   :  { %7304 = vmatpush1.bf16.msra.mxu1 %v12507_v22  ;;  %7345 = vmatpush1.bf16.msra.mxu0 %v12509_v23  ;;  %v12454_v22 = vld [vmem:[%s20092_s4 + $0x1398] sm:$0xff]  ;;  %v12421_v25 = vld [vmem:[%s20092_s4 + $0x1290] sm:$0xff] }
 0x4a0   :  { %7305 = vmatprep.subr.bf16.mxu1 %v12500_v45  ;;  %7346 = vmatprep.subr.bf16.mxu0 %v12502_v34  ;;  %v12458_v23 = vld [vmem:[%s20092_s4 + $0x13b8] sm:$0xff]  ;;  %v18171_v45 = vpack.c.bf16 %v16278_v4, %v16278_v4  ;;  %v12520_v34 = vcombine.high %v12453_v52, %v12457_v62  ;;  %v12425_v39 = vld [vmem:[%s20092_s4 + $0x12b0] sm:$0xff] }
 0x4a1   :  { %v12522_v2 = vcombine.high %v12454_v22, %v12458_v23  ;;  %v12450_v4 = vld [vmem:[%s20092_s4 + $0x1378] sm:$0xff]  ;;  %v12521_v42 = vcombine.low %v12454_v22, %v12458_v23 }
 0x4a2   :  { %v12513_v53 = vcombine.low %v12446_v0, %v12450_v4  ;;  %v12434_v10 = vld [vmem:[%s20092_s4 + $0x12f8] sm:$0xff] }
 0x4a3   :  { %7306 = vmatpush1.bf16.msra.mxu1 %v12499_v59  ;;  %7347 = vmatpush1.bf16.msra.mxu0 %v12501_v32  ;;  %v12422_v29 = vld [vmem:[%s20092_s4 + $0x1298] sm:$0xff] }
 0x4a4   :  { %7307 = vmatprep.subr.bf16.mxu1 %v12492_v38  ;;  %7348 = vmatprep.subr.bf16.mxu0 %v12494_v61  ;;  %v12519_v38 = vcombine.low %v12453_v52, %v12457_v62  ;;  %v12426_v44 = vld [vmem:[%s20092_s4 + $0x12b8] sm:$0xff]  ;;  %v12413_v52 = vld [vmem:[%s20092_s4 + $0x1250] sm:$0xff] }
 0x4a5   :  { %v12417_v62 = vld [vmem:[%s20092_s4 + $0x1270] sm:$0xff]  ;;  %v12414_v22 = vld [vmem:[%s20092_s4 + $0x1258] sm:$0xff] }
 0x4a6   :  { %v12418_v23 = vld [vmem:[%s20092_s4 + $0x1278] sm:$0xff] }
 0x4a7   :  { %7308 = vmatpush1.bf16.msra.mxu1 %v12491_v14  ;;  %7349 = vmatpush1.bf16.msra.mxu0 %v12493_v28  ;;  %v12512_v14 = vcombine.high %v12445_v17, %v12449_v24  ;;  %v12514_v28 = vcombine.high %v12446_v0, %v12450_v4  ;;  %v12406_v0 = vld [vmem:[%s20092_s4 + $0x1218] sm:$0xff] }
 0x4a8   :  { %7309 = vmatprep.subr.bf16.mxu1 %v12484_v58  ;;  %7350 = vmatprep.subr.bf16.mxu0 %v12486_v35  ;;  %v12437_v58 = vld [vmem:[%s20092_s4 + $0x1310] sm:$0xff]  ;;  %v12410_v4 = vld [vmem:[%s20092_s4 + $0x1238] sm:$0xff] }
 0x4ab   :  { %7310 = vmatpush1.bf16.msra.mxu1 %v12483_v57  ;;  %7351 = vmatpush1.bf16.msra.mxu0 %v12485_v9 }
 0x4ac   :  { %7311 = vmatprep.subr.bf16.mxu1 %v12476_v54  ;;  %7352 = vmatprep.subr.bf16.mxu0 %v12478_v51  ;;  %v12506_v51 = vcombine.high %v12438_v50, %v12442_v40 }
 0x4af   :  { %7312 = vmatpush1.bf16.msra.mxu1 %v12475_v37  ;;  %7353 = vmatpush1.bf16.msra.mxu0 %v12477_v43  ;;  %v12505_v43 = vcombine.low %v12438_v50, %v12442_v40 }
 0x4b0   :  { %7313 = vmatprep.subr.bf16.mxu1 %v12468_v26  ;;  %7354 = vmatprep.subr.bf16.mxu0 %v12470_v46  ;;  %v12496_v26 = vcombine.high %v12429_v55, %v12433_v5  ;;  %v12498_v46 = vcombine.high %v12430_v41, %v12434_v10 }
 0x4b3   :  { %7314 = vmatpush1.bf16.msra.mxu1 %v12467_v8  ;;  %7355 = vmatpush1.bf16.msra.mxu0 %v12469_v30  ;;  %v12495_v8 = vcombine.low %v12429_v55, %v12433_v5  ;;  %v12497_v30 = vcombine.low %v12430_v41, %v12434_v10  ;;  %v12571_v55 = vld [vmem:[%s20092_s4 + $0x1540] sm:$0xff]  ;;  %v12572_v41 = vld [vmem:[%s20092_s4 + $0x1548] sm:$0xff] }
 0x4b4   :  { %7381 = vmatprep.subr.bf16.mxu1 %v12528_v7  ;;  %7422 = vmatprep.subr.bf16.mxu0 %v12530_v13  ;;  %v12488_v7 = vcombine.high %v12421_v25, %v12425_v39  ;;  %v12490_v13 = vcombine.high %v12422_v29, %v12426_v44  ;;  %v12575_v5 = vld [vmem:[%s20092_s4 + $0x1560] sm:$0xff]  ;;  %v12576_v10 = vld [vmem:[%s20092_s4 + $0x1568] sm:$0xff] }
 0x4b6   :  { %v5659_v59 = vpop.f32.mrf.mxu1  ;;  %v5700_v32 = vpop.f32.mrf.mxu0  ;;  %7332 = vmatmul.mubr.bf16.vlgmr.msra.gmra.mxu1 %v18171_v45  ;;  %7373 = vmatmul.mubr.bf16.vlgmr.msra.gmra.mxu0 %v18171_v45 }
 0x4b7   :  { %v18188_v61 = vadd.f32 %v5659_v59, %v17960_v27  ;;  %v18191_v12 = vadd.f32 %v5700_v32, %v17963_v18  ;;  %7382 = vmatpush1.bf16.msra.mxu1 %v12527_v49  ;;  %7423 = vmatpush1.bf16.msra.mxu0 %v12529_v6  ;;  %v12441_v18 = vld [vmem:[%s20092_s4 + $0x1330] sm:$0xff]  ;;  %v12487_v49 = vcombine.low %v12421_v25, %v12425_v39 }
 0x4b8   :  { %v5661_v63 = vpop.f32.mrf.mxu1  ;;  %v5702_v47 = vpop.f32.mrf.mxu0  ;;  %7383 = vmatprep.subr.bf16.mxu1 %v12520_v34  ;;  %7424 = vmatprep.subr.bf16.mxu0 %v12522_v2  ;;  %v12504_v54 = vcombine.high %v12437_v58, %v12441_v18  ;;  %v12503_v37 = vcombine.low %v12437_v58, %v12441_v18  ;;  %v12489_v6 = vcombine.low %v12422_v29, %v12426_v44 }
 0x4b9   :  { %v18197_v35 = vadd.f32 %v5661_v63, %v17969_v15  ;;  %v18200_v27 = vadd.f32 %v5702_v47, %v17972_v19  ;;  %7413 = vmatprep.mubr.bf16.mxu1 %v14127_v11  ;;  %7454 = vmatprep.mubr.bf16.mxu0 %v14127_v11  ;;  %v12511_v19 = vcombine.low %v12445_v17, %v12449_v24  ;;  %v12405_v17 = vld [vmem:[%s20092_s4 + $0x1210] sm:$0xff]  ;;  %v12587_v63 = vld [vmem:[%s20092_s4 + $0x15c0] sm:$0xff] }
 0x4ba   :  { %v5663_v15 = vpop.f32.mrf.mxu1  ;;  %v5704_v16 = vpop.f32.mrf.mxu0  ;;  %v12480_v34 = vcombine.high %v12413_v52, %v12417_v62  ;;  %v12482_v2 = vcombine.high %v12414_v22, %v12418_v23  ;;  %v12409_v24 = vld [vmem:[%s20092_s4 + $0x1230] sm:$0xff]  ;;  %v12479_v59 = vcombine.low %v12413_v52, %v12417_v62  ;;  %v12481_v32 = vcombine.low %v12414_v22, %v12418_v23  ;;  %v12591_v47 = vld [vmem:[%s20092_s4 + $0x15e0] sm:$0xff]  ;;  %v12568_v52 = vld [vmem:[%s20092_s4 + $0x1528] sm:$0xff] }
 0x4bb   :  { %7384 = vmatpush1.bf16.msra.mxu1 %v12519_v38  ;;  %7425 = vmatpush1.bf16.msra.mxu0 %v12521_v42  ;;  %v12472_v38 = vcombine.high %v12405_v17, %v12409_v24  ;;  %v12474_v42 = vcombine.high %v12406_v0, %v12410_v4  ;;  %v12471_v58 = vcombine.low %v12405_v17, %v12409_v24  ;;  %v12579_v15 = vld [vmem:[%s20092_s4 + $0x1580] sm:$0xff]  ;;  %v12556_v24 = vld [vmem:[%s20092_s4 + $0x14c8] sm:$0xff] }
 0x4bc   :  { %v5664_v57 = vpop.f32.mrf.mxu1  ;;  %v5705_v9 = vpop.f32.mrf.mxu0  ;;  %7385 = vmatprep.subr.bf16.mxu1 %v12512_v14  ;;  %7426 = vmatprep.subr.bf16.mxu0 %v12514_v28  ;;  %v12588_v14 = vld [vmem:[%s20092_s4 + $0x15c8] sm:$0xff]  ;;  %v12473_v18 = vcombine.low %v12406_v0, %v12410_v4  ;;  %v12652_v50 = vcombine.high %v12587_v63, %v12591_v47  ;;  %v12583_v16 = vld [vmem:[%s20092_s4 + $0x15a0] sm:$0xff]  ;;  %v12637_v22 = vcombine.low %v12572_v41, %v12576_v10 }
 0x4bd   :  { %v12592_v28 = vld [vmem:[%s20092_s4 + $0x15e8] sm:$0xff]  ;;  %v12651_v57 = vcombine.low %v12587_v63, %v12591_v47  ;;  %v12559_v17 = vld [vmem:[%s20092_s4 + $0x14e0] sm:$0xff] }
 0x4be   :  { %v12654_v40 = vcombine.high %v12588_v14, %v12592_v28  ;;  %v12653_v9 = vcombine.low %v12588_v14, %v12592_v28  ;;  %v12560_v0 = vld [vmem:[%s20092_s4 + $0x14e8] sm:$0xff]  ;;  %v12551_v63 = vld [vmem:[%s20092_s4 + $0x14a0] sm:$0xff] }
 0x4bf   :  { %7386 = vmatpush1.bf16.msra.mxu1 %v12511_v19  ;;  %7427 = vmatpush1.bf16.msra.mxu0 %v12513_v53  ;;  %v12580_v19 = vld [vmem:[%s20092_s4 + $0x1588] sm:$0xff] }
 0x4c0   :  { %7387 = vmatprep.subr.bf16.mxu1 %v12504_v54  ;;  %7428 = vmatprep.subr.bf16.mxu0 %v12506_v51  ;;  %v12584_v53 = vld [vmem:[%s20092_s4 + $0x15a8] sm:$0xff]  ;;  %v12644_v54 = vcombine.high %v12579_v15, %v12583_v16 }
 0x4c1   :  { %v12646_v51 = vcombine.high %v12580_v19, %v12584_v53  ;;  %v12645_v39 = vcombine.low %v12580_v19, %v12584_v53  ;;  %v12548_v47 = vld [vmem:[%s20092_s4 + $0x1488] sm:$0xff] }
 0x4c2   :  { %v12552_v14 = vld [vmem:[%s20092_s4 + $0x14a8] sm:$0xff] }
 0x4c3   :  { %7388 = vmatpush1.bf16.msra.mxu1 %v12503_v37  ;;  %7429 = vmatpush1.bf16.msra.mxu0 %v12505_v43  ;;  %v12544_v19 = vld [vmem:[%s20092_s4 + $0x1468] sm:$0xff] }
 0x4c4   :  { %7389 = vmatprep.subr.bf16.mxu1 %v12496_v26  ;;  %7430 = vmatprep.subr.bf16.mxu0 %v12498_v46  ;;  %v12643_v26 = vcombine.low %v12579_v15, %v12583_v16  ;;  %v12543_v15 = vld [vmem:[%s20092_s4 + $0x1460] sm:$0xff]  ;;  %v12540_v16 = vld [vmem:[%s20092_s4 + $0x1448] sm:$0xff] }
 0x4c7   :  { %7390 = vmatpush1.bf16.msra.mxu1 %v12495_v8  ;;  %7431 = vmatpush1.bf16.msra.mxu0 %v12497_v30  ;;  %v12636_v8 = vcombine.high %v12571_v55, %v12575_v5  ;;  %v12638_v30 = vcombine.high %v12572_v41, %v12576_v10  ;;  %v12536_v41 = vld [vmem:[%s20092_s4 + $0x1428] sm:$0xff] }
 0x4c8   :  { %7391 = vmatprep.subr.bf16.mxu1 %v12488_v7  ;;  %7432 = vmatprep.subr.bf16.mxu0 %v12490_v13  ;;  %v12564_v13 = vld [vmem:[%s20092_s4 + $0x1508] sm:$0xff] }
 0x4cb   :  { %7392 = vmatpush1.bf16.msra.mxu1 %v12487_v49  ;;  %7433 = vmatpush1.bf16.msra.mxu0 %v12489_v6 }
 0x4cc   :  { %7393 = vmatprep.subr.bf16.mxu1 %v12480_v34  ;;  %7434 = vmatprep.subr.bf16.mxu0 %v12482_v2  ;;  %v12630_v34 = vcombine.high %v12564_v13, %v12568_v52  ;;  %v12555_v2 = vld [vmem:[%s20092_s4 + $0x14c0] sm:$0xff] }
 0x4cd   :  { %v12619_v28 = vcombine.low %v12555_v2, %v12559_v17 }
 0x4cf   :  { %7394 = vmatpush1.bf16.msra.mxu1 %v12479_v59  ;;  %7435 = vmatpush1.bf16.msra.mxu0 %v12481_v32  ;;  %v12629_v59 = vcombine.low %v12564_v13, %v12568_v52  ;;  %v12620_v32 = vcombine.high %v12555_v2, %v12559_v17  ;;  %v12573_v17 = vld [vmem:[%s20092_s4 + $0x1550] sm:$0xff] }
 0x4d0   :  { %7395 = vmatprep.subr.bf16.mxu1 %v12472_v38  ;;  %7436 = vmatprep.subr.bf16.mxu0 %v12474_v42  ;;  %v12622_v38 = vcombine.high %v12556_v24, %v12560_v0  ;;  %v12547_v42 = vld [vmem:[%s20092_s4 + $0x1480] sm:$0xff] }
 0x4d1   :  { %v12611_v53 = vcombine.low %v12547_v42, %v12551_v63 }
 0x4d3   :  { %7396 = vmatpush1.bf16.msra.mxu1 %v12471_v58  ;;  %7437 = vmatpush1.bf16.msra.mxu0 %v12473_v18  ;;  %v12621_v58 = vcombine.low %v12556_v24, %v12560_v0  ;;  %v12612_v18 = vcombine.high %v12547_v42, %v12551_v63  ;;  %v12577_v24 = vld [vmem:[%s20092_s4 + $0x1570] sm:$0xff]  ;;  %v12574_v0 = vld [vmem:[%s20092_s4 + $0x1558] sm:$0xff] }
 0x4d4   :  { %7857 = vmatprep.subr.bf16.mxu1 %v12652_v50  ;;  %7898 = vmatprep.subr.bf16.mxu0 %v12654_v40  ;;  %v12614_v50 = vcombine.high %v12548_v47, %v12552_v14  ;;  %v12539_v40 = vld [vmem:[%s20092_s4 + $0x1440] sm:$0xff] }
 0x4d5   :  { %v12603_v10 = vcombine.low %v12539_v40, %v12543_v15 }
 0x4d6   :  { %v5741_v37 = vpop.f32.mrf.mxu1  ;;  %v5782_v43 = vpop.f32.mrf.mxu0  ;;  %7414 = vmatmul.mubr.bf16.vlgmr.msra.gmra.mxu1 %v18171_v45  ;;  %7455 = vmatmul.mubr.bf16.vlgmr.msra.gmra.mxu0 %v18171_v45  ;;  %v12563_v45 = vld [vmem:[%s20092_s4 + $0x1500] sm:$0xff] }
 0x4d7   :  { %v18300_v46 = vadd.f32 %v5741_v37, %v18072_v33  ;;  %v18303_v25 = vadd.f32 %v5782_v43, %v18075_v31  ;;  %7858 = vmatpush1.bf16.msra.mxu1 %v12651_v57  ;;  %7899 = vmatpush1.bf16.msra.mxu0 %v12653_v9  ;;  %v12567_v31 = vld [vmem:[%s20092_s4 + $0x1520] sm:$0xff]  ;;  %v12613_v57 = vcombine.low %v12548_v47, %v12552_v14 }
 0x4d8   :  { %v5743_v29 = vpop.f32.mrf.mxu1  ;;  %v5784_v44 = vpop.f32.mrf.mxu0  ;;  %7859 = vmatprep.subr.bf16.mxu1 %v12644_v54  ;;  %7900 = vmatprep.subr.bf16.mxu0 %v12646_v51  ;;  %v12628_v6 = vcombine.high %v12563_v45, %v12567_v31  ;;  %v12627_v4 = vcombine.low %v12563_v45, %v12567_v31  ;;  %v12604_v9 = vcombine.high %v12539_v40, %v12543_v15  ;;  %v12531_v51 = vld [vmem:[%s20092_s4 + $0x1400] sm:$0xff]  ;;  %v12566_v15 = vld [vmem:[%s20092_s4 + $0x1518] sm:$0xff] }
 0x4d9   :  { %v18309_v7 = vadd.f32 %v5743_v29, %v18081_v60  ;;  %v18312_v33 = vadd.f32 %v5784_v44, %v18084_v3  ;;  %7889 = vmatprep.mubr.bf16.mxu1 %v14127_v11  ;;  %7930 = vmatprep.mubr.bf16.mxu0 %v14127_v11  ;;  %v12635_v3 = vcombine.low %v12571_v55, %v12575_v5  ;;  %v12535_v55 = vld [vmem:[%s20092_s4 + $0x1420] sm:$0xff]  ;;  %v12532_v5 = vld [vmem:[%s20092_s4 + $0x1408] sm:$0xff]  ;;  %v12593_v29 = vld [vmem:[%s20092_s4 + $0x15f0] sm:$0xff] }
 0x4da   :  { %v5745_v60 = vpop.f32.mrf.mxu1  ;;  %v5786_v62 = vpop.f32.mrf.mxu0  ;;  %v12606_v54 = vcombine.high %v12540_v16, %v12544_v19  ;;  %v12605_v37 = vcombine.low %v12540_v16, %v12544_v19  ;;  %v12596_v43 = vcombine.high %v12531_v51, %v12535_v55  ;;  %v12590_v44 = vld [vmem:[%s20092_s4 + $0x15d8] sm:$0xff]  ;;  %v12597_v45 = vcombine.low %v12532_v5, %v12536_v41  ;;  %v14125_v31 = vld [vmem:[%s20093_s3] ss:$0 sm:$0xff] }
 0x4db   :  { %7860 = vmatpush1.bf16.msra.mxu1 %v12643_v26  ;;  %7901 = vmatpush1.bf16.msra.mxu0 %v12645_v39  ;;  %v12598_v26 = vcombine.high %v12532_v5, %v12536_v41  ;;  %v12589_v39 = vld [vmem:[%s20092_s4 + $0x15d0] sm:$0xff]  ;;  %v1880_v13 = vadd.f32 %v14125_v31, %v16326_v1  ;;  %v12586_v1 = vld [vmem:[%s20092_s4 + $0x15b8] sm:$0xff] }
 0x4dc   :  { %v5746_v23 = vpop.f32.mrf.mxu1  ;;  %v5787_v49 = vpop.f32.mrf.mxu0  ;;  %7861 = vmatprep.subr.bf16.mxu1 %v12636_v8  ;;  %7902 = vmatprep.subr.bf16.mxu0 %v12638_v30  ;;  %v12594_v8 = vld [vmem:[%s20092_s4 + $0x15f8] sm:$0xff]  ;;  %v12595_v30 = vcombine.low %v12531_v51, %v12535_v55  ;;  %v12656_v52 = vcombine.high %v12589_v39, %v12593_v29  ;;  %v12581_v62 = vld [vmem:[%s20092_s4 + $0x1590] sm:$0xff] }
 0x4dd   :  { %v12658_v60 = vcombine.high %v12590_v44, %v12594_v8  ;;  %v12655_v23 = vcombine.low %v12589_v39, %v12593_v29  ;;  %v12657_v49 = vcombine.low %v12590_v44, %v12594_v8  ;;  %v12570_v16 = vld [vmem:[%s20092_s4 + $0x1538] sm:$0xff]  ;;  %v12557_v55 = vld [vmem:[%s20092_s4 + $0x14d0] sm:$0xff] }
 0x4de   :  { %v12634_v51 = vcombine.high %v12566_v15, %v12570_v16  ;;  %v12561_v5 = vld [vmem:[%s20092_s4 + $0x14f0] sm:$0xff]  ;;  %v12558_v41 = vld [vmem:[%s20092_s4 + $0x14d8] sm:$0xff] }
 0x4df   :  { %7862 = vmatpush1.bf16.msra.mxu1 %v12635_v3  ;;  %7903 = vmatpush1.bf16.msra.mxu0 %v12637_v22  ;;  %v12585_v3 = vld [vmem:[%s20092_s4 + $0x15b0] sm:$0xff]  ;;  %v12582_v22 = vld [vmem:[%s20092_s4 + $0x1598] sm:$0xff] }
 0x4e0   :  { %7863 = vmatprep.subr.bf16.mxu1 %v12628_v6  ;;  %7904 = vmatprep.subr.bf16.mxu0 %v12630_v34  ;;  %v18401_v6 = vpack.c.bf16 %v1880_v13, %v1880_v13  ;;  %v12648_v34 = vcombine.high %v12581_v62, %v12585_v3  ;;  %v12650_v2 = vcombine.high %v12582_v22, %v12586_v1  ;;  %v12549_v29 = vld [vmem:[%s20092_s4 + $0x1490] sm:$0xff]  ;;  %v12550_v8 = vld [vmem:[%s20092_s4 + $0x1498] sm:$0xff] }
 0x4e1   :  { %v12649_v47 = vcombine.low %v12582_v22, %v12586_v1  ;;  %v12553_v44 = vld [vmem:[%s20092_s4 + $0x14b0] sm:$0xff]  ;;  %v12546_v22 = vld [vmem:[%s20092_s4 + $0x1478] sm:$0xff] }
 0x4e2   :  { %v12616_v13 = vcombine.high %v12549_v29, %v12553_v44  ;;  %v12615_v1 = vcombine.low %v12549_v29, %v12553_v44 }
 0x4e3   :  { %7864 = vmatpush1.bf16.msra.mxu1 %v12627_v4  ;;  %7905 = vmatpush1.bf16.msra.mxu0 %v12629_v59  ;;  %v12578_v4 = vld [vmem:[%s20092_s4 + $0x1578] sm:$0xff] }
 0x4e4   :  { %7865 = vmatprep.subr.bf16.mxu1 %v12620_v32  ;;  %7906 = vmatprep.subr.bf16.mxu0 %v12622_v38  ;;  %v12647_v38 = vcombine.low %v12581_v62, %v12585_v3  ;;  %v12545_v62 = vld [vmem:[%s20092_s4 + $0x1470] sm:$0xff]  ;;  %v12542_v3 = vld [vmem:[%s20092_s4 + $0x1458] sm:$0xff] }
 0x4e7   :  { %7866 = vmatpush1.bf16.msra.mxu1 %v12619_v28  ;;  %7907 = vmatpush1.bf16.msra.mxu0 %v12621_v58  ;;  %v12640_v58 = vcombine.high %v12573_v17, %v12577_v24 }
 0x4e8   :  { %7867 = vmatprep.subr.bf16.mxu1 %v12612_v18  ;;  %7908 = vmatprep.subr.bf16.mxu0 %v12614_v50  ;;  %v12642_v18 = vcombine.high %v12574_v0, %v12578_v4  ;;  %v12565_v50 = vld [vmem:[%s20092_s4 + $0x1510] sm:$0xff] }
 0x4eb   :  { %7868 = vmatpush1.bf16.msra.mxu1 %v12611_v53  ;;  %7909 = vmatpush1.bf16.msra.mxu0 %v12613_v57  ;;  %v12641_v53 = vcombine.low %v12574_v0, %v12578_v4  ;;  %v12538_v0 = vld [vmem:[%s20092_s4 + $0x1438] sm:$0xff] }
 0x4ec   :  { %7869 = vmatprep.subr.bf16.mxu1 %v12604_v9  ;;  %7910 = vmatprep.subr.bf16.mxu0 %v12606_v54 }
 0x4ef   :  { %7870 = vmatpush1.bf16.msra.mxu1 %v12603_v10  ;;  %7911 = vmatpush1.bf16.msra.mxu0 %v12605_v37  ;;  %v12562_v10 = vld [vmem:[%s20092_s4 + $0x14f8] sm:$0xff] }
 0x4f0   :  { %7871 = vmatprep.subr.bf16.mxu1 %v12596_v43  ;;  %7912 = vmatprep.subr.bf16.mxu0 %v12598_v26  ;;  %v12633_v43 = vcombine.low %v12566_v15, %v12570_v16  ;;  %v12624_v26 = vcombine.high %v12557_v55, %v12561_v5  ;;  %v12626_v39 = vcombine.high %v12558_v41, %v12562_v10  ;;  %v12707_v16 = vld [vmem:[%s20092_s4 + $0x1780] sm:$0xff] }
 0x4f1   :  { %v12625_v31 = vcombine.low %v12558_v41, %v12562_v10  ;;  %v12704_v41 = vld [vmem:[%s20092_s4 + $0x1768] sm:$0xff] }
 0x4f3   :  { %7872 = vmatpush1.bf16.msra.mxu1 %v12595_v30  ;;  %7913 = vmatpush1.bf16.msra.mxu0 %v12597_v45  ;;  %v12554_v30 = vld [vmem:[%s20092_s4 + $0x14b8] sm:$0xff]  ;;  %v12623_v45 = vcombine.low %v12557_v55, %v12561_v5  ;;  %v12703_v55 = vld [vmem:[%s20092_s4 + $0x1760] sm:$0xff]  ;;  %v12700_v5 = vld [vmem:[%s20092_s4 + $0x1748] sm:$0xff] }
 0x4f4   :  { %7939 = vmatprep.subr.bf16.mxu1 %v12656_v52  ;;  %7980 = vmatprep.subr.bf16.mxu0 %v12658_v60  ;;  %v12618_v52 = vcombine.high %v12550_v8, %v12554_v30  ;;  %v12541_v60 = vld [vmem:[%s20092_s4 + $0x1450] sm:$0xff] }
 0x4f5   :  { %v12607_v4 = vcombine.low %v12541_v60, %v12545_v62 }
 0x4f6   :  { %v6217_v59 = vpop.f32.mrf.mxu1  ;;  %v6258_v32 = vpop.f32.mrf.mxu0  ;;  %7890 = vmatmul.mubr.bf16.vlgmr.msra.gmra.mxu1 %v18401_v6  ;;  %7931 = vmatmul.mubr.bf16.vlgmr.msra.gmra.mxu0 %v18401_v6 }
 0x4f7   :  { %v18418_v42 = vadd.f32 %v6217_v59, %v18188_v61  ;;  %v18421_v63 = vadd.f32 %v6258_v32, %v18191_v12  ;;  %7940 = vmatpush1.bf16.msra.mxu1 %v12655_v23  ;;  %7981 = vmatpush1.bf16.msra.mxu0 %v12657_v49  ;;  %v12569_v12 = vld [vmem:[%s20092_s4 + $0x1530] sm:$0xff]  ;;  %v12617_v23 = vcombine.low %v12550_v8, %v12554_v30 }
 0x4f8   :  { %v6219_v14 = vpop.f32.mrf.mxu1  ;;  %v6260_v28 = vpop.f32.mrf.mxu0  ;;  %7941 = vmatprep.subr.bf16.mxu1 %v12648_v34  ;;  %7982 = vmatprep.subr.bf16.mxu0 %v12650_v2  ;;  %v12632_v54 = vcombine.high %v12565_v50, %v12569_v12  ;;  %v12631_v37 = vcombine.low %v12565_v50, %v12569_v12  ;;  %v12608_v49 = vcombine.high %v12541_v60, %v12545_v62  ;;  %v12533_v2 = vld [vmem:[%s20092_s4 + $0x1410] sm:$0xff] }
 0x4f9   :  { %v18427_v40 = vadd.f32 %v6219_v14, %v18197_v35  ;;  %v18430_v61 = vadd.f32 %v6260_v28, %v18200_v27  ;;  %7971 = vmatprep.mubr.bf16.mxu1 %v14127_v11  ;;  %8012 = vmatprep.mubr.bf16.mxu0 %v14127_v11  ;;  %v12639_v27 = vcombine.low %v12573_v17, %v12577_v24  ;;  %v12537_v17 = vld [vmem:[%s20092_s4 + $0x1430] sm:$0xff]  ;;  %v12534_v24 = vld [vmem:[%s20092_s4 + $0x1418] sm:$0xff]  ;;  %v12719_v14 = vld [vmem:[%s20092_s4 + $0x17e0] sm:$0xff] }
 0x4fa   :  { %v6221_v35 = vpop.f32.mrf.mxu1  ;;  %v6262_v19 = vpop.f32.mrf.mxu0  ;;  %v12610_v34 = vcombine.high %v12542_v3, %v12546_v22  ;;  %v12609_v59 = vcombine.low %v12542_v3, %v12546_v22  ;;  %v12600_v32 = vcombine.high %v12533_v2, %v12537_v17  ;;  %v12716_v28 = vld [vmem:[%s20092_s4 + $0x17c8] sm:$0xff]  ;;  %v12601_v50 = vcombine.low %v12534_v24, %v12538_v0 }
 0x4fb   :  { %7942 = vmatpush1.bf16.msra.mxu1 %v12647_v38  ;;  %7983 = vmatpush1.bf16.msra.mxu0 %v12649_v47  ;;  %v12602_v38 = vcombine.high %v12534_v24, %v12538_v0  ;;  %v12715_v47 = vld [vmem:[%s20092_s4 + $0x17c0] sm:$0xff]  ;;  %v12708_v19 = vld [vmem:[%s20092_s4 + $0x1788] sm:$0xff]  ;;  %v12765_v62 = vcombine.low %v12700_v5, %v12704_v41 }
 0x4fc   :  { %v6222_v57 = vpop.f32.mrf.mxu1  ;;  %v6263_v9 = vpop.f32.mrf.mxu0  ;;  %7943 = vmatprep.subr.bf16.mxu1 %v12640_v58  ;;  %7984 = vmatprep.subr.bf16.mxu0 %v12642_v18  ;;  %v12720_v58 = vld [vmem:[%s20092_s4 + $0x17e8] sm:$0xff]  ;;  %v12599_v18 = vcombine.low %v12533_v2, %v12537_v17  ;;  %v12780_v12 = vcombine.high %v12715_v47, %v12719_v14  ;;  %v12711_v35 = vld [vmem:[%s20092_s4 + $0x17a0] sm:$0xff] }
 0x4fd   :  { %v12782_v15 = vcombine.high %v12716_v28, %v12720_v58  ;;  %v12781_v57 = vcombine.low %v12716_v28, %v12720_v58  ;;  %v12772_v9 = vcombine.high %v12707_v16, %v12711_v35  ;;  %v12684_v2 = vld [vmem:[%s20092_s4 + $0x16c8] sm:$0xff] }
 0x4fe   :  { %v12688_v17 = vld [vmem:[%s20092_s4 + $0x16e8] sm:$0xff] }
 0x4ff   :  { %7944 = vmatpush1.bf16.msra.mxu1 %v12639_v27  ;;  %7985 = vmatpush1.bf16.msra.mxu0 %v12641_v53  ;;  %v12712_v27 = vld [vmem:[%s20092_s4 + $0x17a8] sm:$0xff]  ;;  %v12779_v53 = vcombine.low %v12715_v47, %v12719_v14  ;;  %v12749_v58 = vcombine.low %v12684_v2, %v12688_v17 }
 0x500   :  { %7945 = vmatprep.subr.bf16.mxu1 %v12632_v54  ;;  %7986 = vmatprep.subr.bf16.mxu0 %v12634_v51  ;;  %v12774_v54 = vcombine.high %v12708_v19, %v12712_v27  ;;  %v12699_v51 = vld [vmem:[%s20092_s4 + $0x1740] sm:$0xff]  ;;  %v12773_v29 = vcombine.low %v12708_v19, %v12712_v27  ;;  %v12676_v47 = vld [vmem:[%s20092_s4 + $0x1688] sm:$0xff] }
 0x501   :  { %v12764_v30 = vcombine.high %v12699_v51, %v12703_v55  ;;  %v12680_v14 = vld [vmem:[%s20092_s4 + $0x16a8] sm:$0xff] }
 0x502   :  { %v12741_v27 = vcombine.low %v12676_v47, %v12680_v14 }
 0x503   :  { %7946 = vmatpush1.bf16.msra.mxu1 %v12631_v37  ;;  %7987 = vmatpush1.bf16.msra.mxu0 %v12633_v43  ;;  %v12771_v43 = vcombine.low %v12707_v16, %v12711_v35  ;;  %v12668_v16 = vld [vmem:[%s20092_s4 + $0x1648] sm:$0xff] }
 0x504   :  { %7947 = vmatprep.subr.bf16.mxu1 %v12624_v26  ;;  %7988 = vmatprep.subr.bf16.mxu0 %v12626_v39  ;;  %v12672_v35 = vld [vmem:[%s20092_s4 + $0x1668] sm:$0xff] }
 0x507   :  { %7948 = vmatpush1.bf16.msra.mxu1 %v12623_v45  ;;  %7989 = vmatpush1.bf16.msra.mxu0 %v12625_v31  ;;  %v12766_v45 = vcombine.high %v12700_v5, %v12704_v41  ;;  %v12733_v41 = vcombine.low %v12668_v16, %v12672_v35 }
 0x508   :  { %7949 = vmatprep.subr.bf16.mxu1 %v12616_v13  ;;  %7990 = vmatprep.subr.bf16.mxu0 %v12618_v52  ;;  %v12692_v13 = vld [vmem:[%s20092_s4 + $0x1708] sm:$0xff] }
 0x509   :  { %v12696_v52 = vld [vmem:[%s20092_s4 + $0x1728] sm:$0xff] }
 0x50a   :  { %v12757_v0 = vcombine.low %v12692_v13, %v12696_v52 }
 0x50b   :  { %7950 = vmatpush1.bf16.msra.mxu1 %v12615_v1  ;;  %7991 = vmatpush1.bf16.msra.mxu0 %v12617_v23  ;;  %v12758_v23 = vcombine.high %v12692_v13, %v12696_v52  ;;  %v12709_v13 = vld [vmem:[%s20092_s4 + $0x1790] sm:$0xff] }
 0x50c   :  { %7951 = vmatprep.subr.bf16.mxu1 %v12608_v49  ;;  %7992 = vmatprep.subr.bf16.mxu0 %v12610_v34  ;;  %v12683_v49 = vld [vmem:[%s20092_s4 + $0x16c0] sm:$0xff]  ;;  %v12713_v52 = vld [vmem:[%s20092_s4 + $0x17b0] sm:$0xff] }
 0x50d   :  { %v12687_v34 = vld [vmem:[%s20092_s4 + $0x16e0] sm:$0xff] }
 0x50e   :  { %v12747_v28 = vcombine.low %v12683_v49, %v12687_v34 }
 0x50f   :  { %7952 = vmatpush1.bf16.msra.mxu1 %v12607_v4  ;;  %7993 = vmatpush1.bf16.msra.mxu0 %v12609_v59  ;;  %v12748_v4 = vcombine.high %v12683_v49, %v12687_v34  ;;  %v12750_v59 = vcombine.high %v12684_v2, %v12688_v17  ;;  %v12705_v49 = vld [vmem:[%s20092_s4 + $0x1770] sm:$0xff]  ;;  %v12702_v34 = vld [vmem:[%s20092_s4 + $0x1758] sm:$0xff] }
 0x510   :  { %7953 = vmatprep.subr.bf16.mxu1 %v12600_v32  ;;  %7994 = vmatprep.subr.bf16.mxu0 %v12602_v38  ;;  %v12675_v32 = vld [vmem:[%s20092_s4 + $0x1680] sm:$0xff] }
 0x511   :  { %v12679_v38 = vld [vmem:[%s20092_s4 + $0x16a0] sm:$0xff] }
 0x512   :  { %v12739_v19 = vcombine.low %v12675_v32, %v12679_v38 }
 0x513   :  { %7954 = vmatpush1.bf16.msra.mxu1 %v12599_v18  ;;  %7995 = vmatpush1.bf16.msra.mxu0 %v12601_v50  ;;  %v12740_v18 = vcombine.high %v12675_v32, %v12679_v38  ;;  %v12742_v50 = vcombine.high %v12676_v47, %v12680_v14 }
 0x514   :  { %8415 = vmatprep.subr.bf16.mxu1 %v12780_v12  ;;  %8456 = vmatprep.subr.bf16.mxu0 %v12782_v15  ;;  %v12667_v12 = vld [vmem:[%s20092_s4 + $0x1640] sm:$0xff] }
 0x515   :  { %v12671_v15 = vld [vmem:[%s20092_s4 + $0x1660] sm:$0xff] }
 0x516   :  { %v6299_v10 = vpop.f32.mrf.mxu1  ;;  %v6340_v37 = vpop.f32.mrf.mxu0  ;;  %7972 = vmatmul.mubr.bf16.vlgmr.msra.gmra.mxu1 %v18401_v6  ;;  %8013 = vmatmul.mubr.bf16.vlgmr.msra.gmra.mxu0 %v18401_v6  ;;  %v12691_v6 = vld [vmem:[%s20092_s4 + $0x1700] sm:$0xff]  ;;  %v12731_v5 = vcombine.low %v12667_v12, %v12671_v15 }
 0x517   :  { %v18530_v26 = vadd.f32 %v6299_v10, %v18300_v46  ;;  %v18533_v39 = vadd.f32 %v6340_v37, %v18303_v25  ;;  %8416 = vmatpush1.bf16.msra.mxu1 %v12779_v53  ;;  %8457 = vmatpush1.bf16.msra.mxu0 %v12781_v57  ;;  %v12695_v25 = vld [vmem:[%s20092_s4 + $0x1720] sm:$0xff]  ;;  %v12732_v53 = vcombine.high %v12667_v12, %v12671_v15 }
 0x518   :  { %v6301_v44 = vpop.f32.mrf.mxu1  ;;  %v6342_v8 = vpop.f32.mrf.mxu0  ;;  %8417 = vmatprep.subr.bf16.mxu1 %v12772_v9  ;;  %8458 = vmatprep.subr.bf16.mxu0 %v12774_v54  ;;  %v12756_v1 = vcombine.high %v12691_v6, %v12695_v25  ;;  %v12755_v24 = vcombine.low %v12691_v6, %v12695_v25  ;;  %v12734_v57 = vcombine.high %v12668_v16, %v12672_v35  ;;  %v12659_v9 = vld [vmem:[%s20092_s4 + $0x1600] sm:$0xff] }
 0x519   :  { %v18539_v31 = vadd.f32 %v6301_v44, %v18309_v7  ;;  %v18542_v46 = vadd.f32 %v6342_v8, %v18312_v33  ;;  %8447 = vmatprep.mubr.bf16.mxu1 %v14127_v11  ;;  %8488 = vmatprep.mubr.bf16.mxu0 %v14127_v11  ;;  %v12763_v33 = vcombine.low %v12699_v51, %v12703_v55  ;;  %v12663_v54 = vld [vmem:[%s20092_s4 + $0x1620] sm:$0xff]  ;;  %v12660_v51 = vld [vmem:[%s20092_s4 + $0x1608] sm:$0xff]  ;;  %v12718_v44 = vld [vmem:[%s20092_s4 + $0x17d8] sm:$0xff] }
 0x51a   :  { %v6303_v7 = vpop.f32.mrf.mxu1  ;;  %v6344_v60 = vpop.f32.mrf.mxu0  ;;  %v12664_v55 = vld [vmem:[%s20092_s4 + $0x1628] sm:$0xff]  ;;  %v12724_v10 = vcombine.high %v12659_v9, %v12663_v54  ;;  %v12722_v8 = vld [vmem:[%s20092_s4 + $0x17f8] sm:$0xff] }
 0x51b   :  { %8418 = vmatpush1.bf16.msra.mxu1 %v12771_v43  ;;  %8459 = vmatpush1.bf16.msra.mxu0 %v12773_v29  ;;  %v12726_v37 = vcombine.high %v12660_v51, %v12664_v55  ;;  %v12717_v43 = vld [vmem:[%s20092_s4 + $0x17d0] sm:$0xff]  ;;  %v12786_v25 = vcombine.high %v12718_v44, %v12722_v8  ;;  %v12710_v7 = vld [vmem:[%s20092_s4 + $0x1798] sm:$0xff] }
 0x51c   :  { %v6304_v3 = vpop.f32.mrf.mxu1  ;;  %v6345_v22 = vpop.f32.mrf.mxu0  ;;  %8419 = vmatprep.subr.bf16.mxu1 %v12764_v30  ;;  %8460 = vmatprep.subr.bf16.mxu0 %v12766_v45  ;;  %v12721_v29 = vld [vmem:[%s20092_s4 + $0x17f0] sm:$0xff]  ;;  %v12723_v30 = vcombine.low %v12659_v9, %v12663_v54  ;;  %v12725_v45 = vcombine.low %v12660_v51, %v12664_v55  ;;  %v12714_v60 = vld [vmem:[%s20092_s4 + $0x17b8] sm:$0xff] }
 0x51d   :  { %v12784_v6 = vcombine.high %v12717_v43, %v12721_v29  ;;  %v18629_v3 = vpack.c.bf16 %v16312_v48, %v16312_v48  ;;  %v12776_v22 = vcombine.high %v12709_v13, %v12713_v52  ;;  %v12706_v48 = vld [vmem:[%s20092_s4 + $0x1778] sm:$0xff] }
 0x51e   :  { %v12770_v14 = vcombine.high %v12702_v34, %v12706_v48  ;;  %v12769_v15 = vcombine.low %v12702_v34, %v12706_v48  ;;  %v12686_v9 = vld [vmem:[%s20092_s4 + $0x16d8] sm:$0xff] }
 0x51f   :  { %8420 = vmatpush1.bf16.msra.mxu1 %v12763_v33  ;;  %8461 = vmatpush1.bf16.msra.mxu0 %v12765_v62  ;;  %v12783_v33 = vcombine.low %v12717_v43, %v12721_v29  ;;  %v12785_v62 = vcombine.low %v12718_v44, %v12722_v8  ;;  %v12690_v54 = vld [vmem:[%s20092_s4 + $0x16f8] sm:$0xff] }
 0x520   :  { %8421 = vmatprep.subr.bf16.mxu1 %v12756_v1  ;;  %8462 = vmatprep.subr.bf16.mxu0 %v12758_v23  ;;  %v12778_v1 = vcombine.high %v12710_v7, %v12714_v60  ;;  %v12701_v23 = vld [vmem:[%s20092_s4 + $0x1750] sm:$0xff]  ;;  %v12678_v43 = vld [vmem:[%s20092_s4 + $0x1698] sm:$0xff]  ;;  %v12753_v8 = vcombine.low %v12686_v9, %v12690_v54 }
 0x521   :  { %v12768_v47 = vcombine.high %v12701_v23, %v12705_v49  ;;  %v12682_v29 = vld [vmem:[%s20092_s4 + $0x16b8] sm:$0xff] }
 0x523   :  { %8422 = vmatpush1.bf16.msra.mxu1 %v12755_v24  ;;  %8463 = vmatpush1.bf16.msra.mxu0 %v12757_v0  ;;  %v12775_v24 = vcombine.low %v12709_v13, %v12713_v52  ;;  %v12670_v13 = vld [vmem:[%s20092_s4 + $0x1658] sm:$0xff] }
 0x524   :  { %8423 = vmatprep.subr.bf16.mxu1 %v12748_v4  ;;  %8464 = vmatprep.subr.bf16.mxu0 %v12750_v59  ;;  %v12777_v59 = vcombine.low %v12710_v7, %v12714_v60  ;;  %v12674_v52 = vld [vmem:[%s20092_s4 + $0x1678] sm:$0xff]  ;;  %v12745_v60 = vcombine.low %v12678_v43, %v12682_v29 }
 0x525   :  { %v12737_v48 = vcombine.low %v12670_v13, %v12674_v52 }
 0x527   :  { %8424 = vmatpush1.bf16.msra.mxu1 %v12747_v28  ;;  %8465 = vmatpush1.bf16.msra.mxu0 %v12749_v58  ;;  %v12693_v28 = vld [vmem:[%s20092_s4 + $0x1710] sm:$0xff] }
 0x528   :  { %8425 = vmatprep.subr.bf16.mxu1 %v12740_v18  ;;  %8466 = vmatprep.subr.bf16.mxu0 %v12742_v50  ;;  %v12694_v18 = vld [vmem:[%s20092_s4 + $0x1718] sm:$0xff] }
 0x529   :  { %v12698_v50 = vld [vmem:[%s20092_s4 + $0x1738] sm:$0xff] }
 0x52a   :  { %v12761_v55 = vcombine.low %v12694_v18, %v12698_v50 }
 0x52b   :  { %8426 = vmatpush1.bf16.msra.mxu1 %v12739_v19  ;;  %8467 = vmatpush1.bf16.msra.mxu0 %v12741_v27  ;;  %v12762_v27 = vcombine.high %v12694_v18, %v12698_v50  ;;  %v12835_v18 = vld [vmem:[%s20092_s4 + $0x1980] sm:$0xff] }
 0x52c   :  { %8427 = vmatprep.subr.bf16.mxu1 %v12732_v53  ;;  %8468 = vmatprep.subr.bf16.mxu0 %v12734_v57  ;;  %v12685_v53 = vld [vmem:[%s20092_s4 + $0x16d0] sm:$0xff]  ;;  %v12839_v50 = vld [vmem:[%s20092_s4 + $0x19a0] sm:$0xff] }
 0x52d   :  { %v12689_v57 = vld [vmem:[%s20092_s4 + $0x16f0] sm:$0xff] }
 0x52e   :  { %v12751_v44 = vcombine.low %v12685_v53, %v12689_v57 }
 0x52f   :  { %8428 = vmatpush1.bf16.msra.mxu1 %v12731_v5  ;;  %8469 = vmatpush1.bf16.msra.mxu0 %v12733_v41  ;;  %v12752_v5 = vcombine.high %v12685_v53, %v12689_v57  ;;  %v12754_v41 = vcombine.high %v12686_v9, %v12690_v54  ;;  %v12828_v53 = vld [vmem:[%s20092_s4 + $0x1948] sm:$0xff] }
 0x530   :  { %8429 = vmatprep.subr.bf16.mxu1 %v12724_v10  ;;  %8470 = vmatprep.subr.bf16.mxu0 %v12726_v37  ;;  %v12677_v10 = vld [vmem:[%s20092_s4 + $0x1690] sm:$0xff]  ;;  %v12832_v57 = vld [vmem:[%s20092_s4 + $0x1968] sm:$0xff] }
 0x531   :  { %v12681_v37 = vld [vmem:[%s20092_s4 + $0x16b0] sm:$0xff] }
 0x532   :  { %v12743_v7 = vcombine.low %v12677_v10, %v12681_v37 }
 0x533   :  { %8430 = vmatpush1.bf16.msra.mxu1 %v12723_v30  ;;  %8471 = vmatpush1.bf16.msra.mxu0 %v12725_v45  ;;  %v12744_v30 = vcombine.high %v12677_v10, %v12681_v37  ;;  %v12746_v45 = vcombine.high %v12678_v43, %v12682_v29  ;;  %v12894_v29 = vcombine.high %v12828_v53, %v12832_v57 }
 0x534   :  { %8497 = vmatprep.subr.bf16.mxu1 %v12784_v6  ;;  %8538 = vmatprep.subr.bf16.mxu0 %v12786_v25  ;;  %v12669_v6 = vld [vmem:[%s20092_s4 + $0x1650] sm:$0xff] }
 0x535   :  { %v12673_v25 = vld [vmem:[%s20092_s4 + $0x1670] sm:$0xff] }
 0x536   :  { %v6775_v2 = vpop.f32.mrf.mxu1  ;;  %v6816_v17 = vpop.f32.mrf.mxu0  ;;  %8448 = vmatmul.mubr.bf16.vlgmr.msra.gmra.mxu1 %v18629_v3  ;;  %8489 = vmatmul.mubr.bf16.vlgmr.msra.gmra.mxu0 %v18629_v3  ;;  %v12735_v34 = vcombine.low %v12669_v6, %v12673_v25 }
 0x537   :  { %v18646_v0 = vadd.f32 %v6775_v2, %v18418_v42  ;;  %v18649_v4 = vadd.f32 %v6816_v17, %v18421_v63  ;;  %8498 = vmatpush1.bf16.msra.mxu1 %v12783_v33  ;;  %8539 = vmatpush1.bf16.msra.mxu0 %v12785_v62  ;;  %v12697_v63 = vld [vmem:[%s20092_s4 + $0x1730] sm:$0xff]  ;;  %v12736_v33 = vcombine.high %v12669_v6, %v12673_v25 }
 0x538   :  { %v6777_v32 = vpop.f32.mrf.mxu1  ;;  %v6818_v38 = vpop.f32.mrf.mxu0  ;;  %8499 = vmatprep.subr.bf16.mxu1 %v12776_v22  ;;  %8540 = vmatprep.subr.bf16.mxu0 %v12778_v1  ;;  %v12760_v19 = vcombine.high %v12693_v28, %v12697_v63  ;;  %v12759_v51 = vcombine.low %v12693_v28, %v12697_v63  ;;  %v12738_v62 = vcombine.high %v12670_v13, %v12674_v52  ;;  %v12661_v22 = vld [vmem:[%s20092_s4 + $0x1610] sm:$0xff] }
 0x539   :  { %v18655_v58 = vadd.f32 %v6777_v32, %v18427_v40  ;;  %v18658_v42 = vadd.f32 %v6818_v38, %v18430_v61  ;;  %8529 = vmatprep.mubr.bf16.mxu1 %v14127_v11  ;;  %8570 = vmatprep.mubr.bf16.mxu0 %v14127_v11  ;;  %v12767_v61 = vcombine.low %v12701_v23, %v12705_v49  ;;  %v12665_v1 = vld [vmem:[%s20092_s4 + $0x1630] sm:$0xff]  ;;  %v12662_v23 = vld [vmem:[%s20092_s4 + $0x1618] sm:$0xff]  ;;  %v12844_v32 = vld [vmem:[%s20092_s4 + $0x19c8] sm:$0xff] }
 0x53a   :  { %v6779_v40 = vpop.f32.mrf.mxu1  ;;  %v6820_v12 = vpop.f32.mrf.mxu0  ;;  %v12666_v49 = vld [vmem:[%s20092_s4 + $0x1638] sm:$0xff]  ;;  %v12728_v2 = vcombine.high %v12661_v22, %v12665_v1  ;;  %v12848_v38 = vld [vmem:[%s20092_s4 + $0x19e8] sm:$0xff]  ;;  %v12893_v6 = vcombine.low %v12828_v53, %v12832_v57 }
 0x53b   :  { %8500 = vmatpush1.bf16.msra.mxu1 %v12775_v24  ;;  %8541 = vmatpush1.bf16.msra.mxu0 %v12777_v59  ;;  %v12730_v17 = vcombine.high %v12662_v23, %v12666_v49  ;;  %v12843_v24 = vld [vmem:[%s20092_s4 + $0x19c0] sm:$0xff]  ;;  %v12910_v63 = vcombine.high %v12844_v32, %v12848_v38  ;;  %v12836_v40 = vld [vmem:[%s20092_s4 + $0x1988] sm:$0xff] }
 0x53c   :  { %v6780_v16 = vpop.f32.mrf.mxu1  ;;  %v6821_v35 = vpop.f32.mrf.mxu0  ;;  %8501 = vmatprep.subr.bf16.mxu1 %v12768_v47  ;;  %8542 = vmatprep.subr.bf16.mxu0 %v12770_v14  ;;  %v12847_v59 = vld [vmem:[%s20092_s4 + $0x19e0] sm:$0xff]  ;;  %v12727_v47 = vcombine.low %v12661_v22, %v12665_v1  ;;  %v12729_v14 = vcombine.low %v12662_v23, %v12666_v49  ;;  %v12840_v12 = vld [vmem:[%s20092_s4 + $0x19a8] sm:$0xff] }
 0x53d   :  { %v12908_v28 = vcombine.high %v12843_v24, %v12847_v59  ;;  %v12900_v16 = vcombine.high %v12835_v18, %v12839_v50  ;;  %v12902_v35 = vcombine.high %v12836_v40, %v12840_v12  ;;  %v12816_v22 = vld [vmem:[%s20092_s4 + $0x18e8] sm:$0xff] }
 0x53f   :  { %8502 = vmatpush1.bf16.msra.mxu1 %v12767_v61  ;;  %8543 = vmatpush1.bf16.msra.mxu0 %v12769_v15  ;;  %v12907_v61 = vcombine.low %v12843_v24, %v12847_v59  ;;  %v12909_v15 = vcombine.low %v12844_v32, %v12848_v38  ;;  %v12808_v24 = vld [vmem:[%s20092_s4 + $0x18a8] sm:$0xff] }
 0x540   :  { %8503 = vmatprep.subr.bf16.mxu1 %v12760_v19  ;;  %8544 = vmatprep.subr.bf16.mxu0 %v12762_v27  ;;  %v12827_v19 = vld [vmem:[%s20092_s4 + $0x1940] sm:$0xff] }
 0x541   :  { %v12831_v27 = vld [vmem:[%s20092_s4 + $0x1960] sm:$0xff] }
 0x542   :  { %v12892_v43 = vcombine.high %v12827_v19, %v12831_v27 }
 0x543   :  { %8504 = vmatpush1.bf16.msra.mxu1 %v12759_v51  ;;  %8545 = vmatpush1.bf16.msra.mxu0 %v12761_v55  ;;  %v12899_v51 = vcombine.low %v12835_v18, %v12839_v50  ;;  %v12800_v18 = vld [vmem:[%s20092_s4 + $0x1868] sm:$0xff] }
 0x544   :  { %8505 = vmatprep.subr.bf16.mxu1 %v12752_v5  ;;  %8546 = vmatprep.subr.bf16.mxu0 %v12754_v41  ;;  %v12901_v41 = vcombine.low %v12836_v40, %v12840_v12 }
 0x547   :  { %8506 = vmatpush1.bf16.msra.mxu1 %v12751_v44  ;;  %8547 = vmatpush1.bf16.msra.mxu0 %v12753_v8  ;;  %v12820_v8 = vld [vmem:[%s20092_s4 + $0x1908] sm:$0xff] }
 0x548   :  { %8507 = vmatprep.subr.bf16.mxu1 %v12744_v30  ;;  %8548 = vmatprep.subr.bf16.mxu0 %v12746_v45  ;;  %v12824_v30 = vld [vmem:[%s20092_s4 + $0x1928] sm:$0xff] }
 0x549   :  { %v12885_v23 = vcombine.low %v12820_v8, %v12824_v30 }
 0x54b   :  { %8508 = vmatpush1.bf16.msra.mxu1 %v12743_v7  ;;  %8549 = vmatpush1.bf16.msra.mxu0 %v12745_v60  ;;  %v12886_v7 = vcombine.high %v12820_v8, %v12824_v30  ;;  %v12811_v60 = vld [vmem:[%s20092_s4 + $0x18c0] sm:$0xff]  ;;  %v12841_v8 = vld [vmem:[%s20092_s4 + $0x19b0] sm:$0xff]  ;;  %v12838_v30 = vld [vmem:[%s20092_s4 + $0x1998] sm:$0xff] }
 0x54c   :  { %8509 = vmatprep.subr.bf16.mxu1 %v12736_v33  ;;  %8550 = vmatprep.subr.bf16.mxu0 %v12738_v62  ;;  %v12815_v33 = vld [vmem:[%s20092_s4 + $0x18e0] sm:$0xff]  ;;  %v12812_v62 = vld [vmem:[%s20092_s4 + $0x18c8] sm:$0xff] }
 0x54d   :  { %v12876_v49 = vcombine.high %v12811_v60, %v12815_v33  ;;  %v12875_v59 = vcombine.low %v12811_v60, %v12815_v33  ;;  %v12877_v32 = vcombine.low %v12812_v62, %v12816_v22  ;;  %v12830_v60 = vld [vmem:[%s20092_s4 + $0x1958] sm:$0xff] }
 0x54f   :  { %8510 = vmatpush1.bf16.msra.mxu1 %v12735_v34  ;;  %8551 = vmatpush1.bf16.msra.mxu0 %v12737_v48  ;;  %v12878_v34 = vcombine.high %v12812_v62, %v12816_v22  ;;  %v12803_v48 = vld [vmem:[%s20092_s4 + $0x1880] sm:$0xff] }
 0x550   :  { %8511 = vmatprep.subr.bf16.mxu1 %v12728_v2  ;;  %8552 = vmatprep.subr.bf16.mxu0 %v12730_v17  ;;  %v12807_v2 = vld [vmem:[%s20092_s4 + $0x18a0] sm:$0xff]  ;;  %v12804_v17 = vld [vmem:[%s20092_s4 + $0x1888] sm:$0xff] }
 0x551   :  { %v12868_v38 = vcombine.high %v12803_v48, %v12807_v2  ;;  %v12867_v50 = vcombine.low %v12803_v48, %v12807_v2  ;;  %v12869_v40 = vcombine.low %v12804_v17, %v12808_v24 }
 0x553   :  { %8512 = vmatpush1.bf16.msra.mxu1 %v12727_v47  ;;  %8553 = vmatpush1.bf16.msra.mxu0 %v12729_v14  ;;  %v12870_v47 = vcombine.high %v12804_v17, %v12808_v24  ;;  %v12795_v14 = vld [vmem:[%s20092_s4 + $0x1840] sm:$0xff]  ;;  %v12821_v24 = vld [vmem:[%s20092_s4 + $0x1910] sm:$0xff] }
 0x554   :  { %8973 = vmatprep.subr.bf16.mxu1 %v12908_v28  ;;  %9014 = vmatprep.subr.bf16.mxu0 %v12910_v63  ;;  %v12799_v28 = vld [vmem:[%s20092_s4 + $0x1860] sm:$0xff]  ;;  %v12796_v63 = vld [vmem:[%s20092_s4 + $0x1848] sm:$0xff] }
 0x555   :  { %v12860_v12 = vcombine.high %v12795_v14, %v12799_v28  ;;  %v12861_v53 = vcombine.low %v12796_v63, %v12800_v18 }
 0x556   :  { %v6857_v9 = vpop.f32.mrf.mxu1  ;;  %v6898_v54 = vpop.f32.mrf.mxu0  ;;  %8530 = vmatmul.mubr.bf16.vlgmr.msra.gmra.mxu1 %v18629_v3  ;;  %8571 = vmatmul.mubr.bf16.vlgmr.msra.gmra.mxu0 %v18629_v3  ;;  %v12819_v3 = vld [vmem:[%s20092_s4 + $0x1900] sm:$0xff] }
 0x557   :  { %v18758_v55 = vadd.f32 %v6857_v9, %v18530_v26  ;;  %v18761_v5 = vadd.f32 %v6898_v54, %v18533_v39  ;;  %8974 = vmatpush1.bf16.msra.mxu1 %v12907_v61  ;;  %9015 = vmatpush1.bf16.msra.mxu0 %v12909_v15  ;;  %v12823_v39 = vld [vmem:[%s20092_s4 + $0x1920] sm:$0xff]  ;;  %v12862_v61 = vcombine.high %v12796_v63, %v12800_v18  ;;  %v12845_v54 = vld [vmem:[%s20092_s4 + $0x19d0] sm:$0xff] }
 0x558   :  { %v6859_v10 = vpop.f32.mrf.mxu1  ;;  %v6900_v37 = vpop.f32.mrf.mxu0  ;;  %8975 = vmatprep.subr.bf16.mxu1 %v12900_v16  ;;  %9016 = vmatprep.subr.bf16.mxu0 %v12902_v35  ;;  %v12884_v52 = vcombine.high %v12819_v3, %v12823_v39  ;;  %v12883_v1 = vcombine.low %v12819_v3, %v12823_v39  ;;  %v12787_v15 = vld [vmem:[%s20092_s4 + $0x1800] sm:$0xff]  ;;  %v12788_v35 = vld [vmem:[%s20092_s4 + $0x1808] sm:$0xff]  ;;  %v12837_v39 = vld [vmem:[%s20092_s4 + $0x1990] sm:$0xff] }
 0x559   :  { %v18767_v44 = vadd.f32 %v6859_v10, %v18539_v31  ;;  %v18770_v26 = vadd.f32 %v6900_v37, %v18542_v46  ;;  %9005 = vmatprep.mubr.bf16.mxu1 %v14127_v11  ;;  %9046 = vmatprep.mubr.bf16.mxu0 %v14127_v11  ;;  %v12891_v46 = vcombine.low %v12827_v19, %v12831_v27  ;;  %v12791_v16 = vld [vmem:[%s20092_s4 + $0x1820] sm:$0xff]  ;;  %v12792_v19 = vld [vmem:[%s20092_s4 + $0x1828] sm:$0xff]  ;;  %v12850_v10 = vld [vmem:[%s20092_s4 + $0x19f8] sm:$0xff] }
 0x55a   :  { %v6861_v31 = vpop.f32.mrf.mxu1  ;;  %v6902_v45 = vpop.f32.mrf.mxu0  ;;  %v12859_v27 = vcombine.low %v12795_v14, %v12799_v28  ;;  %v12852_v57 = vcombine.high %v12787_v15, %v12791_v16  ;;  %v12854_v9 = vcombine.high %v12788_v35, %v12792_v19  ;;  %v12851_v37 = vcombine.low %v12787_v15, %v12791_v16  ;;  %v12818_v15 = vld [vmem:[%s20092_s4 + $0x18f8] sm:$0xff] }
 0x55b   :  { %8976 = vmatpush1.bf16.msra.mxu1 %v12899_v51  ;;  %9017 = vmatpush1.bf16.msra.mxu0 %v12901_v41  ;;  %v12849_v51 = vld [vmem:[%s20092_s4 + $0x19f0] sm:$0xff]  ;;  %v12846_v41 = vld [vmem:[%s20092_s4 + $0x19d8] sm:$0xff]  ;;  %v12903_v22 = vcombine.low %v12837_v39, %v12841_v8 }
 0x55c   :  { %v6862_v25 = vpop.f32.mrf.mxu1  ;;  %v6903_v13 = vpop.f32.mrf.mxu0  ;;  %8977 = vmatprep.subr.bf16.mxu1 %v12892_v43  ;;  %9018 = vmatprep.subr.bf16.mxu0 %v12894_v29  ;;  %v12853_v43 = vcombine.low %v12788_v35, %v12792_v19  ;;  %v12912_v29 = vcombine.high %v12845_v54, %v12849_v51  ;;  %v12914_v3 = vcombine.high %v12846_v41, %v12850_v10  ;;  %v12842_v31 = vld [vmem:[%s20092_s4 + $0x19b8] sm:$0xff] }
 0x55d   :  { %v12911_v45 = vcombine.low %v12845_v54, %v12849_v51  ;;  %v12904_v25 = vcombine.high %v12837_v39, %v12841_v8  ;;  %v12906_v13 = vcombine.high %v12838_v30, %v12842_v31  ;;  %v12810_v54 = vld [vmem:[%s20092_s4 + $0x18b8] sm:$0xff] }
 0x55e   :  { %v12802_v39 = vld [vmem:[%s20092_s4 + $0x1878] sm:$0xff] }
 0x55f   :  { %8978 = vmatpush1.bf16.msra.mxu1 %v12891_v46  ;;  %9019 = vmatpush1.bf16.msra.mxu0 %v12893_v6  ;;  %v12913_v46 = vcombine.low %v12846_v41, %v12850_v10  ;;  %v18857_v6 = vpack.c.bf16 %v16344_v20, %v16344_v20  ;;  %v12834_v20 = vld [vmem:[%s20092_s4 + $0x1978] sm:$0xff] }
 0x560   :  { %8979 = vmatprep.subr.bf16.mxu1 %v12884_v52  ;;  %9020 = vmatprep.subr.bf16.mxu0 %v12886_v7  ;;  %v12829_v52 = vld [vmem:[%s20092_s4 + $0x1950] sm:$0xff]  ;;  %v12898_v17 = vcombine.high %v12830_v60, %v12834_v20  ;;  %v12897_v14 = vcombine.low %v12830_v60, %v12834_v20 }
 0x561   :  { %v12833_v7 = vld [vmem:[%s20092_s4 + $0x1970] sm:$0xff] }
 0x562   :  { %v12896_v2 = vcombine.high %v12829_v52, %v12833_v7 }
 0x563   :  { %8980 = vmatpush1.bf16.msra.mxu1 %v12883_v1  ;;  %9021 = vmatpush1.bf16.msra.mxu0 %v12885_v23 }
 0x564   :  { %8981 = vmatprep.subr.bf16.mxu1 %v12876_v49  ;;  %9022 = vmatprep.subr.bf16.mxu0 %v12878_v34  ;;  %v12905_v49 = vcombine.low %v12838_v30, %v12842_v31 }
 0x567   :  { %8982 = vmatpush1.bf16.msra.mxu1 %v12875_v59  ;;  %9023 = vmatpush1.bf16.msra.mxu0 %v12877_v32  ;;  %v12822_v32 = vld [vmem:[%s20092_s4 + $0x1918] sm:$0xff] }
 0x568   :  { %8983 = vmatprep.subr.bf16.mxu1 %v12868_v38  ;;  %9024 = vmatprep.subr.bf16.mxu0 %v12870_v47  ;;  %v12826_v38 = vld [vmem:[%s20092_s4 + $0x1938] sm:$0xff] }
 0x569   :  { %v12889_v35 = vcombine.low %v12822_v32, %v12826_v38 }
 0x56b   :  { %8984 = vmatpush1.bf16.msra.mxu1 %v12867_v50  ;;  %9025 = vmatpush1.bf16.msra.mxu0 %v12869_v40  ;;  %v12890_v50 = vcombine.high %v12822_v32, %v12826_v38  ;;  %v12813_v40 = vld [vmem:[%s20092_s4 + $0x18d0] sm:$0xff]  ;;  %v12967_v32 = vld [vmem:[%s20092_s4 + $0x1ba0] sm:$0xff]  ;;  %v12964_v38 = vld [vmem:[%s20092_s4 + $0x1b88] sm:$0xff] }
 0x56c   :  { %8985 = vmatprep.subr.bf16.mxu1 %v12860_v12  ;;  %9026 = vmatprep.subr.bf16.mxu0 %v12862_v61  ;;  %v12817_v12 = vld [vmem:[%s20092_s4 + $0x18f0] sm:$0xff]  ;;  %v12814_v61 = vld [vmem:[%s20092_s4 + $0x18d8] sm:$0xff] }
 0x56d   :  { %v12880_v19 = vcombine.high %v12813_v40, %v12817_v12  ;;  %v12879_v51 = vcombine.low %v12813_v40, %v12817_v12  ;;  %v12881_v41 = vcombine.low %v12814_v61, %v12818_v15  ;;  %v12960_v40 = vld [vmem:[%s20092_s4 + $0x1b68] sm:$0xff] }
 0x56f   :  { %8986 = vmatpush1.bf16.msra.mxu1 %v12859_v27  ;;  %9027 = vmatpush1.bf16.msra.mxu0 %v12861_v53  ;;  %v12882_v27 = vcombine.high %v12814_v61, %v12818_v15  ;;  %v12805_v53 = vld [vmem:[%s20092_s4 + $0x1890] sm:$0xff] }
 0x570   :  { %8987 = vmatprep.subr.bf16.mxu1 %v12852_v57  ;;  %9028 = vmatprep.subr.bf16.mxu0 %v12854_v9  ;;  %v12809_v57 = vld [vmem:[%s20092_s4 + $0x18b0] sm:$0xff]  ;;  %v12806_v9 = vld [vmem:[%s20092_s4 + $0x1898] sm:$0xff] }
 0x571   :  { %v12872_v10 = vcombine.high %v12805_v53, %v12809_v57  ;;  %v12871_v8 = vcombine.low %v12805_v53, %v12809_v57  ;;  %v12873_v30 = vcombine.low %v12806_v9, %v12810_v54 }
 0x573   :  { %8988 = vmatpush1.bf16.msra.mxu1 %v12851_v37  ;;  %9029 = vmatpush1.bf16.msra.mxu0 %v12853_v43  ;;  %v12874_v37 = vcombine.high %v12806_v9, %v12810_v54  ;;  %v12797_v43 = vld [vmem:[%s20092_s4 + $0x1850] sm:$0xff] }
 0x574   :  { %9055 = vmatprep.subr.bf16.mxu1 %v12912_v29  ;;  %9096 = vmatprep.subr.bf16.mxu0 %v12914_v3  ;;  %v12801_v29 = vld [vmem:[%s20092_s4 + $0x1870] sm:$0xff]  ;;  %v12798_v3 = vld [vmem:[%s20092_s4 + $0x1858] sm:$0xff] }
 0x575   :  { %v12864_v31 = vcombine.high %v12797_v43, %v12801_v29  ;;  %v12865_v60 = vcombine.low %v12798_v3, %v12802_v39 }
 0x576   :  { %v7333_v33 = vpop.f32.mrf.mxu1  ;;  %v7374_v62 = vpop.f32.mrf.mxu0  ;;  %9006 = vmatmul.mubr.bf16.vlgmr.msra.gmra.mxu1 %v18857_v6  ;;  %9047 = vmatmul.mubr.bf16.vlgmr.msra.gmra.mxu0 %v18857_v6 }
 0x577   :  { %v18874_v1 = vadd.f32 %v7333_v33, %v18646_v0  ;;  %v18877_v23 = vadd.f32 %v7374_v62, %v18649_v4  ;;  %9056 = vmatpush1.bf16.msra.mxu1 %v12911_v45  ;;  %9097 = vmatpush1.bf16.msra.mxu0 %v12913_v46  ;;  %v12825_v4 = vld [vmem:[%s20092_s4 + $0x1930] sm:$0xff]  ;;  %v12866_v45 = vcombine.high %v12798_v3, %v12802_v39  ;;  %v12971_v62 = vld [vmem:[%s20092_s4 + $0x1bc0] sm:$0xff] }
 0x578   :  { %v7335_v34 = vpop.f32.mrf.mxu1  ;;  %v7376_v48 = vpop.f32.mrf.mxu0  ;;  %9057 = vmatprep.subr.bf16.mxu1 %v12904_v25  ;;  %9098 = vmatprep.subr.bf16.mxu0 %v12906_v13  ;;  %v12888_v18 = vcombine.high %v12821_v24, %v12825_v4  ;;  %v12887_v16 = vcombine.low %v12821_v24, %v12825_v4  ;;  %v12789_v46 = vld [vmem:[%s20092_s4 + $0x1810] sm:$0xff]  ;;  %v12790_v13 = vld [vmem:[%s20092_s4 + $0x1818] sm:$0xff]  ;;  %v12963_v4 = vld [vmem:[%s20092_s4 + $0x1b80] sm:$0xff] }
 0x579   :  { %v18883_v59 = vadd.f32 %v7335_v34, %v18655_v58  ;;  %v18886_v0 = vadd.f32 %v7376_v48, %v18658_v42  ;;  %9087 = vmatprep.mubr.bf16.mxu1 %v14127_v11  ;;  %9128 = vmatprep.mubr.bf16.mxu0 %v14127_v11  ;;  %v12895_v42 = vcombine.low %v12829_v52, %v12833_v7  ;;  %v12793_v25 = vld [vmem:[%s20092_s4 + $0x1830] sm:$0xff]  ;;  %v12794_v52 = vld [vmem:[%s20092_s4 + $0x1838] sm:$0xff]  ;;  %v12976_v34 = vld [vmem:[%s20092_s4 + $0x1be8] sm:$0xff] }
 0x57a   :  { %v7337_v58 = vpop.f32.mrf.mxu1  ;;  %v7378_v47 = vpop.f32.mrf.mxu0  ;;  %v12863_v7 = vcombine.low %v12797_v43, %v12801_v29  ;;  %v12856_v20 = vcombine.high %v12789_v46, %v12793_v25  ;;  %v12858_v33 = vcombine.high %v12790_v13, %v12794_v52  ;;  %v12855_v48 = vcombine.low %v12789_v46, %v12793_v25 }
 0x57b   :  { %9058 = vmatpush1.bf16.msra.mxu1 %v12903_v22  ;;  %9099 = vmatpush1.bf16.msra.mxu0 %v12905_v49  ;;  %v12975_v22 = vld [vmem:[%s20092_s4 + $0x1be0] sm:$0xff]  ;;  %v12972_v49 = vld [vmem:[%s20092_s4 + $0x1bc8] sm:$0xff]  ;;  %v13027_v15 = vcombine.low %v12963_v4, %v12967_v32 }
 0x57c   :  { %v7338_v28 = vpop.f32.mrf.mxu1  ;;  %v7379_v63 = vpop.f32.mrf.mxu0  ;;  %9059 = vmatprep.subr.bf16.mxu1 %v12896_v2  ;;  %9100 = vmatprep.subr.bf16.mxu0 %v12898_v17  ;;  %v12857_v2 = vcombine.low %v12790_v13, %v12794_v52  ;;  %v13036_v17 = vcombine.high %v12971_v62, %v12975_v22  ;;  %v13038_v24 = vcombine.high %v12972_v49, %v12976_v34  ;;  %v12968_v58 = vld [vmem:[%s20092_s4 + $0x1ba8] sm:$0xff] }
 0x57d   :  { %v13035_v47 = vcombine.low %v12971_v62, %v12975_v22  ;;  %v13030_v28 = vcombine.high %v12964_v38, %v12968_v58  ;;  %v12955_v63 = vld [vmem:[%s20092_s4 + $0x1b40] sm:$0xff] }
 0x57f   :  { %9060 = vmatpush1.bf16.msra.mxu1 %v12895_v42  ;;  %9101 = vmatpush1.bf16.msra.mxu0 %v12897_v14  ;;  %v13037_v42 = vcombine.low %v12972_v49, %v12976_v34  ;;  %v13028_v14 = vcombine.high %v12963_v4, %v12967_v32 }
 0x580   :  { %9061 = vmatprep.subr.bf16.mxu1 %v12888_v18  ;;  %9102 = vmatprep.subr.bf16.mxu0 %v12890_v50  ;;  %v12959_v18 = vld [vmem:[%s20092_s4 + $0x1b60] sm:$0xff]  ;;  %v12956_v50 = vld [vmem:[%s20092_s4 + $0x1b48] sm:$0xff] }
 0x581   :  { %v13020_v57 = vcombine.high %v12955_v63, %v12959_v18  ;;  %v13022_v9 = vcombine.high %v12956_v50, %v12960_v40 }
 0x583   :  { %9062 = vmatpush1.bf16.msra.mxu1 %v12887_v16  ;;  %9103 = vmatpush1.bf16.msra.mxu0 %v12889_v35 }
 0x584   :  { %9063 = vmatprep.subr.bf16.mxu1 %v12880_v19  ;;  %9104 = vmatprep.subr.bf16.mxu0 %v12882_v27  ;;  %v13029_v19 = vcombine.low %v12964_v38, %v12968_v58 }
 0x587   :  { %9064 = vmatpush1.bf16.msra.mxu1 %v12879_v51  ;;  %9105 = vmatpush1.bf16.msra.mxu0 %v12881_v41  ;;  %v12948_v51 = vld [vmem:[%s20092_s4 + $0x1b08] sm:$0xff] }
 0x588   :  { %9065 = vmatprep.subr.bf16.mxu1 %v12872_v10  ;;  %9106 = vmatprep.subr.bf16.mxu0 %v12874_v37  ;;  %v12952_v41 = vld [vmem:[%s20092_s4 + $0x1b28] sm:$0xff]  ;;  %v13021_v37 = vcombine.low %v12956_v50, %v12960_v40 }
 0x589   :  { %v13014_v39 = vcombine.high %v12948_v51, %v12952_v41  ;;  %v13013_v25 = vcombine.low %v12948_v51, %v12952_v41  ;;  %v12966_v51 = vld [vmem:[%s20092_s4 + $0x1b98] sm:$0xff] }
 0x58a   :  { %v12970_v41 = vld [vmem:[%s20092_s4 + $0x1bb8] sm:$0xff] }
 0x58b   :  { %9066 = vmatpush1.bf16.msra.mxu1 %v12871_v8  ;;  %9107 = vmatpush1.bf16.msra.mxu0 %v12873_v30  ;;  %v12939_v8 = vld [vmem:[%s20092_s4 + $0x1ac0] sm:$0xff] }
 0x58c   :  { %9067 = vmatprep.subr.bf16.mxu1 %v12864_v31  ;;  %9108 = vmatprep.subr.bf16.mxu0 %v12866_v45  ;;  %v12943_v30 = vld [vmem:[%s20092_s4 + $0x1ae0] sm:$0xff]  ;;  %v12940_v31 = vld [vmem:[%s20092_s4 + $0x1ac8] sm:$0xff] }
 0x58d   :  { %v12944_v45 = vld [vmem:[%s20092_s4 + $0x1ae8] sm:$0xff]  ;;  %v13004_v13 = vcombine.high %v12939_v8, %v12943_v30  ;;  %v13003_v62 = vcombine.low %v12939_v8, %v12943_v30 }
 0x58e   :  { %v13006_v52 = vcombine.high %v12940_v31, %v12944_v45  ;;  %v13005_v22 = vcombine.low %v12940_v31, %v12944_v45 }
 0x58f   :  { %9068 = vmatpush1.bf16.msra.mxu1 %v12863_v7  ;;  %9109 = vmatpush1.bf16.msra.mxu0 %v12865_v60  ;;  %v12931_v7 = vld [vmem:[%s20092_s4 + $0x1a80] sm:$0xff] }
 0x590   :  { %9069 = vmatprep.subr.bf16.mxu1 %v12856_v20  ;;  %9110 = vmatprep.subr.bf16.mxu0 %v12858_v33  ;;  %v12935_v60 = vld [vmem:[%s20092_s4 + $0x1aa0] sm:$0xff]  ;;  %v12932_v20 = vld [vmem:[%s20092_s4 + $0x1a88] sm:$0xff] }
 0x591   :  { %v12936_v33 = vld [vmem:[%s20092_s4 + $0x1aa8] sm:$0xff]  ;;  %v12996_v49 = vcombine.high %v12931_v7, %v12935_v60  ;;  %v12995_v4 = vcombine.low %v12931_v7, %v12935_v60 }
 0x592   :  { %v12998_v34 = vcombine.high %v12932_v20, %v12936_v33  ;;  %v12997_v32 = vcombine.low %v12932_v20, %v12936_v33  ;;  %v12949_v20 = vld [vmem:[%s20092_s4 + $0x1b10] sm:$0xff] }
 0x593   :  { %9070 = vmatpush1.bf16.msra.mxu1 %v12855_v48  ;;  %9111 = vmatpush1.bf16.msra.mxu0 %v12857_v2  ;;  %v12923_v48 = vld [vmem:[%s20092_s4 + $0x1a40] sm:$0xff] }
 0x594   :  { %9531 = vmatprep.subr.bf16.mxu1 %v13036_v17  ;;  %9572 = vmatprep.subr.bf16.mxu0 %v13038_v24  ;;  %v12927_v2 = vld [vmem:[%s20092_s4 + $0x1a60] sm:$0xff]  ;;  %v12924_v17 = vld [vmem:[%s20092_s4 + $0x1a48] sm:$0xff] }
 0x595   :  { %v12928_v24 = vld [vmem:[%s20092_s4 + $0x1a68] sm:$0xff]  ;;  %v12988_v38 = vcombine.high %v12923_v48, %v12927_v2 }
 0x596   :  { %v7415_v12 = vpop.f32.mrf.mxu1  ;;  %v7456_v61 = vpop.f32.mrf.mxu0  ;;  %9088 = vmatmul.mubr.bf16.vlgmr.msra.gmra.mxu1 %v18857_v6  ;;  %9129 = vmatmul.mubr.bf16.vlgmr.msra.gmra.mxu0 %v18857_v6  ;;  %v12947_v6 = vld [vmem:[%s20092_s4 + $0x1b00] sm:$0xff]  ;;  %v12990_v58 = vcombine.high %v12924_v17, %v12928_v24 }
 0x597   :  { %v18986_v16 = vadd.f32 %v7415_v12, %v18758_v55  ;;  %v18989_v35 = vadd.f32 %v7456_v61, %v18761_v5  ;;  %9532 = vmatpush1.bf16.msra.mxu1 %v13035_v47  ;;  %9573 = vmatpush1.bf16.msra.mxu0 %v13037_v42  ;;  %v12951_v5 = vld [vmem:[%s20092_s4 + $0x1b20] sm:$0xff]  ;;  %v12973_v12 = vld [vmem:[%s20092_s4 + $0x1bd0] sm:$0xff] }
 0x598   :  { %v7417_v27 = vpop.f32.mrf.mxu1  ;;  %v7458_v53 = vpop.f32.mrf.mxu0  ;;  %9533 = vmatprep.subr.bf16.mxu1 %v13028_v14  ;;  %9574 = vmatprep.subr.bf16.mxu0 %v13030_v28  ;;  %v13012_v3 = vcombine.high %v12947_v6, %v12951_v5  ;;  %v13011_v46 = vcombine.low %v12947_v6, %v12951_v5  ;;  %v12915_v47 = vld [vmem:[%s20092_s4 + $0x1a00] sm:$0xff]  ;;  %v12916_v14 = vld [vmem:[%s20092_s4 + $0x1a08] sm:$0xff]  ;;  %v12977_v61 = vld [vmem:[%s20092_s4 + $0x1bf0] sm:$0xff] }
 0x599   :  { %v18995_v54 = vadd.f32 %v7417_v27, %v18767_v44  ;;  %v18998_v55 = vadd.f32 %v7458_v53, %v18770_v26  ;;  %9563 = vmatprep.mubr.bf16.mxu1 %v14127_v11  ;;  %9604 = vmatprep.mubr.bf16.mxu0 %v14127_v11  ;;  %v13019_v26 = vcombine.low %v12955_v63, %v12959_v18  ;;  %v12919_v42 = vld [vmem:[%s20092_s4 + $0x1a20] sm:$0xff]  ;;  %v12920_v28 = vld [vmem:[%s20092_s4 + $0x1a28] sm:$0xff]  ;;  %v12965_v6 = vld [vmem:[%s20092_s4 + $0x1b90] sm:$0xff] }
 0x59a   :  { %v7419_v44 = vpop.f32.mrf.mxu1  ;;  %v7460_v10 = vpop.f32.mrf.mxu0  ;;  %v12987_v63 = vcombine.low %v12923_v48, %v12927_v2  ;;  %v12989_v18 = vcombine.low %v12924_v17, %v12928_v24  ;;  %v12980_v50 = vcombine.high %v12915_v47, %v12919_v42  ;;  %v12982_v40 = vcombine.high %v12916_v14, %v12920_v28  ;;  %v12969_v5 = vld [vmem:[%s20092_s4 + $0x1bb0] sm:$0xff] }
 0x59b   :  { %9534 = vmatpush1.bf16.msra.mxu1 %v13027_v15  ;;  %9575 = vmatpush1.bf16.msra.mxu0 %v13029_v19  ;;  %v12974_v15 = vld [vmem:[%s20092_s4 + $0x1bd8] sm:$0xff]  ;;  %v12979_v27 = vcombine.low %v12915_v47, %v12919_v42  ;;  %v12981_v53 = vcombine.low %v12916_v14, %v12920_v28  ;;  %v13039_v44 = vcombine.low %v12973_v12, %v12977_v61 }
 0x59c   :  { %v7420_v43 = vpop.f32.mrf.mxu1  ;;  %v7461_v29 = vpop.f32.mrf.mxu0  ;;  %9535 = vmatprep.subr.bf16.mxu1 %v13020_v57  ;;  %9576 = vmatprep.subr.bf16.mxu0 %v13022_v9  ;;  %v12978_v19 = vld [vmem:[%s20092_s4 + $0x1bf8] sm:$0xff]  ;;  %v13040_v57 = vcombine.high %v12973_v12, %v12977_v61  ;;  %v13031_v31 = vcombine.low %v12965_v6, %v12969_v5 }
 0x59d   :  { %v13042_v9 = vcombine.high %v12974_v15, %v12978_v19  ;;  %v13041_v10 = vcombine.low %v12974_v15, %v12978_v19  ;;  %v13034_v43 = vcombine.high %v12966_v51, %v12970_v41  ;;  %v12957_v29 = vld [vmem:[%s20092_s4 + $0x1b50] sm:$0xff] }
 0x59f   :  { %9536 = vmatpush1.bf16.msra.mxu1 %v13019_v26  ;;  %9577 = vmatpush1.bf16.msra.mxu0 %v13021_v37  ;;  %v19085_v26 = vpack.c.bf16 %v16341_v21, %v16341_v21  ;;  %v13032_v37 = vcombine.high %v12965_v6, %v12969_v5  ;;  %v12962_v21 = vld [vmem:[%s20092_s4 + $0x1b78] sm:$0xff] }
 0x5a0   :  { %9537 = vmatprep.subr.bf16.mxu1 %v13012_v3  ;;  %9578 = vmatprep.subr.bf16.mxu0 %v13014_v39  ;;  %v12961_v3 = vld [vmem:[%s20092_s4 + $0x1b70] sm:$0xff]  ;;  %v12958_v39 = vld [vmem:[%s20092_s4 + $0x1b58] sm:$0xff] }
 0x5a1   :  { %v13024_v7 = vcombine.high %v12957_v29, %v12961_v3  ;;  %v13026_v60 = vcombine.high %v12958_v39, %v12962_v21 }
 0x5a3   :  { %9538 = vmatpush1.bf16.msra.mxu1 %v13011_v46  ;;  %9579 = vmatpush1.bf16.msra.mxu0 %v13013_v25  ;;  %v13033_v25 = vcombine.low %v12966_v51, %v12970_v41 }
 0x5a4   :  { %9539 = vmatprep.subr.bf16.mxu1 %v13004_v13  ;;  %9580 = vmatprep.subr.bf16.mxu0 %v13006_v52 }
 0x5a7   :  { %9540 = vmatpush1.bf16.msra.mxu1 %v13003_v62  ;;  %9581 = vmatpush1.bf16.msra.mxu0 %v13005_v22  ;;  %v12950_v62 = vld [vmem:[%s20092_s4 + $0x1b18] sm:$0xff] }
 0x5a8   :  { %9541 = vmatprep.subr.bf16.mxu1 %v12996_v49  ;;  %9582 = vmatprep.subr.bf16.mxu0 %v12998_v34  ;;  %v12954_v22 = vld [vmem:[%s20092_s4 + $0x1b38] sm:$0xff]  ;;  %v13025_v34 = vcombine.low %v12958_v39, %v12962_v21 }
 0x5a9   :  { %v13018_v24 = vcombine.high %v12950_v62, %v12954_v22  ;;  %v13017_v42 = vcombine.low %v12950_v62, %v12954_v22  ;;  %v13092_v62 = vld [vmem:[%s20092_s4 + $0x1d88] sm:$0xff] }
 0x5aa   :  { %v13096_v22 = vld [vmem:[%s20092_s4 + $0x1da8] sm:$0xff] }
 0x5ab   :  { %9542 = vmatpush1.bf16.msra.mxu1 %v12995_v4  ;;  %9583 = vmatpush1.bf16.msra.mxu0 %v12997_v32  ;;  %v12941_v4 = vld [vmem:[%s20092_s4 + $0x1ad0] sm:$0xff] }
 0x5ac   :  { %9543 = vmatprep.subr.bf16.mxu1 %v12988_v38  ;;  %9584 = vmatprep.subr.bf16.mxu0 %v12990_v58  ;;  %v12945_v32 = vld [vmem:[%s20092_s4 + $0x1af0] sm:$0xff]  ;;  %v12942_v38 = vld [vmem:[%s20092_s4 + $0x1ad8] sm:$0xff] }
 0x5ad   :  { %v12946_v58 = vld [vmem:[%s20092_s4 + $0x1af8] sm:$0xff]  ;;  %v13008_v14 = vcombine.high %v12941_v4, %v12945_v32  ;;  %v13007_v12 = vcombine.low %v12941_v4, %v12945_v32 }
 0x5ae   :  { %v13010_v28 = vcombine.high %v12942_v38, %v12946_v58  ;;  %v13009_v61 = vcombine.low %v12942_v38, %v12946_v58 }
 0x5af   :  { %9544 = vmatpush1.bf16.msra.mxu1 %v12987_v63  ;;  %9585 = vmatpush1.bf16.msra.mxu0 %v12989_v18  ;;  %v12933_v63 = vld [vmem:[%s20092_s4 + $0x1a90] sm:$0xff] }
 0x5b0   :  { %9545 = vmatprep.subr.bf16.mxu1 %v12980_v50  ;;  %9586 = vmatprep.subr.bf16.mxu0 %v12982_v40  ;;  %v12937_v18 = vld [vmem:[%s20092_s4 + $0x1ab0] sm:$0xff]  ;;  %v12934_v50 = vld [vmem:[%s20092_s4 + $0x1a98] sm:$0xff] }
 0x5b1   :  { %v12938_v40 = vld [vmem:[%s20092_s4 + $0x1ab8] sm:$0xff]  ;;  %v13000_v15 = vcombine.high %v12933_v63, %v12937_v18  ;;  %v12999_v6 = vcombine.low %v12933_v63, %v12937_v18 }
 0x5b2   :  { %v13002_v19 = vcombine.high %v12934_v50, %v12938_v40  ;;  %v13001_v5 = vcombine.low %v12934_v50, %v12938_v40  ;;  %v13076_v40 = vld [vmem:[%s20092_s4 + $0x1d08] sm:$0xff] }
 0x5b3   :  { %9546 = vmatpush1.bf16.msra.mxu1 %v12979_v27  ;;  %9587 = vmatpush1.bf16.msra.mxu0 %v12981_v53  ;;  %v12925_v27 = vld [vmem:[%s20092_s4 + $0x1a50] sm:$0xff] }
 0x5b4   :  { %9613 = vmatprep.subr.bf16.mxu1 %v13040_v57  ;;  %9654 = vmatprep.subr.bf16.mxu0 %v13042_v9  ;;  %v12929_v53 = vld [vmem:[%s20092_s4 + $0x1a70] sm:$0xff]  ;;  %v12926_v57 = vld [vmem:[%s20092_s4 + $0x1a58] sm:$0xff] }
 0x5b5   :  { %v12930_v9 = vld [vmem:[%s20092_s4 + $0x1a78] sm:$0xff]  ;;  %v12992_v51 = vcombine.high %v12925_v27, %v12929_v53 }
 0x5b6   :  { %v7891_v8 = vpop.f32.mrf.mxu1  ;;  %v7932_v30 = vpop.f32.mrf.mxu0  ;;  %9564 = vmatmul.mubr.bf16.vlgmr.msra.gmra.mxu1 %v19085_v26  ;;  %9605 = vmatmul.mubr.bf16.vlgmr.msra.gmra.mxu0 %v19085_v26  ;;  %v12994_v41 = vcombine.high %v12926_v57, %v12930_v9 }
 0x5b7   :  { %v19102_v45 = vadd.f32 %v7891_v8, %v18874_v1  ;;  %v19105_v46 = vadd.f32 %v7932_v30, %v18877_v23  ;;  %9614 = vmatpush1.bf16.msra.mxu1 %v13039_v44  ;;  %9655 = vmatpush1.bf16.msra.mxu0 %v13041_v10  ;;  %v12953_v23 = vld [vmem:[%s20092_s4 + $0x1b30] sm:$0xff]  ;;  %v13099_v8 = vld [vmem:[%s20092_s4 + $0x1dc0] sm:$0xff] }
 0x5b8   :  { %v7893_v13 = vpop.f32.mrf.mxu1  ;;  %v7934_v52 = vpop.f32.mrf.mxu0  ;;  %9615 = vmatprep.subr.bf16.mxu1 %v13032_v37  ;;  %9656 = vmatprep.subr.bf16.mxu0 %v13034_v43  ;;  %v13016_v17 = vcombine.high %v12949_v20, %v12953_v23  ;;  %v13015_v47 = vcombine.low %v12949_v20, %v12953_v23  ;;  %v12917_v44 = vld [vmem:[%s20092_s4 + $0x1a10] sm:$0xff]  ;;  %v12918_v37 = vld [vmem:[%s20092_s4 + $0x1a18] sm:$0xff]  ;;  %v13103_v30 = vld [vmem:[%s20092_s4 + $0x1de0] sm:$0xff] }
 0x5b9   :  { %v19111_v33 = vadd.f32 %v7893_v13, %v18883_v59  ;;  %v19114_v1 = vadd.f32 %v7934_v52, %v18886_v0  ;;  %9645 = vmatprep.mubr.bf16.mxu1 %v14127_v11  ;;  %9686 = vmatprep.mubr.bf16.mxu0 %v14127_v11  ;;  %v13023_v0 = vcombine.low %v12957_v29, %v12961_v3  ;;  %v12921_v10 = vld [vmem:[%s20092_s4 + $0x1a30] sm:$0xff]  ;;  %v12922_v43 = vld [vmem:[%s20092_s4 + $0x1a38] sm:$0xff]  ;;  %v13091_v20 = vld [vmem:[%s20092_s4 + $0x1d80] sm:$0xff] }
 0x5ba   :  { %v7895_v59 = vpop.f32.mrf.mxu1  ;;  %v7936_v49 = vpop.f32.mrf.mxu0  ;;  %v12991_v29 = vcombine.low %v12925_v27, %v12929_v53  ;;  %v12993_v3 = vcombine.low %v12926_v57, %v12930_v9  ;;  %v12984_v39 = vcombine.high %v12917_v44, %v12921_v10  ;;  %v12986_v21 = vcombine.high %v12918_v37, %v12922_v43  ;;  %v13095_v23 = vld [vmem:[%s20092_s4 + $0x1da0] sm:$0xff] }
 0x5bb   :  { %9616 = vmatpush1.bf16.msra.mxu1 %v13031_v31  ;;  %9657 = vmatpush1.bf16.msra.mxu0 %v13033_v25  ;;  %v13100_v31 = vld [vmem:[%s20092_s4 + $0x1dc8] sm:$0xff]  ;;  %v12983_v13 = vcombine.low %v12917_v44, %v12921_v10  ;;  %v12985_v52 = vcombine.low %v12918_v37, %v12922_v43  ;;  %v13163_v59 = vcombine.low %v13099_v8, %v13103_v30  ;;  %v13067_v9 = vld [vmem:[%s20092_s4 + $0x1cc0] sm:$0xff] }
 0x5bc   :  { %v7896_v48 = vpop.f32.mrf.mxu1  ;;  %v7937_v2 = vpop.f32.mrf.mxu0  ;;  %9617 = vmatprep.subr.bf16.mxu1 %v13024_v7  ;;  %9658 = vmatprep.subr.bf16.mxu0 %v13026_v60  ;;  %v13104_v25 = vld [vmem:[%s20092_s4 + $0x1de8] sm:$0xff]  ;;  %v13164_v7 = vcombine.high %v13099_v8, %v13103_v30  ;;  %v13155_v38 = vcombine.low %v13091_v20, %v13095_v23  ;;  %v13059_v43 = vld [vmem:[%s20092_s4 + $0x1c80] sm:$0xff] }
 0x5bd   :  { %v13166_v60 = vcombine.high %v13100_v31, %v13104_v25  ;;  %v13165_v49 = vcombine.low %v13100_v31, %v13104_v25  ;;  %v13083_v48 = vld [vmem:[%s20092_s4 + $0x1d40] sm:$0xff] }
 0x5be   :  { %v13087_v2 = vld [vmem:[%s20092_s4 + $0x1d60] sm:$0xff] }
 0x5bf   :  { %9618 = vmatpush1.bf16.msra.mxu1 %v13023_v0  ;;  %9659 = vmatpush1.bf16.msra.mxu0 %v13025_v34  ;;  %v13156_v0 = vcombine.high %v13091_v20, %v13095_v23  ;;  %v13158_v34 = vcombine.high %v13092_v62, %v13096_v22  ;;  %v13148_v63 = vcombine.high %v13083_v48, %v13087_v2  ;;  %v13051_v25 = vld [vmem:[%s20092_s4 + $0x1c40] sm:$0xff] }
 0x5c0   :  { %9619 = vmatprep.subr.bf16.mxu1 %v13016_v17  ;;  %9660 = vmatprep.subr.bf16.mxu0 %v13018_v24  ;;  %v13084_v17 = vld [vmem:[%s20092_s4 + $0x1d48] sm:$0xff] }
 0x5c1   :  { %v13088_v24 = vld [vmem:[%s20092_s4 + $0x1d68] sm:$0xff] }
 0x5c2   :  { %v13150_v18 = vcombine.high %v13084_v17, %v13088_v24 }
 0x5c3   :  { %9620 = vmatpush1.bf16.msra.mxu1 %v13015_v47  ;;  %9661 = vmatpush1.bf16.msra.mxu0 %v13017_v42  ;;  %v13157_v42 = vcombine.low %v13092_v62, %v13096_v22  ;;  %v13043_v22 = vld [vmem:[%s20092_s4 + $0x1c00] sm:$0xff] }
 0x5c4   :  { %9621 = vmatprep.subr.bf16.mxu1 %v13008_v14  ;;  %9662 = vmatprep.subr.bf16.mxu0 %v13010_v28 }
 0x5c7   :  { %9622 = vmatpush1.bf16.msra.mxu1 %v13007_v12  ;;  %9663 = vmatpush1.bf16.msra.mxu0 %v13009_v61  ;;  %v13080_v12 = vld [vmem:[%s20092_s4 + $0x1d28] sm:$0xff] }
 0x5c8   :  { %9623 = vmatprep.subr.bf16.mxu1 %v13000_v15  ;;  %9664 = vmatprep.subr.bf16.mxu0 %v13002_v19  ;;  %v13149_v15 = vcombine.low %v13084_v17, %v13088_v24  ;;  %v13142_v57 = vcombine.high %v13076_v40, %v13080_v12  ;;  %v13141_v44 = vcombine.low %v13076_v40, %v13080_v12  ;;  %v13101_v24 = vld [vmem:[%s20092_s4 + $0x1dd0] sm:$0xff]  ;;  %v13094_v12 = vld [vmem:[%s20092_s4 + $0x1d98] sm:$0xff] }
 0x5c9   :  { %v13097_v40 = vld [vmem:[%s20092_s4 + $0x1db0] sm:$0xff] }
 0x5cb   :  { %9624 = vmatpush1.bf16.msra.mxu1 %v12999_v6  ;;  %9665 = vmatpush1.bf16.msra.mxu0 %v13001_v5  ;;  %v13071_v6 = vld [vmem:[%s20092_s4 + $0x1ce0] sm:$0xff]  ;;  %v13068_v5 = vld [vmem:[%s20092_s4 + $0x1cc8] sm:$0xff] }
 0x5cc   :  { %9625 = vmatprep.subr.bf16.mxu1 %v12992_v51  ;;  %9666 = vmatprep.subr.bf16.mxu0 %v12994_v41  ;;  %v13072_v51 = vld [vmem:[%s20092_s4 + $0x1ce8] sm:$0xff]  ;;  %v13132_v10 = vcombine.high %v13067_v9, %v13071_v6 }
 0x5cd   :  { %v13134_v37 = vcombine.high %v13068_v5, %v13072_v51  ;;  %v13133_v8 = vcombine.low %v13068_v5, %v13072_v51 }
 0x5cf   :  { %9626 = vmatpush1.bf16.msra.mxu1 %v12991_v29  ;;  %9667 = vmatpush1.bf16.msra.mxu0 %v12993_v3  ;;  %v13063_v29 = vld [vmem:[%s20092_s4 + $0x1ca0] sm:$0xff]  ;;  %v13060_v3 = vld [vmem:[%s20092_s4 + $0x1c88] sm:$0xff] }
 0x5d0   :  { %9627 = vmatprep.subr.bf16.mxu1 %v12984_v39  ;;  %9668 = vmatprep.subr.bf16.mxu0 %v12986_v21  ;;  %v13064_v39 = vld [vmem:[%s20092_s4 + $0x1ca8] sm:$0xff]  ;;  %v13131_v21 = vcombine.low %v13067_v9, %v13071_v6  ;;  %v13124_v30 = vcombine.high %v13059_v43, %v13063_v29  ;;  %v13090_v9 = vld [vmem:[%s20092_s4 + $0x1d78] sm:$0xff] }
 0x5d1   :  { %v13126_v31 = vcombine.high %v13060_v3, %v13064_v39  ;;  %v13125_v20 = vcombine.low %v13060_v3, %v13064_v39  ;;  %v13077_v39 = vld [vmem:[%s20092_s4 + $0x1d10] sm:$0xff] }
 0x5d3   :  { %9628 = vmatpush1.bf16.msra.mxu1 %v12983_v13  ;;  %9669 = vmatpush1.bf16.msra.mxu0 %v12985_v52  ;;  %v13055_v13 = vld [vmem:[%s20092_s4 + $0x1c60] sm:$0xff]  ;;  %v13052_v52 = vld [vmem:[%s20092_s4 + $0x1c48] sm:$0xff] }
 0x5d4   :  { %10089 = vmatprep.subr.bf16.mxu1 %v13164_v7  ;;  %10130 = vmatprep.subr.bf16.mxu0 %v13166_v60  ;;  %v13056_v7 = vld [vmem:[%s20092_s4 + $0x1c68] sm:$0xff]  ;;  %v13123_v60 = vcombine.low %v13059_v43, %v13063_v29  ;;  %v13116_v23 = vcombine.high %v13051_v25, %v13055_v13 }
 0x5d5   :  { %v13118_v62 = vcombine.high %v13052_v52, %v13056_v7 }
 0x5d6   :  { %v7973_v4 = vpop.f32.mrf.mxu1  ;;  %v8014_v32 = vpop.f32.mrf.mxu0  ;;  %9646 = vmatmul.mubr.bf16.vlgmr.msra.gmra.mxu1 %v19085_v26  ;;  %9687 = vmatmul.mubr.bf16.vlgmr.msra.gmra.mxu0 %v19085_v26  ;;  %v13075_v26 = vld [vmem:[%s20092_s4 + $0x1d00] sm:$0xff] }
 0x5d7   :  { %v19214_v58 = vadd.f32 %v7973_v4, %v18986_v16  ;;  %v19217_v47 = vadd.f32 %v8014_v32, %v18989_v35  ;;  %10090 = vmatpush1.bf16.msra.mxu1 %v13163_v59  ;;  %10131 = vmatpush1.bf16.msra.mxu0 %v13165_v49  ;;  %v13079_v35 = vld [vmem:[%s20092_s4 + $0x1d20] sm:$0xff]  ;;  %v13044_v49 = vld [vmem:[%s20092_s4 + $0x1c08] sm:$0xff]  ;;  %v13105_v4 = vld [vmem:[%s20092_s4 + $0x1df0] sm:$0xff] }
 0x5d8   :  { %v7975_v14 = vpop.f32.mrf.mxu1  ;;  %v8016_v28 = vpop.f32.mrf.mxu0  ;;  %10091 = vmatprep.subr.bf16.mxu1 %v13156_v0  ;;  %10132 = vmatprep.subr.bf16.mxu0 %v13158_v34  ;;  %v13140_v53 = vcombine.high %v13075_v26, %v13079_v35  ;;  %v13139_v41 = vcombine.low %v13075_v26, %v13079_v35  ;;  %v13047_v59 = vld [vmem:[%s20092_s4 + $0x1c20] sm:$0xff]  ;;  %v13048_v0 = vld [vmem:[%s20092_s4 + $0x1c28] sm:$0xff]  ;;  %v13115_v34 = vcombine.low %v13051_v25, %v13055_v13  ;;  %v13102_v32 = vld [vmem:[%s20092_s4 + $0x1dd8] sm:$0xff] }
 0x5d9   :  { %v19223_v50 = vadd.f32 %v7975_v14, %v18995_v54  ;;  %v19226_v16 = vadd.f32 %v8016_v28, %v18998_v55  ;;  %10121 = vmatprep.mubr.bf16.mxu1 %v14127_v11  ;;  %10162 = vmatprep.mubr.bf16.mxu0 %v14127_v11  ;;  %v13147_v55 = vcombine.low %v13083_v48, %v13087_v2  ;;  %v14126_v28 = vld [vmem:[%s20093_s3] ss:$0 sm:$0xff]  ;;  %v13093_v35 = vld [vmem:[%s20092_s4 + $0x1d90] sm:$0xff] }
 0x5da   :  { %v7977_v54 = vpop.f32.mrf.mxu1  ;;  %v8018_v61 = vpop.f32.mrf.mxu0  ;;  %v13117_v48 = vcombine.low %v13052_v52, %v13056_v7  ;;  %v13108_v2 = vcombine.high %v13043_v22, %v13047_v59  ;;  %v13110_v17 = vcombine.high %v13044_v49, %v13048_v0  ;;  %v13109_v14 = vcombine.low %v13044_v49, %v13048_v0 }
 0x5db   :  { %10092 = vmatpush1.bf16.msra.mxu1 %v13155_v38  ;;  %10133 = vmatpush1.bf16.msra.mxu0 %v13157_v42  ;;  %v13106_v38 = vld [vmem:[%s20092_s4 + $0x1df8] sm:$0xff]  ;;  %v13107_v42 = vcombine.low %v13043_v22, %v13047_v59  ;;  %v13167_v54 = vcombine.low %v13101_v24, %v13105_v4  ;;  %v13159_v51 = vcombine.low %v13093_v35, %v13097_v40 }
 0x5dc   :  { %v7978_v19 = vpop.f32.mrf.mxu1  ;;  %v8019_v27 = vpop.f32.mrf.mxu0  ;;  %10093 = vmatprep.subr.bf16.mxu1 %v13148_v63  ;;  %10134 = vmatprep.subr.bf16.mxu0 %v13150_v18  ;;  %v1900_v63 = vadd.f32 %v14126_v28, %v16809_v36  ;;  %v13168_v18 = vcombine.high %v13101_v24, %v13105_v4  ;;  %v13170_v26 = vcombine.high %v13102_v32, %v13106_v38  ;;  %v13098_v36 = vld [vmem:[%s20092_s4 + $0x1db8] sm:$0xff]  ;;  %v13057_v28 = vld [vmem:[%s20092_s4 + $0x1c70] sm:$0xff] }
 0x5dd   :  { %v13169_v61 = vcombine.low %v13102_v32, %v13106_v38  ;;  %v13162_v19 = vcombine.high %v13094_v12, %v13098_v36  ;;  %v13085_v27 = vld [vmem:[%s20092_s4 + $0x1d50] sm:$0xff]  ;;  %v13074_v22 = vld [vmem:[%s20092_s4 + $0x1cf8] sm:$0xff] }
 0x5de   :  { %v13066_v24 = vld [vmem:[%s20092_s4 + $0x1cb8] sm:$0xff] }
 0x5df   :  { %10094 = vmatpush1.bf16.msra.mxu1 %v13147_v55  ;;  %10135 = vmatpush1.bf16.msra.mxu0 %v13149_v15  ;;  %v19315_v55 = vpack.c.bf16 %v1900_v63, %v1900_v63  ;;  %v13160_v15 = vcombine.high %v13093_v35, %v13097_v40  ;;  %v13054_v63 = vld [vmem:[%s20092_s4 + $0x1c58] sm:$0xff] }
 0x5e0   :  { %10095 = vmatprep.subr.bf16.mxu1 %v13140_v53  ;;  %10136 = vmatprep.subr.bf16.mxu0 %v13142_v57  ;;  %v13089_v53 = vld [vmem:[%s20092_s4 + $0x1d70] sm:$0xff]  ;;  %v13086_v57 = vld [vmem:[%s20092_s4 + $0x1d58] sm:$0xff] }
 0x5e1   :  { %v13152_v29 = vcombine.high %v13085_v27, %v13089_v53  ;;  %v13154_v3 = vcombine.high %v13086_v57, %v13090_v9  ;;  %v13153_v25 = vcombine.low %v13086_v57, %v13090_v9  ;;  %v13227_v9 = vld [vmem:[%s20092_s4 + $0x1fc0] sm:$0xff] }
 0x5e3   :  { %10096 = vmatpush1.bf16.msra.mxu1 %v13139_v41  ;;  %10137 = vmatpush1.bf16.msra.mxu0 %v13141_v44 }
 0x5e4   :  { %10097 = vmatprep.subr.bf16.mxu1 %v13132_v10  ;;  %10138 = vmatprep.subr.bf16.mxu0 %v13134_v37  ;;  %v13161_v10 = vcombine.low %v13094_v12, %v13098_v36  ;;  %v13045_v36 = vld [vmem:[%s20092_s4 + $0x1c10] sm:$0xff] }
 0x5e7   :  { %10098 = vmatpush1.bf16.msra.mxu1 %v13131_v21  ;;  %10139 = vmatpush1.bf16.msra.mxu0 %v13133_v8  ;;  %v13078_v8 = vld [vmem:[%s20092_s4 + $0x1d18] sm:$0xff] }
 0x5e8   :  { %10099 = vmatprep.subr.bf16.mxu1 %v13124_v30  ;;  %10140 = vmatprep.subr.bf16.mxu0 %v13126_v31  ;;  %v13082_v30 = vld [vmem:[%s20092_s4 + $0x1d38] sm:$0xff] }
 0x5e9   :  { %v13145_v49 = vcombine.low %v13078_v8, %v13082_v30 }
 0x5eb   :  { %10100 = vmatpush1.bf16.msra.mxu1 %v13123_v60  ;;  %10141 = vmatpush1.bf16.msra.mxu0 %v13125_v20  ;;  %v13146_v60 = vcombine.high %v13078_v8, %v13082_v30  ;;  %v13069_v20 = vld [vmem:[%s20092_s4 + $0x1cd0] sm:$0xff]  ;;  %v13224_v8 = vld [vmem:[%s20092_s4 + $0x1fa8] sm:$0xff] }
 0x5ec   :  { %10101 = vmatprep.subr.bf16.mxu1 %v13116_v23  ;;  %10142 = vmatprep.subr.bf16.mxu0 %v13118_v62  ;;  %v13073_v23 = vld [vmem:[%s20092_s4 + $0x1cf0] sm:$0xff]  ;;  %v13070_v62 = vld [vmem:[%s20092_s4 + $0x1cd8] sm:$0xff] }
 0x5ed   :  { %v13136_v0 = vcombine.high %v13069_v20, %v13073_v23  ;;  %v13135_v4 = vcombine.low %v13069_v20, %v13073_v23  ;;  %v13137_v32 = vcombine.low %v13070_v62, %v13074_v22 }
 0x5ef   :  { %10102 = vmatpush1.bf16.msra.mxu1 %v13115_v34  ;;  %10143 = vmatpush1.bf16.msra.mxu0 %v13117_v48  ;;  %v13138_v34 = vcombine.high %v13070_v62, %v13074_v22  ;;  %v13061_v48 = vld [vmem:[%s20092_s4 + $0x1c90] sm:$0xff] }
 0x5f0   :  { %10103 = vmatprep.subr.bf16.mxu1 %v13108_v2  ;;  %10144 = vmatprep.subr.bf16.mxu0 %v13110_v17  ;;  %v13065_v2 = vld [vmem:[%s20092_s4 + $0x1cb0] sm:$0xff]  ;;  %v13062_v17 = vld [vmem:[%s20092_s4 + $0x1c98] sm:$0xff] }
 0x5f1   :  { %v13128_v38 = vcombine.high %v13061_v48, %v13065_v2  ;;  %v13129_v35 = vcombine.low %v13062_v17, %v13066_v24 }
 0x5f3   :  { %10104 = vmatpush1.bf16.msra.mxu1 %v13107_v42  ;;  %10145 = vmatpush1.bf16.msra.mxu0 %v13109_v14  ;;  %v13130_v42 = vcombine.high %v13062_v17, %v13066_v24  ;;  %v13053_v14 = vld [vmem:[%s20092_s4 + $0x1c50] sm:$0xff]  ;;  %v13204_v17 = vld [vmem:[%s20092_s4 + $0x1f08] sm:$0xff] }
 0x5f4   :  { %10171 = vmatprep.subr.bf16.mxu1 %v13168_v18  ;;  %10212 = vmatprep.subr.bf16.mxu0 %v13170_v26  ;;  %v13058_v18 = vld [vmem:[%s20092_s4 + $0x1c78] sm:$0xff]  ;;  %v13127_v26 = vcombine.low %v13061_v48, %v13065_v2  ;;  %v13120_v40 = vcombine.high %v13053_v14, %v13057_v28  ;;  %v13208_v24 = vld [vmem:[%s20092_s4 + $0x1f28] sm:$0xff] }
 0x5f5   :  { %v13122_v12 = vcombine.high %v13054_v63, %v13058_v18 }
 0x5f6   :  { %v8449_v6 = vpop.f32.mrf.mxu1  ;;  %v8490_v5 = vpop.f32.mrf.mxu0  ;;  %10122 = vmatmul.mubr.bf16.vlgmr.msra.gmra.mxu1 %v19315_v55  ;;  %10163 = vmatmul.mubr.bf16.vlgmr.msra.gmra.mxu0 %v19315_v55 }
 0x5f7   :  { %v19332_v41 = vadd.f32 %v8449_v6, %v19102_v45  ;;  %v19335_v44 = vadd.f32 %v8490_v5, %v19105_v46  ;;  %10172 = vmatpush1.bf16.msra.mxu1 %v13167_v54  ;;  %10213 = vmatpush1.bf16.msra.mxu0 %v13169_v61  ;;  %v13081_v46 = vld [vmem:[%s20092_s4 + $0x1d30] sm:$0xff]  ;;  %v13046_v61 = vld [vmem:[%s20092_s4 + $0x1c18] sm:$0xff]  ;;  %v13231_v6 = vld [vmem:[%s20092_s4 + $0x1fe0] sm:$0xff] }
 0x5f8   :  { %v8451_v37 = vpop.f32.mrf.mxu1  ;;  %v8492_v43 = vpop.f32.mrf.mxu0  ;;  %10173 = vmatprep.subr.bf16.mxu1 %v13160_v15  ;;  %10214 = vmatprep.subr.bf16.mxu0 %v13162_v19  ;;  %v13144_v7 = vcombine.high %v13077_v39, %v13081_v46  ;;  %v13143_v59 = vcombine.low %v13077_v39, %v13081_v46  ;;  %v13049_v54 = vld [vmem:[%s20092_s4 + $0x1c30] sm:$0xff]  ;;  %v13050_v15 = vld [vmem:[%s20092_s4 + $0x1c38] sm:$0xff]  ;;  %v13119_v19 = vcombine.low %v13053_v14, %v13057_v28  ;;  %v13228_v5 = vld [vmem:[%s20092_s4 + $0x1fc8] sm:$0xff] }
 0x5f9   :  { %v19341_v21 = vadd.f32 %v8451_v37, %v19111_v33  ;;  %v19344_v45 = vadd.f32 %v8492_v43, %v19114_v1  ;;  %10203 = vmatprep.mubr.bf16.mxu1 %v14127_v11  ;;  %10244 = vmatprep.mubr.bf16.mxu0 %v14127_v11  ;;  %v13151_v1 = vcombine.low %v13085_v27, %v13089_v53  ;;  %v13223_v39 = vld [vmem:[%s20092_s4 + $0x1fa0] sm:$0xff]  ;;  %v13220_v46 = vld [vmem:[%s20092_s4 + $0x1f88] sm:$0xff] }
 0x5fa   :  { %v8453_v33 = vpop.f32.mrf.mxu1  ;;  %v8494_v31 = vpop.f32.mrf.mxu0  ;;  %v13121_v27 = vcombine.low %v13054_v63, %v13058_v18  ;;  %v13112_v53 = vcombine.high %v13045_v36, %v13049_v54  ;;  %v13114_v57 = vcombine.high %v13046_v61, %v13050_v15  ;;  %v13113_v37 = vcombine.low %v13046_v61, %v13050_v15  ;;  %v13195_v63 = vld [vmem:[%s20092_s4 + $0x1ec0] sm:$0xff] }
 0x5fb   :  { %10174 = vmatpush1.bf16.msra.mxu1 %v13159_v51  ;;  %10215 = vmatpush1.bf16.msra.mxu0 %v13161_v10  ;;  %v13232_v51 = vld [vmem:[%s20092_s4 + $0x1fe8] sm:$0xff]  ;;  %v13111_v10 = vcombine.low %v13045_v36, %v13049_v54  ;;  %v13292_v43 = vcombine.high %v13227_v9, %v13231_v6  ;;  %v13291_v30 = vcombine.low %v13227_v9, %v13231_v6  ;;  %v13199_v18 = vld [vmem:[%s20092_s4 + $0x1ee0] sm:$0xff] }
 0x5fc   :  { %v8454_v13 = vpop.f32.mrf.mxu1  ;;  %v8495_v52 = vpop.f32.mrf.mxu0  ;;  %10175 = vmatprep.subr.bf16.mxu1 %v13152_v29  ;;  %10216 = vmatprep.subr.bf16.mxu0 %v13154_v3  ;;  %v13294_v29 = vcombine.high %v13228_v5, %v13232_v51  ;;  %v13219_v3 = vld [vmem:[%s20092_s4 + $0x1f80] sm:$0xff]  ;;  %v13293_v33 = vcombine.low %v13228_v5, %v13232_v51  ;;  %v13270_v28 = vcombine.high %v13204_v17, %v13208_v24 }
 0x5fd   :  { %v13284_v31 = vcombine.high %v13219_v3, %v13223_v39  ;;  %v13215_v13 = vld [vmem:[%s20092_s4 + $0x1f60] sm:$0xff]  ;;  %v13212_v52 = vld [vmem:[%s20092_s4 + $0x1f48] sm:$0xff]  ;;  %v13283_v23 = vcombine.low %v13219_v3, %v13223_v39  ;;  %v13260_v36 = vcombine.high %v13195_v63, %v13199_v18 }
 0x5fe   :  { %v13187_v61 = vld [vmem:[%s20092_s4 + $0x1e80] sm:$0xff] }
 0x5ff   :  { %10176 = vmatpush1.bf16.msra.mxu1 %v13151_v1  ;;  %10217 = vmatpush1.bf16.msra.mxu0 %v13153_v25  ;;  %v13286_v1 = vcombine.high %v13220_v46, %v13224_v8  ;;  %v13211_v25 = vld [vmem:[%s20092_s4 + $0x1f40] sm:$0xff] }
 0x600   :  { %10177 = vmatprep.subr.bf16.mxu1 %v13144_v7  ;;  %10218 = vmatprep.subr.bf16.mxu0 %v13146_v60  ;;  %v13216_v7 = vld [vmem:[%s20092_s4 + $0x1f68] sm:$0xff]  ;;  %v13191_v15 = vld [vmem:[%s20092_s4 + $0x1ea0] sm:$0xff] }
 0x601   :  { %v13278_v48 = vcombine.high %v13212_v52, %v13216_v7  ;;  %v13252_v9 = vcombine.high %v13187_v61, %v13191_v15  ;;  %v13179_v5 = vld [vmem:[%s20092_s4 + $0x1e40] sm:$0xff] }
 0x602   :  { %v13183_v51 = vld [vmem:[%s20092_s4 + $0x1e60] sm:$0xff] }
 0x603   :  { %10178 = vmatpush1.bf16.msra.mxu1 %v13143_v59  ;;  %10219 = vmatpush1.bf16.msra.mxu0 %v13145_v49  ;;  %v13285_v59 = vcombine.low %v13220_v46, %v13224_v8  ;;  %v13244_v3 = vcombine.high %v13179_v5, %v13183_v51  ;;  %v13171_v46 = vld [vmem:[%s20092_s4 + $0x1e00] sm:$0xff] }
 0x604   :  { %10179 = vmatprep.subr.bf16.mxu1 %v13136_v0  ;;  %10220 = vmatprep.subr.bf16.mxu0 %v13138_v34  ;;  %v13276_v34 = vcombine.high %v13211_v25, %v13215_v13  ;;  %v13175_v8 = vld [vmem:[%s20092_s4 + $0x1e20] sm:$0xff] }
 0x607   :  { %10180 = vmatpush1.bf16.msra.mxu1 %v13135_v4  ;;  %10221 = vmatpush1.bf16.msra.mxu0 %v13137_v32  ;;  %v13277_v32 = vcombine.low %v13212_v52, %v13216_v7  ;;  %v13229_v52 = vld [vmem:[%s20092_s4 + $0x1fd0] sm:$0xff] }
 0x608   :  { %10181 = vmatprep.subr.bf16.mxu1 %v13128_v38  ;;  %10222 = vmatprep.subr.bf16.mxu0 %v13130_v42  ;;  %v13233_v7 = vld [vmem:[%s20092_s4 + $0x1ff0] sm:$0xff] }
 0x60b   :  { %10182 = vmatpush1.bf16.msra.mxu1 %v13127_v26  ;;  %10223 = vmatpush1.bf16.msra.mxu0 %v13129_v35  ;;  %v13196_v26 = vld [vmem:[%s20092_s4 + $0x1ec8] sm:$0xff] }
 0x60c   :  { %10183 = vmatprep.subr.bf16.mxu1 %v13120_v40  ;;  %10224 = vmatprep.subr.bf16.mxu0 %v13122_v12  ;;  %v13200_v35 = vld [vmem:[%s20092_s4 + $0x1ee8] sm:$0xff]  ;;  %v13269_v12 = vcombine.low %v13204_v17, %v13208_v24  ;;  %v13295_v17 = vcombine.low %v13229_v52, %v13233_v7 }
 0x60d   :  { %v13262_v54 = vcombine.high %v13196_v26, %v13200_v35 }
 0x60f   :  { %10184 = vmatpush1.bf16.msra.mxu1 %v13119_v19  ;;  %10225 = vmatpush1.bf16.msra.mxu0 %v13121_v27  ;;  %v13188_v19 = vld [vmem:[%s20092_s4 + $0x1e88] sm:$0xff] }
 0x610   :  { %10185 = vmatprep.subr.bf16.mxu1 %v13112_v53  ;;  %10226 = vmatprep.subr.bf16.mxu0 %v13114_v57  ;;  %v13192_v27 = vld [vmem:[%s20092_s4 + $0x1ea8] sm:$0xff]  ;;  %v13259_v53 = vcombine.low %v13195_v63, %v13199_v18  ;;  %v13261_v57 = vcombine.low %v13196_v26, %v13200_v35 }
 0x611   :  { %v13254_v6 = vcombine.high %v13188_v19, %v13192_v27 }
 0x613   :  { %10186 = vmatpush1.bf16.msra.mxu1 %v13111_v10  ;;  %10227 = vmatpush1.bf16.msra.mxu0 %v13113_v37  ;;  %v13180_v10 = vld [vmem:[%s20092_s4 + $0x1e48] sm:$0xff] }
 0x614   :  { %10647 = vmatprep.subr.bf16.mxu1 %v13292_v43  ;;  %10688 = vmatprep.subr.bf16.mxu0 %v13294_v29  ;;  %v13184_v37 = vld [vmem:[%s20092_s4 + $0x1e68] sm:$0xff]  ;;  %v13251_v43 = vcombine.low %v13187_v61, %v13191_v15  ;;  %v13253_v29 = vcombine.low %v13188_v19, %v13192_v27  ;;  %v13205_v61 = vld [vmem:[%s20092_s4 + $0x1f10] sm:$0xff]  ;;  %v13206_v19 = vld [vmem:[%s20092_s4 + $0x1f18] sm:$0xff] }
 0x615   :  { %v13246_v39 = vcombine.high %v13180_v10, %v13184_v37  ;;  %v13210_v27 = vld [vmem:[%s20092_s4 + $0x1f38] sm:$0xff] }
 0x616   :  { %v8531_v60 = vpop.f32.mrf.mxu1  ;;  %v8572_v20 = vpop.f32.mrf.mxu0  ;;  %10204 = vmatmul.mubr.bf16.vlgmr.msra.gmra.mxu1 %v19315_v55  ;;  %10245 = vmatmul.mubr.bf16.vlgmr.msra.gmra.mxu0 %v19315_v55  ;;  %v13203_v55 = vld [vmem:[%s20092_s4 + $0x1f00] sm:$0xff] }
 0x617   :  { %v19444_v62 = vadd.f32 %v8531_v60, %v19214_v58  ;;  %v19447_v22 = vadd.f32 %v8572_v20, %v19217_v47  ;;  %10648 = vmatpush1.bf16.msra.mxu1 %v13291_v30  ;;  %10689 = vmatpush1.bf16.msra.mxu0 %v13293_v33  ;;  %v13207_v47 = vld [vmem:[%s20092_s4 + $0x1f20] sm:$0xff]  ;;  %v13172_v30 = vld [vmem:[%s20092_s4 + $0x1e08] sm:$0xff]  ;;  %v13230_v60 = vld [vmem:[%s20092_s4 + $0x1fd8] sm:$0xff] }
 0x618   :  { %v8533_v49 = vpop.f32.mrf.mxu1  ;;  %v8574_v0 = vpop.f32.mrf.mxu0  ;;  %10649 = vmatprep.subr.bf16.mxu1 %v13284_v31  ;;  %10690 = vmatprep.subr.bf16.mxu0 %v13286_v1  ;;  %v13268_v14 = vcombine.high %v13203_v55, %v13207_v47  ;;  %v13267_v40 = vcombine.low %v13203_v55, %v13207_v47  ;;  %v13176_v33 = vld [vmem:[%s20092_s4 + $0x1e28] sm:$0xff]  ;;  %v13243_v31 = vcombine.low %v13179_v5, %v13183_v51  ;;  %v13234_v20 = vld [vmem:[%s20092_s4 + $0x1ff8] sm:$0xff] }
 0x619   :  { %v19453_v2 = vadd.f32 %v8533_v49, %v19223_v50  ;;  %v19456_v58 = vadd.f32 %v8574_v0, %v19226_v16  ;;  %10679 = vmatprep.mubr.bf16.mxu1 %v14127_v11  ;;  %10720 = vmatprep.mubr.bf16.mxu0 %v14127_v11  ;;  %v13275_v16 = vcombine.low %v13211_v25, %v13215_v13  ;;  %v13222_v55 = vld [vmem:[%s20092_s4 + $0x1f98] sm:$0xff] }
 0x61a   :  { %v8535_v50 = vpop.f32.mrf.mxu1  ;;  %v8576_v4 = vpop.f32.mrf.mxu0  ;;  %v13245_v1 = vcombine.low %v13180_v10, %v13184_v37  ;;  %v13236_v25 = vcombine.high %v13171_v46, %v13175_v8  ;;  %v13238_v13 = vcombine.high %v13172_v30, %v13176_v33  ;;  %v13296_v49 = vcombine.high %v13229_v52, %v13233_v7  ;;  %v13226_v47 = vld [vmem:[%s20092_s4 + $0x1fb8] sm:$0xff]  ;;  %v13197_v10 = vld [vmem:[%s20092_s4 + $0x1ed0] sm:$0xff] }
 0x61b   :  { %10650 = vmatpush1.bf16.msra.mxu1 %v13283_v23  ;;  %10691 = vmatpush1.bf16.msra.mxu0 %v13285_v59  ;;  %v13235_v23 = vcombine.low %v13171_v46, %v13175_v8  ;;  %v13237_v59 = vcombine.low %v13172_v30, %v13176_v33  ;;  %v13298_v0 = vcombine.high %v13230_v60, %v13234_v20  ;;  %v13198_v37 = vld [vmem:[%s20092_s4 + $0x1ed8] sm:$0xff]  ;;  %v13189_v8 = vld [vmem:[%s20092_s4 + $0x1e90] sm:$0xff] }
 0x61c   :  { %v8536_v38 = vpop.f32.mrf.mxu1  ;;  %v8577_v42 = vpop.f32.mrf.mxu0  ;;  %10651 = vmatprep.subr.bf16.mxu1 %v13276_v34  ;;  %10692 = vmatprep.subr.bf16.mxu0 %v13278_v48  ;;  %v13221_v34 = vld [vmem:[%s20092_s4 + $0x1f90] sm:$0xff]  ;;  %v13297_v24 = vcombine.low %v13230_v60, %v13234_v20  ;;  %v19543_v50 = vpack.c.bf16 %v16371_v56, %v16371_v56  ;;  %v13218_v56 = vld [vmem:[%s20092_s4 + $0x1f78] sm:$0xff]  ;;  %v13289_v35 = vcombine.low %v13222_v55, %v13226_v47 }
 0x61d   :  { %v13225_v48 = vld [vmem:[%s20092_s4 + $0x1fb0] sm:$0xff]  ;;  %v13214_v42 = vld [vmem:[%s20092_s4 + $0x1f58] sm:$0xff]  ;;  %v13274_v51 = vcombine.high %v13206_v19, %v13210_v27 }
 0x61e   :  { %v13288_v4 = vcombine.high %v13221_v34, %v13225_v48  ;;  %v13217_v38 = vld [vmem:[%s20092_s4 + $0x1f70] sm:$0xff]  ;;  %v13287_v63 = vcombine.low %v13221_v34, %v13225_v48  ;;  %v13190_v33 = vld [vmem:[%s20092_s4 + $0x1e98] sm:$0xff] }
 0x61f   :  { %10652 = vmatpush1.bf16.msra.mxu1 %v13275_v16  ;;  %10693 = vmatpush1.bf16.msra.mxu0 %v13277_v32  ;;  %v13290_v16 = vcombine.high %v13222_v55, %v13226_v47  ;;  %v13213_v32 = vld [vmem:[%s20092_s4 + $0x1f50] sm:$0xff]  ;;  %v13182_v20 = vld [vmem:[%s20092_s4 + $0x1e58] sm:$0xff] }
 0x620   :  { %10653 = vmatprep.subr.bf16.mxu1 %v13268_v14  ;;  %10694 = vmatprep.subr.bf16.mxu0 %v13270_v28  ;;  %v13193_v30 = vld [vmem:[%s20092_s4 + $0x1eb0] sm:$0xff]  ;;  %v13174_v47 = vld [vmem:[%s20092_s4 + $0x1e18] sm:$0xff] }
 0x621   :  { %v13181_v7 = vld [vmem:[%s20092_s4 + $0x1e50] sm:$0xff] }
 0x622   :  { %v13185_v60 = vld [vmem:[%s20092_s4 + $0x1e70] sm:$0xff] }
 0x623   :  { %10654 = vmatpush1.bf16.msra.mxu1 %v13267_v40  ;;  %10695 = vmatpush1.bf16.msra.mxu0 %v13269_v12  ;;  %v13173_v48 = vld [vmem:[%s20092_s4 + $0x1e10] sm:$0xff] }
 0x624   :  { %10655 = vmatprep.subr.bf16.mxu1 %v13260_v36  ;;  %10696 = vmatprep.subr.bf16.mxu0 %v13262_v54  ;;  %v13280_v36 = vcombine.high %v13213_v32, %v13217_v38  ;;  %v13282_v54 = vcombine.high %v13214_v42, %v13218_v56  ;;  %v13177_v55 = vld [vmem:[%s20092_s4 + $0x1e30] sm:$0xff] }
 0x627   :  { %10656 = vmatpush1.bf16.msra.mxu1 %v13259_v53  ;;  %10697 = vmatpush1.bf16.msra.mxu0 %v13261_v57  ;;  %v13281_v57 = vcombine.low %v13214_v42, %v13218_v56 }
 0x628   :  { %10657 = vmatprep.subr.bf16.mxu1 %v13252_v9  ;;  %10698 = vmatprep.subr.bf16.mxu0 %v13254_v6 }
 0x62b   :  { %10658 = vmatpush1.bf16.msra.mxu1 %v13251_v43  ;;  %10699 = vmatpush1.bf16.msra.mxu0 %v13253_v29  ;;  %v13202_v43 = vld [vmem:[%s20092_s4 + $0x1ef8] sm:$0xff] }
 0x62c   :  { %10659 = vmatprep.subr.bf16.mxu1 %v13244_v3  ;;  %10700 = vmatprep.subr.bf16.mxu0 %v13246_v39  ;;  %v13273_v3 = vcombine.low %v13206_v19, %v13210_v27  ;;  %v13266_v46 = vcombine.high %v13198_v37, %v13202_v43  ;;  %v10939_v27 = vld [vmem:[%s20094_s6 + $0x1f0] sm:$0xff] }
 0x62f   :  { %10660 = vmatpush1.bf16.msra.mxu1 %v13243_v31  ;;  %10701 = vmatpush1.bf16.msra.mxu0 %v13245_v1  ;;  %v13194_v31 = vld [vmem:[%s20092_s4 + $0x1eb8] sm:$0xff] }
 0x630   :  { %10661 = vmatprep.subr.bf16.mxu1 %v13236_v25  ;;  %10702 = vmatprep.subr.bf16.mxu0 %v13238_v13  ;;  %v13265_v25 = vcombine.low %v13198_v37, %v13202_v43  ;;  %v13256_v13 = vcombine.high %v13189_v8, %v13193_v30  ;;  %v13258_v52 = vcombine.high %v13190_v33, %v13194_v31  ;;  %v10904_v37 = vld [vmem:[%s20094_s6 + $0xd8] sm:$0xff] }
 0x631   :  { %v10936_v43 = vld [vmem:[%s20094_s6 + $0x1d8] sm:$0xff] }
 0x633   :  { %10662 = vmatpush1.bf16.msra.mxu1 %v13235_v23  ;;  %10703 = vmatpush1.bf16.msra.mxu0 %v13237_v59  ;;  %v13186_v23 = vld [vmem:[%s20092_s4 + $0x1e78] sm:$0xff]  ;;  %v13255_v59 = vcombine.low %v13189_v8, %v13193_v30  ;;  %v10887_v8 = vld [vmem:[%s20094_s6 + $0x50] sm:$0xff] }
 0x634   :  { %10729 = vmatprep.subr.bf16.mxu1 %v13296_v49  ;;  %10770 = vmatprep.subr.bf16.mxu0 %v13298_v0  ;;  %v13257_v49 = vcombine.low %v13190_v33, %v13194_v31  ;;  %v13248_v0 = vcombine.high %v13181_v7, %v13185_v60  ;;  %v13250_v34 = vcombine.high %v13182_v20, %v13186_v23  ;;  %v10919_v30 = vld [vmem:[%s20094_s6 + $0x150] sm:$0xff]  ;;  %v10902_v33 = vld [vmem:[%s20094_s6 + $0xc8] sm:$0xff] }
 0x635   :  { %v10934_v31 = vld [vmem:[%s20094_s6 + $0x1c8] sm:$0xff] }
 0x636   :  { %v9007_v14 = vpop.f32.mrf.mxu1  ;;  %v9048_v28 = vpop.f32.mrf.mxu0  ;;  %10680 = vmatmul.mubr.bf16.vlgmr.msra.gmra.mxu1 %v19543_v50  ;;  %10721 = vmatmul.mubr.bf16.vlgmr.msra.gmra.mxu0 %v19543_v50 }
 0x637   :  { %v19560_v18 = vadd.f32 %v9007_v14, %v19332_v41  ;;  %v19563_v26 = vadd.f32 %v9048_v28, %v19335_v44  ;;  %10730 = vmatpush1.bf16.msra.mxu1 %v13295_v17  ;;  %10771 = vmatpush1.bf16.msra.mxu0 %v13297_v24  ;;  %v13209_v44 = vld [vmem:[%s20092_s4 + $0x1f30] sm:$0xff]  ;;  %v13178_v17 = vld [vmem:[%s20092_s4 + $0x1e38] sm:$0xff]  ;;  %v13247_v24 = vcombine.low %v13181_v7, %v13185_v60  ;;  %v10885_v7 = vld [vmem:[%s20094_s6 + $0x40] sm:$0xff] }
 0x638   :  { %v9009_v40 = vpop.f32.mrf.mxu1  ;;  %v9050_v12 = vpop.f32.mrf.mxu0  ;;  %10731 = vmatprep.subr.bf16.mxu1 %v13288_v4  ;;  %10772 = vmatprep.subr.bf16.mxu0 %v13290_v16  ;;  %v13272_v5 = vcombine.high %v13205_v61, %v13209_v44  ;;  %v13271_v29 = vcombine.low %v13205_v61, %v13209_v44  ;;  %v13249_v4 = vcombine.low %v13182_v20, %v13186_v23  ;;  %v10917_v60 = vld [vmem:[%s20094_s6 + $0x140] sm:$0xff]  ;;  %v10900_v20 = vld [vmem:[%s20094_s6 + $0xb8] sm:$0xff] }
 0x639   :  { %v19569_v15 = vadd.f32 %v9009_v40, %v19341_v21  ;;  %v19572_v41 = vadd.f32 %v9050_v12, %v19344_v45  ;;  %10761 = vmatprep.mubr.bf16.mxu1 %v14127_v11  ;;  %10802 = vmatprep.mubr.bf16.mxu0 %v14127_v11  ;;  %v13279_v45 = vcombine.low %v13213_v32, %v13217_v38  ;;  %v13201_v11 = vld [vmem:[%s20092_s4 + $0x1ef0] sm:$0xff]  ;;  %v10932_v23 = vld [vmem:[%s20094_s6 + $0x1b8] sm:$0xff] }
 0x63a   :  { %v9011_v21 = vpop.f32.mrf.mxu1  ;;  %v9052_v53 = vpop.f32.mrf.mxu0  ;;  %v13264_v39 = vcombine.high %v13197_v10, %v13201_v11  ;;  %v13263_v1 = vcombine.low %v13197_v10, %v13201_v11  ;;  %v13240_v16 = vcombine.high %v13173_v48, %v13177_v55  ;;  %v13242_v32 = vcombine.high %v13174_v47, %v13178_v17  ;;  %v10889_v10 = vld [vmem:[%s20094_s6 + $0x60] sm:$0xff] }
 0x63b   :  { %10732 = vmatpush1.bf16.msra.mxu1 %v13287_v63  ;;  %10773 = vmatpush1.bf16.msra.mxu0 %v13289_v35  ;;  %v13239_v38 = vcombine.low %v13173_v48, %v13177_v55  ;;  %v13241_v42 = vcombine.low %v13174_v47, %v13178_v17  ;;  %v10891_v21 = vld [vmem:[%s20094_s6 + $0x70] sm:$0xff]  ;;  %v10921_v11 = vld [vmem:[%s20094_s6 + $0x160] sm:$0xff]  ;;  %v10898_v47 = vld [vmem:[%s20094_s6 + $0xa8] sm:$0xff] }
 0x63c   :  { %v9012_v9 = vpop.f32.mrf.mxu1  ;;  %v9053_v6 = vpop.f32.mrf.mxu0  ;;  %10733 = vmatprep.subr.bf16.mxu1 %v13280_v36  ;;  %10774 = vmatprep.subr.bf16.mxu0 %v13282_v54  ;;  %v10923_v53 = vld [vmem:[%s20094_s6 + $0x170] sm:$0xff]  ;;  %v10930_v17 = vld [vmem:[%s20094_s6 + $0x1a8] sm:$0xff] }
 0x63d   :  { %v10890_v9 = vld [vmem:[%s20094_s6 + $0x68] sm:$0xff]  ;;  %v10883_v48 = vld [vmem:[%s20094_s6 + $0x30] sm:$0xff] }
 0x63e   :  { %v10922_v6 = vld [vmem:[%s20094_s6 + $0x168] sm:$0xff]  ;;  %v10915_v55 = vld [vmem:[%s20094_s6 + $0x130] sm:$0xff] }
 0x63f   :  { %10734 = vmatpush1.bf16.msra.mxu1 %v13279_v45  ;;  %10775 = vmatpush1.bf16.msra.mxu0 %v13281_v57  ;;  %v10906_v45 = vld [vmem:[%s20094_s6 + $0xe8] sm:$0xff] }
 0x640   :  { %10735 = vmatprep.subr.bf16.mxu1 %v13272_v5  ;;  %10776 = vmatprep.subr.bf16.mxu0 %v13274_v51  ;;  %v10938_v57 = vld [vmem:[%s20094_s6 + $0x1e8] sm:$0xff]  ;;  %v10905_v5 = vld [vmem:[%s20094_s6 + $0xe0] sm:$0xff] }
 0x641   :  { %v10937_v51 = vld [vmem:[%s20094_s6 + $0x1e0] sm:$0xff] }
 0x643   :  { %10736 = vmatpush1.bf16.msra.mxu1 %v13271_v29  ;;  %10777 = vmatpush1.bf16.msra.mxu0 %v13273_v3  ;;  %v10888_v29 = vld [vmem:[%s20094_s6 + $0x58] sm:$0xff] }
 0x644   :  { %10737 = vmatprep.subr.bf16.mxu1 %v13264_v39  ;;  %10778 = vmatprep.subr.bf16.mxu0 %v13266_v46  ;;  %v10920_v3 = vld [vmem:[%s20094_s6 + $0x158] sm:$0xff]  ;;  %v10903_v39 = vld [vmem:[%s20094_s6 + $0xd0] sm:$0xff] }
 0x645   :  { %v10935_v46 = vld [vmem:[%s20094_s6 + $0x1d0] sm:$0xff] }
 0x647   :  { %10738 = vmatpush1.bf16.msra.mxu1 %v13263_v1  ;;  %10779 = vmatpush1.bf16.msra.mxu0 %v13265_v25  ;;  %v10886_v1 = vld [vmem:[%s20094_s6 + $0x48] sm:$0xff] }
 0x648   :  { %10739 = vmatprep.subr.bf16.mxu1 %v13256_v13  ;;  %10780 = vmatprep.subr.bf16.mxu0 %v13258_v52  ;;  %v10918_v25 = vld [vmem:[%s20094_s6 + $0x148] sm:$0xff]  ;;  %v10901_v13 = vld [vmem:[%s20094_s6 + $0xc0] sm:$0xff] }
 0x649   :  { %v10933_v52 = vld [vmem:[%s20094_s6 + $0x1c0] sm:$0xff] }
 0x64b   :  { %10740 = vmatpush1.bf16.msra.mxu1 %v13255_v59  ;;  %10781 = vmatpush1.bf16.msra.mxu0 %v13257_v49  ;;  %v10884_v59 = vld [vmem:[%s20094_s6 + $0x38] sm:$0xff] }
 0x64c   :  { %10741 = vmatprep.subr.bf16.mxu1 %v13248_v0  ;;  %10782 = vmatprep.subr.bf16.mxu0 %v13250_v34  ;;  %v10916_v49 = vld [vmem:[%s20094_s6 + $0x138] sm:$0xff]  ;;  %v10899_v0 = vld [vmem:[%s20094_s6 + $0xb0] sm:$0xff] }
 0x64d   :  { %v10931_v34 = vld [vmem:[%s20094_s6 + $0x1b0] sm:$0xff] }
 0x64f   :  { %10742 = vmatpush1.bf16.msra.mxu1 %v13247_v24  ;;  %10783 = vmatpush1.bf16.msra.mxu0 %v13249_v4  ;;  %v10882_v24 = vld [vmem:[%s20094_s6 + $0x28] sm:$0xff] }
 0x650   :  { %10743 = vmatprep.subr.bf16.mxu1 %v13240_v16  ;;  %10784 = vmatprep.subr.bf16.mxu0 %v13242_v32  ;;  %v10914_v4 = vld [vmem:[%s20094_s6 + $0x128] sm:$0xff]  ;;  %v10897_v16 = vld [vmem:[%s20094_s6 + $0xa0] sm:$0xff] }
 0x651   :  { %v10929_v32 = vld [vmem:[%s20094_s6 + $0x1a0] sm:$0xff] }
 0x653   :  { %10744 = vmatpush1.bf16.msra.mxu1 %v13239_v38  ;;  %10785 = vmatpush1.bf16.msra.mxu0 %v13241_v42 }
 0x656   :  { %v9089_v56 = vpop.f32.mrf.mxu1  ;;  %v9130_v14 = vpop.f32.mrf.mxu0  ;;  %10762 = vmatmul.mubr.bf16.vlgmr.msra.gmra.mxu1 %v19543_v50  ;;  %10803 = vmatmul.mubr.bf16.vlgmr.msra.gmra.mxu0 %v19543_v50  ;;  %v10907_v50 = vld [vmem:[%s20094_s6 + $0xf0] sm:$0xff] }
 0x657   :  { %v19636_v28 = vadd.f32 %v9089_v56, %v19444_v62  ;;  %v19639_v63 = vadd.f32 %v9130_v14, %v19447_v22  ;;  %v10908_v62 = vld [vmem:[%s20094_s6 + $0xf8] sm:$0xff]  ;;  %v10881_v56 = vld [vmem:[%s20094_s6 + $0x20] sm:$0xff] }
 0x658   :  { %v9091_v35 = vpop.f32.mrf.mxu1  ;;  %v9132_v40 = vpop.f32.mrf.mxu0  ;;  %v10940_v22 = vld [vmem:[%s20094_s6 + $0x1f8] sm:$0xff]  ;;  %13957 = vmatprep.subr.mxu1 %v10908_v62  ;;  %v10913_v14 = vld [vmem:[%s20094_s6 + $0x120] sm:$0xff] }
 0x659   :  { %v19642_v12 = vadd.f32 %v9091_v35, %v19453_v2  ;;  %v19645_v36 = vadd.f32 %v9132_v40, %v19456_v58  ;;  %v10892_v2 = vld [vmem:[%s20094_s6 + $0x78] sm:$0xff]  ;;  %13992 = vmatprep.subr.mxu0 %v10940_v22 }
 0x65a   :  { %v9093_v54 = vpop.f32.mrf.mxu1  ;;  %v9134_v61 = vpop.f32.mrf.mxu0  ;;  %v10924_v58 = vld [vmem:[%s20094_s6 + $0x178] sm:$0xff]  ;;  %13958 = vmatpush3.msra.mxu1 %v10892_v2  ;;  %v10895_v2 = vld [vmem:[%s20094_s6 + $0x90] sm:$0xff] }
 0x65b   :  { %13993 = vmatpush3.msra.mxu0 %v10924_v58  ;;  %13959 = vmatprep.subr.mxu1 %v10907_v50  ;;  %v10896_v54 = vld [vmem:[%s20094_s6 + $0x98] sm:$0xff]  ;;  %v10927_v58 = vld [vmem:[%s20094_s6 + $0x190] sm:$0xff] }
 0x65c   :  { %v9094_v44 = vpop.f32.mrf.mxu1  ;;  %v9135_v19 = vpop.f32.mrf.mxu0  ;;  %13994 = vmatprep.subr.mxu0 %v10939_v27  ;;  %13960 = vmatpush3.msra.mxu1 %v10891_v21  ;;  %v10928_v61 = vld [vmem:[%s20094_s6 + $0x198] sm:$0xff]  ;;  %v10894_v21 = vld [vmem:[%s20094_s6 + $0x88] sm:$0xff] }
 0x65d   :  { %13995 = vmatpush3.msra.mxu0 %v10923_v53  ;;  %13961 = vmatprep.subr.mxu1 %v10906_v45  ;;  %v10880_v62 = vld [vmem:[%s20094_s6 + $0x18] sm:$0xff]  ;;  %v10926_v53 = vld [vmem:[%s20094_s6 + $0x188] sm:$0xff] }
 0x65e   :  { %13996 = vmatprep.subr.mxu0 %v10938_v57  ;;  %13962 = vmatpush3.msra.mxu1 %v10890_v9  ;;  %v10878_v9 = vld [vmem:[%s20094_s6 + $0x8] sm:$0xff] }
 0x65f   :  { %13997 = vmatpush3.msra.mxu0 %v10922_v6  ;;  %13963 = vmatprep.subr.mxu1 %v10905_v5  ;;  %v10910_v6 = vld [vmem:[%s20094_s6 + $0x108] sm:$0xff]  ;;  %v10893_v5 = vld [vmem:[%s20094_s6 + $0x80] sm:$0xff] }
 0x660   :  { %13998 = vmatprep.subr.mxu0 %v10937_v51  ;;  %13964 = vmatpush3.msra.mxu1 %v10889_v10  ;;  %v10925_v51 = vld [vmem:[%s20094_s6 + $0x180] sm:$0xff] }
 0x661   :  { %13999 = vmatpush3.msra.mxu0 %v10921_v11  ;;  %13965 = vmatprep.subr.mxu1 %v10904_v37  ;;  %v10877_v10 = vld [vmem:[%s20094_s6] sm:$0xff]  ;;  %v10972_v37 = vld [vmem:[%s20094_s6 + $0x2f8] sm:$0xff] }
 0x662   :  { %14000 = vmatprep.subr.mxu0 %v10936_v43  ;;  %13966 = vmatpush3.msra.mxu1 %v10888_v29  ;;  %v10909_v11 = vld [vmem:[%s20094_s6 + $0x100] sm:$0xff]  ;;  %v11004_v43 = vld [vmem:[%s20094_s6 + $0x3f8] sm:$0xff] }
 0x663   :  { %14001 = vmatpush3.msra.mxu0 %v10920_v3  ;;  %13967 = vmatprep.subr.mxu1 %v10903_v39 }
 0x664   :  { %14002 = vmatprep.subr.mxu0 %v10935_v46  ;;  %13968 = vmatpush3.msra.mxu1 %v10887_v8 }
 0x665   :  { %14003 = vmatpush3.msra.mxu0 %v10919_v30  ;;  %13969 = vmatprep.subr.mxu1 %v10902_v33 }
 0x666   :  { %14004 = vmatprep.subr.mxu0 %v10934_v31  ;;  %13970 = vmatpush3.msra.mxu1 %v10886_v1 }
 0x667   :  { %14005 = vmatpush3.msra.mxu0 %v10918_v25  ;;  %13971 = vmatprep.subr.mxu1 %v10901_v13 }
 0x668   :  { %14006 = vmatprep.subr.mxu0 %v10933_v52  ;;  %13972 = vmatpush3.msra.mxu1 %v10885_v7 }
 0x669   :  { %14007 = vmatpush3.msra.mxu0 %v10917_v60  ;;  %13973 = vmatprep.subr.mxu1 %v10900_v20 }
 0x66a   :  { %14008 = vmatprep.subr.mxu0 %v10932_v23  ;;  %13974 = vmatpush3.msra.mxu1 %v10884_v59 }
 0x66b   :  { %14009 = vmatpush3.msra.mxu0 %v10916_v49  ;;  %13975 = vmatprep.subr.mxu1 %v10899_v0 }
 0x66c   :  { %14010 = vmatprep.subr.mxu0 %v10931_v34  ;;  %13976 = vmatpush3.msra.mxu1 %v10883_v48 }
 0x66d   :  { %14011 = vmatpush3.msra.mxu0 %v10915_v55  ;;  %13977 = vmatprep.subr.mxu1 %v10898_v47 }
 0x66e   :  { %14012 = vmatprep.subr.mxu0 %v10930_v17  ;;  %13978 = vmatpush3.msra.mxu1 %v10882_v24 }
 0x66f   :  { %14013 = vmatpush3.msra.mxu0 %v10914_v4  ;;  %13979 = vmatprep.subr.mxu1 %v10897_v16 }
 0x670   :  { %14014 = vmatprep.subr.mxu0 %v10929_v32  ;;  %13980 = vmatpush3.msra.mxu1 %v10881_v56 }
 0x671   :  { %14015 = vmatpush3.msra.mxu0 %v10913_v14  ;;  %13981 = vmatprep.subr.mxu1 %v10896_v54 }
 0x672   :  { %14016 = vmatprep.subr.mxu0 %v10928_v61  ;;  %13982 = vmatpush3.msra.mxu1 %v10880_v62  ;;  %v19876_v61 = vld [vmem:[%s20095_s5] sm:$0xff] }
 0x673   :  { %13983 = vmatprep.subr.mxu1 %v10895_v2 }
 0x676   :  { %v9565_v38 = vpop.f32.mrf.mxu1  ;;  %v9606_v42 = vpop.f32.mrf.mxu0 }
 0x677   :  { %v9695_v35 = vadd.f32 %v9565_v38, %v19560_v18  ;;  %v9697_v40 = vadd.f32 %v9606_v42, %v19563_v26  ;;  %v10912_v18 = vld [vmem:[%s20094_s6 + $0x118] sm:$0xff]  ;;  %v10821_v42 = vlaneseq }
 0x678   :  { %v9567_v44 = vpop.f32.mrf.mxu1  ;;  %v9608_v19 = vpop.f32.mrf.mxu0  ;;  %14017 = vmatpush3.msra.mxu0 %v10912_v18 }
 0x679   :  { %v19806_v26 = vadd.f32 %v9567_v44, %v19569_v15  ;;  %v19809_v22 = vadd.f32 %v9608_v19, %v19572_v41  ;;  %v10879_v15 = vld [vmem:[%s20094_s6 + $0x10] sm:$0xff]  ;;  %14018 = vmatprep.subr.mxu0 %v10927_v58  ;;  %v19867_v56 = vshrl.u32 %v10821_v42, 7  ;;  %v10965_v42 = vld [vmem:[%s20094_s6 + $0x2c0] sm:$0xff] }
 0x67a   :  { %v9569_v50 = vpop.f32.mrf.mxu1  ;;  %v9610_v27 = vpop.f32.mrf.mxu0  ;;  %v10911_v41 = vld [vmem:[%s20094_s6 + $0x110] sm:$0xff]  ;;  %13984 = vmatpush3.msra.mxu1 %v10879_v15 }
 0x67b   :  { %14019 = vmatpush3.msra.mxu0 %v10911_v41  ;;  %13985 = vmatprep.subr.mxu1 %v10894_v21  ;;  %v10823_v14 = vsub.s32 0, %v19867_v56  ;;  %v10835_v54 = vsub.s32 3, %v19867_v56 }
 0x67c   :  { %v9570_v45 = vpop.f32.mrf.mxu1  ;;  %v9611_v57 = vpop.f32.mrf.mxu0  ;;  %14020 = vmatprep.subr.mxu0 %v10926_v53  ;;  %13986 = vmatpush3.msra.mxu1 %v10878_v9 }
 0x67d   :  { %14021 = vmatpush3.msra.mxu0 %v10910_v6  ;;  %13987 = vmatprep.subr.mxu1 %v10893_v5  ;;  %v10824_v19 = vrot.slane %v19876_v61, %v10823_v14  ;;  %v10836_v58 = vrot.slane %v19876_v61, %v10835_v54  ;;  %v10997_v14 = vld [vmem:[%s20094_s6 + $0x3c0] sm:$0xff]  ;;  %v10964_v54 = vld [vmem:[%s20094_s6 + $0x2b8] sm:$0xff] }
 0x67e   :  { %14022 = vmatprep.subr.mxu0 %v10925_v51  ;;  %13988 = vmatpush3.msra.mxu1 %v10877_v10 }
 0x67f   :  { %14023 = vmatpush3.msra.mxu0 %v10909_v11  ;;  %14027 = vmatprep.subr.mxu1 %v10972_v37 }
 0x680   :  { %14062 = vmatprep.subr.mxu0 %v11004_v43 }
 0x696   :  { %v9647_v29 = vpop.f32.mrf.mxu1  ;;  %v9688_v3 = vpop.f32.mrf.mxu0 }
 0x697   :  { %v9699_v39 = vadd.f32 %v9647_v29, %v19636_v28  ;;  %v9701_v46 = vadd.f32 %v9688_v3, %v19639_v63 }
 0x698   :  { %v9649_v8 = vpop.f32.mrf.mxu1  ;;  %v9690_v30 = vpop.f32.mrf.mxu0 }
 0x699   :  { %v19856_v33 = vadd.f32 %v9649_v8, %v19642_v12  ;;  %v9702_v31 = vadd.f32 %v9690_v30, %v19645_v36  ;;  %v10971_v8 = vld [vmem:[%s20094_s6 + $0x2f0] sm:$0xff] }
 0x69a   :  { %v9651_v1 = vpop.f32.mrf.mxu1  ;;  %v9692_v25 = vpop.f32.mrf.mxu0  ;;  %v11003_v30 = vld [vmem:[%s20094_s6 + $0x3f0] sm:$0xff] }
 0x69b   :  { %v10987_v1 = vld [vmem:[%s20094_s6 + $0x370] sm:$0xff]  ;;  %v10970_v25 = vld [vmem:[%s20094_s6 + $0x2e8] sm:$0xff] }
 0x69c   :  { %v9652_v13 = vpop.f32.mrf.mxu1  ;;  %v9693_v52 = vpop.f32.mrf.mxu0 }
 0x69d   :  { %v11002_v13 = vld [vmem:[%s20094_s6 + $0x3e8] sm:$0xff] }
 0x69e   :  { %v10954_v52 = vld [vmem:[%s20094_s6 + $0x268] sm:$0xff] }
 0x6b6   :  { %v10123_v7 = vpop.f32.mrf.mxu1  ;;  %v10164_v60 = vpop.f32.mrf.mxu0 }
 0x6b7   :  { %v10253_v20 = vadd.f32 %v10123_v7, %v9695_v35  ;;  %v10255_v23 = vadd.f32 %v10164_v60, %v9697_v40  ;;  %v10831_v35 = vsub.s32 2, %v19867_v56  ;;  %v10827_v40 = vsub.s32 1, %v19867_v56  ;;  %v10986_v7 = vld [vmem:[%s20094_s6 + $0x368] sm:$0xff]  ;;  %v10969_v60 = vld [vmem:[%s20094_s6 + $0x2e0] sm:$0xff] }
 0x6b8   :  { %v10125_v59 = vpop.f32.mrf.mxu1  ;;  %v10166_v49 = vpop.f32.mrf.mxu0 }
 0x6b9   :  { %v10832_v18 = vrot.slane %v19876_v61, %v10831_v35  ;;  %v10828_v2 = vrot.slane %v19876_v61, %v10827_v40  ;;  %v10254_v50 = vadd.f32 %v10125_v59, %v19806_v26  ;;  %v10256_v27 = vadd.f32 %v10166_v49, %v19809_v22  ;;  %v10956_v22 = vld [vmem:[%s20094_s6 + $0x278] sm:$0xff]  ;;  %v10985_v59 = vld [vmem:[%s20094_s6 + $0x360] sm:$0xff] }
 0x6ba   :  { %v10127_v28 = vpop.f32.mrf.mxu1  ;;  %v10168_v0 = vpop.f32.mrf.mxu0  ;;  %v10968_v49 = vld [vmem:[%s20094_s6 + $0x2d8] sm:$0xff]  ;;  %v10949_v35 = vld [vmem:[%s20094_s6 + $0x240] sm:$0xff] }
 0x6bb   :  { %v11000_v28 = vld [vmem:[%s20094_s6 + $0x3d8] sm:$0xff]  ;;  %v10981_v40 = vld [vmem:[%s20094_s6 + $0x340] sm:$0xff] }
 0x6bc   :  { %v10128_v63 = vpop.f32.mrf.mxu1  ;;  %v10169_v34 = vpop.f32.mrf.mxu0  ;;  %v10952_v0 = vld [vmem:[%s20094_s6 + $0x258] sm:$0xff] }
 0x6bd   :  { %v10984_v63 = vld [vmem:[%s20094_s6 + $0x358] sm:$0xff]  ;;  %v10967_v34 = vld [vmem:[%s20094_s6 + $0x2d0] sm:$0xff] }
 0x6d6   :  { %v10205_v48 = vpop.f32.mrf.mxu1  ;;  %v10246_v55 = vpop.f32.mrf.mxu0 }
 0x6d7   :  { %v19859_v12 = vadd.f32 %v10205_v48, %v9699_v39  ;;  %v19861_v47 = vadd.f32 %v10246_v55, %v9701_v46  ;;  %v10988_v46 = vld [vmem:[%s20094_s6 + $0x378] sm:$0xff]  ;;  %v10999_v48 = vld [vmem:[%s20094_s6 + $0x3d0] sm:$0xff] }
 0x6d8   :  { %v19863_v36 = vpop.f32.mrf.mxu1  ;;  %v10248_v17 = vpop.f32.mrf.mxu0  ;;  %v10951_v55 = vld [vmem:[%s20094_s6 + $0x250] sm:$0xff] }
 0x6d9   :  { %v19865_v24 = vadd.f32 %v10248_v17, %v9702_v31  ;;  %v10955_v31 = vld [vmem:[%s20094_s6 + $0x270] sm:$0xff] }
 0x6da   :  { %v10209_v4 = vpop.f32.mrf.mxu1  ;;  %v10250_v16 = vpop.f32.mrf.mxu0  ;;  %v10983_v17 = vld [vmem:[%s20094_s6 + $0x350] sm:$0xff] }
 0x6db   :  { %v10966_v4 = vld [vmem:[%s20094_s6 + $0x2c8] sm:$0xff] }
 0x6dc   :  { %v10210_v32 = vpop.f32.mrf.mxu1  ;;  %v10251_v38 = vpop.f32.mrf.mxu0  ;;  %v10998_v16 = vld [vmem:[%s20094_s6 + $0x3c8] sm:$0xff] }
 0x6dd   :  { %v10950_v32 = vld [vmem:[%s20094_s6 + $0x248] sm:$0xff] }
 0x6de   :  { %v10982_v38 = vld [vmem:[%s20094_s6 + $0x348] sm:$0xff] }
 0x6f6   :  { %v10681_v44 = vpop.f32.mrf.mxu1  ;;  %v10722_v62 = vpop.f32.mrf.mxu0 }
 0x6f7   :  { %v10811_v15 = vadd.f32 %v10681_v44, %v10253_v20  ;;  %v10813_v41 = vadd.f32 %v10722_v62, %v10255_v23  ;;  %v11001_v20 = vld [vmem:[%s20094_s6 + $0x3e0] sm:$0xff]  ;;  %v10996_v44 = vld [vmem:[%s20094_s6 + $0x3b8] sm:$0xff] }
 0x6f8   :  { %v10683_v21 = vpop.f32.mrf.mxu1  ;;  %v10724_v53 = vpop.f32.mrf.mxu0  ;;  %v10953_v23 = vld [vmem:[%s20094_s6 + $0x260] sm:$0xff]  ;;  %v10980_v62 = vld [vmem:[%s20094_s6 + $0x338] sm:$0xff] }
 0x6f9   :  { %v10812_v45 = vadd.f32 %v10683_v21, %v10254_v50  ;;  %v10814_v57 = vadd.f32 %v10724_v53, %v10256_v27  ;;  %v10861_v9 = vadd.f32 %v10824_v19, %v10811_v15  ;;  %v10863_v6 = vadd.f32 %v10832_v18, %v10813_v41  ;;  %v10948_v19 = vld [vmem:[%s20094_s6 + $0x238] sm:$0xff]  ;;  %v10963_v18 = vld [vmem:[%s20094_s6 + $0x2b0] sm:$0xff]  ;;  %v10962_v27 = vld [vmem:[%s20094_s6 + $0x2a8] sm:$0xff] }
 0x6fa   :  { %v10685_v5 = vpop.f32.mrf.mxu1  ;;  %v10726_v51 = vpop.f32.mrf.mxu0  ;;  %v10979_v50 = vld [vmem:[%s20094_s6 + $0x330] sm:$0xff]  ;;  %v10994_v15 = vld [vmem:[%s20094_s6 + $0x3a8] sm:$0xff]  ;;  %v10839_v53 = vsub.s32 4, %v19867_v56 }
 0x6fb   :  { %v10862_v10 = vadd.f32 %v10828_v2, %v10812_v45  ;;  %v10864_v11 = vadd.f32 %v10836_v58, %v10814_v57  ;;  %v10869_v39 = vmax.f32 %v10861_v9, 0.0  ;;  %v10871_v26 = vmax.f32 %v10863_v6, 0.0  ;;  %v10995_v2 = vld [vmem:[%s20094_s6 + $0x3b0] sm:$0xff]  ;;  %v10946_v41 = vld [vmem:[%s20094_s6 + $0x228] sm:$0xff]  ;;  %v10961_v57 = vld [vmem:[%s20094_s6 + $0x2a0] sm:$0xff] }
 0x6fc   :  { %v10686_v37 = vpop.f32.mrf.mxu1  ;;  %v10727_v43 = vpop.f32.mrf.mxu0  ;;  %v10947_v58 = vld [vmem:[%s20094_s6 + $0x230] sm:$0xff]  ;;  %v10978_v21 = vld [vmem:[%s20094_s6 + $0x328] sm:$0xff]  ;;  %v10843_v45 = vsub.s32 5, %v19867_v56  ;;  %v10993_v9 = vld [vmem:[%s20094_s6 + $0x3a0] sm:$0xff]  ;;  %v10851_v6 = vsub.s32 7, %v19867_v56  ;;  %v10847_v5 = vsub.s32 6, %v19867_v56  ;;  %v10840_v56 = vrot.slane %v19876_v61, %v10839_v53 }
 0x6fd   :  { %v10870_v29 = vmax.f32 %v10862_v10, 0.0  ;;  %v10872_v3 = vmax.f32 %v10864_v11, 0.0  ;;  %v10945_v51 = vld [vmem:[%s20094_s6 + $0x220] sm:$0xff]  ;;  %v10960_v11 = vld [vmem:[%s20094_s6 + $0x298] sm:$0xff] }
 0x6fe   :  { %v10977_v10 = vld [vmem:[%s20094_s6 + $0x320] sm:$0xff]  ;;  %v10992_v37 = vld [vmem:[%s20094_s6 + $0x398] sm:$0xff] }
 0x6ff   :  { %11076 = vmatprep.mubr.f32.mxu1 %v10870_v29  ;;  %11146 = vmatprep.mubr.f32.mxu0 %v10872_v3  ;;  %v10844_v3 = vrot.slane %v19876_v61, %v10843_v45 }
 0x700   :  { %11077 = vmatmul.mubr.f32.vlgmr.msra.gmra.mxu1 %v10869_v39  ;;  %11147 = vmatmul.mubr.f32.vlgmr.msra.gmra.mxu0 %v10871_v26  ;;  %v10944_v39 = vld [vmem:[%s20094_s6 + $0x218] sm:$0xff]  ;;  %v10258_v26 = vadd.f32 %v19863_v36, %v19856_v33  ;;  %v10943_v36 = vld [vmem:[%s20094_s6 + $0x210] sm:$0xff] }
 0x701   :  { %14028 = vmatpush3.msra.mxu1 %v10956_v22  ;;  %14063 = vmatpush3.msra.mxu0 %v10988_v46  ;;  %v10852_v46 = vrot.slane %v19876_v61, %v10851_v6 }
 0x702   :  { %14029 = vmatprep.subr.mxu1 %v10971_v8  ;;  %14064 = vmatprep.subr.mxu0 %v11003_v30  ;;  %v10976_v8 = vld [vmem:[%s20094_s6 + $0x318] sm:$0xff]  ;;  %v10959_v30 = vld [vmem:[%s20094_s6 + $0x290] sm:$0xff] }
 0x703   :  { %14030 = vmatpush3.msra.mxu1 %v10955_v31  ;;  %14065 = vmatpush3.msra.mxu0 %v10987_v1  ;;  %v10848_v1 = vrot.slane %v19876_v61, %v10847_v5  ;;  %v10958_v61 = vld [vmem:[%s20094_s6 + $0x288] sm:$0xff] }
 0x704   :  { %14031 = vmatprep.subr.mxu1 %v10970_v25  ;;  %14066 = vmatprep.subr.mxu0 %v11002_v13 }
 0x705   :  { %14032 = vmatpush3.msra.mxu1 %v10954_v52  ;;  %14067 = vmatpush3.msra.mxu0 %v10986_v7 }
 0x706   :  { %14033 = vmatprep.subr.mxu1 %v10969_v60  ;;  %14068 = vmatprep.subr.mxu0 %v11001_v20  ;;  %v10990_v20 = vld [vmem:[%s20094_s6 + $0x388] sm:$0xff] }
 0x707   :  { %14034 = vmatpush3.msra.mxu1 %v10953_v23  ;;  %14069 = vmatpush3.msra.mxu0 %v10985_v59 }
 0x708   :  { %14035 = vmatprep.subr.mxu1 %v10968_v49  ;;  %14070 = vmatprep.subr.mxu0 %v11000_v28  ;;  %v10974_v28 = vld [vmem:[%s20094_s6 + $0x308] sm:$0xff] }
 0x709   :  { %14036 = vmatpush3.msra.mxu1 %v10952_v0  ;;  %14071 = vmatpush3.msra.mxu0 %v10984_v63  ;;  %v10957_v0 = vld [vmem:[%s20094_s6 + $0x280] sm:$0xff] }
 0x70a   :  { %14037 = vmatprep.subr.mxu1 %v10967_v34  ;;  %14072 = vmatprep.subr.mxu0 %v10999_v48 }
 0x70b   :  { %14038 = vmatpush3.msra.mxu1 %v10951_v55  ;;  %14073 = vmatpush3.msra.mxu0 %v10983_v17  ;;  %v10989_v55 = vld [vmem:[%s20094_s6 + $0x380] sm:$0xff] }
 0x70c   :  { %14039 = vmatprep.subr.mxu1 %v10966_v4  ;;  %14074 = vmatprep.subr.mxu0 %v10998_v16  ;;  %v10941_v17 = vld [vmem:[%s20094_s6 + $0x200] sm:$0xff] }
 0x70d   :  { %14040 = vmatpush3.msra.mxu1 %v10950_v32  ;;  %14075 = vmatpush3.msra.mxu0 %v10982_v38  ;;  %v10973_v32 = vld [vmem:[%s20094_s6 + $0x300] sm:$0xff] }
 0x70e   :  { %14041 = vmatprep.subr.mxu1 %v10965_v42  ;;  %14076 = vmatprep.subr.mxu0 %v10997_v14 }
 0x70f   :  { %14042 = vmatpush3.msra.mxu1 %v10949_v35  ;;  %14077 = vmatpush3.msra.mxu0 %v10981_v40 }
 0x710   :  { %14043 = vmatprep.subr.mxu1 %v10964_v54  ;;  %14078 = vmatprep.subr.mxu0 %v10996_v44  ;;  %v13299_v44 = vld [vmem:[%s20096_s7] ss:$0 sm:$0xff] }
 0x711   :  { %14044 = vmatpush3.msra.mxu1 %v10948_v19  ;;  %14079 = vmatpush3.msra.mxu0 %v10980_v62 }
 0x712   :  { %14045 = vmatprep.subr.mxu1 %v10963_v18  ;;  %14080 = vmatprep.subr.mxu0 %v10995_v2 }
 0x713   :  { %14046 = vmatpush3.msra.mxu1 %v10947_v58  ;;  %14081 = vmatpush3.msra.mxu0 %v10979_v50 }
 0x714   :  { %14047 = vmatprep.subr.mxu1 %v10962_v27  ;;  %14082 = vmatprep.subr.mxu0 %v10994_v15 }
 0x715   :  { %14048 = vmatpush3.msra.mxu1 %v10946_v41  ;;  %14083 = vmatpush3.msra.mxu0 %v10978_v21 }
 0x716   :  { %v10763_v43 = vpop.f32.mrf.mxu1  ;;  %v10804_v29 = vpop.f32.mrf.mxu0  ;;  %14049 = vmatprep.subr.mxu1 %v10961_v57  ;;  %14084 = vmatprep.subr.mxu0 %v10993_v9 }
 0x717   :  { %v10815_v22 = vadd.f32 %v10763_v43, %v19859_v12  ;;  %14050 = vmatpush3.msra.mxu1 %v10945_v51  ;;  %14085 = vmatpush3.msra.mxu0 %v10977_v10  ;;  %v10817_v31 = vadd.f32 %v10804_v29, %v19861_v47  ;;  %v10991_v12 = vld [vmem:[%s20094_s6 + $0x390] sm:$0xff] }
 0x718   :  { %v10765_v25 = vpop.f32.mrf.mxu1  ;;  %v10806_v33 = vpop.f32.mrf.mxu0  ;;  %14051 = vmatprep.subr.mxu1 %v10960_v11  ;;  %14086 = vmatprep.subr.mxu0 %v10992_v37  ;;  %v10975_v47 = vld [vmem:[%s20094_s6 + $0x310] sm:$0xff] }
 0x719   :  { %v10816_v13 = vadd.f32 %v10765_v25, %v10258_v26  ;;  %v10818_v52 = vadd.f32 %v10806_v33, %v19865_v24  ;;  %14052 = vmatpush3.msra.mxu1 %v10944_v39  ;;  %14087 = vmatpush3.msra.mxu0 %v10976_v8  ;;  %v10942_v24 = vld [vmem:[%s20094_s6 + $0x208] sm:$0xff]  ;;  %v10865_v23 = vadd.f32 %v10840_v56, %v10815_v22 }
 0x71a   :  { %v10767_v7 = vpop.f32.mrf.mxu1  ;;  %v10808_v60 = vpop.f32.mrf.mxu0  ;;  %14053 = vmatprep.subr.mxu1 %v10959_v30  ;;  %14088 = vmatprep.subr.mxu0 %v10991_v12  ;;  %v10867_v63 = vadd.f32 %v10848_v1, %v10817_v31 }
 0x71b   :  { %v10866_v59 = vadd.f32 %v10844_v3, %v10816_v13  ;;  %v10868_v49 = vadd.f32 %v10852_v46, %v10818_v52  ;;  %14054 = vmatpush3.msra.mxu1 %v10943_v36  ;;  %14089 = vmatpush3.msra.mxu0 %v10975_v47  ;;  %v10873_v38 = vmax.f32 %v10865_v23, 0.0 }
 0x71c   :  { %v10768_v34 = vpop.f32.mrf.mxu1  ;;  %v10809_v48 = vpop.f32.mrf.mxu0  ;;  %14055 = vmatprep.subr.mxu1 %v10958_v61  ;;  %14090 = vmatprep.subr.mxu0 %v10990_v20  ;;  %v10875_v42 = vmax.f32 %v10867_v63, 0.0 }
 0x71d   :  { %v10874_v4 = vmax.f32 %v10866_v59, 0.0  ;;  %v10876_v16 = vmax.f32 %v10868_v49, 0.0  ;;  %14056 = vmatpush3.msra.mxu1 %v10942_v24  ;;  %14091 = vmatpush3.msra.mxu0 %v10974_v28 }
 0x71e   :  { %14057 = vmatprep.subr.mxu1 %v10957_v0  ;;  %14092 = vmatprep.subr.mxu0 %v10989_v55 }
 0x71f   :  { %14058 = vmatpush3.msra.mxu1 %v10941_v17  ;;  %11216 = vmatprep.mubr.f32.mxu1 %v10874_v4 }
 0x720   :  { %14093 = vmatpush3.msra.mxu0 %v10973_v32  ;;  %11286 = vmatprep.mubr.f32.mxu0 %v10876_v16 }
 0x721   :  { %11217 = vmatmul.mubr.f32.vlgmr.msra.gmra.mxu1 %v10873_v38  ;;  %11287 = vmatmul.mubr.f32.vlgmr.msra.gmra.mxu0 %v10875_v42 }
 0x7c0   :  { %v13989_v14 = vpop.f32.mrf.mxu1  ;;  %v14024_v40 = vpop.f32.mrf.mxu0 }
 0x7c2   :  { %v13990_v35 = vpop.f32.mrf.mxu1  ;;  %v14025_v19 = vpop.f32.mrf.mxu0 }
 0x7c3   :  { %v13991_v54 = vadd.f32 %v13990_v35, %v13989_v14  ;;  %v14026_v2 = vadd.f32 %v14025_v19, %v14024_v40 }
 0x7c5   :  { %v11079_v62 = vadd.f32 %v13991_v54, %v13299_v44 }
 0x7c7   :  { %v11149_v27 = vadd.f32 %v14026_v2, %v11079_v62 }
 0x7e1   :  { %v14059_v18 = vpop.f32.mrf.mxu1  ;;  %v14094_v58 = vpop.f32.mrf.mxu0 }
 0x7e3   :  { %v14060_v50 = vpop.f32.mrf.mxu1  ;;  %v14095_v41 = vpop.f32.mrf.mxu0 }
 0x7e4   :  { %v14061_v15 = vadd.f32 %v14060_v50, %v14059_v18  ;;  %v14096_v53 = vadd.f32 %v14095_v41, %v14094_v58 }
 0x7e6   :  { %v11219_v21 = vadd.f32 %v14061_v15, %v11149_v27 }
 0x7e8   :  { %v11289_v45 = vadd.f32 %v14096_v53, %v11219_v21 }
 0x7ea   :  { %11292 = vst [vmem:[%s20097_s8] sm:$0xff] %v11289_v45 }

</bundles_post_ra>
